<compile_context>
chip_gen: v5e
topology: v5e:2x2
jax: 0.10.0
libtpu: 0.0.40
codegen_flags: <defaults>
</compile_context>

<pallas_src>
import functools

import jax
import jax.numpy as jnp
from jax.experimental import pallas as pl
from jax.experimental.pallas import tpu as pltpu

_LEFT = 8  # left halo width in the scratch: f32-sublane-aligned extraction


# ----------------------------------------------------------------------------
# Fused GaussianHead kernel: conv1 (3x3, pad=1) -> conv2 (3x3, pad=1)
# ----------------------------------------------------------------------------
def _gaussian_head_kernel(x_ref, w1_ref, b1_ref, w2_ref, b2_ref, o_ref,
                          xs_ref, ys_ref, *, H, W, WS, Ch, Co, Cop):
    Cin = x_ref.shape[-1]
    M = H * WS

    # Stage 0: refresh only the zero-halo border strips (the interiors are
    # fully overwritten every step), then place this image inside the halo.
    for ref in (xs_ref, ys_ref):
        c = ref.shape[-1]
        ref[0:1, :, :] = jnp.zeros((1, WS, c), ref.dtype)
        ref[H + 1:H + 2, :, :] = jnp.zeros((1, WS, c), ref.dtype)
        ref[:, 0:_LEFT, :] = jnp.zeros((H + 2, _LEFT, c), ref.dtype)
        ref[:, _LEFT + W:WS, :] = jnp.zeros((H + 2, WS - _LEFT - W, c), ref.dtype)
    xs_ref[1:1 + H, _LEFT:_LEFT + W, :] = x_ref[0]

    # Stage 1: conv1.  Per kernel row dy: one contiguous row-slab reshape and
    # one (M, Cin) x (Cin, 3*Ch) matmul (dx taps concatenated along N);
    # accumulate over dy in f32.
    acc1 = None
    for dy in range(3):
        slab = xs_ref[dy:dy + H].reshape(M, Cin)
        p = jnp.dot(slab, w1_ref[dy], preferred_element_type=jnp.float32)
        acc1 = p if acc1 is None else acc1 + p
    # Combine the dx taps: the +/-1 column shift is a sublane roll (XLU); the
    # roll wrap only lands in halo columns that are never extracted.
    comb1 = (pltpu.roll(acc1[:, 0:Ch], 1, axis=0)
             + acc1[:, Ch:2 * Ch]
             + pltpu.roll(acc1[:, 2 * Ch:3 * Ch], M - 1, axis=0))
    hidden = comb1.reshape(H, WS, Ch)[:, _LEFT:_LEFT + W, :] + b1_ref[...]

    # Stage 2: hidden map stays in VMEM (bf16) inside its own zero halo
    # (conv2's padding=1 zero-pads the *hidden* map, matching PyTorch).
    ys_ref[1:1 + H, _LEFT:_LEFT + W, :] = hidden.astype(ys_ref.dtype)

    # Stage 3: conv2.  The three dx taps' Co=18 channels are packed into one
    # 128-lane group (lanes [0, 3*Co)), so N = 128 per dy matmul.
    acc2 = None
    for dy in range(3):
        slab = ys_ref[dy:dy + H].reshape(M, Ch)
        p = jnp.dot(slab, w2_ref[dy], preferred_element_type=jnp.float32)
        acc2 = p if acc2 is None else acc2 + p
    # Recombine taps: sublane rolls give the +/-1 column shift, lane rolls
    # bring tap dx's lanes [dx*Co, (dx+1)*Co) down to [0, Co).  Lanes >= Co of
    # the result are don't-care (sliced off in the wrapper).
    comb2 = (pltpu.roll(acc2, 1, axis=0)
             + pltpu.roll(acc2, Cop - Co, axis=1)
             + pltpu.roll(pltpu.roll(acc2, M - 1, axis=0), Cop - 2 * Co, axis=1))
    out = comb2.reshape(H, WS, Cop)[:, _LEFT:_LEFT + W, :] + b2_ref[...]
    o_ref[0] = out


# ----------------------------------------------------------------------------
# Parameter packing & wrapper
# ----------------------------------------------------------------------------
def pack_gaussian_head_params(w1, b1, w2, b2, lane_pad=128):
    """HWIO f32 weights -> kernel layout (bf16, dx taps along the MXU N dim)."""
    kh, kw, cin, ch = w1.shape
    co = w2.shape[-1]
    assert 3 * co <= lane_pad, "conv2 tap packing requires 3*Cout <= 128"
    # w1r[dy, i, dx*Ch + o] = w1[dy, dx, i, o]
    w1r = jnp.transpose(w1, (0, 2, 1, 3)).reshape(kh, cin, kw * ch)
    # w2r[dy, i, dx*Co + o] = w2[dy, dx, i, o], all taps share one 128-lane group
    w2r = jnp.transpose(w2, (0, 2, 1, 3)).reshape(kh, ch, kw * co)
    w2r = jnp.pad(w2r, ((0, 0), (0, 0), (0, lane_pad - kw * co)))
    return {
        "w1r": w1r.astype(jnp.bfloat16),
        "b1": b1.reshape(1, 1, ch).astype(jnp.float32),
        "w2r": w2r.astype(jnp.bfloat16),
        "b2": jnp.pad(b2, (0, lane_pad - co)).reshape(1, 1, lane_pad).astype(jnp.float32),
    }


def gaussian_head_forward(params, x_nchw, *, co):
    """x: (N, Cin, H, W) NCHW (PyTorch layout) -> (N, co, H, W) NCHW."""
    w1r, b1, w2r, b2 = params["w1r"], params["b1"], params["w2r"], params["b2"]
    N, Cin, H, W = x_nchw.shape
    Ch = w1r.shape[-1] // 3
    Cop = w2r.shape[-1]
    # scratch width: 8-col left halo + W + >=1 right halo, rounded to the bf16
    # sublane tile so the row-slab reshape stays layout-free.
    WS = -(-(W + _LEFT + 1) // 16) * 16

    # One layout change + cast at the module boundary (fused by XLA under jit).
    x = jnp.transpose(x_nchw, (0, 2, 3, 1)).astype(jnp.bfloat16)

    kern = functools.partial(_gaussian_head_kernel,
                             H=H, W=W, WS=WS, Ch=Ch, Co=co, Cop=Cop)
    out = pl.pallas_call(
        kern,
        out_shape=jax.ShapeDtypeStruct((N, H, W, Cop), jnp.float32),
        grid=(N,),
        in_specs=[
            pl.BlockSpec((1, H, W, Cin), lambda n: (n, 0, 0, 0)),
            pl.BlockSpec(w1r.shape, lambda n: (0, 0, 0)),
            pl.BlockSpec(b1.shape, lambda n: (0, 0, 0)),
            pl.BlockSpec(w2r.shape, lambda n: (0, 0, 0)),
            pl.BlockSpec(b2.shape, lambda n: (0, 0, 0)),
        ],
        out_specs=pl.BlockSpec((1, H, W, Cop), lambda n: (n, 0, 0, 0)),
        scratch_shapes=[
            pltpu.VMEM((H + 2, WS, Cin), jnp.bfloat16),  # zero-haloed input
            pltpu.VMEM((H + 2, WS, Ch), jnp.bfloat16),   # zero-haloed hidden map
        ],
        compiler_params=pltpu.CompilerParams(
            dimension_semantics=("parallel",),
            vmem_limit_bytes=32 * 1024 * 1024),
    )(x, w1r, b1, w2r, b2)

    # Lane-dense (128-ch) kernel output -> real channels + back to NCHW.
    return jnp.transpose(out[..., :co], (0, 3, 1, 2))


# ----------------------------------------------------------------------------
# Init + pure-JAX reference (for a correctness check)
# ----------------------------------------------------------------------------
def _conv_init(key, kh, kw, cin, cout):
    kw_, kb = jax.random.split(key)
    bound = 1.0 / ((kh * kw * cin) ** 0.5)
    w = jax.random.uniform(kw_, (kh, kw, cin, cout), jnp.float32, -bound, bound)
    b = jax.random.uniform(kb, (cout,), jnp.float32, -bound, bound)
    return w, b


def reference_gaussian_head(x_nchw, w1, b1, w2, b2):
    dn = ("NHWC", "HWIO", "NHWC")
    x = jnp.transpose(x_nchw, (0, 2, 3, 1))
    y = jax.lax.conv_general_dilated(
        x, w1, (1, 1), ((1, 1), (1, 1)), dimension_numbers=dn,
        precision=jax.lax.Precision.HIGHEST) + b1
    z = jax.lax.conv_general_dilated(
        y, w2, (1, 1), ((1, 1), (1, 1)), dimension_numbers=dn,
        precision=jax.lax.Precision.HIGHEST) + b2
    return jnp.transpose(z, (0, 3, 1, 2))


if __name__ == "__main__":
    input_dim, hidden_dim, mixtures = 128, 256, 9
    N, H, W = 2, 16, 16

    key = jax.random.PRNGKey(0)
    kx, k1, k2 = jax.random.split(key, 3)
    x = jax.random.normal(kx, (N, input_dim, H, W), jnp.float32)
    w1, b1 = _conv_init(k1, 3, 3, input_dim, hidden_dim)
    w2, b2 = _conv_init(k2, 3, 3, hidden_dim, 2 * mixtures)

    packed = pack_gaussian_head_params(w1, b1, w2, b2)
    fwd = jax.jit(functools.partial(gaussian_head_forward, co=2 * mixtures))
    out = jax.block_until_ready(fwd(packed, x))

    assert out.shape == (N, 2 * mixtures, H, W)
    assert bool(jnp.all(jnp.isfinite(out)))
    # bf16 MXU inputs / bf16 hidden map vs. f32 reference -> loose tolerance.
    ref = reference_gaussian_head(x, w1, b1, w2, b2)
    assert bool(jnp.allclose(out, ref, atol=5e-2, rtol=5e-2)), float(
        jnp.max(jnp.abs(out - ref)))
    print("KERNEL_OK")
</pallas_src>

<mosaic_0001>
module attributes {stable_mosaic.version = 11 : i64} {
  func.func @_gaussian_head_kernel(%arg0: i32, %arg1: memref<1x16x16x128xbf16, #tpu.memory_space<vmem>>, %arg2: memref<3x128x768xbf16, #tpu.memory_space<vmem>>, %arg3: memref<1x1x256xf32, #tpu.memory_space<vmem>>, %arg4: memref<3x256x128xbf16, #tpu.memory_space<vmem>>, %arg5: memref<1x1x128xf32, #tpu.memory_space<vmem>>, %arg6: memref<1x16x16x128xf32, #tpu.memory_space<vmem>>, %arg7: memref<18x32x128xbf16, #tpu.memory_space<vmem>>, %arg8: memref<18x32x256xbf16, #tpu.memory_space<vmem>>) attributes {dimension_semantics = [#tpu.dimension_semantics<parallel>], iteration_bounds = array<i64: 2>, scalar_prefetch = 0 : i64, scratch_operands = 2 : i64, tpu.core_type = #tpu.core_type<tc>, window_params = [{transform_indices = @transform_0, window_bounds = array<i64: 1, 16, 16, 128>}, {pipeline_mode = #tpu.pipeline_mode<synchronous>, transform_indices = @transform_1, window_bounds = array<i64: 3, 128, 768>}, {pipeline_mode = #tpu.pipeline_mode<synchronous>, transform_indices = @transform_2, window_bounds = array<i64: 1, 1, 256>}, {pipeline_mode = #tpu.pipeline_mode<synchronous>, transform_indices = @transform_3, window_bounds = array<i64: 3, 256, 128>}, {pipeline_mode = #tpu.pipeline_mode<synchronous>, transform_indices = @transform_4, window_bounds = array<i64: 1, 1, 128>}, {transform_indices = @transform_5, window_bounds = array<i64: 1, 16, 16, 128>}]} {
    %cst = arith.constant 0.000000e+00 : bf16
    %0 = vector.broadcast %cst : bf16 to vector<1x32x128xbf16>
    %c0 = arith.constant 0 : index
    %c0_0 = arith.constant 0 : index
    %c0_1 = arith.constant 0 : index
    %1 = vector.load %arg7[%c0, %c0_0, %c0_1] : memref<18x32x128xbf16, #tpu.memory_space<vmem>>, vector<1x32x128xbf16>
    tpu.vector_store %arg7[%c0, %c0_0, %c0_1], %0 {strides = array<i32>} : memref<18x32x128xbf16, #tpu.memory_space<vmem>>, vector<1x32x128xbf16>,
    %cst_2 = arith.constant 0.000000e+00 : bf16
    %2 = vector.broadcast %cst_2 : bf16 to vector<1x32x128xbf16>
    %c17 = arith.constant 17 : index
    %c0_3 = arith.constant 0 : index
    %c0_4 = arith.constant 0 : index
    %3 = vector.load %arg7[%c17, %c0_3, %c0_4] : memref<18x32x128xbf16, #tpu.memory_space<vmem>>, vector<1x32x128xbf16>
    tpu.vector_store %arg7[%c17, %c0_3, %c0_4], %2 {strides = array<i32>} : memref<18x32x128xbf16, #tpu.memory_space<vmem>>, vector<1x32x128xbf16>,
    %cst_5 = arith.constant 0.000000e+00 : bf16
    %4 = vector.broadcast %cst_5 : bf16 to vector<18x8x128xbf16>
    %c0_6 = arith.constant 0 : index
    %c0_7 = arith.constant 0 : index
    %c0_8 = arith.constant 0 : index
    %5 = vector.load %arg7[%c0_6, %c0_7, %c0_8] : memref<18x32x128xbf16, #tpu.memory_space<vmem>>, vector<18x8x128xbf16>
    tpu.vector_store %arg7[%c0_6, %c0_7, %c0_8], %4 {strides = array<i32>} : memref<18x32x128xbf16, #tpu.memory_space<vmem>>, vector<18x8x128xbf16>,
    %cst_9 = arith.constant 0.000000e+00 : bf16
    %6 = vector.broadcast %cst_9 : bf16 to vector<18x8x128xbf16>
    %c0_10 = arith.constant 0 : index
    %c24 = arith.constant 24 : index
    %c0_11 = arith.constant 0 : index
    %7 = vector.load %arg7[%c0_10, %c24, %c0_11] : memref<18x32x128xbf16, #tpu.memory_space<vmem>>, vector<18x8x128xbf16>
    tpu.vector_store %arg7[%c0_10, %c24, %c0_11], %6 {strides = array<i32>} : memref<18x32x128xbf16, #tpu.memory_space<vmem>>, vector<18x8x128xbf16>,
    %cst_12 = arith.constant 0.000000e+00 : bf16
    %8 = vector.broadcast %cst_12 : bf16 to vector<1x32x256xbf16>
    %c0_13 = arith.constant 0 : index
    %c0_14 = arith.constant 0 : index
    %c0_15 = arith.constant 0 : index
    %9 = vector.load %arg8[%c0_13, %c0_14, %c0_15] : memref<18x32x256xbf16, #tpu.memory_space<vmem>>, vector<1x32x256xbf16>
    tpu.vector_store %arg8[%c0_13, %c0_14, %c0_15], %8 {strides = array<i32>} : memref<18x32x256xbf16, #tpu.memory_space<vmem>>, vector<1x32x256xbf16>,
    %cst_16 = arith.constant 0.000000e+00 : bf16
    %10 = vector.broadcast %cst_16 : bf16 to vector<1x32x256xbf16>
    %c17_17 = arith.constant 17 : index
    %c0_18 = arith.constant 0 : index
    %c0_19 = arith.constant 0 : index
    %11 = vector.load %arg8[%c17_17, %c0_18, %c0_19] : memref<18x32x256xbf16, #tpu.memory_space<vmem>>, vector<1x32x256xbf16>
    tpu.vector_store %arg8[%c17_17, %c0_18, %c0_19], %10 {strides = array<i32>} : memref<18x32x256xbf16, #tpu.memory_space<vmem>>, vector<1x32x256xbf16>,
    %cst_20 = arith.constant 0.000000e+00 : bf16
    %12 = vector.broadcast %cst_20 : bf16 to vector<18x8x256xbf16>
    %c0_21 = arith.constant 0 : index
    %c0_22 = arith.constant 0 : index
    %c0_23 = arith.constant 0 : index
    %13 = vector.load %arg8[%c0_21, %c0_22, %c0_23] : memref<18x32x256xbf16, #tpu.memory_space<vmem>>, vector<18x8x256xbf16>
    tpu.vector_store %arg8[%c0_21, %c0_22, %c0_23], %12 {strides = array<i32>} : memref<18x32x256xbf16, #tpu.memory_space<vmem>>, vector<18x8x256xbf16>,
    %cst_24 = arith.constant 0.000000e+00 : bf16
    %14 = vector.broadcast %cst_24 : bf16 to vector<18x8x256xbf16>
    %c0_25 = arith.constant 0 : index
    %c24_26 = arith.constant 24 : index
    %c0_27 = arith.constant 0 : index
    %15 = vector.load %arg8[%c0_25, %c24_26, %c0_27] : memref<18x32x256xbf16, #tpu.memory_space<vmem>>, vector<18x8x256xbf16>
    tpu.vector_store %arg8[%c0_25, %c24_26, %c0_27], %14 {strides = array<i32>} : memref<18x32x256xbf16, #tpu.memory_space<vmem>>, vector<18x8x256xbf16>,
    %c0_28 = arith.constant 0 : index
    %c0_29 = arith.constant 0 : index
    %c0_30 = arith.constant 0 : index
    %c0_31 = arith.constant 0 : index
    %16 = vector.load %arg1[%c0_28, %c0_29, %c0_30, %c0_31] : memref<1x16x16x128xbf16, #tpu.memory_space<vmem>>, vector<1x16x16x128xbf16>
    %17 = vector.shape_cast %16 : vector<1x16x16x128xbf16> to vector<16x16x128xbf16>
    %c1 = arith.constant 1 : index
    %c8 = arith.constant 8 : index
    %c0_32 = arith.constant 0 : index
    %18 = vector.load %arg7[%c1, %c8, %c0_32] : memref<18x32x128xbf16, #tpu.memory_space<vmem>>, vector<16x16x128xbf16>
    tpu.vector_store %arg7[%c1, %c8, %c0_32], %17 {strides = array<i32>} : memref<18x32x128xbf16, #tpu.memory_space<vmem>>, vector<16x16x128xbf16>,
    %c0_33 = arith.constant 0 : index
    %c0_34 = arith.constant 0 : index
    %c0_35 = arith.constant 0 : index
    %19 = vector.load %arg7[%c0_33, %c0_34, %c0_35] : memref<18x32x128xbf16, #tpu.memory_space<vmem>>, vector<16x32x128xbf16>
    %20 = vector.shape_cast %19 : vector<16x32x128xbf16> to vector<512x128xbf16>
    %c0_36 = arith.constant 0 : index
    %c0_37 = arith.constant 0 : index
    %c0_38 = arith.constant 0 : index
    %21 = vector.load %arg2[%c0_36, %c0_37, %c0_38] : memref<3x128x768xbf16, #tpu.memory_space<vmem>>, vector<1x128x768xbf16>
    %22 = vector.shape_cast %21 : vector<1x128x768xbf16> to vector<128x768xbf16>
    %cst_39 = arith.constant dense<0.000000e+00> : vector<512x768xf32>
    %23 = tpu.matmul %20, %22, %cst_39 {dimension_numbers = #tpu.dot_dimension_numbers<[1], [0], [0], [1], [0, 0, 1, 1], [], []>} : vector<512x128xbf16>, vector<128x768xbf16>, vector<512x768xf32> -> vector<512x768xf32>
    %c1_40 = arith.constant 1 : index
    %c0_41 = arith.constant 0 : index
    %c0_42 = arith.constant 0 : index
    %24 = vector.load %arg7[%c1_40, %c0_41, %c0_42] : memref<18x32x128xbf16, #tpu.memory_space<vmem>>, vector<16x32x128xbf16>
    %25 = vector.shape_cast %24 : vector<16x32x128xbf16> to vector<512x128xbf16>
    %c1_43 = arith.constant 1 : index
    %c0_44 = arith.constant 0 : index
    %c0_45 = arith.constant 0 : index
    %26 = vector.load %arg2[%c1_43, %c0_44, %c0_45] : memref<3x128x768xbf16, #tpu.memory_space<vmem>>, vector<1x128x768xbf16>
    %27 = vector.shape_cast %26 : vector<1x128x768xbf16> to vector<128x768xbf16>
    %cst_46 = arith.constant dense<0.000000e+00> : vector<512x768xf32>
    %28 = tpu.matmul %25, %27, %cst_46 {dimension_numbers = #tpu.dot_dimension_numbers<[1], [0], [0], [1], [0, 0, 1, 1], [], []>} : vector<512x128xbf16>, vector<128x768xbf16>, vector<512x768xf32> -> vector<512x768xf32>
    %29 = arith.addf %23, %28 : vector<512x768xf32>
    %c2 = arith.constant 2 : index
    %c0_47 = arith.constant 0 : index
    %c0_48 = arith.constant 0 : index
    %30 = vector.load %arg7[%c2, %c0_47, %c0_48] : memref<18x32x128xbf16, #tpu.memory_space<vmem>>, vector<16x32x128xbf16>
    %31 = vector.shape_cast %30 : vector<16x32x128xbf16> to vector<512x128xbf16>
    %c2_49 = arith.constant 2 : index
    %c0_50 = arith.constant 0 : index
    %c0_51 = arith.constant 0 : index
    %32 = vector.load %arg2[%c2_49, %c0_50, %c0_51] : memref<3x128x768xbf16, #tpu.memory_space<vmem>>, vector<1x128x768xbf16>
    %33 = vector.shape_cast %32 : vector<1x128x768xbf16> to vector<128x768xbf16>
    %cst_52 = arith.constant dense<0.000000e+00> : vector<512x768xf32>
    %34 = tpu.matmul %31, %33, %cst_52 {dimension_numbers = #tpu.dot_dimension_numbers<[1], [0], [0], [1], [0, 0, 1, 1], [], []>} : vector<512x128xbf16>, vector<128x768xbf16>, vector<512x768xf32> -> vector<512x768xf32>
    %35 = arith.addf %29, %34 : vector<512x768xf32>
    %36 = vector.extract_strided_slice %35 {offsets = [0, 0], sizes = [512, 256], strides = [1, 1]} : vector<512x768xf32> to vector<512x256xf32>
    %c1_i32 = arith.constant 1 : i32
    %37 = tpu.dynamic_rotate %36 by %c1_i32 dim 0 : vector<512x256xf32>, i32 -> vector<512x256xf32>
    %38 = vector.extract_strided_slice %35 {offsets = [0, 256], sizes = [512, 256], strides = [1, 1]} : vector<512x768xf32> to vector<512x256xf32>
    %39 = arith.addf %37, %38 : vector<512x256xf32>
    %40 = vector.extract_strided_slice %35 {offsets = [0, 512], sizes = [512, 256], strides = [1, 1]} : vector<512x768xf32> to vector<512x256xf32>
    %c511_i32 = arith.constant 511 : i32
    %41 = tpu.dynamic_rotate %40 by %c511_i32 dim 0 : vector<512x256xf32>, i32 -> vector<512x256xf32>
    %42 = arith.addf %39, %41 : vector<512x256xf32>
    %43 = vector.shape_cast %42 : vector<512x256xf32> to vector<16x32x256xf32>
    %44 = vector.extract_strided_slice %43 {offsets = [0, 8, 0], sizes = [16, 16, 256], strides = [1, 1, 1]} : vector<16x32x256xf32> to vector<16x16x256xf32>
    %c0_53 = arith.constant 0 : index
    %c0_54 = arith.constant 0 : index
    %c0_55 = arith.constant 0 : index
    %45 = vector.load %arg3[%c0_53, %c0_54, %c0_55] : memref<1x1x256xf32, #tpu.memory_space<vmem>>, vector<1x1x256xf32>
    %46 = vector.broadcast %45 : vector<1x1x256xf32> to vector<16x16x256xf32>
    %47 = arith.addf %44, %46 : vector<16x16x256xf32>
    %48 = arith.truncf %47 : vector<16x16x256xf32> to vector<16x16x256xbf16>
    %c1_56 = arith.constant 1 : index
    %c8_57 = arith.constant 8 : index
    %c0_58 = arith.constant 0 : index
    %49 = vector.load %arg8[%c1_56, %c8_57, %c0_58] : memref<18x32x256xbf16, #tpu.memory_space<vmem>>, vector<16x16x256xbf16>
    tpu.vector_store %arg8[%c1_56, %c8_57, %c0_58], %48 {strides = array<i32>} : memref<18x32x256xbf16, #tpu.memory_space<vmem>>, vector<16x16x256xbf16>,
    %c0_59 = arith.constant 0 : index
    %c0_60 = arith.constant 0 : index
    %c0_61 = arith.constant 0 : index
    %50 = vector.load %arg8[%c0_59, %c0_60, %c0_61] : memref<18x32x256xbf16, #tpu.memory_space<vmem>>, vector<16x32x256xbf16>
    %51 = vector.shape_cast %50 : vector<16x32x256xbf16> to vector<512x256xbf16>
    %c0_62 = arith.constant 0 : index
    %c0_63 = arith.constant 0 : index
    %c0_64 = arith.constant 0 : index
    %52 = vector.load %arg4[%c0_62, %c0_63, %c0_64] : memref<3x256x128xbf16, #tpu.memory_space<vmem>>, vector<1x256x128xbf16>
    %53 = vector.shape_cast %52 : vector<1x256x128xbf16> to vector<256x128xbf16>
    %cst_65 = arith.constant dense<0.000000e+00> : vector<512x128xf32>
    %54 = tpu.matmul %51, %53, %cst_65 {dimension_numbers = #tpu.dot_dimension_numbers<[1], [0], [0], [1], [0, 0, 1, 1], [], []>} : vector<512x256xbf16>, vector<256x128xbf16>, vector<512x128xf32> -> vector<512x128xf32>
    %c1_66 = arith.constant 1 : index
    %c0_67 = arith.constant 0 : index
    %c0_68 = arith.constant 0 : index
    %55 = vector.load %arg8[%c1_66, %c0_67, %c0_68] : memref<18x32x256xbf16, #tpu.memory_space<vmem>>, vector<16x32x256xbf16>
    %56 = vector.shape_cast %55 : vector<16x32x256xbf16> to vector<512x256xbf16>
    %c1_69 = arith.constant 1 : index
    %c0_70 = arith.constant 0 : index
    %c0_71 = arith.constant 0 : index
    %57 = vector.load %arg4[%c1_69, %c0_70, %c0_71] : memref<3x256x128xbf16, #tpu.memory_space<vmem>>, vector<1x256x128xbf16>
    %58 = vector.shape_cast %57 : vector<1x256x128xbf16> to vector<256x128xbf16>
    %cst_72 = arith.constant dense<0.000000e+00> : vector<512x128xf32>
    %59 = tpu.matmul %56, %58, %cst_72 {dimension_numbers = #tpu.dot_dimension_numbers<[1], [0], [0], [1], [0, 0, 1, 1], [], []>} : vector<512x256xbf16>, vector<256x128xbf16>, vector<512x128xf32> -> vector<512x128xf32>
    %60 = arith.addf %54, %59 : vector<512x128xf32>
    %c2_73 = arith.constant 2 : index
    %c0_74 = arith.constant 0 : index
    %c0_75 = arith.constant 0 : index
    %61 = vector.load %arg8[%c2_73, %c0_74, %c0_75] : memref<18x32x256xbf16, #tpu.memory_space<vmem>>, vector<16x32x256xbf16>
    %62 = vector.shape_cast %61 : vector<16x32x256xbf16> to vector<512x256xbf16>
    %c2_76 = arith.constant 2 : index
    %c0_77 = arith.constant 0 : index
    %c0_78 = arith.constant 0 : index
    %63 = vector.load %arg4[%c2_76, %c0_77, %c0_78] : memref<3x256x128xbf16, #tpu.memory_space<vmem>>, vector<1x256x128xbf16>
    %64 = vector.shape_cast %63 : vector<1x256x128xbf16> to vector<256x128xbf16>
    %cst_79 = arith.constant dense<0.000000e+00> : vector<512x128xf32>
    %65 = tpu.matmul %62, %64, %cst_79 {dimension_numbers = #tpu.dot_dimension_numbers<[1], [0], [0], [1], [0, 0, 1, 1], [], []>} : vector<512x256xbf16>, vector<256x128xbf16>, vector<512x128xf32> -> vector<512x128xf32>
    %66 = arith.addf %60, %65 : vector<512x128xf32>
    %c1_i32_80 = arith.constant 1 : i32
    %67 = tpu.dynamic_rotate %66 by %c1_i32_80 dim 0 : vector<512x128xf32>, i32 -> vector<512x128xf32>
    %c110_i32 = arith.constant 110 : i32
    %68 = tpu.dynamic_rotate %66 by %c110_i32 dim 1 : vector<512x128xf32>, i32 -> vector<512x128xf32>
    %69 = arith.addf %67, %68 : vector<512x128xf32>
    %c511_i32_81 = arith.constant 511 : i32
    %70 = tpu.dynamic_rotate %66 by %c511_i32_81 dim 0 : vector<512x128xf32>, i32 -> vector<512x128xf32>
    %c92_i32 = arith.constant 92 : i32
    %71 = tpu.dynamic_rotate %70 by %c92_i32 dim 1 : vector<512x128xf32>, i32 -> vector<512x128xf32>
    %72 = arith.addf %69, %71 : vector<512x128xf32>
    %73 = vector.shape_cast %72 : vector<512x128xf32> to vector<16x32x128xf32>
    %74 = vector.extract_strided_slice %73 {offsets = [0, 8, 0], sizes = [16, 16, 128], strides = [1, 1, 1]} : vector<16x32x128xf32> to vector<16x16x128xf32>
    %c0_82 = arith.constant 0 : index
    %c0_83 = arith.constant 0 : index
    %c0_84 = arith.constant 0 : index
    %75 = vector.load %arg5[%c0_82, %c0_83, %c0_84] : memref<1x1x128xf32, #tpu.memory_space<vmem>>, vector<1x1x128xf32>
    %76 = vector.broadcast %75 : vector<1x1x128xf32> to vector<16x16x128xf32>
    %77 = arith.addf %74, %76 : vector<16x16x128xf32>
    %c0_85 = arith.constant 0 : index
    %c0_86 = arith.constant 0 : index
    %c0_87 = arith.constant 0 : index
    %c0_88 = arith.constant 0 : index
    %78 = vector.load %arg6[%c0_85, %c0_86, %c0_87, %c0_88] : memref<1x16x16x128xf32, #tpu.memory_space<vmem>>, vector<1x16x16x128xf32>
    %79 = vector.shape_cast %78 : vector<1x16x16x128xf32> to vector<16x16x128xf32>
    %80 = vector.shape_cast %77 : vector<16x16x128xf32> to vector<1x16x16x128xf32>
    tpu.vector_store %arg6[%c0_85, %c0_86, %c0_87, %c0_88], %80 {strides = array<i32>} : memref<1x16x16x128xf32, #tpu.memory_space<vmem>>, vector<1x16x16x128xf32>,
    return
  }
  func.func @transform_0(%arg0: i32) -> (i32, i32, i32, i32) {
    %c0_i32 = arith.constant 0 : i32
    %c0_i32_0 = arith.constant 0 : i32
    %c0_i32_1 = arith.constant 0 : i32
    %c0_i32_2 = arith.constant 0 : i32
    return %arg0, %c0_i32, %c0_i32_0, %c0_i32_1 : i32, i32, i32, i32
  }
  func.func @transform_1(%arg0: i32) -> (i32, i32, i32) {
    %c0_i32 = arith.constant 0 : i32
    %c0_i32_0 = arith.constant 0 : i32
    %c0_i32_1 = arith.constant 0 : i32
    %c0_i32_2 = arith.constant 0 : i32
    return %c0_i32, %c0_i32_0, %c0_i32_1 : i32, i32, i32
  }
  func.func @transform_2(%arg0: i32) -> (i32, i32, i32) {
    %c0_i32 = arith.constant 0 : i32
    %c0_i32_0 = arith.constant 0 : i32
    %c0_i32_1 = arith.constant 0 : i32
    %c0_i32_2 = arith.constant 0 : i32
    return %c0_i32, %c0_i32_0, %c0_i32_1 : i32, i32, i32
  }
  func.func @transform_3(%arg0: i32) -> (i32, i32, i32) {
    %c0_i32 = arith.constant 0 : i32
    %c0_i32_0 = arith.constant 0 : i32
    %c0_i32_1 = arith.constant 0 : i32
    %c0_i32_2 = arith.constant 0 : i32
    return %c0_i32, %c0_i32_0, %c0_i32_1 : i32, i32, i32
  }
  func.func @transform_4(%arg0: i32) -> (i32, i32, i32) {
    %c0_i32 = arith.constant 0 : i32
    %c0_i32_0 = arith.constant 0 : i32
    %c0_i32_1 = arith.constant 0 : i32
    %c0_i32_2 = arith.constant 0 : i32
    return %c0_i32, %c0_i32_0, %c0_i32_1 : i32, i32, i32
  }
  func.func @transform_5(%arg0: i32) -> (i32, i32, i32, i32) {
    %c0_i32 = arith.constant 0 : i32
    %c0_i32_0 = arith.constant 0 : i32
    %c0_i32_1 = arith.constant 0 : i32
    %c0_i32_2 = arith.constant 0 : i32
    return %arg0, %c0_i32, %c0_i32_0, %c0_i32_1 : i32, i32, i32, i32
  }
}

</mosaic_0001>

<bundles_post_ra>
// kernel: gaussian_head_forward.1
= control target key start
LH: loop header
LB: loop body
LE: loop exit
PB: predicated region body
PF: predicated region fallthrough
CT: control target
= control target key end

     0   :  { %10 = vsyncpa [#allocation5], 0  ;;  %s11317_s18 = smov 0   ;;  %s14431_s0 = inlined_call_operand.vmem [shape: bf16[2,16,16,128], index: 0, kind: input, shape index: {}]   ;;  %s14432_s1 = inlined_call_operand.hbm [shape: bf16[3,128,768], index: 1, kind: input, shape index: {}]   ;;  %s14433_s2 = inlined_call_operand.vmem [shape: f32[1,1,256], index: 2, kind: input, shape index: {}]   ;;  %s14434_s3 = inlined_call_operand.vmem [shape: bf16[3,256,128], index: 3, kind: input, shape index: {}]   ;;  %s14435_s4 = inlined_call_operand.vmem [shape: f32[1,1,128], index: 4, kind: input, shape index: {}]   ;;  %s14436_s5 = inlined_call_operand.vmem [shape: f32[2,16,16,128], index: 5, kind: output, shape index: {}]  }
   0x1 LB: > { %s168_s21 = sshll.u32 %s14432_s1, 4  ;;  %s11326_s22 = sadd.s32 4294967295, %s11279_s18   ;;  %s11279_s18 = sphi %s11317_s18, %s16_s18   ;;  %s169_s21 = int_to_ptr.hbm [resolvable:$true] %s168_s21 }
   0x2   : > { %p8640_p0 = scmp.ge.s32.totalorder %s11279_s18, 1  ;;  %p157_p1 = scmp.lt.s32.totalorder %s11279_s18, 3 }
   0x3   : > { %p11125_p2 = scmp.eq.s32.totalorder %s11326_s22, 0  ;;  %s11281_s23 = smov [#allocation4]  }
   0x4   : > { %p158_p3 = pnand %p8640_p0, %p157_p1  ;;  %s170_s24 = sshll.u32 %s11281_s23, 4  ;;  %s171_s24 = int_to_ptr.vmem [resolvable:$true] %s170_s24 }
   0x5   : > { %s11282_s25 = smov 384   ;;  %s11283_s26 = smov 24  }
   0x6   : > { %p11121_p4 = pneg %p158_p3  ;;  %203 = sbr.rel (%p158_p3) target bundleno = 3575 (0xdf7), region = 40 }
   0x8   : > { %p11122_p5 = pnand %p11125_p2, %p11121_p4 }
   0xa   : > { %11124 = dma.hbm_to_vmem [thread:$0]  (!%p11122_p5), %s169_s21, 18432, %s171_s24, [#allocation5], %s11282_s25, %s11282_s25, %s11283_s26  }
   0xb   : > { %11274 = dma.done.wait (%p11125_p2), [#allocation5], 18432  }
   0xc   : > { %11276 = vsyncadd (%p11125_p2), [#allocation5], 4294948864  ;;  %v11284_v0 = vmov 0   ;;  %p232_p6 = scmp.lt.s32.totalorder %s11326_s22, 1  ;;  %v8947_v1 = vld [vmem:[#allocation4 + $0x2d0] sm:$0xf] }
   0xd   : > { %253 = vst [vmem:[#allocation2 + $0x10] sm:$0xf] %v11284_v0  ;;  %v10794_v2 = vld [vmem:[#allocation4 + $0x2e4] sm:$0xf0]  ;;  %v10791_v3 = vld [vmem:[#allocation4 + $0x2d4] sm:$0xf] }
   0xe   : > { %243 = vst [vmem:[#allocation2] sm:$0xf] %v11284_v0  ;;  %v8948_v4 = vor.u32 %v10794_v2, %v8947_v1  ;;  %v8949_v5 = vld [vmem:[#allocation4 + $0x2e8] sm:$0xf0]  ;;  %v8955_v6 = vld [vmem:[#allocation4 + $0x2d8] sm:$0xf] }
   0xf   : > { %244 = vst [vmem:[#allocation2 + $0x4] sm:$0xf] %v11284_v0  ;;  %v10795_v7 = vld [vmem:[#allocation4 + $0x2ec] sm:$0xf0]  ;;  %v8952_v8 = vor.u32 %v10791_v3, %v8949_v5  ;;  %v10792_v10 = vld [vmem:[#allocation4 + $0x2dc] sm:$0xf] }
  0x10   : > { %245 = vst [vmem:[#allocation2 + $0x8] sm:$0xf] %v11284_v0  ;;  %v8956_v9 = vor.u32 %v10795_v7, %v8955_v6  ;;  %v8957_v11 = vld [vmem:[#allocation4 + $0x2f0] sm:$0xf0]  ;;  %v8923_v12 = vld [vmem:[#allocation4 + $0x2a0] sm:$0xf]  ;;  %1055 = vmatpush.bf16.msra.mxu0 %v8948_v4 }
  0x11   : > { %246 = vst [vmem:[#allocation2 + $0xc] sm:$0xf] %v11284_v0  ;;  %v8960_v13 = vor.u32 %v10792_v10, %v8957_v11  ;;  %v10788_v14 = vld [vmem:[#allocation4 + $0x2b4] sm:$0xf0]  ;;  %v10785_v15 = vld [vmem:[#allocation4 + $0x2a4] sm:$0xf]  ;;  %1208 = vmatpush.bf16.msra.mxu1 %v8952_v8 }
  0x12   : > { %v8925_v16 = vld [vmem:[#allocation4 + $0x2b8] sm:$0xf0]  ;;  %1361 = vmatpush.bf16.msra.mxu2 %v8956_v9  ;;  %v8924_v17 = vor.u32 %v10788_v14, %v8923_v12  ;;  %v8931_v19 = vld [vmem:[#allocation4 + $0x2a8] sm:$0xf]  ;;  %v10789_v20 = vld [vmem:[#allocation4 + $0x2bc] sm:$0xf0] }
  0x13   : > { %v8928_v18 = vor.u32 %v10785_v15, %v8925_v16  ;;  %v10786_v21 = vld [vmem:[#allocation4 + $0x2ac] sm:$0xf]  ;;  %1498 = vmatpush.bf16.msra.mxu3 %v8960_v13  ;;  %v8932_v22 = vor.u32 %v10789_v20, %v8931_v19  ;;  %v8933_v23 = vld [vmem:[#allocation4 + $0x2c0] sm:$0xf0]  ;;  %v8899_v24 = vld [vmem:[#allocation4 + $0x270] sm:$0xf] }
  0x14   : > { %v10782_v25 = vld [vmem:[#allocation4 + $0x284] sm:$0xf0]  ;;  %v8936_v26 = vor.u32 %v10786_v21, %v8933_v23  ;;  %v10779_v27 = vld [vmem:[#allocation4 + $0x274] sm:$0xf]  ;;  %v8901_v28 = vld [vmem:[#allocation4 + $0x288] sm:$0xf0]  ;;  %1056 = vmatpush.bf16.msra.mxu0 %v8924_v17 }
  0x15   : > { %v8907_v29 = vld [vmem:[#allocation4 + $0x278] sm:$0xf]  ;;  %v8900_v30 = vor.u32 %v10782_v25, %v8899_v24  ;;  %v10783_v31 = vld [vmem:[#allocation4 + $0x28c] sm:$0xf0]  ;;  %v10780_v32 = vld [vmem:[#allocation4 + $0x27c] sm:$0xf]  ;;  %1209 = vmatpush.bf16.msra.mxu1 %v8928_v18  ;;  %v8904_v34 = vor.u32 %v10779_v27, %v8901_v28 }
  0x16   : > { %v8909_v33 = vld [vmem:[#allocation4 + $0x290] sm:$0xf0]  ;;  %1362 = vmatpush.bf16.msra.mxu2 %v8932_v22  ;;  %v8908_v35 = vor.u32 %v10783_v31, %v8907_v29  ;;  %v8875_v36 = vld [vmem:[#allocation4 + $0x240] sm:$0xf]  ;;  %v10776_v37 = vld [vmem:[#allocation4 + $0x254] sm:$0xf0] }
  0x17   : > { %v10773_v38 = vld [vmem:[#allocation4 + $0x244] sm:$0xf]  ;;  %1499 = vmatpush.bf16.msra.mxu3 %v8936_v26  ;;  %v8912_v39 = vor.u32 %v10780_v32, %v8909_v33  ;;  %v8877_v40 = vld [vmem:[#allocation4 + $0x258] sm:$0xf0]  ;;  %v8883_v41 = vld [vmem:[#allocation4 + $0x248] sm:$0xf]  ;;  %v8876_v45 = vor.u32 %v10776_v37, %v8875_v36 }
  0x18   : > { %v10777_v42 = vld [vmem:[#allocation4 + $0x25c] sm:$0xf0]  ;;  %v10774_v43 = vld [vmem:[#allocation4 + $0x24c] sm:$0xf]  ;;  %v8885_v44 = vld [vmem:[#allocation4 + $0x260] sm:$0xf0]  ;;  %1057 = vmatpush.bf16.msra.mxu0 %v8900_v30  ;;  %v8880_v46 = vor.u32 %v10773_v38, %v8877_v40 }
  0x19   : > { %s15474_s22 = smov (!%p232_p6, %s11326_s22), 1  ;;  %1210 = vmatpush.bf16.msra.mxu1 %v8904_v34  ;;  %v8884_v47 = vor.u32 %v10777_v42, %v8883_v41  ;;  %v8851_v48 = vld [vmem:[#allocation4 + $0x210] sm:$0xf]  ;;  %v10770_v49 = vld [vmem:[#allocation4 + $0x224] sm:$0xf0]  ;;  %v8888_v51 = vor.u32 %v10774_v43, %v8885_v44  ;;  %289 = vst [vmem:[#allocation3 + $0x8] sm:$0xff] %v11284_v0 }
  0x1a   : > { %1363 = vmatpush.bf16.msra.mxu2 %v8908_v35  ;;  %v10767_v50 = vld [vmem:[#allocation4 + $0x214] sm:$0xf]  ;;  %v8853_v52 = vld [vmem:[#allocation4 + $0x228] sm:$0xf0]  ;;  %v8859_v53 = vld [vmem:[#allocation4 + $0x218] sm:$0xf]  ;;  %v8852_v57 = vor.u32 %v10770_v49, %v8851_v48 }
  0x1b   : > { %1500 = vmatpush.bf16.msra.mxu3 %v8912_v39  ;;  %v10771_v54 = vld [vmem:[#allocation4 + $0x22c] sm:$0xf0]  ;;  %v10768_v55 = vld [vmem:[#allocation4 + $0x21c] sm:$0xf]  ;;  %v8861_v56 = vld [vmem:[#allocation4 + $0x230] sm:$0xf0]  ;;  %v8856_v58 = vor.u32 %v10767_v50, %v8853_v52 }
  0x1c   : > { %1058 = vmatpush.bf16.msra.mxu0 %v8876_v45  ;;  %s10635_s27 = sshll.u32 %s15474_s22, 7  ;;  %v8860_v59 = vor.u32 %v10771_v54, %v8859_v53  ;;  %v8827_v60 = vld [vmem:[#allocation4 + $0x1e0] sm:$0xf]  ;;  %v10764_v61 = vld [vmem:[#allocation4 + $0x1f4] sm:$0xf0]  ;;  %v8864_v63 = vor.u32 %v10768_v55, %v8861_v56  ;;  %290 = vst [vmem:[#allocation3 + $0x10] sm:$0xff] %v11284_v0 }
  0x1d   : > { %1211 = vmatpush.bf16.msra.mxu1 %v8880_v46  ;;  %v10761_v62 = vld [vmem:[#allocation4 + $0x1e4] sm:$0xf]  ;;  %v8829_v1 = vld [vmem:[#allocation4 + $0x1f8] sm:$0xf0]  ;;  %v8835_v2 = vld [vmem:[#allocation4 + $0x1e8] sm:$0xf]  ;;  %s11346_s30 = scalar_lea.vmem %s14431_s0, %s10635_s27  ;;  %v8828_v6 = vor.u32 %v10764_v61, %v8827_v60 }
  0x1e   : > { %1364 = vmatpush.bf16.msra.mxu2 %v8884_v47  ;;  %v10765_v3 = vld [vmem:[#allocation4 + $0x1fc] sm:$0xf0]  ;;  %v10762_v4 = vld [vmem:[#allocation4 + $0x1ec] sm:$0xf]  ;;  %v8837_v5 = vld [vmem:[#allocation4 + $0x200] sm:$0xf0]  ;;  %v8832_v10 = vor.u32 %v10761_v62, %v8829_v1 }
  0x1f   : > { %1501 = vmatpush.bf16.msra.mxu3 %v8888_v51  ;;  %v8803_v7 = vld [vmem:[#allocation4 + $0x1b0] sm:$0xf]  ;;  %v10758_v8 = vld [vmem:[#allocation4 + $0x1c4] sm:$0xf0]  ;;  %v10755_v9 = vld [vmem:[#allocation4 + $0x1b4] sm:$0xf]  ;;  %v8836_v11 = vor.u32 %v10765_v3, %v8835_v2  ;;  %v8840_v15 = vor.u32 %v10762_v4, %v8837_v5 }
  0x20   : > { %1059 = vmatpush.bf16.msra.mxu0 %v8852_v57  ;;  %v8805_v12 = vld [vmem:[#allocation4 + $0x1c8] sm:$0xf0]  ;;  %v8811_v13 = vld [vmem:[#allocation4 + $0x1b8] sm:$0xf]  ;;  %v10759_v14 = vld [vmem:[#allocation4 + $0x1cc] sm:$0xf0]  ;;  %v8804_v19 = vor.u32 %v10758_v8, %v8803_v7 }
  0x21   : > { %1212 = vmatpush.bf16.msra.mxu1 %v8856_v58  ;;  %v10756_v16 = vld [vmem:[#allocation4 + $0x1bc] sm:$0xf]  ;;  %v333_v17 = vld [vmem:[%s11346_s30] sm:$0xff]   ;;  %248 = vst [vmem:[#allocation2 + $0x110] sm:$0xf] %v11284_v0  ;;  %v8808_v22 = vor.u32 %v10755_v9, %v8805_v12  ;;  %v8812_v23 = vor.u32 %v10759_v14, %v8811_v13  ;;  %v335_v43 = vld [vmem:[%s11346_s30 + $0x8] sm:$0xff]  }
  0x22   : > { %1365 = vmatpush.bf16.msra.mxu2 %v8860_v59  ;;  %v8813_v18 = vld [vmem:[#allocation4 + $0x1d0] sm:$0xf0]  ;;  %366 = vst [vmem:[#allocation2 + $0x14] sm:$0xff] %v333_v17   ;;  %v8779_v20 = vld [vmem:[#allocation4 + $0x180] sm:$0xf]  ;;  %s11285_s12 = smov 110  }
  0x23   : > { %1502 = vmatpush.bf16.msra.mxu3 %v8864_v63  ;;  %v10752_v21 = vld [vmem:[#allocation4 + $0x194] sm:$0xf0]  ;;  %249 = vst [vmem:[#allocation2 + $0x114] sm:$0xf] %v11284_v0  ;;  %v10749_v24 = vld [vmem:[#allocation4 + $0x184] sm:$0xf]  ;;  %v8816_v26 = vor.u32 %v10756_v16, %v8813_v18 }
  0x24   : > { %1060 = vmatpush.bf16.msra.mxu0 %v8828_v6  ;;  %v8781_v25 = vld [vmem:[#allocation4 + $0x198] sm:$0xf0]  ;;  %250 = vst [vmem:[#allocation2 + $0x118] sm:$0xf] %v11284_v0  ;;  %v8787_v27 = vld [vmem:[#allocation4 + $0x188] sm:$0xf]  ;;  %v8780_v31 = vor.u32 %v10752_v21, %v8779_v20 }
  0x25   : > { %1213 = vmatpush.bf16.msra.mxu1 %v8832_v10  ;;  %v10753_v28 = vld [vmem:[#allocation4 + $0x19c] sm:$0xf0]  ;;  %251 = vst [vmem:[#allocation2 + $0x11c] sm:$0xf] %v11284_v0  ;;  %v10750_v29 = vld [vmem:[#allocation4 + $0x18c] sm:$0xf]  ;;  %v8784_v32 = vor.u32 %v10749_v24, %v8781_v25 }
  0x26   : > { %1366 = vmatpush.bf16.msra.mxu2 %v8836_v11  ;;  %v8789_v30 = vld [vmem:[#allocation4 + $0x1a0] sm:$0xf0]  ;;  %254 = vst [vmem:[#allocation2 + $0x20] sm:$0xf] %v11284_v0  ;;  %v8788_v33 = vor.u32 %v10753_v28, %v8787_v27  ;;  %v8963_v37 = vld [vmem:[#allocation4 + $0x2e0] sm:$0xf] }
  0x27   : > { %1503 = vmatpush.bf16.msra.mxu3 %v8840_v15  ;;  %255 = vst [vmem:[#allocation2 + $0x30] sm:$0xf] %v11284_v0  ;;  %v8792_v34 = vor.u32 %v10750_v29, %v8789_v30  ;;  %v10796_v38 = vld [vmem:[#allocation4 + $0x2f4] sm:$0xf0]  ;;  %v10793_v40 = vld [vmem:[#allocation4 + $0x2e4] sm:$0xf] }
  0x28   : > { %1061 = vmatpush.bf16.msra.mxu0 %v8804_v19  ;;  %256 = vst [vmem:[#allocation2 + $0x40] sm:$0xf] %v11284_v0  ;;  %v8964_v39 = vor.u32 %v10796_v38, %v8963_v37  ;;  %v8965_v41 = vld [vmem:[#allocation4 + $0x2f8] sm:$0xf0]  ;;  %v337_v44 = vld [vmem:[%s11346_s30 + $0x10] sm:$0xff]   ;;  %v341_v55 = vld [vmem:[%s11346_s30 + $0x20] sm:$0xff]  }
  0x29   : > { %1214 = vmatpush.bf16.msra.mxu1 %v8808_v22  ;;  %257 = vst [vmem:[#allocation2 + $0x50] sm:$0xf] %v11284_v0  ;;  %v10717_v35 = vld [vmem:[#allocation2 + $0x10] sm:$0xff]  ;;  %v8968_v42 = vor.u32 %v10793_v40, %v8965_v41  ;;  %v10790_v47 = vld [vmem:[#allocation4 + $0x2c4] sm:$0xf0]  ;;  %s11286_s13 = smov 92  }
  0x2a   : > { %1367 = vmatpush.bf16.msra.mxu2 %v8812_v23  ;;  %258 = vst [vmem:[#allocation2 + $0x60] sm:$0xf] %v11284_v0  ;;  %v8939_v46 = vld [vmem:[#allocation4 + $0x2b0] sm:$0xf]  ;;  %v10787_v48 = vld [vmem:[#allocation4 + $0x2b4] sm:$0xf] }
  0x2b   : > { %1504 = vmatpush.bf16.msra.mxu3 %v8816_v26  ;;  %259 = vst [vmem:[#allocation2 + $0x70] sm:$0xf] %v11284_v0  ;;  %v8940_v49 = vor.u32 %v10790_v47, %v8939_v46  ;;  %v8941_v50 = vld [vmem:[#allocation4 + $0x2c8] sm:$0xf0]  ;;  %v8915_v61 = vld [vmem:[#allocation4 + $0x280] sm:$0xf] }
  0x2c   : > { %1062 = vmatpush.bf16.msra.mxu0 %v8780_v31  ;;  %260 = vst [vmem:[#allocation2 + $0x80] sm:$0xf] %v11284_v0  ;;  %v8944_v51 = vor.u32 %v10787_v48, %v8941_v50  ;;  %v10784_v62 = vld [vmem:[#allocation4 + $0x294] sm:$0xf0]  ;;  %v10781_v63 = vld [vmem:[#allocation4 + $0x284] sm:$0xf] }
  0x2d   : > { %1215 = vmatpush.bf16.msra.mxu1 %v8784_v32  ;;  %261 = vst [vmem:[#allocation2 + $0x90] sm:$0xf] %v11284_v0  ;;  %v8916_v3 = vor.u32 %v10784_v62, %v8915_v61  ;;  %v8917_v4 = vld [vmem:[#allocation4 + $0x298] sm:$0xf0]  ;;  %v343_v15 = vld [vmem:[%s11346_s30 + $0x28] sm:$0xff]   ;;  %v345_v26 = vld [vmem:[%s11346_s30 + $0x30] sm:$0xff]  }
  0x2e   : > { %1368 = vmatpush.bf16.msra.mxu2 %v8788_v33  ;;  %262 = vst [vmem:[#allocation2 + $0xa0] sm:$0xf] %v11284_v0  ;;  %v8920_v5 = vor.u32 %v10781_v63, %v8917_v4  ;;  %v9267_v19 = vld [vmem:[#allocation4 + $0x150] sm:$0xf]  ;;  %v10714_v20 = vld [vmem:[#allocation4 + $0x164] sm:$0xf0] }
  0x2f   : > { %1505 = vmatpush.bf16.msra.mxu3 %v8792_v34  ;;  %1063 = vmatmul.bf16.vlgmr.msra.gmra.mxu0 %v10717_v35  ;;  %263 = vst [vmem:[#allocation2 + $0xb0] sm:$0xf] %v11284_v0  ;;  %v10711_v21 = vld [vmem:[#allocation4 + $0x154] sm:$0xf]  ;;  %v9268_v22 = vor.u32 %v10714_v20, %v9267_v19  ;;  %v9269_v23 = vld [vmem:[#allocation4 + $0x168] sm:$0xf0] }
  0x30   : > { %1216 = vmatmul.bf16.vlgmr.msra.gmra.mxu1 %v10717_v35  ;;  %264 = vst [vmem:[#allocation2 + $0xc0] sm:$0xf] %v11284_v0  ;;  %1635 = vmatpush.bf16.msrb.mxu0 %v8964_v39  ;;  %v9272_v24 = vor.u32 %v10711_v21, %v9269_v23  ;;  %v8891_v30 = vld [vmem:[#allocation4 + $0x250] sm:$0xf]  ;;  %v10778_v31 = vld [vmem:[#allocation4 + $0x264] sm:$0xf0] }
  0x31   : > { %1369 = vmatmul.bf16.vlgmr.msra.gmra.mxu2 %v10717_v35  ;;  %265 = vst [vmem:[#allocation2 + $0xd0] sm:$0xf] %v11284_v0  ;;  %1788 = vmatpush.bf16.msrb.mxu1 %v8968_v42  ;;  %v10775_v32 = vld [vmem:[#allocation4 + $0x254] sm:$0xf]  ;;  %v8892_v33 = vor.u32 %v10778_v31, %v8891_v30  ;;  %v8893_v34 = vld [vmem:[#allocation4 + $0x268] sm:$0xf0] }
  0x32   : > { %1506 = vmatmul.bf16.vlgmr.msra.gmra.mxu3 %v10717_v35  ;;  %266 = vst [vmem:[#allocation2 + $0xe0] sm:$0xf] %v11284_v0  ;;  %2373 = vmatpush.bf16.msrb.mxu2 %v9268_v22  ;;  %v8896_v35 = vor.u32 %v10775_v32, %v8893_v34  ;;  %v349_v20 = vld [vmem:[%s11346_s30 + $0x40] sm:$0xff]   ;;  %v8869_v32 = vld [vmem:[#allocation4 + $0x238] sm:$0xf0]  ;;  %s10636_s14 = sshll.u32 %s15474_s22, 8 }
  0x33   : > { %267 = vst [vmem:[#allocation2 + $0xf0] sm:$0xf] %v11284_v0  ;;  %2526 = vmatpush.bf16.msrb.mxu3 %v9272_v24  ;;  %v10769_v30 = vld [vmem:[#allocation4 + $0x224] sm:$0xf]  ;;  %s13978_s20 = scalar_lea.vmem %s14436_s5, %s10636_s14 }
  0x34   : > { %268 = vst [vmem:[#allocation2 + $0x100] sm:$0xf] %v11284_v0  ;;  %1636 = vmatpush.bf16.msrb.mxu0 %v8940_v49  ;;  %v347_v49 = vld [vmem:[%s11346_s30 + $0x38] sm:$0xff]  }
  0x35   : > { %271 = vst [vmem:[#allocation2 + $0x1c] sm:$0xf] %v11284_v0  ;;  %1789 = vmatpush.bf16.msrb.mxu1 %v8944_v51 }
  0x36   : > { %272 = vst [vmem:[#allocation2 + $0x2c] sm:$0xf] %v11284_v0 }
  0x37   : > { %273 = vst [vmem:[#allocation2 + $0x3c] sm:$0xf] %v11284_v0 }
  0x38   : > { %274 = vst [vmem:[#allocation2 + $0x4c] sm:$0xf] %v11284_v0  ;;  %1637 = vmatpush.bf16.msrb.mxu0 %v8916_v3  ;;  %v9245_v3 = vld [vmem:[#allocation4 + $0x138] sm:$0xf0] }
  0x39   : > { %275 = vst [vmem:[#allocation2 + $0x5c] sm:$0xf] %v11284_v0  ;;  %1790 = vmatpush.bf16.msrb.mxu1 %v8920_v5 }
  0x3a   : > { %276 = vst [vmem:[#allocation2 + $0x6c] sm:$0xf] %v11284_v0 }
  0x3b   : > { %277 = vst [vmem:[#allocation2 + $0x7c] sm:$0xf] %v11284_v0 }
  0x3c   : > { %278 = vst [vmem:[#allocation2 + $0x8c] sm:$0xf] %v11284_v0  ;;  %v10718_v36 = vld [vmem:[#allocation2 + $0x18] sm:$0xff]  ;;  %1638 = vmatpush.bf16.msrb.mxu0 %v8892_v33  ;;  %v8872_v33 = vor.u32 %v10769_v30, %v8869_v32 }
  0x3d   : > { %279 = vst [vmem:[#allocation2 + $0x9c] sm:$0xf] %v11284_v0  ;;  %1791 = vmatpush.bf16.msrb.mxu1 %v8896_v35 }
  0x3e   : > { %280 = vst [vmem:[#allocation2 + $0xac] sm:$0xf] %v11284_v0 }
  0x3f   : > { %1068 = vmatmul.bf16.gmra.mxu0 %v10718_v36  ;;  %281 = vst [vmem:[#allocation2 + $0xbc] sm:$0xf] %v11284_v0 }
  0x40   : > { %1221 = vmatmul.bf16.gmra.mxu1 %v10718_v36  ;;  %282 = vst [vmem:[#allocation2 + $0xcc] sm:$0xf] %v11284_v0 }
  0x41   : > { %1373 = vmatmul.bf16.gmra.mxu2 %v10718_v36  ;;  %283 = vst [vmem:[#allocation2 + $0xdc] sm:$0xf] %v11284_v0  ;;  %1792 = vmatpush.bf16.msrb.mxu1 %v8872_v33 }
  0x42   : > { %1510 = vmatmul.bf16.gmra.mxu3 %v10718_v36  ;;  %284 = vst [vmem:[#allocation2 + $0xec] sm:$0xf] %v11284_v0 }
  0x43   : > { %285 = vst [vmem:[#allocation2 + $0xfc] sm:$0xf] %v11284_v0 }
  0x44   : > { %286 = vst [vmem:[#allocation2 + $0x10c] sm:$0xf] %v11284_v0 }
  0x45   : > { %294 = vst [vmem:[#allocation3 + $0x228] sm:$0xff] %v11284_v0 }
  0x46   : > { %295 = vst [vmem:[#allocation3 + $0x230] sm:$0xff] %v11284_v0 }
  0x47   : > { %298 = vst [vmem:[#allocation3 + $0x20] sm:$0xff] %v11284_v0 }
  0x48   : > { %299 = vst [vmem:[#allocation3 + $0x40] sm:$0xff] %v11284_v0 }
  0x49   : > { %300 = vst [vmem:[#allocation3 + $0x60] sm:$0xff] %v11284_v0 }
  0x4a   : > { %301 = vst [vmem:[#allocation3 + $0x80] sm:$0xff] %v11284_v0 }
  0x4b   : > { %302 = vst [vmem:[#allocation3 + $0xa0] sm:$0xff] %v11284_v0 }
  0x4c   : > { %303 = vst [vmem:[#allocation3 + $0xc0] sm:$0xff] %v11284_v0 }
  0x4d   : > { %304 = vst [vmem:[#allocation3 + $0xe0] sm:$0xff] %v11284_v0 }
  0x4e   : > { %305 = vst [vmem:[#allocation3 + $0x100] sm:$0xff] %v11284_v0 }
  0x4f   : > { %306 = vst [vmem:[#allocation3 + $0x120] sm:$0xff] %v11284_v0 }
  0x50   : > { %307 = vst [vmem:[#allocation3 + $0x140] sm:$0xff] %v11284_v0 }
  0x51   : > { %308 = vst [vmem:[#allocation3 + $0x160] sm:$0xff] %v11284_v0 }
  0x52   : > { %309 = vst [vmem:[#allocation3 + $0x180] sm:$0xff] %v11284_v0 }
  0x53   : > { %310 = vst [vmem:[#allocation3 + $0x1a0] sm:$0xff] %v11284_v0 }
  0x54   : > { %311 = vst [vmem:[#allocation3 + $0x1c0] sm:$0xff] %v11284_v0 }
  0x55   : > { %312 = vst [vmem:[#allocation3 + $0x1e0] sm:$0xff] %v11284_v0 }
  0x56   : > { %313 = vst [vmem:[#allocation3 + $0x200] sm:$0xff] %v11284_v0 }
  0x57   : > { %316 = vst [vmem:[#allocation3 + $0x38] sm:$0xff] %v11284_v0 }
  0x58   : > { %317 = vst [vmem:[#allocation3 + $0x58] sm:$0xff] %v11284_v0 }
  0x59   : > { %318 = vst [vmem:[#allocation3 + $0x78] sm:$0xff] %v11284_v0 }
  0x5a   : > { %319 = vst [vmem:[#allocation3 + $0x98] sm:$0xff] %v11284_v0 }
  0x5b   : > { %320 = vst [vmem:[#allocation3 + $0xb8] sm:$0xff] %v11284_v0 }
  0x5c   : > { %321 = vst [vmem:[#allocation3 + $0xd8] sm:$0xff] %v11284_v0 }
  0x5d   : > { %322 = vst [vmem:[#allocation3 + $0xf8] sm:$0xff] %v11284_v0 }
  0x5e   : > { %323 = vst [vmem:[#allocation3 + $0x118] sm:$0xff] %v11284_v0 }
  0x5f   : > { %324 = vst [vmem:[#allocation3 + $0x138] sm:$0xff] %v11284_v0 }
  0x60   : > { %325 = vst [vmem:[#allocation3 + $0x158] sm:$0xff] %v11284_v0 }
  0x61   : > { %326 = vst [vmem:[#allocation3 + $0x178] sm:$0xff] %v11284_v0 }
  0x62   : > { %327 = vst [vmem:[#allocation3 + $0x198] sm:$0xff] %v11284_v0 }
  0x63   : > { %328 = vst [vmem:[#allocation3 + $0x1b8] sm:$0xff] %v11284_v0 }
  0x64   : > { %329 = vst [vmem:[#allocation3 + $0x1d8] sm:$0xff] %v11284_v0 }
  0x65   : > { %330 = vst [vmem:[#allocation3 + $0x1f8] sm:$0xff] %v11284_v0 }
  0x66   : > { %331 = vst [vmem:[#allocation3 + $0x218] sm:$0xff] %v11284_v0 }
  0x67   : > { %252 = vst [vmem:[#allocation2] sm:$0xf] %v11284_v0 }
  0x68   : > { %269 = vst [vmem:[#allocation2 + $0x110] sm:$0xf] %v11284_v0 }
  0x69   : > { %270 = vst [vmem:[#allocation2 + $0xc] sm:$0xf] %v11284_v0 }
  0x6a   : > { %287 = vst [vmem:[#allocation2 + $0x11c] sm:$0xf] %v11284_v0 }
  0x6b   : > { %297 = vst [vmem:[#allocation3] sm:$0xff] %v11284_v0 }
  0x6c   : > { %314 = vst [vmem:[#allocation3 + $0x220] sm:$0xff] %v11284_v0 }
  0x6d   : > { %315 = vst [vmem:[#allocation3 + $0x18] sm:$0xff] %v11284_v0 }
  0x6e   : > { %332 = vst [vmem:[#allocation3 + $0x238] sm:$0xff] %v11284_v0  ;;  %v339_v0 = vld [vmem:[%s11346_s30 + $0x18] sm:$0xff]  }
  0x6f   : > { %368 = vst [vmem:[#allocation2 + $0x24] sm:$0xff] %v335_v43  }
  0x70   : > { %370 = vst [vmem:[#allocation2 + $0x34] sm:$0xff] %v337_v44  }
  0x71   : > { %372 = vst [vmem:[#allocation2 + $0x44] sm:$0xff] %v339_v0  }
  0x72   : > { %374 = vst [vmem:[#allocation2 + $0x54] sm:$0xff] %v341_v55  }
  0x73   : > { %376 = vst [vmem:[#allocation2 + $0x64] sm:$0xff] %v343_v15  }
  0x74   : > { %378 = vst [vmem:[#allocation2 + $0x74] sm:$0xff] %v345_v26   ;;  %v8867_v26 = vld [vmem:[#allocation4 + $0x220] sm:$0xf] }
  0x75   : > { %380 = vst [vmem:[#allocation2 + $0x84] sm:$0xff] %v347_v49  }
  0x76   : > { %v10719_v45 = vld [vmem:[#allocation2 + $0x20] sm:$0xff]  ;;  %v10720_v52 = vld [vmem:[#allocation2 + $0x28] sm:$0xff]  ;;  %382 = vst [vmem:[#allocation2 + $0x94] sm:$0xff] %v349_v20  }
  0x77   : > { %1072 = vmatmul.bf16.gmra.mxu0 %v10719_v45  ;;  %1225 = vmatmul.bf16.gmra.mxu1 %v10719_v45  ;;  %v10721_v53 = vld [vmem:[#allocation2 + $0x30] sm:$0xff]  ;;  %v10722_v54 = vld [vmem:[#allocation2 + $0x38] sm:$0xff]  ;;  %v10702_v20 = vld [vmem:[#allocation4 + $0x104] sm:$0xf0] }
  0x78   : > { %1377 = vmatmul.bf16.gmra.mxu2 %v10719_v45  ;;  %1514 = vmatmul.bf16.gmra.mxu3 %v10719_v45  ;;  %v10723_v60 = vld [vmem:[#allocation2 + $0x40] sm:$0xff]  ;;  %v10724_v10 = vld [vmem:[#allocation2 + $0x48] sm:$0xff] }
  0x79   : > { %v10725_v18 = vld [vmem:[#allocation2 + $0x50] sm:$0xff]  ;;  %v10726_v25 = vld [vmem:[#allocation2 + $0x58] sm:$0xff] }
  0x7a   : > { %v10727_v27 = vld [vmem:[#allocation2 + $0x60] sm:$0xff]  ;;  %v10728_v42 = vld [vmem:[#allocation2 + $0x68] sm:$0xff] }
  0x7c   : > { %v10731_v23 = vld [vmem:[#allocation2 + $0x80] sm:$0xff] }
  0x7d   : > { %v10734_v33 = vld [vmem:[#allocation2 + $0x98] sm:$0xff] }
  0x87   : > { %1077 = vmatmul.bf16.gmra.mxu0 %v10720_v52  ;;  %1230 = vmatmul.bf16.gmra.mxu1 %v10720_v52 }
  0x88   : > { %1381 = vmatmul.bf16.gmra.mxu2 %v10720_v52  ;;  %1518 = vmatmul.bf16.gmra.mxu3 %v10720_v52  ;;  %v10729_v52 = vld [vmem:[#allocation2 + $0x70] sm:$0xff] }
  0x97   : > { %1081 = vmatmul.bf16.gmra.mxu0 %v10721_v53  ;;  %1234 = vmatmul.bf16.gmra.mxu1 %v10721_v53 }
  0x98   : > { %1385 = vmatmul.bf16.gmra.mxu2 %v10721_v53  ;;  %1522 = vmatmul.bf16.gmra.mxu3 %v10721_v53 }
  0xa7   : > { %1086 = vmatmul.bf16.gmra.mxu0 %v10722_v54  ;;  %1239 = vmatmul.bf16.gmra.mxu1 %v10722_v54 }
  0xa8   : > { %1389 = vmatmul.bf16.gmra.mxu2 %v10722_v54  ;;  %1526 = vmatmul.bf16.gmra.mxu3 %v10722_v54 }
  0xac   : > { %v11432_v56 = vpop.f32.mrf.mxu0 }
  0xad   : > { %v11434_v57 = vpop.f32.mrf.mxu1 }
  0xb4   : > { %v1370_v58 = vpop.f32.mrf.mxu2  ;;  %v11436_v1 = vpop.f32.mrf.mxu0 }
  0xb5   : > { %v1507_v59 = vpop.f32.mrf.mxu3  ;;  %v11438_v2 = vpop.f32.mrf.mxu1  ;;  %v9243_v58 = vld [vmem:[#allocation4 + $0x120] sm:$0xf] }
  0xb6   : > { %v10708_v59 = vld [vmem:[#allocation4 + $0x134] sm:$0xf0] }
  0xb7   : > { %1090 = vmatmul.bf16.gmra.mxu0 %v10723_v60  ;;  %1243 = vmatmul.bf16.gmra.mxu1 %v10723_v60  ;;  %v9244_v63 = vor.u32 %v10708_v59, %v9243_v58  ;;  %v351_v58 = vld [vmem:[%s11346_s30 + $0x48] sm:$0xff]  }
  0xb8   : > { %1393 = vmatmul.bf16.gmra.mxu2 %v10723_v60  ;;  %1530 = vmatmul.bf16.gmra.mxu3 %v10723_v60  ;;  %v10705_v60 = vld [vmem:[#allocation4 + $0x124] sm:$0xf]  ;;  %384 = vst [vmem:[#allocation2 + $0xa4] sm:$0xff] %v351_v58  }
  0xb9   : > { %v9248_v4 = vor.u32 %v10705_v60, %v9245_v3  ;;  %2374 = vmatpush.bf16.msrb.mxu2 %v9244_v63  ;;  %v10733_v63 = vld [vmem:[#allocation2 + $0x90] sm:$0xff] }
  0xbb   : > { %2527 = vmatpush.bf16.msrb.mxu3 %v9248_v4 }
  0xbc   : > { %v11440_v6 = vpop.f32.mrf.mxu2  ;;  %v11444_v8 = vpop.f32.mrf.mxu0 }
  0xbd   : > { %v11442_v7 = vpop.f32.mrf.mxu3  ;;  %v11446_v9 = vpop.f32.mrf.mxu1 }
  0xc4   : > { %v11448_v11 = vpop.f32.mrf.mxu2  ;;  %v1071_v13 = vpop.f32.mrf.mxu0 }
  0xc5   : > { %v11450_v12 = vpop.f32.mrf.mxu3  ;;  %v1224_v14 = vpop.f32.mrf.mxu1  ;;  %v10730_v13 = vld [vmem:[#allocation2 + $0x78] sm:$0xff] }
  0xc7   : > { %1095 = vmatmul.bf16.gmra.mxu0 %v10724_v10  ;;  %1248 = vmatmul.bf16.gmra.mxu1 %v10724_v10 }
  0xc8   : > { %1397 = vmatmul.bf16.gmra.mxu2 %v10724_v10  ;;  %1534 = vmatmul.bf16.gmra.mxu3 %v10724_v10 }
  0xcc   : > { %v1376_v16 = vpop.f32.mrf.mxu2 }
  0xcd   : > { %v1513_v17 = vpop.f32.mrf.mxu3 }
  0xd7   : > { %1099 = vmatmul.bf16.gmra.mxu0 %v10725_v18  ;;  %1252 = vmatmul.bf16.gmra.mxu1 %v10725_v18 }
  0xd8   : > { %1401 = vmatmul.bf16.gmra.mxu2 %v10725_v18  ;;  %1538 = vmatmul.bf16.gmra.mxu3 %v10725_v18 }
  0xe7   : > { %1104 = vmatmul.bf16.gmra.mxu0 %v10726_v25  ;;  %1257 = vmatmul.bf16.gmra.mxu1 %v10726_v25 }
  0xe8   : > { %1405 = vmatmul.bf16.gmra.mxu2 %v10726_v25  ;;  %1542 = vmatmul.bf16.gmra.mxu3 %v10726_v25 }
  0xf4   : > { %v11454_v28 = vpop.f32.mrf.mxu0  ;;  %v11456_v29 = vpop.f32.mrf.mxu1 }
  0xf7   : > { %1108 = vmatmul.bf16.gmra.mxu0 %v10727_v27  ;;  %1261 = vmatmul.bf16.gmra.mxu1 %v10727_v27 }
  0xf8   : > { %1409 = vmatmul.bf16.gmra.mxu2 %v10727_v27  ;;  %1546 = vmatmul.bf16.gmra.mxu3 %v10727_v27  ;;  %v10772_v27 = vld [vmem:[#allocation4 + $0x234] sm:$0xf0] }
  0xf9   : > { %v8868_v31 = vor.u32 %v10772_v27, %v8867_v26  ;;  %v9221_v27 = vld [vmem:[#allocation4 + $0x108] sm:$0xf0] }
  0xfb   : > { %v1378_v36 = vpop.f32.mrf.mxu2  ;;  %v1515_v37 = vpop.f32.mrf.mxu3  ;;  %1639 = vmatpush.bf16.msrb.mxu0 %v8868_v31 }
  0xfc   : > { %v11458_v38 = vpop.f32.mrf.mxu0  ;;  %v11460_v39 = vpop.f32.mrf.mxu1 }
 0x103   : > { %v11462_v40 = vpop.f32.mrf.mxu2  ;;  %v11464_v41 = vpop.f32.mrf.mxu3 }
 0x104   : > { %v11466_v43 = vpop.f32.mrf.mxu0  ;;  %v11468_v44 = vpop.f32.mrf.mxu1 }
 0x107   : > { %1113 = vmatmul.bf16.gmra.mxu0 %v10728_v42  ;;  %1266 = vmatmul.bf16.gmra.mxu1 %v10728_v42 }
 0x108   : > { %1413 = vmatmul.bf16.gmra.mxu2 %v10728_v42  ;;  %1550 = vmatmul.bf16.gmra.mxu3 %v10728_v42 }
 0x10b   : > { %v11470_v45 = vpop.f32.mrf.mxu2  ;;  %v11472_v46 = vpop.f32.mrf.mxu3 }
 0x10c   : > { %v1080_v47 = vpop.f32.mrf.mxu0  ;;  %v1233_v48 = vpop.f32.mrf.mxu1 }
 0x10d   : > { %v10732_v48 = vld [vmem:[#allocation2 + $0x88] sm:$0xff] }
 0x113   : > { %v1384_v50 = vpop.f32.mrf.mxu2  ;;  %v1521_v51 = vpop.f32.mrf.mxu3 }
 0x114   : > { %v11475_v0 = vpop.f32.mrf.mxu0  ;;  %v11477_v53 = vpop.f32.mrf.mxu1 }
 0x117   : > { %1117 = vmatmul.bf16.gmra.mxu0 %v10729_v52  ;;  %1270 = vmatmul.bf16.gmra.mxu1 %v10729_v52 }
 0x118   : > { %1417 = vmatmul.bf16.gmra.mxu2 %v10729_v52  ;;  %1554 = vmatmul.bf16.gmra.mxu3 %v10729_v52 }
 0x11b   : > { %v1386_v54 = vpop.f32.mrf.mxu2  ;;  %v1523_v55 = vpop.f32.mrf.mxu3 }
 0x11c   : > { %v11479_v61 = vpop.f32.mrf.mxu0  ;;  %v11481_v62 = vpop.f32.mrf.mxu1 }
 0x123   : > { %v11483_v5 = vpop.f32.mrf.mxu2  ;;  %v11485_v10 = vpop.f32.mrf.mxu3 }
 0x124   : > { %14437 = vst [vmem:[#allocation7_spill] sm:$0xff] %v11483_v5  ;;  %v11487_v14 = vpop.f32.mrf.mxu0  ;;  %v11489_v15 = vpop.f32.mrf.mxu1  ;;  %v9429_v5 = vld [vmem:[#allocation4 + $0x320] sm:$0xf0] }
 0x125   : > { %14438 = vst [vmem:[#allocation8_spill] sm:$0xff] %v11485_v10 }
 0x126   : > { %14439 = vst [vmem:[#allocation9_spill] sm:$0xff] %v11487_v14 }
 0x127   : > { %14440 = vst [vmem:[#allocation10_spill] sm:$0xff] %v11489_v15  ;;  %1122 = vmatmul.bf16.gmra.mxu0 %v10730_v13  ;;  %1275 = vmatmul.bf16.gmra.mxu1 %v10730_v13 }
 0x128   : > { %1421 = vmatmul.bf16.gmra.mxu2 %v10730_v13  ;;  %1558 = vmatmul.bf16.gmra.mxu3 %v10730_v13 }
 0x12b   : > { %v11491_v16 = vpop.f32.mrf.mxu2  ;;  %v11493_v17 = vpop.f32.mrf.mxu3 }
 0x12c   : > { %14441 = vst [vmem:[#allocation11_spill] sm:$0xff] %v11491_v16  ;;  %v1089_v18 = vpop.f32.mrf.mxu0  ;;  %v1242_v19 = vpop.f32.mrf.mxu1 }
 0x12d   : > { %14442 = vst [vmem:[#allocation12_spill] sm:$0xff] %v11493_v17  ;;  %v9219_v19 = vld [vmem:[#allocation4 + $0xf0] sm:$0xf] }
 0x12e   : > { %v9220_v26 = vor.u32 %v10702_v20, %v9219_v19  ;;  %v8843_v20 = vld [vmem:[#allocation4 + $0x1f0] sm:$0xf] }
 0x130   : > { %2375 = vmatpush.bf16.msrb.mxu2 %v9220_v26  ;;  %v10763_v26 = vld [vmem:[#allocation4 + $0x1f4] sm:$0xf] }
 0x133   : > { %v1392_v21 = vpop.f32.mrf.mxu2  ;;  %v1529_v22 = vpop.f32.mrf.mxu3 }
 0x134   : > { %v11496_v24 = vpop.f32.mrf.mxu0  ;;  %v11498_v25 = vpop.f32.mrf.mxu1  ;;  %v10699_v21 = vld [vmem:[#allocation4 + $0xf4] sm:$0xf] }
 0x135   : > { %14443 = vst [vmem:[#allocation13_spill] sm:$0xff] %v11496_v24  ;;  %v9224_v30 = vor.u32 %v10699_v21, %v9221_v27  ;;  %v10766_v21 = vld [vmem:[#allocation4 + $0x204] sm:$0xf0]  ;;  %v9117_v24 = vld [vmem:[#allocation4 + $0x28] sm:$0xf0] }
 0x136   : > { %14444 = vst [vmem:[#allocation14_spill] sm:$0xff] %v11498_v25  ;;  %v8844_v27 = vor.u32 %v10766_v21, %v8843_v20 }
 0x137   : > { %1126 = vmatmul.bf16.gmra.mxu0 %v10731_v23  ;;  %1279 = vmatmul.bf16.gmra.mxu1 %v10731_v23 }
 0x138   : > { %1425 = vmatmul.bf16.gmra.mxu2 %v10731_v23  ;;  %1562 = vmatmul.bf16.gmra.mxu3 %v10731_v23 }
 0x139   : > { %2528 = vmatpush.bf16.msrb.mxu3 %v9224_v30  ;;  %v8845_v30 = vld [vmem:[#allocation4 + $0x208] sm:$0xf0]  ;;  %1640 = vmatpush.bf16.msrb.mxu0 %v8844_v27 }
 0x13b   : > { %v1394_v34 = vpop.f32.mrf.mxu2  ;;  %v1531_v35 = vpop.f32.mrf.mxu3 }
 0x13c   : > { %v11500_v36 = vpop.f32.mrf.mxu0  ;;  %v11502_v37 = vpop.f32.mrf.mxu1 }
 0x13d   : > { %14445 = vst [vmem:[#allocation15_spill] sm:$0xff] %v11500_v36 }
 0x13e   : > { %14446 = vst [vmem:[#allocation16_spill] sm:$0xff] %v11502_v37  ;;  %v9181_v37 = vld [vmem:[#allocation4 + $0xb0] sm:$0xf0] }
 0x143   : > { %v11504_v42 = vpop.f32.mrf.mxu2  ;;  %v11506_v47 = vpop.f32.mrf.mxu3 }
 0x144   : > { %14447 = vst [vmem:[#allocation17_spill] sm:$0xff] %v11504_v42  ;;  %v11508_v49 = vpop.f32.mrf.mxu0  ;;  %v11510_v50 = vpop.f32.mrf.mxu1 }
 0x145   : > { %14448 = vst [vmem:[#allocation18_spill] sm:$0xff] %v11506_v47  ;;  %v10688_v47 = vld [vmem:[#allocation4 + $0x9c] sm:$0xf] }
 0x146   : > { %14449 = vst [vmem:[#allocation19_spill] sm:$0xff] %v11508_v49  ;;  %v10651_v49 = vld [vmem:[#allocation2 + $0x70] sm:$0xff]  ;;  %v9184_v36 = vor.u32 %v10688_v47, %v9181_v37  ;;  %v11157_v37 = vld [vmem:[#allocation2 + $0x88] sm:$0xff] }
 0x147   : > { %14450 = vst [vmem:[#allocation20_spill] sm:$0xff] %v11510_v50  ;;  %1131 = vmatmul.bf16.gmra.mxu0 %v10732_v48  ;;  %1284 = vmatmul.bf16.gmra.mxu1 %v10732_v48  ;;  %v10650_v50 = vld [vmem:[#allocation2 + $0x68] sm:$0xff] }
 0x148   : > { %1429 = vmatmul.bf16.gmra.mxu2 %v10732_v48  ;;  %1566 = vmatmul.bf16.gmra.mxu3 %v10732_v48 }
 0x14b   : > { %v11512_v51 = vpop.f32.mrf.mxu2  ;;  %v11514_v52 = vpop.f32.mrf.mxu3 }
 0x14c   : > { %14451 = vst [vmem:[#allocation21_spill] sm:$0xff] %v11512_v51  ;;  %v1098_v54 = vpop.f32.mrf.mxu0  ;;  %v1251_v55 = vpop.f32.mrf.mxu1 }
 0x14d   : > { %14452 = vst [vmem:[#allocation22_spill] sm:$0xff] %v11514_v52 }
 0x153   : > { %v1400_v59 = vpop.f32.mrf.mxu2  ;;  %v1537_v60 = vpop.f32.mrf.mxu3 }
 0x154   : > { %v11517_v3 = vpop.f32.mrf.mxu0  ;;  %v11519_v4 = vpop.f32.mrf.mxu1  ;;  %v353_v59 = vld [vmem:[%s11346_s30 + $0x50] sm:$0xff]  }
 0x155   : > { %14453 = vst [vmem:[#allocation23_spill] sm:$0xff] %v11517_v3 }
 0x156   : > { %14454 = vst [vmem:[#allocation24_spill] sm:$0xff] %v11519_v4 }
 0x157   : > { %1135 = vmatmul.bf16.gmra.mxu0 %v10733_v63  ;;  %1288 = vmatmul.bf16.gmra.mxu1 %v10733_v63  ;;  %386 = vst [vmem:[#allocation2 + $0xb4] sm:$0xff] %v353_v59  }
 0x158   : > { %1433 = vmatmul.bf16.gmra.mxu2 %v10733_v63  ;;  %1570 = vmatmul.bf16.gmra.mxu3 %v10733_v63 }
 0x15b   : > { %v1402_v13 = vpop.f32.mrf.mxu2  ;;  %v1539_v18 = vpop.f32.mrf.mxu3 }
 0x15c   : > { %v11521_v22 = vpop.f32.mrf.mxu0  ;;  %v11523_v23 = vpop.f32.mrf.mxu1  ;;  %v10735_v13 = vld [vmem:[#allocation2 + $0xa0] sm:$0xff] }
 0x15d   : > { %14455 = vst [vmem:[#allocation25_spill] sm:$0xff] %v11521_v22  ;;  %v10649_v22 = vld [vmem:[#allocation2 + $0x60] sm:$0xff] }
 0x15e   : > { %14456 = vst [vmem:[#allocation26_spill] sm:$0xff] %v11523_v23 }
 0x163   : > { %v11525_v31 = vpop.f32.mrf.mxu2  ;;  %v11527_v32 = vpop.f32.mrf.mxu3 }
 0x164   : > { %14457 = vst [vmem:[#allocation27_spill] sm:$0xff] %v11525_v31  ;;  %v11529_v34 = vpop.f32.mrf.mxu0  ;;  %v11531_v35 = vpop.f32.mrf.mxu1 }
 0x165   : > { %14458 = vst [vmem:[#allocation28_spill] sm:$0xff] %v11527_v32  ;;  %v9205_v32 = vld [vmem:[#allocation4 + $0xe0] sm:$0xf0] }
 0x166   : > { %14459 = vst [vmem:[#allocation29_spill] sm:$0xff] %v11529_v34 }
 0x167   : > { %14460 = vst [vmem:[#allocation30_spill] sm:$0xff] %v11531_v35  ;;  %1140 = vmatmul.bf16.gmra.mxu0 %v10734_v33  ;;  %1293 = vmatmul.bf16.gmra.mxu1 %v10734_v33 }
 0x168   : > { %1437 = vmatmul.bf16.gmra.mxu2 %v10734_v33  ;;  %1574 = vmatmul.bf16.gmra.mxu3 %v10734_v33  ;;  %v8848_v33 = vor.u32 %v10763_v26, %v8845_v30  ;;  %v355_v30 = vld [vmem:[%s11346_s30 + $0x58] sm:$0xff]  }
 0x169   : > { %388 = vst [vmem:[#allocation2 + $0xc4] sm:$0xff] %v355_v30  }
 0x16a   : > { %1793 = vmatpush.bf16.msrb.mxu1 %v8848_v33 }
 0x16b   : > { %v11533_v48 = vpop.f32.mrf.mxu2  ;;  %v11535_v54 = vpop.f32.mrf.mxu3 }
 0x16c   : > { %14461 = vst [vmem:[#allocation31_spill] sm:$0xff] %v11533_v48  ;;  %v1107_v55 = vpop.f32.mrf.mxu0  ;;  %v1260_v58 = vpop.f32.mrf.mxu1 }
 0x16d   : > { %14462 = vst [vmem:[#allocation32_spill] sm:$0xff] %v11535_v54 }
 0x173   : > { %v1408_v60 = vpop.f32.mrf.mxu2  ;;  %v1545_v63 = vpop.f32.mrf.mxu3 }
 0x174   : > { %v11538_v18 = vpop.f32.mrf.mxu0  ;;  %v11540_v19 = vpop.f32.mrf.mxu1 }
 0x175   : > { %14463 = vst [vmem:[#allocation33_spill] sm:$0xff] %v11538_v18 }
 0x176   : > { %14464 = vst [vmem:[#allocation34_spill] sm:$0xff] %v11540_v19 }
 0x177   : > { %1144 = vmatmul.bf16.gmra.mxu0 %v10735_v13  ;;  %1297 = vmatmul.bf16.gmra.mxu1 %v10735_v13 }
 0x178   : > { %1441 = vmatmul.bf16.gmra.mxu2 %v10735_v13  ;;  %1578 = vmatmul.bf16.gmra.mxu3 %v10735_v13  ;;  %v10736_v13 = vld [vmem:[#allocation2 + $0xa8] sm:$0xff] }
 0x17b   : > { %v1410_v55 = vpop.f32.mrf.mxu2  ;;  %v1547_v58 = vpop.f32.mrf.mxu3 }
 0x17c   : > { %v11542_v59 = vpop.f32.mrf.mxu0  ;;  %v11544_v60 = vpop.f32.mrf.mxu1  ;;  %v10737_v58 = vld [vmem:[#allocation2 + $0xb0] sm:$0xff] }
 0x17d   : > { %14465 = vst [vmem:[#allocation35_spill] sm:$0xff] %v11542_v59 }
 0x17e   : > { %14466 = vst [vmem:[#allocation36_spill] sm:$0xff] %v11544_v60 }
 0x183   : > { %v11546_v63 = vpop.f32.mrf.mxu2  ;;  %v11548_v19 = vpop.f32.mrf.mxu3 }
 0x184   : > { %14467 = vst [vmem:[#allocation37_spill] sm:$0xff] %v11546_v63  ;;  %v11550_v18 = vpop.f32.mrf.mxu0  ;;  %v11552_v54 = vpop.f32.mrf.mxu1  ;;  %v10696_v63 = vld [vmem:[#allocation4 + $0xd4] sm:$0xf0] }
 0x185   : > { %14468 = vst [vmem:[#allocation38_spill] sm:$0xff] %v11548_v19 }
 0x186   : > { %14469 = vst [vmem:[#allocation39_spill] sm:$0xff] %v11550_v18 }
 0x187   : > { %14470 = vst [vmem:[#allocation40_spill] sm:$0xff] %v11552_v54  ;;  %1149 = vmatmul.bf16.gmra.mxu0 %v10736_v13  ;;  %1302 = vmatmul.bf16.gmra.mxu1 %v10736_v13 }
 0x188   : > { %1445 = vmatmul.bf16.gmra.mxu2 %v10736_v13  ;;  %1582 = vmatmul.bf16.gmra.mxu3 %v10736_v13 }
 0x18b   : > { %v11554_v20 = vpop.f32.mrf.mxu2  ;;  %v11556_v21 = vpop.f32.mrf.mxu3 }
 0x18c   : > { %14471 = vst [vmem:[#allocation41_spill] sm:$0xff] %v11554_v20  ;;  %v1116_v26 = vpop.f32.mrf.mxu0  ;;  %v1269_v27 = vpop.f32.mrf.mxu1  ;;  %v9195_v20 = vld [vmem:[#allocation4 + $0xc0] sm:$0xf] }
 0x18d   : > { %14472 = vst [vmem:[#allocation42_spill] sm:$0xff] %v11556_v21  ;;  %v10693_v21 = vld [vmem:[#allocation4 + $0xc4] sm:$0xf]  ;;  %v9196_v30 = vor.u32 %v10696_v63, %v9195_v20 }
 0x18f   : > { %2376 = vmatpush.bf16.msrb.mxu2 %v9196_v30  ;;  %v357_v30 = vld [vmem:[%s11346_s30 + $0x60] sm:$0xff]  }
 0x190   : > { %390 = vst [vmem:[#allocation2 + $0xd4] sm:$0xff] %v357_v30  }
 0x193   : > { %v1416_v33 = vpop.f32.mrf.mxu2  ;;  %v1553_v55 = vpop.f32.mrf.mxu3 }
 0x194   : > { %v11559_v19 = vpop.f32.mrf.mxu0  ;;  %v11561_v18 = vpop.f32.mrf.mxu1  ;;  %v9197_v33 = vld [vmem:[#allocation4 + $0xd8] sm:$0xf0] }
 0x195   : > { %14473 = vst [vmem:[#allocation43_spill] sm:$0xff] %v11559_v19  ;;  %v9200_v55 = vor.u32 %v10693_v21, %v9197_v33 }
 0x196   : > { %14474 = vst [vmem:[#allocation44_spill] sm:$0xff] %v11561_v18 }
 0x197   : > { %1153 = vmatmul.bf16.gmra.mxu0 %v10737_v58  ;;  %1306 = vmatmul.bf16.gmra.mxu1 %v10737_v58 }
 0x198   : > { %1449 = vmatmul.bf16.gmra.mxu2 %v10737_v58  ;;  %1586 = vmatmul.bf16.gmra.mxu3 %v10737_v58  ;;  %v10738_v58 = vld [vmem:[#allocation2 + $0xb8] sm:$0xff] }
 0x199   : > { %2529 = vmatpush.bf16.msrb.mxu3 %v9200_v55 }
 0x19b   : > { %v1418_v13 = vpop.f32.mrf.mxu2  ;;  %v1555_v54 = vpop.f32.mrf.mxu3 }
 0x19c   : > { %v11563_v26 = vpop.f32.mrf.mxu0  ;;  %v11565_v27 = vpop.f32.mrf.mxu1 }
 0x19d   : > { %14475 = vst [vmem:[#allocation45_spill] sm:$0xff] %v11563_v26 }
 0x19e   : > { %14476 = vst [vmem:[#allocation46_spill] sm:$0xff] %v11565_v27 }
 0x1a3   : > { %v11567_v18 = vpop.f32.mrf.mxu2  ;;  %v11569_v19 = vpop.f32.mrf.mxu3 }
 0x1a4   : > { %14477 = vst [vmem:[#allocation47_spill] sm:$0xff] %v11567_v18  ;;  %v11571_v13 = vpop.f32.mrf.mxu0  ;;  %v11573_v54 = vpop.f32.mrf.mxu1 }
 0x1a5   : > { %14478 = vst [vmem:[#allocation48_spill] sm:$0xff] %v11569_v19  ;;  %v10739_v19 = vld [vmem:[#allocation2 + $0xc0] sm:$0xff] }
 0x1a6   : > { %14479 = vst [vmem:[#allocation49_spill] sm:$0xff] %v11571_v13 }
 0x1a7   : > { %14480 = vst [vmem:[#allocation50_spill] sm:$0xff] %v11573_v54  ;;  %1158 = vmatmul.bf16.gmra.mxu0 %v10738_v58  ;;  %1311 = vmatmul.bf16.gmra.mxu1 %v10738_v58  ;;  %v10760_v54 = vld [vmem:[#allocation4 + $0x1d4] sm:$0xf0] }
 0x1a8   : > { %1453 = vmatmul.bf16.gmra.mxu2 %v10738_v58  ;;  %1590 = vmatmul.bf16.gmra.mxu3 %v10738_v58  ;;  %v8819_v58 = vld [vmem:[#allocation4 + $0x1c0] sm:$0xf] }
 0x1a9   : > { %v8820_v26 = vor.u32 %v10760_v54, %v8819_v58 }
 0x1ab   : > { %v11575_v27 = vpop.f32.mrf.mxu2  ;;  %v11577_v63 = vpop.f32.mrf.mxu3  ;;  %1641 = vmatpush.bf16.msrb.mxu0 %v8820_v26 }
 0x1ac   : > { %14481 = vst [vmem:[#allocation51_spill] sm:$0xff] %v11575_v27  ;;  %v1125_v20 = vpop.f32.mrf.mxu0  ;;  %v1278_v21 = vpop.f32.mrf.mxu1  ;;  %v10757_v27 = vld [vmem:[#allocation4 + $0x1c4] sm:$0xf] }
 0x1ad   : > { %14482 = vst [vmem:[#allocation52_spill] sm:$0xff] %v11577_v63  ;;  %v8821_v63 = vld [vmem:[#allocation4 + $0x1d8] sm:$0xf0] }
 0x1ae   : > { %v8824_v20 = vor.u32 %v10757_v27, %v8821_v63  ;;  %v359_v63 = vld [vmem:[%s11346_s30 + $0x68] sm:$0xff]  }
 0x1af   : > { %392 = vst [vmem:[#allocation2 + $0xe4] sm:$0xff] %v359_v63  }
 0x1b0   : > { %1794 = vmatpush.bf16.msrb.mxu1 %v8824_v20 }
 0x1b3   : > { %v1424_v33 = vpop.f32.mrf.mxu2  ;;  %v1561_v55 = vpop.f32.mrf.mxu3 }
 0x1b4   : > { %v11580_v18 = vpop.f32.mrf.mxu0  ;;  %v11582_v13 = vpop.f32.mrf.mxu1 }
 0x1b5   : > { %14483 = vst [vmem:[#allocation53_spill] sm:$0xff] %v11580_v18 }
 0x1b6   : > { %14484 = vst [vmem:[#allocation54_spill] sm:$0xff] %v11582_v13 }
 0x1b7   : > { %1162 = vmatmul.bf16.gmra.mxu0 %v10739_v19  ;;  %1315 = vmatmul.bf16.gmra.mxu1 %v10739_v19 }
 0x1b8   : > { %1457 = vmatmul.bf16.gmra.mxu2 %v10739_v19  ;;  %1594 = vmatmul.bf16.gmra.mxu3 %v10739_v19  ;;  %v10740_v19 = vld [vmem:[#allocation2 + $0xc8] sm:$0xff] }
 0x1bb   : > { %v1426_v21 = vpop.f32.mrf.mxu2  ;;  %v1563_v60 = vpop.f32.mrf.mxu3 }
 0x1bc   : > { %v11584_v30 = vpop.f32.mrf.mxu0  ;;  %v11586_v33 = vpop.f32.mrf.mxu1  ;;  %v10741_v21 = vld [vmem:[#allocation2 + $0xd0] sm:$0xff] }
 0x1bd   : > { %14485 = vst [vmem:[#allocation55_spill] sm:$0xff] %v11584_v30 }
 0x1be   : > { %14486 = vst [vmem:[#allocation56_spill] sm:$0xff] %v11586_v33 }
 0x1c3   : > { %v11588_v55 = vpop.f32.mrf.mxu2  ;;  %v11590_v13 = vpop.f32.mrf.mxu3 }
 0x1c4   : > { %14487 = vst [vmem:[#allocation57_spill] sm:$0xff] %v11588_v55  ;;  %v11592_v18 = vpop.f32.mrf.mxu0  ;;  %v11594_v59 = vpop.f32.mrf.mxu1  ;;  %v10690_v55 = vld [vmem:[#allocation4 + $0xa4] sm:$0xf0] }
 0x1c5   : > { %14488 = vst [vmem:[#allocation58_spill] sm:$0xff] %v11590_v13 }
 0x1c6   : > { %14489 = vst [vmem:[#allocation59_spill] sm:$0xff] %v11592_v18 }
 0x1c7   : > { %14490 = vst [vmem:[#allocation60_spill] sm:$0xff] %v11594_v59  ;;  %1167 = vmatmul.bf16.gmra.mxu0 %v10740_v19  ;;  %1320 = vmatmul.bf16.gmra.mxu1 %v10740_v19 }
 0x1c8   : > { %1461 = vmatmul.bf16.gmra.mxu2 %v10740_v19  ;;  %1598 = vmatmul.bf16.gmra.mxu3 %v10740_v19 }
 0x1cb   : > { %v11596_v60 = vpop.f32.mrf.mxu2  ;;  %v11598_v26 = vpop.f32.mrf.mxu3 }
 0x1cc   : > { %14491 = vst [vmem:[#allocation61_spill] sm:$0xff] %v11596_v60  ;;  %v1134_v27 = vpop.f32.mrf.mxu0  ;;  %v1287_v54 = vpop.f32.mrf.mxu1  ;;  %v9171_v60 = vld [vmem:[#allocation4 + $0x90] sm:$0xf] }
 0x1cd   : > { %14492 = vst [vmem:[#allocation62_spill] sm:$0xff] %v11598_v26  ;;  %v10687_v26 = vld [vmem:[#allocation4 + $0x94] sm:$0xf]  ;;  %v9172_v63 = vor.u32 %v10690_v55, %v9171_v60 }
 0x1cf   : > { %2377 = vmatpush.bf16.msrb.mxu2 %v9172_v63  ;;  %v361_v63 = vld [vmem:[%s11346_s30 + $0x70] sm:$0xff]  }
 0x1d0   : > { %394 = vst [vmem:[#allocation2 + $0xf4] sm:$0xff] %v361_v63  }
 0x1d3   : > { %v1432_v58 = vpop.f32.mrf.mxu2  ;;  %v1569_v20 = vpop.f32.mrf.mxu3 }
 0x1d4   : > { %v11601_v13 = vpop.f32.mrf.mxu0  ;;  %v11603_v18 = vpop.f32.mrf.mxu1  ;;  %v9173_v58 = vld [vmem:[#allocation4 + $0xa8] sm:$0xf0] }
 0x1d5   : > { %14493 = vst [vmem:[#allocation63_spill] sm:$0xff] %v11601_v13  ;;  %v9176_v20 = vor.u32 %v10687_v26, %v9173_v58 }
 0x1d6   : > { %14494 = vst [vmem:[#allocation64_spill] sm:$0xff] %v11603_v18 }
 0x1d7   : > { %1171 = vmatmul.bf16.gmra.mxu0 %v10741_v21  ;;  %1324 = vmatmul.bf16.gmra.mxu1 %v10741_v21 }
 0x1d8   : > { %1465 = vmatmul.bf16.gmra.mxu2 %v10741_v21  ;;  %1602 = vmatmul.bf16.gmra.mxu3 %v10741_v21  ;;  %v10742_v21 = vld [vmem:[#allocation2 + $0xd8] sm:$0xff] }
 0x1d9   : > { %2530 = vmatpush.bf16.msrb.mxu3 %v9176_v20 }
 0x1db   : > { %v1434_v19 = vpop.f32.mrf.mxu2  ;;  %v1571_v59 = vpop.f32.mrf.mxu3 }
 0x1dc   : > { %v11605_v27 = vpop.f32.mrf.mxu0  ;;  %v11607_v54 = vpop.f32.mrf.mxu1 }
 0x1dd   : > { %14495 = vst [vmem:[#allocation65_spill] sm:$0xff] %v11605_v27 }
 0x1de   : > { %14496 = vst [vmem:[#allocation66_spill] sm:$0xff] %v11607_v54 }
 0x1e3   : > { %v11609_v18 = vpop.f32.mrf.mxu2  ;;  %v11611_v13 = vpop.f32.mrf.mxu3 }
 0x1e4   : > { %14497 = vst [vmem:[#allocation67_spill] sm:$0xff] %v11609_v18  ;;  %v11613_v19 = vpop.f32.mrf.mxu0  ;;  %v11615_v59 = vpop.f32.mrf.mxu1 }
 0x1e5   : > { %14498 = vst [vmem:[#allocation68_spill] sm:$0xff] %v11611_v13  ;;  %v10743_v13 = vld [vmem:[#allocation2 + $0xe0] sm:$0xff] }
 0x1e6   : > { %14499 = vst [vmem:[#allocation69_spill] sm:$0xff] %v11613_v19 }
 0x1e7   : > { %14500 = vst [vmem:[#allocation70_spill] sm:$0xff] %v11615_v59  ;;  %1176 = vmatmul.bf16.gmra.mxu0 %v10742_v21  ;;  %1329 = vmatmul.bf16.gmra.mxu1 %v10742_v21  ;;  %v10754_v59 = vld [vmem:[#allocation4 + $0x1a4] sm:$0xf0] }
 0x1e8   : > { %1469 = vmatmul.bf16.gmra.mxu2 %v10742_v21  ;;  %1606 = vmatmul.bf16.gmra.mxu3 %v10742_v21  ;;  %v8795_v21 = vld [vmem:[#allocation4 + $0x190] sm:$0xf] }
 0x1e9   : > { %v8796_v27 = vor.u32 %v10754_v59, %v8795_v21 }
 0x1eb   : > { %v11617_v54 = vpop.f32.mrf.mxu2  ;;  %v11619_v55 = vpop.f32.mrf.mxu3  ;;  %1642 = vmatpush.bf16.msrb.mxu0 %v8796_v27 }
 0x1ec   : > { %14501 = vst [vmem:[#allocation71_spill] sm:$0xff] %v11617_v54  ;;  %v1143_v60 = vpop.f32.mrf.mxu0  ;;  %v1296_v26 = vpop.f32.mrf.mxu1  ;;  %v10751_v54 = vld [vmem:[#allocation4 + $0x194] sm:$0xf] }
 0x1ed   : > { %14502 = vst [vmem:[#allocation72_spill] sm:$0xff] %v11619_v55  ;;  %v8797_v55 = vld [vmem:[#allocation4 + $0x1a8] sm:$0xf0] }
 0x1ee   : > { %v8800_v60 = vor.u32 %v10751_v54, %v8797_v55  ;;  %v363_v55 = vld [vmem:[%s11346_s30 + $0x78] sm:$0xff]  }
 0x1ef   : > { %396 = vst [vmem:[#allocation2 + $0x104] sm:$0xff] %v363_v55  }
 0x1f0   : > { %1795 = vmatpush.bf16.msrb.mxu1 %v8800_v60 }
 0x1f3   : > { %v1440_v58 = vpop.f32.mrf.mxu2  ;;  %v1577_v20 = vpop.f32.mrf.mxu3 }
 0x1f4   : > { %v11622_v18 = vpop.f32.mrf.mxu0  ;;  %v11624_v19 = vpop.f32.mrf.mxu1 }
 0x1f5   : > { %14503 = vst [vmem:[#allocation73_spill] sm:$0xff] %v11622_v18 }
 0x1f6   : > { %14504 = vst [vmem:[#allocation74_spill] sm:$0xff] %v11624_v19 }
 0x1f7   : > { %1180 = vmatmul.bf16.gmra.mxu0 %v10743_v13  ;;  %1333 = vmatmul.bf16.gmra.mxu1 %v10743_v13 }
 0x1f8   : > { %1473 = vmatmul.bf16.gmra.mxu2 %v10743_v13  ;;  %1610 = vmatmul.bf16.gmra.mxu3 %v10743_v13  ;;  %v10744_v13 = vld [vmem:[#allocation2 + $0xe8] sm:$0xff] }
 0x1fb   : > { %v1442_v26 = vpop.f32.mrf.mxu2  ;;  %v1579_v33 = vpop.f32.mrf.mxu3 }
 0x1fc   : > { %v11626_v63 = vpop.f32.mrf.mxu0  ;;  %v11628_v58 = vpop.f32.mrf.mxu1  ;;  %v10745_v26 = vld [vmem:[#allocation2 + $0xf0] sm:$0xff] }
 0x1fd   : > { %14505 = vst [vmem:[#allocation75_spill] sm:$0xff] %v11626_v63 }
 0x1fe   : > { %14506 = vst [vmem:[#allocation76_spill] sm:$0xff] %v11628_v58  ;;  %v10746_v58 = vld [vmem:[#allocation2 + $0xf8] sm:$0xff] }
 0x203   : > { %v11630_v20 = vpop.f32.mrf.mxu2  ;;  %v11632_v19 = vpop.f32.mrf.mxu3 }
 0x204   : > { %14507 = vst [vmem:[#allocation77_spill] sm:$0xff] %v11630_v20  ;;  %v11634_v18 = vpop.f32.mrf.mxu0  ;;  %v11636_v30 = vpop.f32.mrf.mxu1  ;;  %v10684_v20 = vld [vmem:[#allocation4 + $0x74] sm:$0xf0] }
 0x205   : > { %14508 = vst [vmem:[#allocation78_spill] sm:$0xff] %v11632_v19 }
 0x206   : > { %14509 = vst [vmem:[#allocation79_spill] sm:$0xff] %v11634_v18 }
 0x207   : > { %14510 = vst [vmem:[#allocation80_spill] sm:$0xff] %v11636_v30  ;;  %1185 = vmatmul.bf16.gmra.mxu0 %v10744_v13  ;;  %1338 = vmatmul.bf16.gmra.mxu1 %v10744_v13 }
 0x208   : > { %1477 = vmatmul.bf16.gmra.mxu2 %v10744_v13  ;;  %1614 = vmatmul.bf16.gmra.mxu3 %v10744_v13 }
 0x20b   : > { %v11638_v33 = vpop.f32.mrf.mxu2  ;;  %v11640_v27 = vpop.f32.mrf.mxu3 }
 0x20c   : > { %14511 = vst [vmem:[#allocation81_spill] sm:$0xff] %v11638_v33  ;;  %v1152_v54 = vpop.f32.mrf.mxu0  ;;  %v1305_v59 = vpop.f32.mrf.mxu1  ;;  %v9147_v33 = vld [vmem:[#allocation4 + $0x60] sm:$0xf] }
 0x20d   : > { %14512 = vst [vmem:[#allocation82_spill] sm:$0xff] %v11640_v27  ;;  %v10681_v27 = vld [vmem:[#allocation4 + $0x64] sm:$0xf]  ;;  %v9148_v55 = vor.u32 %v10684_v20, %v9147_v33 }
 0x20f   : > { %2378 = vmatpush.bf16.msrb.mxu2 %v9148_v55  ;;  %v9123_v55 = vld [vmem:[#allocation4 + $0x30] sm:$0xf] }
 0x213   : > { %v1448_v21 = vpop.f32.mrf.mxu2  ;;  %v1585_v60 = vpop.f32.mrf.mxu3 }
 0x214   : > { %v11643_v19 = vpop.f32.mrf.mxu0  ;;  %v11645_v18 = vpop.f32.mrf.mxu1  ;;  %v9149_v21 = vld [vmem:[#allocation4 + $0x78] sm:$0xf0] }
 0x215   : > { %14513 = vst [vmem:[#allocation83_spill] sm:$0xff] %v11643_v19  ;;  %v9152_v60 = vor.u32 %v10681_v27, %v9149_v21  ;;  %v10678_v21 = vld [vmem:[#allocation4 + $0x44] sm:$0xf0] }
 0x216   : > { %14514 = vst [vmem:[#allocation84_spill] sm:$0xff] %v11645_v18 }
 0x217   : > { %1189 = vmatmul.bf16.gmra.mxu0 %v10745_v26  ;;  %1342 = vmatmul.bf16.gmra.mxu1 %v10745_v26 }
 0x218   : > { %1481 = vmatmul.bf16.gmra.mxu2 %v10745_v26  ;;  %1618 = vmatmul.bf16.gmra.mxu3 %v10745_v26 }
 0x219   : > { %2531 = vmatpush.bf16.msrb.mxu3 %v9152_v60  ;;  %v10675_v60 = vld [vmem:[#allocation4 + $0x34] sm:$0xf] }
 0x21b   : > { %v1450_v13 = vpop.f32.mrf.mxu2  ;;  %v1587_v30 = vpop.f32.mrf.mxu3 }
 0x21c   : > { %v11647_v54 = vpop.f32.mrf.mxu0  ;;  %v11649_v59 = vpop.f32.mrf.mxu1 }
 0x21d   : > { %14515 = vst [vmem:[#allocation85_spill] sm:$0xff] %v11647_v54  ;;  %v10669_v54 = vld [vmem:[#allocation4 + $0x4] sm:$0xf] }
 0x21e   : > { %14516 = vst [vmem:[#allocation86_spill] sm:$0xff] %v11649_v59 }
 0x223   : > { %v11651_v19 = vpop.f32.mrf.mxu2  ;;  %v11653_v18 = vpop.f32.mrf.mxu3 }
 0x224   : > { %14517 = vst [vmem:[#allocation87_spill] sm:$0xff] %v11651_v19  ;;  %v11655_v26 = vpop.f32.mrf.mxu0  ;;  %v11657_v30 = vpop.f32.mrf.mxu1  ;;  %v9124_v19 = vor.u32 %v10678_v21, %v9123_v55 }
 0x225   : > { %14518 = vst [vmem:[#allocation88_spill] sm:$0xff] %v11653_v18  ;;  %v9125_v18 = vld [vmem:[#allocation4 + $0x48] sm:$0xf0] }
 0x226   : > { %14519 = vst [vmem:[#allocation89_spill] sm:$0xff] %v11655_v26  ;;  %v9128_v59 = vor.u32 %v10675_v60, %v9125_v18  ;;  %2379 = vmatpush.bf16.msrb.mxu2 %v9124_v19  ;;  %v9099_v26 = vld [vmem:[#allocation4] sm:$0xf]  ;;  %v9275_v18 = vld [vmem:[#allocation4 + $0x158] sm:$0xf] }
 0x227   : > { %14520 = vst [vmem:[#allocation90_spill] sm:$0xff] %v11657_v30  ;;  %1194 = vmatmul.bf16.gmra.mxu0 %v10746_v58  ;;  %1347 = vmatmul.bf16.gmra.mxu1 %v10746_v58  ;;  %v10672_v30 = vld [vmem:[#allocation4 + $0x14] sm:$0xf0]  ;;  %v10715_v19 = vld [vmem:[#allocation4 + $0x16c] sm:$0xf0] }
 0x228   : > { %1485 = vmatmul.bf16.gmra.mxu2 %v10746_v58  ;;  %1622 = vmatmul.bf16.gmra.mxu3 %v10746_v58  ;;  %v10747_v58 = vld [vmem:[#allocation2 + $0x100] sm:$0xff]  ;;  %v9100_v35 = vor.u32 %v10672_v30, %v9099_v26  ;;  %v9276_v55 = vor.u32 %v10715_v19, %v9275_v18 }
 0x229   : > { %2532 = vmatpush.bf16.msrb.mxu3 %v9128_v59  ;;  %v10712_v59 = vld [vmem:[#allocation4 + $0x15c] sm:$0xf] }
 0x22a   : > { %2380 = vmatpush.bf16.msrb.mxu2 %v9100_v35  ;;  %2679 = vmatpush.bf16.msra.mxu0 %v9276_v55 }
 0x22b   : > { %v11659_v13 = vpop.f32.mrf.mxu2  ;;  %v11661_v20 = vpop.f32.mrf.mxu3 }
 0x22c   : > { %14521 = vst [vmem:[#allocation91_spill] sm:$0xff] %v11659_v13  ;;  %v1161_v33 = vpop.f32.mrf.mxu0  ;;  %v1314_v27 = vpop.f32.mrf.mxu1  ;;  %v9101_v13 = vld [vmem:[#allocation4 + $0x18] sm:$0xf0] }
 0x22d   : > { %14522 = vst [vmem:[#allocation92_spill] sm:$0xff] %v11661_v20  ;;  %v9104_v27 = vor.u32 %v10669_v54, %v9101_v13  ;;  %v10748_v13 = vld [vmem:[#allocation2 + $0x108] sm:$0xff] }
 0x22f   : > { %2533 = vmatpush.bf16.msrb.mxu3 %v9104_v27 }
 0x233   : > { %v1456_v63 = vpop.f32.mrf.mxu2  ;;  %v1593_v48 = vpop.f32.mrf.mxu3 }
 0x234   : > { %v11663_v34 = vpop.f32.mrf.mxu0  ;;  %v11665_v33 = vpop.f32.mrf.mxu1  ;;  %v9277_v63 = vld [vmem:[#allocation4 + $0x170] sm:$0xf0] }
 0x235   : > { %14523 = vst [vmem:[#allocation93_spill] sm:$0xff] %v11663_v34  ;;  %v9280_v48 = vor.u32 %v10712_v59, %v9277_v63  ;;  %v10694_v34 = vld [vmem:[#allocation4 + $0xcc] sm:$0xf] }
 0x236   : > { %14524 = vst [vmem:[#allocation94_spill] sm:$0xff] %v11665_v33  ;;  %v10647_v33 = vld [vmem:[#allocation2 + $0x50] sm:$0xff]  ;;  %v9208_v31 = vor.u32 %v10694_v34, %v9205_v32  ;;  %v11153_v32 = vld [vmem:[#allocation2 + $0x68] sm:$0xff] }
 0x237   : > { %1198 = vmatmul.bf16.gmra.mxu0 %v10747_v58  ;;  %1351 = vmatmul.bf16.gmra.mxu1 %v10747_v58 }
 0x238   : > { %1489 = vmatmul.bf16.gmra.mxu2 %v10747_v58  ;;  %1626 = vmatmul.bf16.gmra.mxu3 %v10747_v58 }
 0x239   : > { %2816 = vmatpush.bf16.msra.mxu1 %v9280_v48 }
 0x23b   : > { %v1458_v21 = vpop.f32.mrf.mxu2  ;;  %v1595_v26 = vpop.f32.mrf.mxu3 }
 0x23c   : > { %v11667_v30 = vpop.f32.mrf.mxu0  ;;  %v11669_v60 = vpop.f32.mrf.mxu1 }
 0x23d   : > { %14525 = vst [vmem:[#allocation95_spill] sm:$0xff] %v11667_v30  ;;  %v10640_v30 = vld [vmem:[#allocation2 + $0x18] sm:$0xff] }
 0x23e   : > { %14526 = vst [vmem:[#allocation96_spill] sm:$0xff] %v11669_v60  ;;  %v9253_v60 = vld [vmem:[#allocation4 + $0x140] sm:$0xf0] }
 0x243   : > { %v11671_v35 = vpop.f32.mrf.mxu2  ;;  %v11673_v54 = vpop.f32.mrf.mxu3 }
 0x244   : > { %14527 = vst [vmem:[#allocation97_spill] sm:$0xff] %v11671_v35  ;;  %v11675_v58 = vpop.f32.mrf.mxu0  ;;  %v11677_v27 = vpop.f32.mrf.mxu1 }
 0x245   : > { %14528 = vst [vmem:[#allocation98_spill] sm:$0xff] %v11673_v54  ;;  %v10637_v54 = vld [vmem:[#allocation2] sm:$0xff] }
 0x246   : > { %14529 = vst [vmem:[#allocation99_spill] sm:$0xff] %v11675_v58  ;;  %v11142_v58 = vld [vmem:[#allocation2 + $0x10] sm:$0xff] }
 0x247   : > { %14530 = vst [vmem:[#allocation100_spill] sm:$0xff] %v11677_v27  ;;  %1203 = vmatmul.bf16.gmra.mxu0 %v10748_v13  ;;  %1356 = vmatmul.bf16.gmra.mxu1 %v10748_v13 }
 0x248   : > { %1493 = vmatmul.bf16.gmra.mxu2 %v10748_v13  ;;  %1630 = vmatmul.bf16.gmra.mxu3 %v10748_v13 }
 0x24b   : > { %v11679_v18 = vpop.f32.mrf.mxu2  ;;  %v11681_v19 = vpop.f32.mrf.mxu3 }
 0x24c   : > { %14531 = vst [vmem:[#allocation101_spill] sm:$0xff] %v11679_v18  ;;  %v1170_v59 = vpop.f32.mrf.mxu0  ;;  %v1323_v55 = vpop.f32.mrf.mxu1 }
 0x24d   : > { %14532 = vst [vmem:[#allocation102_spill] sm:$0xff] %v11681_v19  ;;  %v10706_v19 = vld [vmem:[#allocation4 + $0x12c] sm:$0xf] }
 0x253   : > { %v1464_v63 = vpop.f32.mrf.mxu2  ;;  %v1601_v48 = vpop.f32.mrf.mxu3 }
 0x254   : > { %v11683_v21 = vpop.f32.mrf.mxu0  ;;  %v11685_v26 = vpop.f32.mrf.mxu1 }
 0x255   : > { %14533 = vst [vmem:[#allocation103_spill] sm:$0xff] %v11683_v21  ;;  %v11143_v21 = vld [vmem:[#allocation2 + $0x18] sm:$0xff] }
 0x256   : > { %14534 = vst [vmem:[#allocation104_spill] sm:$0xff] %v11685_v26  ;;  %v10638_v26 = vld [vmem:[#allocation2 + $0x8] sm:$0xff] }
 0x257   : > { %1643 = vmatmul.bf16.vlgmr.msrb.gmra.mxu0 %v11142_v58  ;;  %1796 = vmatmul.bf16.vlgmr.msrb.gmra.mxu1 %v11142_v58 }
 0x258   : > { %2381 = vmatmul.bf16.vlgmr.msrb.gmra.mxu2 %v10637_v54  ;;  %2534 = vmatmul.bf16.vlgmr.msrb.gmra.mxu3 %v10637_v54 }
 0x25b   : > { %v1466_v27 = vpop.f32.mrf.mxu2  ;;  %v1603_v13 = vpop.f32.mrf.mxu3 }
 0x25c   : > { %v11687_v35 = vpop.f32.mrf.mxu0  ;;  %v11689_v18 = vpop.f32.mrf.mxu1 }
 0x25d   : > { %14535 = vst [vmem:[#allocation105_spill] sm:$0xff] %v11687_v35 }
 0x25e   : > { %14536 = vst [vmem:[#allocation106_spill] sm:$0xff] %v11689_v18 }
 0x263   : > { %v11691_v59 = vpop.f32.mrf.mxu2  ;;  %v11693_v55 = vpop.f32.mrf.mxu3 }
 0x264   : > { %14537 = vst [vmem:[#allocation107_spill] sm:$0xff] %v11691_v59  ;;  %v11695_v63 = vpop.f32.mrf.mxu0  ;;  %v11697_v48 = vpop.f32.mrf.mxu1 }
 0x265   : > { %14538 = vst [vmem:[#allocation108_spill] sm:$0xff] %v11693_v55 }
 0x266   : > { %14539 = vst [vmem:[#allocation109_spill] sm:$0xff] %v11695_v63  ;;  %v10639_v63 = vld [vmem:[#allocation2 + $0x10] sm:$0xff] }
 0x267   : > { %14540 = vst [vmem:[#allocation110_spill] sm:$0xff] %v11697_v48  ;;  %1647 = vmatmul.bf16.gmra.mxu0 %v11143_v21  ;;  %1800 = vmatmul.bf16.gmra.mxu1 %v11143_v21  ;;  %v11144_v48 = vld [vmem:[#allocation2 + $0x20] sm:$0xff]  ;;  %v9251_v21 = vld [vmem:[#allocation4 + $0x128] sm:$0xf] }
 0x268   : > { %2386 = vmatmul.bf16.gmra.mxu2 %v10638_v26  ;;  %2539 = vmatmul.bf16.gmra.mxu3 %v10638_v26  ;;  %v10709_v26 = vld [vmem:[#allocation4 + $0x13c] sm:$0xf0] }
 0x26b   : > { %v11699_v54 = vpop.f32.mrf.mxu2  ;;  %v11701_v58 = vpop.f32.mrf.mxu3 }
 0x26c   : > { %14541 = vst [vmem:[#allocation111_spill] sm:$0xff] %v11699_v54  ;;  %v1179_v27 = vpop.f32.mrf.mxu0  ;;  %v1332_v13 = vpop.f32.mrf.mxu1  ;;  %v9252_v54 = vor.u32 %v10709_v26, %v9251_v21  ;;  %v11145_v21 = vld [vmem:[#allocation2 + $0x28] sm:$0xff] }
 0x26d   : > { %14542 = vst [vmem:[#allocation112_spill] sm:$0xff] %v11701_v58  ;;  %v9256_v58 = vor.u32 %v10706_v19, %v9253_v60 }
 0x26e   : > { %2680 = vmatpush.bf16.msra.mxu0 %v9252_v54 }
 0x26f   : > { %2817 = vmatpush.bf16.msra.mxu1 %v9256_v58 }
 0x273   : > { %v1472_v18 = vpop.f32.mrf.mxu2  ;;  %v1609_v59 = vpop.f32.mrf.mxu3 }
 0x274   : > { %v11703_v35 = vpop.f32.mrf.mxu0  ;;  %v11705_v55 = vpop.f32.mrf.mxu1 }
 0x275   : > { %14543 = vst [vmem:[#allocation113_spill] sm:$0xff] %v11703_v35 }
 0x276   : > { %14544 = vst [vmem:[#allocation114_spill] sm:$0xff] %v11705_v55 }
 0x277   : > { %1652 = vmatmul.bf16.gmra.mxu0 %v11144_v48  ;;  %1805 = vmatmul.bf16.gmra.mxu1 %v11144_v48 }
 0x278   : > { %2390 = vmatmul.bf16.gmra.mxu2 %v10639_v63  ;;  %2543 = vmatmul.bf16.gmra.mxu3 %v10639_v63 }
 0x27b   : > { %v1474_v27 = vpop.f32.mrf.mxu2  ;;  %v1611_v13 = vpop.f32.mrf.mxu3 }
 0x27c   : > { %v11707_v18 = vpop.f32.mrf.mxu0  ;;  %v11709_v59 = vpop.f32.mrf.mxu1 }
 0x27d   : > { %14545 = vst [vmem:[#allocation115_spill] sm:$0xff] %v11707_v18  ;;  %v10644_v18 = vld [vmem:[#allocation2 + $0x38] sm:$0xff] }
 0x27e   : > { %14546 = vst [vmem:[#allocation116_spill] sm:$0xff] %v11709_v59  ;;  %v9229_v59 = vld [vmem:[#allocation4 + $0x110] sm:$0xf0] }
 0x283   : > { %v11711_v55 = vpop.f32.mrf.mxu2  ;;  %v11713_v35 = vpop.f32.mrf.mxu3 }
 0x284   : > { %14547 = vst [vmem:[#allocation117_spill] sm:$0xff] %v11711_v55  ;;  %v11715_v48 = vpop.f32.mrf.mxu0  ;;  %v11717_v63 = vpop.f32.mrf.mxu1 }
 0x285   : > { %14548 = vst [vmem:[#allocation118_spill] sm:$0xff] %v11713_v35 }
 0x286   : > { %14549 = vst [vmem:[#allocation119_spill] sm:$0xff] %v11715_v48  ;;  %v10641_v48 = vld [vmem:[#allocation2 + $0x20] sm:$0xff] }
 0x287   : > { %14550 = vst [vmem:[#allocation120_spill] sm:$0xff] %v11717_v63  ;;  %1656 = vmatmul.bf16.gmra.mxu0 %v11145_v21  ;;  %1809 = vmatmul.bf16.gmra.mxu1 %v11145_v21  ;;  %v11146_v63 = vld [vmem:[#allocation2 + $0x30] sm:$0xff] }
 0x288   : > { %2395 = vmatmul.bf16.gmra.mxu2 %v10640_v30  ;;  %2548 = vmatmul.bf16.gmra.mxu3 %v10640_v30 }
 0x28b   : > { %v11719_v60 = vpop.f32.mrf.mxu2  ;;  %v11721_v19 = vpop.f32.mrf.mxu3 }
 0x28c   : > { %14551 = vst [vmem:[#allocation121_spill] sm:$0xff] %v11719_v60  ;;  %v1188_v54 = vpop.f32.mrf.mxu0  ;;  %v1341_v58 = vpop.f32.mrf.mxu1 }
 0x28d   : > { %14552 = vst [vmem:[#allocation122_spill] sm:$0xff] %v11721_v19  ;;  %v10700_v19 = vld [vmem:[#allocation4 + $0xfc] sm:$0xf] }
 0x293   : > { %v1480_v26 = vpop.f32.mrf.mxu2  ;;  %v1617_v27 = vpop.f32.mrf.mxu3 }
 0x294   : > { %v11723_v13 = vpop.f32.mrf.mxu0  ;;  %v11725_v35 = vpop.f32.mrf.mxu1 }
 0x295   : > { %14553 = vst [vmem:[#allocation123_spill] sm:$0xff] %v11723_v13  ;;  %v11147_v13 = vld [vmem:[#allocation2 + $0x38] sm:$0xff] }
 0x296   : > { %14554 = vst [vmem:[#allocation124_spill] sm:$0xff] %v11725_v35  ;;  %v10642_v35 = vld [vmem:[#allocation2 + $0x28] sm:$0xff] }
 0x297   : > { %1661 = vmatmul.bf16.gmra.mxu0 %v11146_v63  ;;  %1814 = vmatmul.bf16.gmra.mxu1 %v11146_v63 }
 0x298   : > { %2399 = vmatmul.bf16.gmra.mxu2 %v10641_v48  ;;  %2552 = vmatmul.bf16.gmra.mxu3 %v10641_v48 }
 0x29b   : > { %v1482_v21 = vpop.f32.mrf.mxu2  ;;  %v1619_v30 = vpop.f32.mrf.mxu3 }
 0x29c   : > { %v11727_v55 = vpop.f32.mrf.mxu0  ;;  %v11729_v60 = vpop.f32.mrf.mxu1 }
 0x29d   : > { %14555 = vst [vmem:[#allocation125_spill] sm:$0xff] %v11727_v55 }
 0x29e   : > { %14556 = vst [vmem:[#allocation126_spill] sm:$0xff] %v11729_v60 }
 0x2a3   : > { %v11731_v54 = vpop.f32.mrf.mxu2  ;;  %v11733_v58 = vpop.f32.mrf.mxu3 }
 0x2a4   : > { %14557 = vst [vmem:[#allocation127_spill] sm:$0xff] %v11731_v54  ;;  %v11735_v26 = vpop.f32.mrf.mxu0  ;;  %v11737_v27 = vpop.f32.mrf.mxu1 }
 0x2a5   : > { %14558 = vst [vmem:[#allocation128_spill] sm:$0xff] %v11733_v58 }
 0x2a6   : > { %14559 = vst [vmem:[#allocation129_spill] sm:$0xff] %v11735_v26  ;;  %v10643_v26 = vld [vmem:[#allocation2 + $0x30] sm:$0xff] }
 0x2a7   : > { %14560 = vst [vmem:[#allocation130_spill] sm:$0xff] %v11737_v27  ;;  %1665 = vmatmul.bf16.gmra.mxu0 %v11147_v13  ;;  %1818 = vmatmul.bf16.gmra.mxu1 %v11147_v13  ;;  %v11148_v27 = vld [vmem:[#allocation2 + $0x40] sm:$0xff]  ;;  %v9227_v13 = vld [vmem:[#allocation4 + $0xf8] sm:$0xf] }
 0x2a8   : > { %2404 = vmatmul.bf16.gmra.mxu2 %v10642_v35  ;;  %2557 = vmatmul.bf16.gmra.mxu3 %v10642_v35  ;;  %v10703_v35 = vld [vmem:[#allocation4 + $0x10c] sm:$0xf0] }
 0x2ab   : > { %v11739_v48 = vpop.f32.mrf.mxu2  ;;  %v11741_v63 = vpop.f32.mrf.mxu3 }
 0x2ac   : > { %14561 = vst [vmem:[#allocation131_spill] sm:$0xff] %v11739_v48  ;;  %v1197_v21 = vpop.f32.mrf.mxu0  ;;  %v1350_v30 = vpop.f32.mrf.mxu1  ;;  %v9228_v48 = vor.u32 %v10703_v35, %v9227_v13  ;;  %v11149_v13 = vld [vmem:[#allocation2 + $0x48] sm:$0xff] }
 0x2ad   : > { %14562 = vst [vmem:[#allocation132_spill] sm:$0xff] %v11741_v63  ;;  %v9232_v63 = vor.u32 %v10700_v19, %v9229_v59 }
 0x2ae   : > { %2681 = vmatpush.bf16.msra.mxu0 %v9228_v48 }
 0x2af   : > { %2818 = vmatpush.bf16.msra.mxu1 %v9232_v63 }
 0x2b3   : > { %v1488_v60 = vpop.f32.mrf.mxu2  ;;  %v1625_v54 = vpop.f32.mrf.mxu3  ;;  %2819 = vmatpush.bf16.msra.mxu1 %v9208_v31 }
 0x2b4   : > { %v11743_v55 = vpop.f32.mrf.mxu0  ;;  %v11745_v58 = vpop.f32.mrf.mxu1 }
 0x2b5   : > { %14563 = vst [vmem:[#allocation133_spill] sm:$0xff] %v11743_v55 }
 0x2b6   : > { %14564 = vst [vmem:[#allocation134_spill] sm:$0xff] %v11745_v58 }
 0x2b7   : > { %1670 = vmatmul.bf16.gmra.mxu0 %v11148_v27  ;;  %1823 = vmatmul.bf16.gmra.mxu1 %v11148_v27 }
 0x2b8   : > { %2408 = vmatmul.bf16.gmra.mxu2 %v10643_v26  ;;  %2561 = vmatmul.bf16.gmra.mxu3 %v10643_v26 }
 0x2b9   : > { %2820 = vmatpush.bf16.msra.mxu1 %v9184_v36 }
 0x2bb   : > { %v1490_v21 = vpop.f32.mrf.mxu2  ;;  %v1627_v30 = vpop.f32.mrf.mxu3 }
 0x2bc   : > { %v11747_v60 = vpop.f32.mrf.mxu0  ;;  %v11749_v54 = vpop.f32.mrf.mxu1 }
 0x2bd   : > { %14565 = vst [vmem:[#allocation135_spill] sm:$0xff] %v11747_v60  ;;  %v10646_v60 = vld [vmem:[#allocation2 + $0x48] sm:$0xff] }
 0x2be   : > { %14566 = vst [vmem:[#allocation136_spill] sm:$0xff] %v11749_v54 }
 0x2c3   : > { %v11751_v58 = vpop.f32.mrf.mxu2  ;;  %v11753_v55 = vpop.f32.mrf.mxu3 }
 0x2c4   : > { %14567 = vst [vmem:[#allocation137_spill] sm:$0xff] %v11751_v58  ;;  %v11755_v27 = vpop.f32.mrf.mxu0  ;;  %v11757_v26 = vpop.f32.mrf.mxu1  ;;  %v10645_v58 = vld [vmem:[#allocation2 + $0x40] sm:$0xff] }
 0x2c5   : > { %14568 = vst [vmem:[#allocation138_spill] sm:$0xff] %v11753_v55 }
 0x2c6   : > { %14569 = vst [vmem:[#allocation139_spill] sm:$0xff] %v11755_v27  ;;  %v11150_v27 = vld [vmem:[#allocation2 + $0x50] sm:$0xff] }
 0x2c7   : > { %14570 = vst [vmem:[#allocation140_spill] sm:$0xff] %v11757_v26  ;;  %1674 = vmatmul.bf16.gmra.mxu0 %v11149_v13  ;;  %1827 = vmatmul.bf16.gmra.mxu1 %v11149_v13 }
 0x2c8   : > { %2413 = vmatmul.bf16.gmra.mxu2 %v10644_v18  ;;  %2566 = vmatmul.bf16.gmra.mxu3 %v10644_v18 }
 0x2cb   : > { %v11759_v59 = vpop.f32.mrf.mxu2  ;;  %v11761_v19 = vpop.f32.mrf.mxu3 }
 0x2cc   : > { %14571 = vst [vmem:[#allocation141_spill] sm:$0xff] %v11759_v59  ;;  %v1206_v48 = vpop.f32.mrf.mxu0  ;;  %v1359_v63 = vpop.f32.mrf.mxu1 }
 0x2cd   : > { %14572 = vst [vmem:[#allocation142_spill] sm:$0xff] %v11761_v19  ;;  %v9283_v48 = vld [vmem:[#allocation4 + $0x160] sm:$0xf]  ;;  %v10716_v63 = vld [vmem:[#allocation4 + $0x174] sm:$0xf0] }
 0x2d3   : > { %v1496_v35 = vpop.f32.mrf.mxu2  ;;  %v1633_v21 = vpop.f32.mrf.mxu3 }
 0x2d4   : > { %v1644_v30 = vpop.f32.mrf.mxu0  ;;  %v1797_v55 = vpop.f32.mrf.mxu1  ;;  %v10713_v35 = vld [vmem:[#allocation4 + $0x164] sm:$0xf]  ;;  %v9284_v21 = vor.u32 %v10716_v63, %v9283_v48 }
 0x2d5   : > { %v9285_v30 = vld [vmem:[#allocation4 + $0x178] sm:$0xf0] }
 0x2d6   : > { %v9288_v55 = vor.u32 %v10713_v35, %v9285_v30  ;;  %2953 = vmatpush.bf16.msra.mxu2 %v9284_v21 }
 0x2d7   : > { %1679 = vmatmul.bf16.gmra.mxu0 %v11150_v27  ;;  %1832 = vmatmul.bf16.gmra.mxu1 %v11150_v27 }
 0x2d8   : > { %2417 = vmatmul.bf16.gmra.mxu2 %v10645_v58  ;;  %2570 = vmatmul.bf16.gmra.mxu3 %v10645_v58 }
 0x2d9   : > { %3106 = vmatpush.bf16.msra.mxu3 %v9288_v55 }
 0x2db   : > { %v11763_v26 = vpop.f32.mrf.mxu2  ;;  %v11765_v13 = vpop.f32.mrf.mxu3 }
 0x2dc   : > { %v11767_v18 = vpop.f32.mrf.mxu0  ;;  %v11769_v59 = vpop.f32.mrf.mxu1 }
 0x2dd   : > { %14573 = vst [vmem:[#allocation143_spill] sm:$0xff] %v11767_v18  ;;  %v11151_v18 = vld [vmem:[#allocation2 + $0x58] sm:$0xff] }
 0x2de   : > { %14574 = vst [vmem:[#allocation144_spill] sm:$0xff] %v11769_v59 }
 0x2e3   : > { %v11771_v19 = vpop.f32.mrf.mxu2  ;;  %v11773_v27 = vpop.f32.mrf.mxu3 }
 0x2e4   : > { %v11775_v58 = vpop.f32.mrf.mxu0  ;;  %v11777_v54 = vpop.f32.mrf.mxu1 }
 0x2e5   : > { %14575 = vst [vmem:[#allocation145_spill] sm:$0xff] %v11775_v58 }
 0x2e6   : > { %14576 = vst [vmem:[#allocation146_spill] sm:$0xff] %v11777_v54  ;;  %v11152_v54 = vld [vmem:[#allocation2 + $0x60] sm:$0xff] }
 0x2e7   : > { %1683 = vmatmul.bf16.gmra.mxu0 %v11151_v18  ;;  %1836 = vmatmul.bf16.gmra.mxu1 %v11151_v18  ;;  %v9203_v18 = vld [vmem:[#allocation4 + $0xc8] sm:$0xf] }
 0x2e8   : > { %2422 = vmatmul.bf16.gmra.mxu2 %v10646_v60  ;;  %2575 = vmatmul.bf16.gmra.mxu3 %v10646_v60  ;;  %v10697_v60 = vld [vmem:[#allocation4 + $0xdc] sm:$0xf0] }
 0x2e9   : > { %v9204_v20 = vor.u32 %v10697_v60, %v9203_v18  ;;  %v10648_v18 = vld [vmem:[#allocation2 + $0x58] sm:$0xff] }
 0x2eb   : > { %v11779_v59 = vpop.f32.mrf.mxu2  ;;  %v11781_v48 = vpop.f32.mrf.mxu3  ;;  %2682 = vmatpush.bf16.msra.mxu0 %v9204_v20 }
 0x2ec   : > { %v11783_v63 = vpop.f32.mrf.mxu0  ;;  %v11785_v35 = vpop.f32.mrf.mxu1 }
 0x2ed   : > { %14577 = vst [vmem:[#allocation147_spill] sm:$0xff] %v11783_v63 }
 0x2ee   : > { %14578 = vst [vmem:[#allocation148_spill] sm:$0xff] %v11785_v35 }
 0x2f3   : > { %v2389_v21 = vpop.f32.mrf.mxu2  ;;  %v2542_v30 = vpop.f32.mrf.mxu3 }
 0x2f4   : > { %v1653_v55 = vpop.f32.mrf.mxu0  ;;  %v1806_v58 = vpop.f32.mrf.mxu1 }
 0x2f7   : > { %1688 = vmatmul.bf16.gmra.mxu0 %v11152_v54  ;;  %1841 = vmatmul.bf16.gmra.mxu1 %v11152_v54 }
 0x2f8   : > { %2426 = vmatmul.bf16.gmra.mxu2 %v10647_v33  ;;  %2579 = vmatmul.bf16.gmra.mxu3 %v10647_v33 }
 0x2fb   : > { %v11787_v23 = vpop.f32.mrf.mxu2  ;;  %v11789_v63 = vpop.f32.mrf.mxu3 }
 0x2fc   : > { %v11791_v21 = vpop.f32.mrf.mxu0  ;;  %v11793_v58 = vpop.f32.mrf.mxu1 }
 0x2fd   : > { %14579 = vst [vmem:[#allocation149_spill] sm:$0xff] %v11791_v21 }
 0x2fe   : > { %14580 = vst [vmem:[#allocation150_spill] sm:$0xff] %v11793_v58 }
 0x303   : > { %v11795_v30 = vpop.f32.mrf.mxu2  ;;  %v11797_v54 = vpop.f32.mrf.mxu3 }
 0x304   : > { %v11799_v33 = vpop.f32.mrf.mxu0  ;;  %v11801_v55 = vpop.f32.mrf.mxu1 }
 0x305   : > { %14581 = vst [vmem:[#allocation151_spill] sm:$0xff] %v11799_v33 }
 0x306   : > { %14582 = vst [vmem:[#allocation152_spill] sm:$0xff] %v11801_v55  ;;  %v11154_v55 = vld [vmem:[#allocation2 + $0x70] sm:$0xff] }
 0x307   : > { %1692 = vmatmul.bf16.gmra.mxu0 %v11153_v32  ;;  %1845 = vmatmul.bf16.gmra.mxu1 %v11153_v32 }
 0x308   : > { %2431 = vmatmul.bf16.gmra.mxu2 %v10648_v18  ;;  %2584 = vmatmul.bf16.gmra.mxu3 %v10648_v18 }
 0x30b   : > { %v11803_v34 = vpop.f32.mrf.mxu2  ;;  %v11805_v20 = vpop.f32.mrf.mxu3 }
 0x30c   : > { %v11807_v60 = vpop.f32.mrf.mxu0  ;;  %v11809_v31 = vpop.f32.mrf.mxu1 }
 0x30d   : > { %14583 = vst [vmem:[#allocation153_spill] sm:$0xff] %v11807_v60  ;;  %v9259_v60 = vld [vmem:[#allocation4 + $0x130] sm:$0xf] }
 0x30e   : > { %14584 = vst [vmem:[#allocation154_spill] sm:$0xff] %v11809_v31  ;;  %v10710_v31 = vld [vmem:[#allocation4 + $0x144] sm:$0xf0] }
 0x313   : > { %v2398_v58 = vpop.f32.mrf.mxu2  ;;  %v2551_v21 = vpop.f32.mrf.mxu3 }
 0x314   : > { %v1662_v35 = vpop.f32.mrf.mxu0  ;;  %v1815_v33 = vpop.f32.mrf.mxu1  ;;  %v10707_v58 = vld [vmem:[#allocation4 + $0x134] sm:$0xf]  ;;  %v9260_v21 = vor.u32 %v10710_v31, %v9259_v60 }
 0x315   : > { %v9261_v35 = vld [vmem:[#allocation4 + $0x148] sm:$0xf0] }
 0x316   : > { %v9264_v33 = vor.u32 %v10707_v58, %v9261_v35  ;;  %2954 = vmatpush.bf16.msra.mxu2 %v9260_v21 }
 0x317   : > { %1697 = vmatmul.bf16.gmra.mxu0 %v11154_v55  ;;  %1850 = vmatmul.bf16.gmra.mxu1 %v11154_v55 }
 0x318   : > { %2435 = vmatmul.bf16.gmra.mxu2 %v10649_v22  ;;  %2588 = vmatmul.bf16.gmra.mxu3 %v10649_v22 }
 0x319   : > { %3107 = vmatpush.bf16.msra.mxu3 %v9264_v33 }
 0x31b   : > { %v11811_v32 = vpop.f32.mrf.mxu2  ;;  %v11813_v18 = vpop.f32.mrf.mxu3 }
 0x31c   : > { %v11815_v4 = vpop.f32.mrf.mxu0  ;;  %v11817_v3 = vpop.f32.mrf.mxu1 }
 0x31d   : > { %14585 = vst [vmem:[#allocation155_spill] sm:$0xff] %v11815_v4  ;;  %v11155_v4 = vld [vmem:[#allocation2 + $0x78] sm:$0xff] }
 0x31e   : > { %14586 = vst [vmem:[#allocation156_spill] sm:$0xff] %v11817_v3 }
 0x323   : > { %v11819_v52 = vpop.f32.mrf.mxu2  ;;  %v11821_v55 = vpop.f32.mrf.mxu3 }
 0x324   : > { %14587 = vst [vmem:[#allocation157_spill] sm:$0xff] %v11821_v55  ;;  %v11823_v22 = vpop.f32.mrf.mxu0  ;;  %v11825_v51 = vpop.f32.mrf.mxu1  ;;  %v11204_v55 = vld [vmem:[#allocation2 + $0xf0] sm:$0xff] }
 0x325   : > { %14588 = vst [vmem:[#allocation158_spill] sm:$0xff] %v11823_v22 }
 0x326   : > { %14589 = vst [vmem:[#allocation159_spill] sm:$0xff] %v11825_v51  ;;  %v11156_v51 = vld [vmem:[#allocation2 + $0x80] sm:$0xff] }
 0x327   : > { %1701 = vmatmul.bf16.gmra.mxu0 %v11155_v4  ;;  %1854 = vmatmul.bf16.gmra.mxu1 %v11155_v4  ;;  %v9179_v4 = vld [vmem:[#allocation4 + $0x98] sm:$0xf] }
 0x328   : > { %2440 = vmatmul.bf16.gmra.mxu2 %v10650_v50  ;;  %2593 = vmatmul.bf16.gmra.mxu3 %v10650_v50  ;;  %v10691_v50 = vld [vmem:[#allocation4 + $0xac] sm:$0xf0] }
 0x329   : > { %v9180_v42 = vor.u32 %v10691_v50, %v9179_v4  ;;  %v10652_v4 = vld [vmem:[#allocation2 + $0x78] sm:$0xff] }
 0x32b   : > { %v11827_v3 = vpop.f32.mrf.mxu2  ;;  %v11829_v60 = vpop.f32.mrf.mxu3  ;;  %2683 = vmatpush.bf16.msra.mxu0 %v9180_v42 }
 0x32c   : > { %14590 = vst [vmem:[#allocation160_spill] sm:$0xff] %v11827_v3  ;;  %v11831_v31 = vpop.f32.mrf.mxu0  ;;  %v11833_v58 = vpop.f32.mrf.mxu1  ;;  %v10869_v3 = vld [vmem:[#allocation4 + $0x43c] sm:$0xf0] }
 0x32d   : > { %14591 = vst [vmem:[#allocation161_spill] sm:$0xff] %v11829_v60  ;;  %v11185_v60 = vld [vmem:[#allocation2 + $0x58] sm:$0xff] }
 0x32e   : > { %14592 = vst [vmem:[#allocation162_spill] sm:$0xff] %v11831_v31 }
 0x32f   : > { %14593 = vst [vmem:[#allocation163_spill] sm:$0xff] %v11833_v58 }
 0x333   : > { %v2407_v21 = vpop.f32.mrf.mxu2  ;;  %v2560_v35 = vpop.f32.mrf.mxu3 }
 0x334   : > { %v1671_v33 = vpop.f32.mrf.mxu0  ;;  %v1824_v22 = vpop.f32.mrf.mxu1 }
 0x337   : > { %1706 = vmatmul.bf16.gmra.mxu0 %v11156_v51  ;;  %1859 = vmatmul.bf16.gmra.mxu1 %v11156_v51 }
 0x338   : > { %2444 = vmatmul.bf16.gmra.mxu2 %v10651_v49  ;;  %2597 = vmatmul.bf16.gmra.mxu3 %v10651_v49 }
 0x33b   : > { %v11835_v25 = vpop.f32.mrf.mxu2  ;;  %v11837_v31 = vpop.f32.mrf.mxu3 }
 0x33c   : > { %14594 = vst [vmem:[#allocation164_spill] sm:$0xff] %v11835_v25  ;;  %v11839_v21 = vpop.f32.mrf.mxu0  ;;  %v11841_v22 = vpop.f32.mrf.mxu1 }
 0x33d   : > { %14595 = vst [vmem:[#allocation165_spill] sm:$0xff] %v11837_v31  ;;  %v9157_v31 = vld [vmem:[#allocation4 + $0x80] sm:$0xf0] }
 0x33e   : > { %14596 = vst [vmem:[#allocation166_spill] sm:$0xff] %v11839_v21 }
 0x33f   : > { %14597 = vst [vmem:[#allocation167_spill] sm:$0xff] %v11841_v22 }
 0x343   : > { %v11843_v35 = vpop.f32.mrf.mxu2  ;;  %v11845_v51 = vpop.f32.mrf.mxu3 }
 0x344   : > { %14598 = vst [vmem:[#allocation168_spill] sm:$0xff] %v11843_v35  ;;  %v11847_v49 = vpop.f32.mrf.mxu0  ;;  %v11849_v33 = vpop.f32.mrf.mxu1 }
 0x345   : > { %14599 = vst [vmem:[#allocation169_spill] sm:$0xff] %v11845_v51  ;;  %v10653_v51 = vld [vmem:[#allocation2 + $0x80] sm:$0xff] }
 0x346   : > { %14600 = vst [vmem:[#allocation170_spill] sm:$0xff] %v11847_v49 }
 0x347   : > { %14601 = vst [vmem:[#allocation171_spill] sm:$0xff] %v11849_v33  ;;  %1710 = vmatmul.bf16.gmra.mxu0 %v11157_v37  ;;  %1863 = vmatmul.bf16.gmra.mxu1 %v11157_v37  ;;  %v11158_v33 = vld [vmem:[#allocation2 + $0x90] sm:$0xff] }
 0x348   : > { %2449 = vmatmul.bf16.gmra.mxu2 %v10652_v4  ;;  %2602 = vmatmul.bf16.gmra.mxu3 %v10652_v4 }
 0x34b   : > { %v11851_v42 = vpop.f32.mrf.mxu2  ;;  %v11853_v47 = vpop.f32.mrf.mxu3 }
 0x34c   : > { %14602 = vst [vmem:[#allocation172_spill] sm:$0xff] %v11851_v42  ;;  %v11855_v50 = vpop.f32.mrf.mxu0  ;;  %v11857_v36 = vpop.f32.mrf.mxu1 }
 0x34d   : > { %14603 = vst [vmem:[#allocation173_spill] sm:$0xff] %v11853_v47 }
 0x34e   : > { %14604 = vst [vmem:[#allocation174_spill] sm:$0xff] %v11855_v50  ;;  %v9235_v50 = vld [vmem:[#allocation4 + $0x100] sm:$0xf] }
 0x34f   : > { %14605 = vst [vmem:[#allocation175_spill] sm:$0xff] %v11857_v36  ;;  %v10704_v36 = vld [vmem:[#allocation4 + $0x114] sm:$0xf0] }
 0x353   : > { %v2416_v22 = vpop.f32.mrf.mxu2  ;;  %v2569_v21 = vpop.f32.mrf.mxu3 }
 0x354   : > { %v1680_v58 = vpop.f32.mrf.mxu0  ;;  %v1833_v49 = vpop.f32.mrf.mxu1  ;;  %v10701_v22 = vld [vmem:[#allocation4 + $0x104] sm:$0xf]  ;;  %v9236_v21 = vor.u32 %v10704_v36, %v9235_v50 }
 0x355   : > { %v9237_v58 = vld [vmem:[#allocation4 + $0x118] sm:$0xf0] }
 0x356   : > { %v9240_v49 = vor.u32 %v10701_v22, %v9237_v58  ;;  %2955 = vmatpush.bf16.msra.mxu2 %v9236_v21 }
 0x357   : > { %1715 = vmatmul.bf16.gmra.mxu0 %v11158_v33  ;;  %1868 = vmatmul.bf16.gmra.mxu1 %v11158_v33 }
 0x358   : > { %2453 = vmatmul.bf16.gmra.mxu2 %v10653_v51  ;;  %2606 = vmatmul.bf16.gmra.mxu3 %v10653_v51 }
 0x359   : > { %3108 = vmatpush.bf16.msra.mxu3 %v9240_v49 }
 0x35b   : > { %v11859_v37 = vpop.f32.mrf.mxu2  ;;  %v11861_v4 = vpop.f32.mrf.mxu3 }
 0x35c   : > { %14606 = vst [vmem:[#allocation176_spill] sm:$0xff] %v11859_v37  ;;  %v11863_v42 = vpop.f32.mrf.mxu0  ;;  %v11865_v47 = vpop.f32.mrf.mxu1 }
 0x35d   : > { %14607 = vst [vmem:[#allocation177_spill] sm:$0xff] %v11861_v4  ;;  %v10654_v4 = vld [vmem:[#allocation2 + $0x88] sm:$0xff] }
 0x35e   : > { %14608 = vst [vmem:[#allocation178_spill] sm:$0xff] %v11863_v42  ;;  %v11159_v42 = vld [vmem:[#allocation2 + $0x98] sm:$0xff] }
 0x35f   : > { %14609 = vst [vmem:[#allocation179_spill] sm:$0xff] %v11865_v47 }
 0x363   : > { %v11867_v35 = vpop.f32.mrf.mxu2  ;;  %v11869_v33 = vpop.f32.mrf.mxu3 }
 0x364   : > { %14610 = vst [vmem:[#allocation180_spill] sm:$0xff] %v11867_v35  ;;  %v11871_v51 = vpop.f32.mrf.mxu0  ;;  %v11873_v37 = vpop.f32.mrf.mxu1  ;;  %v10682_v35 = vld [vmem:[#allocation4 + $0x6c] sm:$0xf] }
 0x365   : > { %14611 = vst [vmem:[#allocation181_spill] sm:$0xff] %v11869_v33  ;;  %v10655_v33 = vld [vmem:[#allocation2 + $0x90] sm:$0xff] }
 0x366   : > { %14612 = vst [vmem:[#allocation182_spill] sm:$0xff] %v11871_v51 }
 0x367   : > { %14613 = vst [vmem:[#allocation183_spill] sm:$0xff] %v11873_v37  ;;  %1719 = vmatmul.bf16.gmra.mxu0 %v11159_v42  ;;  %1872 = vmatmul.bf16.gmra.mxu1 %v11159_v42  ;;  %v11160_v37 = vld [vmem:[#allocation2 + $0xa0] sm:$0xff]  ;;  %v9155_v42 = vld [vmem:[#allocation4 + $0x68] sm:$0xf] }
 0x368   : > { %2458 = vmatmul.bf16.gmra.mxu2 %v10654_v4  ;;  %2611 = vmatmul.bf16.gmra.mxu3 %v10654_v4  ;;  %v10685_v4 = vld [vmem:[#allocation4 + $0x7c] sm:$0xf0] }
 0x36b   : > { %v11875_v47 = vpop.f32.mrf.mxu2  ;;  %v11877_v50 = vpop.f32.mrf.mxu3 }
 0x36c   : > { %14614 = vst [vmem:[#allocation184_spill] sm:$0xff] %v11875_v47  ;;  %v11879_v36 = vpop.f32.mrf.mxu0  ;;  %v11881_v22 = vpop.f32.mrf.mxu1  ;;  %v9156_v47 = vor.u32 %v10685_v4, %v9155_v42  ;;  %v10656_v42 = vld [vmem:[#allocation2 + $0x98] sm:$0xff] }
 0x36d   : > { %14615 = vst [vmem:[#allocation185_spill] sm:$0xff] %v11877_v50  ;;  %v9160_v50 = vor.u32 %v10682_v35, %v9157_v31  ;;  %v11161_v31 = vld [vmem:[#allocation2 + $0xa8] sm:$0xff] }
 0x36e   : > { %14616 = vst [vmem:[#allocation186_spill] sm:$0xff] %v11879_v36  ;;  %2684 = vmatpush.bf16.msra.mxu0 %v9156_v47 }
 0x36f   : > { %14617 = vst [vmem:[#allocation187_spill] sm:$0xff] %v11881_v22  ;;  %2821 = vmatpush.bf16.msra.mxu1 %v9160_v50 }
 0x373   : > { %v2425_v21 = vpop.f32.mrf.mxu2  ;;  %v2578_v58 = vpop.f32.mrf.mxu3 }
 0x374   : > { %v1689_v49 = vpop.f32.mrf.mxu0  ;;  %v1842_v51 = vpop.f32.mrf.mxu1 }
 0x377   : > { %1724 = vmatmul.bf16.gmra.mxu0 %v11160_v37  ;;  %1877 = vmatmul.bf16.gmra.mxu1 %v11160_v37 }
 0x378   : > { %2462 = vmatmul.bf16.gmra.mxu2 %v10655_v33  ;;  %2615 = vmatmul.bf16.gmra.mxu3 %v10655_v33 }
 0x37b   : > { %v11883_v25 = vpop.f32.mrf.mxu2  ;;  %v11885_v36 = vpop.f32.mrf.mxu3 }
 0x37c   : > { %14618 = vst [vmem:[#allocation188_spill] sm:$0xff] %v11883_v25  ;;  %v11887_v21 = vpop.f32.mrf.mxu0  ;;  %v11889_v51 = vpop.f32.mrf.mxu1 }
 0x37d   : > { %14619 = vst [vmem:[#allocation189_spill] sm:$0xff] %v11885_v36  ;;  %v9133_v36 = vld [vmem:[#allocation4 + $0x50] sm:$0xf0] }
 0x37e   : > { %14620 = vst [vmem:[#allocation190_spill] sm:$0xff] %v11887_v21 }
 0x37f   : > { %14621 = vst [vmem:[#allocation191_spill] sm:$0xff] %v11889_v51 }
 0x383   : > { %v11891_v58 = vpop.f32.mrf.mxu2  ;;  %v11893_v37 = vpop.f32.mrf.mxu3 }
 0x384   : > { %14622 = vst [vmem:[#allocation192_spill] sm:$0xff] %v11891_v58  ;;  %v11895_v33 = vpop.f32.mrf.mxu0  ;;  %v11897_v49 = vpop.f32.mrf.mxu1 }
 0x385   : > { %14623 = vst [vmem:[#allocation193_spill] sm:$0xff] %v11893_v37  ;;  %v10657_v37 = vld [vmem:[#allocation2 + $0xa0] sm:$0xff] }
 0x386   : > { %14624 = vst [vmem:[#allocation194_spill] sm:$0xff] %v11895_v33 }
 0x387   : > { %14625 = vst [vmem:[#allocation195_spill] sm:$0xff] %v11897_v49  ;;  %1728 = vmatmul.bf16.gmra.mxu0 %v11161_v31  ;;  %1881 = vmatmul.bf16.gmra.mxu1 %v11161_v31  ;;  %v11162_v49 = vld [vmem:[#allocation2 + $0xb0] sm:$0xff] }
 0x388   : > { %2467 = vmatmul.bf16.gmra.mxu2 %v10656_v42  ;;  %2620 = vmatmul.bf16.gmra.mxu3 %v10656_v42 }
 0x38b   : > { %v11899_v35 = vpop.f32.mrf.mxu2  ;;  %v11901_v47 = vpop.f32.mrf.mxu3 }
 0x38c   : > { %14626 = vst [vmem:[#allocation196_spill] sm:$0xff] %v11899_v35  ;;  %v11903_v4 = vpop.f32.mrf.mxu0  ;;  %v11905_v50 = vpop.f32.mrf.mxu1 }
 0x38d   : > { %14627 = vst [vmem:[#allocation197_spill] sm:$0xff] %v11901_v47 }
 0x38e   : > { %14628 = vst [vmem:[#allocation198_spill] sm:$0xff] %v11903_v4  ;;  %v9211_v4 = vld [vmem:[#allocation4 + $0xd0] sm:$0xf] }
 0x38f   : > { %14629 = vst [vmem:[#allocation199_spill] sm:$0xff] %v11905_v50  ;;  %v10698_v50 = vld [vmem:[#allocation4 + $0xe4] sm:$0xf0] }
 0x393   : > { %v2434_v51 = vpop.f32.mrf.mxu2  ;;  %v2587_v21 = vpop.f32.mrf.mxu3 }
 0x394   : > { %v1698_v22 = vpop.f32.mrf.mxu0  ;;  %v1851_v33 = vpop.f32.mrf.mxu1  ;;  %v10695_v51 = vld [vmem:[#allocation4 + $0xd4] sm:$0xf]  ;;  %v9212_v21 = vor.u32 %v10698_v50, %v9211_v4 }
 0x395   : > { %v9213_v22 = vld [vmem:[#allocation4 + $0xe8] sm:$0xf0] }
 0x396   : > { %v9216_v33 = vor.u32 %v10695_v51, %v9213_v22  ;;  %2956 = vmatpush.bf16.msra.mxu2 %v9212_v21 }
 0x397   : > { %1733 = vmatmul.bf16.gmra.mxu0 %v11162_v49  ;;  %1886 = vmatmul.bf16.gmra.mxu1 %v11162_v49 }
 0x398   : > { %2471 = vmatmul.bf16.gmra.mxu2 %v10657_v37  ;;  %2624 = vmatmul.bf16.gmra.mxu3 %v10657_v37 }
 0x399   : > { %3109 = vmatpush.bf16.msra.mxu3 %v9216_v33 }
 0x39b   : > { %v11907_v31 = vpop.f32.mrf.mxu2  ;;  %v11909_v42 = vpop.f32.mrf.mxu3 }
 0x39c   : > { %14630 = vst [vmem:[#allocation200_spill] sm:$0xff] %v11907_v31  ;;  %v11911_v35 = vpop.f32.mrf.mxu0  ;;  %v11913_v47 = vpop.f32.mrf.mxu1 }
 0x39d   : > { %14631 = vst [vmem:[#allocation201_spill] sm:$0xff] %v11909_v42  ;;  %v10658_v42 = vld [vmem:[#allocation2 + $0xa8] sm:$0xff] }
 0x39e   : > { %14632 = vst [vmem:[#allocation202_spill] sm:$0xff] %v11911_v35  ;;  %v11163_v35 = vld [vmem:[#allocation2 + $0xb8] sm:$0xff] }
 0x39f   : > { %14633 = vst [vmem:[#allocation203_spill] sm:$0xff] %v11913_v47 }
 0x3a3   : > { %v11915_v58 = vpop.f32.mrf.mxu2  ;;  %v11917_v49 = vpop.f32.mrf.mxu3 }
 0x3a4   : > { %14634 = vst [vmem:[#allocation204_spill] sm:$0xff] %v11915_v58  ;;  %v11919_v37 = vpop.f32.mrf.mxu0  ;;  %v11921_v31 = vpop.f32.mrf.mxu1  ;;  %v10676_v58 = vld [vmem:[#allocation4 + $0x3c] sm:$0xf] }
 0x3a5   : > { %14635 = vst [vmem:[#allocation205_spill] sm:$0xff] %v11917_v49  ;;  %v10659_v49 = vld [vmem:[#allocation2 + $0xb0] sm:$0xff] }
 0x3a6   : > { %14636 = vst [vmem:[#allocation206_spill] sm:$0xff] %v11919_v37 }
 0x3a7   : > { %14637 = vst [vmem:[#allocation207_spill] sm:$0xff] %v11921_v31  ;;  %1737 = vmatmul.bf16.gmra.mxu0 %v11163_v35  ;;  %1890 = vmatmul.bf16.gmra.mxu1 %v11163_v35  ;;  %v11164_v31 = vld [vmem:[#allocation2 + $0xc0] sm:$0xff]  ;;  %v9131_v35 = vld [vmem:[#allocation4 + $0x38] sm:$0xf] }
 0x3a8   : > { %2476 = vmatmul.bf16.gmra.mxu2 %v10658_v42  ;;  %2629 = vmatmul.bf16.gmra.mxu3 %v10658_v42  ;;  %v10679_v42 = vld [vmem:[#allocation4 + $0x4c] sm:$0xf0] }
 0x3ab   : > { %v11923_v47 = vpop.f32.mrf.mxu2  ;;  %v11925_v4 = vpop.f32.mrf.mxu3 }
 0x3ac   : > { %14638 = vst [vmem:[#allocation208_spill] sm:$0xff] %v11923_v47  ;;  %v11927_v50 = vpop.f32.mrf.mxu0  ;;  %v11929_v51 = vpop.f32.mrf.mxu1  ;;  %v9132_v47 = vor.u32 %v10679_v42, %v9131_v35  ;;  %v10660_v35 = vld [vmem:[#allocation2 + $0xb8] sm:$0xff] }
 0x3ad   : > { %14639 = vst [vmem:[#allocation209_spill] sm:$0xff] %v11925_v4  ;;  %v9136_v4 = vor.u32 %v10676_v58, %v9133_v36  ;;  %v11165_v36 = vld [vmem:[#allocation2 + $0xc8] sm:$0xff] }
 0x3ae   : > { %14640 = vst [vmem:[#allocation210_spill] sm:$0xff] %v11927_v50  ;;  %2685 = vmatpush.bf16.msra.mxu0 %v9132_v47 }
 0x3af   : > { %14641 = vst [vmem:[#allocation211_spill] sm:$0xff] %v11929_v51  ;;  %2822 = vmatpush.bf16.msra.mxu1 %v9136_v4 }
 0x3b3   : > { %v2443_v21 = vpop.f32.mrf.mxu2  ;;  %v2596_v22 = vpop.f32.mrf.mxu3 }
 0x3b4   : > { %v1707_v33 = vpop.f32.mrf.mxu0  ;;  %v1860_v37 = vpop.f32.mrf.mxu1 }
 0x3b7   : > { %1742 = vmatmul.bf16.gmra.mxu0 %v11164_v31  ;;  %1895 = vmatmul.bf16.gmra.mxu1 %v11164_v31 }
 0x3b8   : > { %2480 = vmatmul.bf16.gmra.mxu2 %v10659_v49  ;;  %2633 = vmatmul.bf16.gmra.mxu3 %v10659_v49 }
 0x3bb   : > { %v11931_v25 = vpop.f32.mrf.mxu2  ;;  %v11933_v50 = vpop.f32.mrf.mxu3 }
 0x3bc   : > { %14642 = vst [vmem:[#allocation212_spill] sm:$0xff] %v11931_v25  ;;  %v11935_v21 = vpop.f32.mrf.mxu0  ;;  %v11937_v37 = vpop.f32.mrf.mxu1 }
 0x3bd   : > { %14643 = vst [vmem:[#allocation213_spill] sm:$0xff] %v11933_v50  ;;  %v9109_v50 = vld [vmem:[#allocation4 + $0x20] sm:$0xf0] }
 0x3be   : > { %14644 = vst [vmem:[#allocation214_spill] sm:$0xff] %v11935_v21 }
 0x3bf   : > { %14645 = vst [vmem:[#allocation215_spill] sm:$0xff] %v11937_v37 }
 0x3c3   : > { %v11939_v22 = vpop.f32.mrf.mxu2  ;;  %v11941_v31 = vpop.f32.mrf.mxu3 }
 0x3c4   : > { %14646 = vst [vmem:[#allocation216_spill] sm:$0xff] %v11939_v22  ;;  %v11943_v49 = vpop.f32.mrf.mxu0  ;;  %v11945_v33 = vpop.f32.mrf.mxu1 }
 0x3c5   : > { %14647 = vst [vmem:[#allocation217_spill] sm:$0xff] %v11941_v31  ;;  %v10661_v31 = vld [vmem:[#allocation2 + $0xc0] sm:$0xff] }
 0x3c6   : > { %14648 = vst [vmem:[#allocation218_spill] sm:$0xff] %v11943_v49 }
 0x3c7   : > { %14649 = vst [vmem:[#allocation219_spill] sm:$0xff] %v11945_v33  ;;  %1746 = vmatmul.bf16.gmra.mxu0 %v11165_v36  ;;  %1899 = vmatmul.bf16.gmra.mxu1 %v11165_v36  ;;  %v11166_v33 = vld [vmem:[#allocation2 + $0xd0] sm:$0xff] }
 0x3c8   : > { %2485 = vmatmul.bf16.gmra.mxu2 %v10660_v35  ;;  %2638 = vmatmul.bf16.gmra.mxu3 %v10660_v35 }
 0x3cb   : > { %v11947_v58 = vpop.f32.mrf.mxu2  ;;  %v11949_v47 = vpop.f32.mrf.mxu3 }
 0x3cc   : > { %14650 = vst [vmem:[#allocation220_spill] sm:$0xff] %v11947_v58  ;;  %v11951_v42 = vpop.f32.mrf.mxu0  ;;  %v11953_v4 = vpop.f32.mrf.mxu1 }
 0x3cd   : > { %14651 = vst [vmem:[#allocation221_spill] sm:$0xff] %v11949_v47 }
 0x3ce   : > { %14652 = vst [vmem:[#allocation222_spill] sm:$0xff] %v11951_v42  ;;  %v9187_v42 = vld [vmem:[#allocation4 + $0xa0] sm:$0xf] }
 0x3cf   : > { %14653 = vst [vmem:[#allocation223_spill] sm:$0xff] %v11953_v4  ;;  %v10692_v4 = vld [vmem:[#allocation4 + $0xb4] sm:$0xf0] }
 0x3d3   : > { %v2452_v37 = vpop.f32.mrf.mxu2  ;;  %v2605_v21 = vpop.f32.mrf.mxu3 }
 0x3d4   : > { %v1716_v51 = vpop.f32.mrf.mxu0  ;;  %v1869_v49 = vpop.f32.mrf.mxu1  ;;  %v10689_v37 = vld [vmem:[#allocation4 + $0xa4] sm:$0xf]  ;;  %v9188_v21 = vor.u32 %v10692_v4, %v9187_v42 }
 0x3d5   : > { %v9189_v51 = vld [vmem:[#allocation4 + $0xb8] sm:$0xf0] }
 0x3d6   : > { %v9192_v49 = vor.u32 %v10689_v37, %v9189_v51  ;;  %2957 = vmatpush.bf16.msra.mxu2 %v9188_v21 }
 0x3d7   : > { %1751 = vmatmul.bf16.gmra.mxu0 %v11166_v33  ;;  %1904 = vmatmul.bf16.gmra.mxu1 %v11166_v33 }
 0x3d8   : > { %2489 = vmatmul.bf16.gmra.mxu2 %v10661_v31  ;;  %2642 = vmatmul.bf16.gmra.mxu3 %v10661_v31 }
 0x3d9   : > { %3110 = vmatpush.bf16.msra.mxu3 %v9192_v49 }
 0x3db   : > { %v11955_v36 = vpop.f32.mrf.mxu2  ;;  %v11957_v35 = vpop.f32.mrf.mxu3 }
 0x3dc   : > { %14654 = vst [vmem:[#allocation224_spill] sm:$0xff] %v11955_v36  ;;  %v11959_v58 = vpop.f32.mrf.mxu0  ;;  %v11961_v47 = vpop.f32.mrf.mxu1 }
 0x3dd   : > { %14655 = vst [vmem:[#allocation225_spill] sm:$0xff] %v11957_v35  ;;  %v10662_v35 = vld [vmem:[#allocation2 + $0xc8] sm:$0xff] }
 0x3de   : > { %14656 = vst [vmem:[#allocation226_spill] sm:$0xff] %v11959_v58  ;;  %v11167_v58 = vld [vmem:[#allocation2 + $0xd8] sm:$0xff] }
 0x3df   : > { %14657 = vst [vmem:[#allocation227_spill] sm:$0xff] %v11961_v47 }
 0x3e3   : > { %v11963_v22 = vpop.f32.mrf.mxu2  ;;  %v11965_v33 = vpop.f32.mrf.mxu3 }
 0x3e4   : > { %14658 = vst [vmem:[#allocation228_spill] sm:$0xff] %v11963_v22  ;;  %v11967_v31 = vpop.f32.mrf.mxu0  ;;  %v11969_v36 = vpop.f32.mrf.mxu1  ;;  %v10670_v22 = vld [vmem:[#allocation4 + $0xc] sm:$0xf] }
 0x3e5   : > { %14659 = vst [vmem:[#allocation229_spill] sm:$0xff] %v11965_v33  ;;  %v10663_v33 = vld [vmem:[#allocation2 + $0xd0] sm:$0xff] }
 0x3e6   : > { %14660 = vst [vmem:[#allocation230_spill] sm:$0xff] %v11967_v31 }
 0x3e7   : > { %14661 = vst [vmem:[#allocation231_spill] sm:$0xff] %v11969_v36  ;;  %1755 = vmatmul.bf16.gmra.mxu0 %v11167_v58  ;;  %1908 = vmatmul.bf16.gmra.mxu1 %v11167_v58  ;;  %v11168_v36 = vld [vmem:[#allocation2 + $0xe0] sm:$0xff]  ;;  %v9107_v58 = vld [vmem:[#allocation4 + $0x8] sm:$0xf] }
 0x3e8   : > { %2494 = vmatmul.bf16.gmra.mxu2 %v10662_v35  ;;  %2647 = vmatmul.bf16.gmra.mxu3 %v10662_v35  ;;  %v10673_v35 = vld [vmem:[#allocation4 + $0x1c] sm:$0xf0] }
 0x3eb   : > { %v11971_v47 = vpop.f32.mrf.mxu2  ;;  %v11973_v42 = vpop.f32.mrf.mxu3 }
 0x3ec   : > { %14662 = vst [vmem:[#allocation232_spill] sm:$0xff] %v11971_v47  ;;  %v11975_v4 = vpop.f32.mrf.mxu0  ;;  %v11977_v37 = vpop.f32.mrf.mxu1  ;;  %v9108_v47 = vor.u32 %v10673_v35, %v9107_v58  ;;  %v10664_v58 = vld [vmem:[#allocation2 + $0xd8] sm:$0xff] }
 0x3ed   : > { %14663 = vst [vmem:[#allocation233_spill] sm:$0xff] %v11973_v42  ;;  %v9112_v42 = vor.u32 %v10670_v22, %v9109_v50  ;;  %v11169_v50 = vld [vmem:[#allocation2 + $0xe8] sm:$0xff] }
 0x3ee   : > { %14664 = vst [vmem:[#allocation234_spill] sm:$0xff] %v11975_v4  ;;  %2686 = vmatpush.bf16.msra.mxu0 %v9108_v47 }
 0x3ef   : > { %14665 = vst [vmem:[#allocation235_spill] sm:$0xff] %v11977_v37  ;;  %2823 = vmatpush.bf16.msra.mxu1 %v9112_v42 }
 0x3f3   : > { %v2461_v21 = vpop.f32.mrf.mxu2  ;;  %v2614_v51 = vpop.f32.mrf.mxu3 }
 0x3f4   : > { %v1725_v49 = vpop.f32.mrf.mxu0  ;;  %v1878_v31 = vpop.f32.mrf.mxu1 }
 0x3f7   : > { %1760 = vmatmul.bf16.gmra.mxu0 %v11168_v36  ;;  %1913 = vmatmul.bf16.gmra.mxu1 %v11168_v36 }
 0x3f8   : > { %2498 = vmatmul.bf16.gmra.mxu2 %v10663_v33  ;;  %2651 = vmatmul.bf16.gmra.mxu3 %v10663_v33 }
 0x3fb   : > { %v11979_v25 = vpop.f32.mrf.mxu2  ;;  %v11981_v4 = vpop.f32.mrf.mxu3 }
 0x3fc   : > { %14666 = vst [vmem:[#allocation236_spill] sm:$0xff] %v11979_v25  ;;  %v11983_v21 = vpop.f32.mrf.mxu0  ;;  %v11985_v31 = vpop.f32.mrf.mxu1 }
 0x3fd   : > { %14667 = vst [vmem:[#allocation237_spill] sm:$0xff] %v11981_v4  ;;  %v10671_v4 = vld [vmem:[#allocation4 + $0x14] sm:$0xf] }
 0x3fe   : > { %14668 = vst [vmem:[#allocation238_spill] sm:$0xff] %v11983_v21  ;;  %v9120_v16 = vor.u32 %v10671_v4, %v9117_v24 }
 0x3ff   : > { %14669 = vst [vmem:[#allocation239_spill] sm:$0xff] %v11985_v31 }
 0x403   : > { %v11987_v51 = vpop.f32.mrf.mxu2  ;;  %v11989_v36 = vpop.f32.mrf.mxu3 }
 0x404   : > { %14670 = vst [vmem:[#allocation240_spill] sm:$0xff] %v11987_v51  ;;  %v11991_v33 = vpop.f32.mrf.mxu0  ;;  %v11993_v49 = vpop.f32.mrf.mxu1 }
 0x405   : > { %14671 = vst [vmem:[#allocation241_spill] sm:$0xff] %v11989_v36  ;;  %v10665_v36 = vld [vmem:[#allocation2 + $0xe0] sm:$0xff] }
 0x406   : > { %14672 = vst [vmem:[#allocation242_spill] sm:$0xff] %v11991_v33 }
 0x407   : > { %14673 = vst [vmem:[#allocation243_spill] sm:$0xff] %v11993_v49  ;;  %1764 = vmatmul.bf16.gmra.mxu0 %v11169_v50  ;;  %1917 = vmatmul.bf16.gmra.mxu1 %v11169_v50  ;;  %v11170_v49 = vld [vmem:[#allocation2 + $0xf0] sm:$0xff] }
 0x408   : > { %2503 = vmatmul.bf16.gmra.mxu2 %v10664_v58  ;;  %2656 = vmatmul.bf16.gmra.mxu3 %v10664_v58 }
 0x40b   : > { %v11995_v22 = vpop.f32.mrf.mxu2  ;;  %v11997_v47 = vpop.f32.mrf.mxu3 }
 0x40c   : > { %14674 = vst [vmem:[#allocation244_spill] sm:$0xff] %v11995_v22  ;;  %v11999_v35 = vpop.f32.mrf.mxu0  ;;  %v12001_v42 = vpop.f32.mrf.mxu1 }
 0x40d   : > { %14675 = vst [vmem:[#allocation245_spill] sm:$0xff] %v11997_v47 }
 0x40e   : > { %14676 = vst [vmem:[#allocation246_spill] sm:$0xff] %v11999_v35  ;;  %v9163_v35 = vld [vmem:[#allocation4 + $0x70] sm:$0xf] }
 0x40f   : > { %14677 = vst [vmem:[#allocation247_spill] sm:$0xff] %v12001_v42  ;;  %v10686_v42 = vld [vmem:[#allocation4 + $0x84] sm:$0xf0] }
 0x413   : > { %v2470_v31 = vpop.f32.mrf.mxu2  ;;  %v2623_v21 = vpop.f32.mrf.mxu3 }
 0x414   : > { %v1734_v37 = vpop.f32.mrf.mxu0  ;;  %v1887_v33 = vpop.f32.mrf.mxu1  ;;  %v10683_v31 = vld [vmem:[#allocation4 + $0x74] sm:$0xf]  ;;  %v9164_v21 = vor.u32 %v10686_v42, %v9163_v35 }
 0x415   : > { %v9165_v37 = vld [vmem:[#allocation4 + $0x88] sm:$0xf0] }
 0x416   : > { %v9168_v33 = vor.u32 %v10683_v31, %v9165_v37  ;;  %2958 = vmatpush.bf16.msra.mxu2 %v9164_v21  ;;  %v9139_v21 = vld [vmem:[#allocation4 + $0x40] sm:$0xf]  ;;  %v10680_v37 = vld [vmem:[#allocation4 + $0x54] sm:$0xf0] }
 0x417   : > { %1769 = vmatmul.bf16.gmra.mxu0 %v11170_v49  ;;  %1922 = vmatmul.bf16.gmra.mxu1 %v11170_v49 }
 0x418   : > { %2507 = vmatmul.bf16.gmra.mxu2 %v10665_v36  ;;  %2660 = vmatmul.bf16.gmra.mxu3 %v10665_v36 }
 0x419   : > { %3111 = vmatpush.bf16.msra.mxu3 %v9168_v33  ;;  %v10677_v33 = vld [vmem:[#allocation4 + $0x44] sm:$0xf] }
 0x41b   : > { %v12003_v50 = vpop.f32.mrf.mxu2  ;;  %v12005_v58 = vpop.f32.mrf.mxu3 }
 0x41c   : > { %14678 = vst [vmem:[#allocation248_spill] sm:$0xff] %v12003_v50  ;;  %v12007_v22 = vpop.f32.mrf.mxu0  ;;  %v12009_v47 = vpop.f32.mrf.mxu1 }
 0x41d   : > { %14679 = vst [vmem:[#allocation249_spill] sm:$0xff] %v12005_v58  ;;  %v10666_v58 = vld [vmem:[#allocation2 + $0xe8] sm:$0xff] }
 0x41e   : > { %14680 = vst [vmem:[#allocation250_spill] sm:$0xff] %v12007_v22  ;;  %v11171_v22 = vld [vmem:[#allocation2 + $0xf8] sm:$0xff] }
 0x41f   : > { %14681 = vst [vmem:[#allocation251_spill] sm:$0xff] %v12009_v47 }
 0x423   : > { %v12011_v51 = vpop.f32.mrf.mxu2  ;;  %v12013_v49 = vpop.f32.mrf.mxu3 }
 0x424   : > { %14682 = vst [vmem:[#allocation252_spill] sm:$0xff] %v12011_v51  ;;  %v12015_v36 = vpop.f32.mrf.mxu0  ;;  %v12017_v50 = vpop.f32.mrf.mxu1  ;;  %v9115_v51 = vld [vmem:[#allocation4 + $0x10] sm:$0xf] }
 0x425   : > { %14683 = vst [vmem:[#allocation253_spill] sm:$0xff] %v12013_v49  ;;  %v9141_v49 = vld [vmem:[#allocation4 + $0x58] sm:$0xf0] }
 0x426   : > { %14684 = vst [vmem:[#allocation254_spill] sm:$0xff] %v12015_v36  ;;  %v9140_v36 = vor.u32 %v10680_v37, %v9139_v21  ;;  %v9589_v37 = vld [vmem:[#allocation4 + $0x468] sm:$0xf0] }
 0x427   : > { %14685 = vst [vmem:[#allocation255_spill] sm:$0xff] %v12017_v50  ;;  %1773 = vmatmul.bf16.gmra.mxu0 %v11171_v22  ;;  %1926 = vmatmul.bf16.gmra.mxu1 %v11171_v22  ;;  %v9144_v50 = vor.u32 %v10677_v33, %v9141_v49  ;;  %v10674_v22 = vld [vmem:[#allocation4 + $0x24] sm:$0xf0]  ;;  %v9587_v49 = vld [vmem:[#allocation4 + $0x450] sm:$0xf] }
 0x428   : > { %2512 = vmatmul.bf16.gmra.mxu2 %v10666_v58  ;;  %2665 = vmatmul.bf16.gmra.mxu3 %v10666_v58 }
 0x429   : > { %2959 = vmatpush.bf16.msra.mxu2 %v9140_v36  ;;  %3112 = vmatpush.bf16.msra.mxu3 %v9144_v50  ;;  %v10874_v50 = vld [vmem:[#allocation4 + $0x464] sm:$0xf0]  ;;  %v10871_v36 = vld [vmem:[#allocation4 + $0x454] sm:$0xf] }
 0x42a   : > { %v9588_v21 = vor.u32 %v10874_v50, %v9587_v49  ;;  %v9592_v33 = vor.u32 %v10871_v36, %v9589_v37 }
 0x42b   : > { %v12019_v47 = vpop.f32.mrf.mxu2  ;;  %v12021_v35 = vpop.f32.mrf.mxu3 }
 0x42c   : > { %14686 = vst [vmem:[#allocation256_spill] sm:$0xff] %v12019_v47  ;;  %v12023_v42 = vpop.f32.mrf.mxu0  ;;  %v12025_v31 = vpop.f32.mrf.mxu1  ;;  %v9116_v47 = vor.u32 %v10674_v22, %v9115_v51  ;;  %3805 = vmatpush.bf16.msrb.mxu0 %v9588_v21  ;;  %3958 = vmatpush.bf16.msrb.mxu1 %v9592_v33 }
 0x42d   : > { %14687 = vst [vmem:[#allocation257_spill] sm:$0xff] %v12021_v35  ;;  %3113 = vmatpush.bf16.msra.mxu3 %v9120_v16 }
 0x42e   : > { %14688 = vst [vmem:[#allocation258_spill] sm:$0xff] %v12023_v42  ;;  %v10667_v42 = vld [vmem:[#allocation2 + $0xf0] sm:$0xff]  ;;  %2960 = vmatpush.bf16.msra.mxu2 %v9116_v47 }
 0x42f   : > { %14689 = vst [vmem:[#allocation259_spill] sm:$0xff] %v12025_v31  ;;  %v11172_v31 = vld [vmem:[#allocation2 + $0x100] sm:$0xff] }
 0x433   : > { %v2479_v58 = vpop.f32.mrf.mxu2  ;;  %v2632_v25 = vpop.f32.mrf.mxu3 }
 0x434   : > { %v1743_v35 = vpop.f32.mrf.mxu0  ;;  %v1896_v17 = vpop.f32.mrf.mxu1 }
 0x437   : > { %1778 = vmatmul.bf16.gmra.mxu0 %v11172_v31  ;;  %1931 = vmatmul.bf16.gmra.mxu1 %v11172_v31  ;;  %v11173_v31 = vld [vmem:[#allocation2 + $0x108] sm:$0xff] }
 0x438   : > { %2516 = vmatmul.bf16.gmra.mxu2 %v10667_v42  ;;  %2669 = vmatmul.bf16.gmra.mxu3 %v10667_v42  ;;  %v10668_v42 = vld [vmem:[#allocation2 + $0xf8] sm:$0xff] }
 0x43b   : > { %v12027_v25 = vpop.f32.mrf.mxu2  ;;  %v12029_v51 = vpop.f32.mrf.mxu3 }
 0x43c   : > { %14690 = vst [vmem:[#allocation260_spill] sm:$0xff] %v12027_v25  ;;  %v12031_v17 = vpop.f32.mrf.mxu0  ;;  %v12033_v24 = vpop.f32.mrf.mxu1 }
 0x43d   : > { %14691 = vst [vmem:[#allocation261_spill] sm:$0xff] %v12029_v51 }
 0x43e   : > { %14692 = vst [vmem:[#allocation262_spill] sm:$0xff] %v12031_v17 }
 0x43f   : > { %14693 = vst [vmem:[#allocation263_spill] sm:$0xff] %v12033_v24 }
 0x443   : > { %v12035_v16 = vpop.f32.mrf.mxu2  ;;  %v12037_v4 = vpop.f32.mrf.mxu3 }
 0x444   : > { %14694 = vst [vmem:[#allocation264_spill] sm:$0xff] %v12035_v16  ;;  %v12039_v47 = vpop.f32.mrf.mxu0  ;;  %v12041_v35 = vpop.f32.mrf.mxu1  ;;  %v10856_v16 = vld [vmem:[#allocation4 + $0x3d4] sm:$0xf0] }
 0x445   : > { %14695 = vst [vmem:[#allocation265_spill] sm:$0xff] %v12037_v4  ;;  %v9515_v4 = vld [vmem:[#allocation4 + $0x3c0] sm:$0xf] }
 0x446   : > { %14696 = vst [vmem:[#allocation266_spill] sm:$0xff] %v12039_v47  ;;  %v11174_v47 = vld [vmem:[#allocation2] sm:$0xff]  ;;  %v9516_v51 = vor.u32 %v10856_v16, %v9515_v4 }
 0x447   : > { %14697 = vst [vmem:[#allocation267_spill] sm:$0xff] %v12041_v35  ;;  %1782 = vmatmul.bf16.gmra.mxu0 %v11173_v31  ;;  %1935 = vmatmul.bf16.gmra.mxu1 %v11173_v31 }
 0x448   : > { %2521 = vmatmul.bf16.gmra.mxu2 %v10668_v42  ;;  %2674 = vmatmul.bf16.gmra.mxu3 %v10668_v42 }
 0x44b   : > { %v12043_v22 = vpop.f32.mrf.mxu2  ;;  %v12045_v58 = vpop.f32.mrf.mxu3 }
 0x44c   : > { %14698 = vst [vmem:[#allocation268_spill] sm:$0xff] %v12043_v22  ;;  %v12047_v49 = vpop.f32.mrf.mxu0  ;;  %v12049_v50 = vpop.f32.mrf.mxu1 }
 0x44d   : > { %14699 = vst [vmem:[#allocation269_spill] sm:$0xff] %v12045_v58 }
 0x44e   : > { %14700 = vst [vmem:[#allocation270_spill] sm:$0xff] %v12047_v49 }
 0x44f   : > { %14701 = vst [vmem:[#allocation271_spill] sm:$0xff] %v12049_v50 }
 0x453   : > { %v2488_v36 = vpop.f32.mrf.mxu2  ;;  %v2641_v21 = vpop.f32.mrf.mxu3 }
 0x454   : > { %v1752_v37 = vpop.f32.mrf.mxu0  ;;  %v1905_v33 = vpop.f32.mrf.mxu1 }
 0x455   : > { %v11175_v37 = vld [vmem:[#allocation2 + $0x8] sm:$0xff] }
 0x457   : > { %2687 = vmatmul.bf16.vlgmr.msra.gmra.mxu0 %v11174_v47  ;;  %2824 = vmatmul.bf16.vlgmr.msra.gmra.mxu1 %v11174_v47 }
 0x458   : > { %2961 = vmatmul.bf16.vlgmr.msra.gmra.mxu2 %v11174_v47  ;;  %3114 = vmatmul.bf16.vlgmr.msra.gmra.mxu3 %v11174_v47 }
 0x45b   : > { %v12051_v31 = vpop.f32.mrf.mxu2  ;;  %v12053_v42 = vpop.f32.mrf.mxu3 }
 0x45c   : > { %14702 = vst [vmem:[#allocation272_spill] sm:$0xff] %v12051_v31  ;;  %v12055_v35 = vpop.f32.mrf.mxu0  ;;  %v12057_v24 = vpop.f32.mrf.mxu1  ;;  %v10868_v31 = vld [vmem:[#allocation4 + $0x434] sm:$0xf0] }
 0x45d   : > { %14703 = vst [vmem:[#allocation273_spill] sm:$0xff] %v12053_v42 }
 0x45e   : > { %14704 = vst [vmem:[#allocation274_spill] sm:$0xff] %v12055_v35 }
 0x45f   : > { %14705 = vst [vmem:[#allocation275_spill] sm:$0xff] %v12057_v24 }
 0x463   : > { %v12059_v49 = vpop.f32.mrf.mxu2  ;;  %v12061_v50 = vpop.f32.mrf.mxu3 }
 0x464   : > { %14706 = vst [vmem:[#allocation276_spill] sm:$0xff] %v12059_v49  ;;  %v12063_v36 = vpop.f32.mrf.mxu0  ;;  %v12065_v21 = vpop.f32.mrf.mxu1 }
 0x465   : > { %14707 = vst [vmem:[#allocation277_spill] sm:$0xff] %v12061_v50 }
 0x466   : > { %14708 = vst [vmem:[#allocation278_spill] sm:$0xff] %v12063_v36  ;;  %v11176_v36 = vld [vmem:[#allocation2 + $0x10] sm:$0xff] }
 0x467   : > { %14709 = vst [vmem:[#allocation279_spill] sm:$0xff] %v12065_v21  ;;  %2691 = vmatmul.bf16.gmra.mxu0 %v11175_v37  ;;  %2828 = vmatmul.bf16.gmra.mxu1 %v11175_v37  ;;  %v9563_v21 = vld [vmem:[#allocation4 + $0x420] sm:$0xf] }
 0x468   : > { %2965 = vmatmul.bf16.gmra.mxu2 %v11175_v37  ;;  %3118 = vmatmul.bf16.gmra.mxu3 %v11175_v37  ;;  %v10865_v37 = vld [vmem:[#allocation4 + $0x424] sm:$0xf]  ;;  %v9564_v58 = vor.u32 %v10868_v31, %v9563_v21  ;;  %v11177_v31 = vld [vmem:[#allocation2 + $0x18] sm:$0xff] }
 0x46a   : > { %3806 = vmatpush.bf16.msrb.mxu0 %v9564_v58 }
 0x46b   : > { %v12067_v47 = vpop.f32.mrf.mxu2  ;;  %v12069_v33 = vpop.f32.mrf.mxu3 }
 0x46c   : > { %14710 = vst [vmem:[#allocation280_spill] sm:$0xff] %v12067_v47  ;;  %v12071_v35 = vpop.f32.mrf.mxu0  ;;  %v12073_v24 = vpop.f32.mrf.mxu1  ;;  %v9565_v47 = vld [vmem:[#allocation4 + $0x438] sm:$0xf0] }
 0x46d   : > { %14711 = vst [vmem:[#allocation281_spill] sm:$0xff] %v12069_v33  ;;  %v9568_v22 = vor.u32 %v10865_v37, %v9565_v47 }
 0x46e   : > { %14712 = vst [vmem:[#allocation282_spill] sm:$0xff] %v12071_v35 }
 0x46f   : > { %14713 = vst [vmem:[#allocation283_spill] sm:$0xff] %v12073_v24  ;;  %3959 = vmatpush.bf16.msrb.mxu1 %v9568_v22 }
 0x473   : > { %v2497_v17 = vpop.f32.mrf.mxu2  ;;  %v2650_v49 = vpop.f32.mrf.mxu3 }
 0x474   : > { %v1761_v50 = vpop.f32.mrf.mxu0  ;;  %v1914_v42 = vpop.f32.mrf.mxu1 }
 0x477   : > { %2695 = vmatmul.bf16.gmra.mxu0 %v11176_v36  ;;  %2832 = vmatmul.bf16.gmra.mxu1 %v11176_v36 }
 0x478   : > { %2970 = vmatmul.bf16.gmra.mxu2 %v11176_v36  ;;  %3123 = vmatmul.bf16.gmra.mxu3 %v11176_v36 }
 0x47b   : > { %v12075_v33 = vpop.f32.mrf.mxu2  ;;  %v12077_v35 = vpop.f32.mrf.mxu3 }
 0x47c   : > { %14714 = vst [vmem:[#allocation284_spill] sm:$0xff] %v12075_v33  ;;  %v12079_v17 = vpop.f32.mrf.mxu0  ;;  %v12081_v49 = vpop.f32.mrf.mxu1 }
 0x47d   : > { %14715 = vst [vmem:[#allocation285_spill] sm:$0xff] %v12077_v35 }
 0x47e   : > { %14716 = vst [vmem:[#allocation286_spill] sm:$0xff] %v12079_v17 }
 0x47f   : > { %14717 = vst [vmem:[#allocation287_spill] sm:$0xff] %v12081_v49 }
 0x483   : > { %v12083_v50 = vpop.f32.mrf.mxu2  ;;  %v12085_v42 = vpop.f32.mrf.mxu3 }
 0x484   : > { %14718 = vst [vmem:[#allocation288_spill] sm:$0xff] %v12083_v50  ;;  %v12087_v36 = vpop.f32.mrf.mxu0  ;;  %v12089_v24 = vpop.f32.mrf.mxu1  ;;  %v10862_v50 = vld [vmem:[#allocation4 + $0x404] sm:$0xf0] }
 0x485   : > { %14719 = vst [vmem:[#allocation289_spill] sm:$0xff] %v12085_v42 }
 0x486   : > { %14720 = vst [vmem:[#allocation290_spill] sm:$0xff] %v12087_v36  ;;  %v11178_v36 = vld [vmem:[#allocation2 + $0x20] sm:$0xff] }
 0x487   : > { %14721 = vst [vmem:[#allocation291_spill] sm:$0xff] %v12089_v24  ;;  %2699 = vmatmul.bf16.gmra.mxu0 %v11177_v31  ;;  %2836 = vmatmul.bf16.gmra.mxu1 %v11177_v31 }
 0x488   : > { %2974 = vmatmul.bf16.gmra.mxu2 %v11177_v31  ;;  %3127 = vmatmul.bf16.gmra.mxu3 %v11177_v31 }
 0x48b   : > { %v12091_v21 = vpop.f32.mrf.mxu2  ;;  %v12093_v58 = vpop.f32.mrf.mxu3 }
 0x48c   : > { %14722 = vst [vmem:[#allocation292_spill] sm:$0xff] %v12091_v21  ;;  %v12095_v47 = vpop.f32.mrf.mxu0  ;;  %v12097_v22 = vpop.f32.mrf.mxu1 }
 0x48d   : > { %14723 = vst [vmem:[#allocation293_spill] sm:$0xff] %v12093_v58 }
 0x48e   : > { %14724 = vst [vmem:[#allocation294_spill] sm:$0xff] %v12095_v47 }
 0x48f   : > { %14725 = vst [vmem:[#allocation295_spill] sm:$0xff] %v12097_v22 }
 0x493   : > { %v2506_v37 = vpop.f32.mrf.mxu2  ;;  %v2659_v49 = vpop.f32.mrf.mxu3 }
 0x494   : > { %v1770_v17 = vpop.f32.mrf.mxu0  ;;  %v1923_v42 = vpop.f32.mrf.mxu1 }
 0x495   : > { %v11179_v42 = vld [vmem:[#allocation2 + $0x28] sm:$0xff] }
 0x497   : > { %2703 = vmatmul.bf16.gmra.mxu0 %v11178_v36  ;;  %2840 = vmatmul.bf16.gmra.mxu1 %v11178_v36 }
 0x498   : > { %2979 = vmatmul.bf16.gmra.mxu2 %v11178_v36  ;;  %3132 = vmatmul.bf16.gmra.mxu3 %v11178_v36 }
 0x49b   : > { %v12099_v24 = vpop.f32.mrf.mxu2  ;;  %v12101_v31 = vpop.f32.mrf.mxu3 }
 0x49c   : > { %14726 = vst [vmem:[#allocation296_spill] sm:$0xff] %v12099_v24  ;;  %v12103_v21 = vpop.f32.mrf.mxu0  ;;  %v12105_v58 = vpop.f32.mrf.mxu1 }
 0x49d   : > { %14727 = vst [vmem:[#allocation297_spill] sm:$0xff] %v12101_v31 }
 0x49e   : > { %14728 = vst [vmem:[#allocation298_spill] sm:$0xff] %v12103_v21 }
 0x49f   : > { %14729 = vst [vmem:[#allocation299_spill] sm:$0xff] %v12105_v58 }
 0x4a3   : > { %v12107_v47 = vpop.f32.mrf.mxu2  ;;  %v12109_v22 = vpop.f32.mrf.mxu3 }
 0x4a4   : > { %14730 = vst [vmem:[#allocation300_spill] sm:$0xff] %v12107_v47  ;;  %v12111_v49 = vpop.f32.mrf.mxu0  ;;  %v12113_v17 = vpop.f32.mrf.mxu1 }
 0x4a5   : > { %14731 = vst [vmem:[#allocation301_spill] sm:$0xff] %v12109_v22 }
 0x4a6   : > { %14732 = vst [vmem:[#allocation302_spill] sm:$0xff] %v12111_v49  ;;  %v11180_v49 = vld [vmem:[#allocation2 + $0x30] sm:$0xff] }
 0x4a7   : > { %14733 = vst [vmem:[#allocation303_spill] sm:$0xff] %v12113_v17  ;;  %2707 = vmatmul.bf16.gmra.mxu0 %v11179_v42  ;;  %2844 = vmatmul.bf16.gmra.mxu1 %v11179_v42  ;;  %v9539_v17 = vld [vmem:[#allocation4 + $0x3f0] sm:$0xf] }
 0x4a8   : > { %2983 = vmatmul.bf16.gmra.mxu2 %v11179_v42  ;;  %3136 = vmatmul.bf16.gmra.mxu3 %v11179_v42  ;;  %v10859_v42 = vld [vmem:[#allocation4 + $0x3f4] sm:$0xf]  ;;  %v9540_v35 = vor.u32 %v10862_v50, %v9539_v17  ;;  %v11181_v50 = vld [vmem:[#allocation2 + $0x38] sm:$0xff] }
 0x4aa   : > { %3807 = vmatpush.bf16.msrb.mxu0 %v9540_v35 }
 0x4ab   : > { %v12115_v36 = vpop.f32.mrf.mxu2  ;;  %v12117_v37 = vpop.f32.mrf.mxu3 }
 0x4ac   : > { %14734 = vst [vmem:[#allocation304_spill] sm:$0xff] %v12115_v36  ;;  %v12119_v21 = vpop.f32.mrf.mxu0  ;;  %v12121_v58 = vpop.f32.mrf.mxu1  ;;  %v9541_v36 = vld [vmem:[#allocation4 + $0x408] sm:$0xf0] }
 0x4ad   : > { %14735 = vst [vmem:[#allocation305_spill] sm:$0xff] %v12117_v37  ;;  %v9544_v33 = vor.u32 %v10859_v42, %v9541_v36 }
 0x4ae   : > { %14736 = vst [vmem:[#allocation306_spill] sm:$0xff] %v12119_v21  ;;  %3808 = vmatpush.bf16.msrb.mxu0 %v9516_v51 }
 0x4af   : > { %14737 = vst [vmem:[#allocation307_spill] sm:$0xff] %v12121_v58  ;;  %3960 = vmatpush.bf16.msrb.mxu1 %v9544_v33 }
 0x4b3   : > { %v2515_v47 = vpop.f32.mrf.mxu2  ;;  %v2668_v31 = vpop.f32.mrf.mxu3 }
 0x4b4   : > { %v1779_v22 = vpop.f32.mrf.mxu0  ;;  %v1932_v24 = vpop.f32.mrf.mxu1 }
 0x4b7   : > { %2711 = vmatmul.bf16.gmra.mxu0 %v11180_v49  ;;  %2848 = vmatmul.bf16.gmra.mxu1 %v11180_v49 }
 0x4b8   : > { %2988 = vmatmul.bf16.gmra.mxu2 %v11180_v49  ;;  %3141 = vmatmul.bf16.gmra.mxu3 %v11180_v49 }
 0x4bb   : > { %v12123_v37 = vpop.f32.mrf.mxu2  ;;  %v12125_v21 = vpop.f32.mrf.mxu3 }
 0x4bc   : > { %14738 = vst [vmem:[#allocation308_spill] sm:$0xff] %v12123_v37  ;;  %v12127_v47 = vpop.f32.mrf.mxu0  ;;  %v12129_v22 = vpop.f32.mrf.mxu1 }
 0x4bd   : > { %14739 = vst [vmem:[#allocation309_spill] sm:$0xff] %v12125_v21  ;;  %v10875_v21 = vld [vmem:[#allocation4 + $0x46c] sm:$0xf0] }
 0x4be   : > { %14740 = vst [vmem:[#allocation310_spill] sm:$0xff] %v12127_v47 }
 0x4bf   : > { %14741 = vst [vmem:[#allocation311_spill] sm:$0xff] %v12129_v22 }
 0x4c3   : > { %v12131_v24 = vpop.f32.mrf.mxu2  ;;  %v12133_v31 = vpop.f32.mrf.mxu3 }
 0x4c4   : > { %14742 = vst [vmem:[#allocation312_spill] sm:$0xff] %v12131_v24  ;;  %v12135_v49 = vpop.f32.mrf.mxu0  ;;  %v12137_v58 = vpop.f32.mrf.mxu1 }
 0x4c5   : > { %14743 = vst [vmem:[#allocation313_spill] sm:$0xff] %v12133_v31 }
 0x4c6   : > { %14744 = vst [vmem:[#allocation314_spill] sm:$0xff] %v12135_v49  ;;  %v11182_v49 = vld [vmem:[#allocation2 + $0x40] sm:$0xff] }
 0x4c7   : > { %14745 = vst [vmem:[#allocation315_spill] sm:$0xff] %v12137_v58  ;;  %2715 = vmatmul.bf16.gmra.mxu0 %v11181_v50  ;;  %2852 = vmatmul.bf16.gmra.mxu1 %v11181_v50 }
 0x4c8   : > { %2992 = vmatmul.bf16.gmra.mxu2 %v11181_v50  ;;  %3145 = vmatmul.bf16.gmra.mxu3 %v11181_v50  ;;  %v9595_v50 = vld [vmem:[#allocation4 + $0x458] sm:$0xf] }
 0x4cb   : > { %v12139_v17 = vpop.f32.mrf.mxu2  ;;  %v12141_v35 = vpop.f32.mrf.mxu3 }
 0x4cc   : > { %14746 = vst [vmem:[#allocation316_spill] sm:$0xff] %v12139_v17  ;;  %v12143_v36 = vpop.f32.mrf.mxu0  ;;  %v12145_v33 = vpop.f32.mrf.mxu1  ;;  %v10872_v17 = vld [vmem:[#allocation4 + $0x45c] sm:$0xf] }
 0x4cd   : > { %14747 = vst [vmem:[#allocation317_spill] sm:$0xff] %v12141_v35 }
 0x4ce   : > { %14748 = vst [vmem:[#allocation318_spill] sm:$0xff] %v12143_v36  ;;  %v9596_v36 = vor.u32 %v10875_v21, %v9595_v50 }
 0x4cf   : > { %14749 = vst [vmem:[#allocation319_spill] sm:$0xff] %v12145_v33  ;;  %v9597_v33 = vld [vmem:[#allocation4 + $0x470] sm:$0xf0] }
 0x4d0   : > { %4111 = vmatpush.bf16.msrb.mxu2 %v9596_v36 }
 0x4d3   : > { %v2524_v42 = vpop.f32.mrf.mxu2  ;;  %v2677_v22 = vpop.f32.mrf.mxu3 }
 0x4d4   : > { %v2688_v47 = vpop.f32.mrf.mxu0  ;;  %v2825_v31 = vpop.f32.mrf.mxu1  ;;  %v9600_v42 = vor.u32 %v10872_v17, %v9597_v33 }
 0x4d6   : > { %4248 = vmatpush.bf16.msrb.mxu3 %v9600_v42 }
 0x4d7   : > { %2719 = vmatmul.bf16.gmra.mxu0 %v11182_v49  ;;  %2856 = vmatmul.bf16.gmra.mxu1 %v11182_v49 }
 0x4d8   : > { %2997 = vmatmul.bf16.gmra.mxu2 %v11182_v49  ;;  %3150 = vmatmul.bf16.gmra.mxu3 %v11182_v49 }
 0x4db   : > { %v2962_v58 = vpop.f32.mrf.mxu2  ;;  %v3115_v24 = vpop.f32.mrf.mxu3 }
 0x4dc   : > { %v12147_v37 = vpop.f32.mrf.mxu0  ;;  %v12149_v35 = vpop.f32.mrf.mxu1  ;;  %v11183_v24 = vld [vmem:[#allocation2 + $0x48] sm:$0xff] }
 0x4e3   : > { %v12151_v47 = vpop.f32.mrf.mxu2  ;;  %v12153_v22 = vpop.f32.mrf.mxu3 }
 0x4e4   : > { %14750 = vst [vmem:[#allocation320_spill] sm:$0xff] %v12151_v47  ;;  %v12155_v31 = vpop.f32.mrf.mxu0  ;;  %v12157_v58 = vpop.f32.mrf.mxu1  ;;  %v11184_v47 = vld [vmem:[#allocation2 + $0x50] sm:$0xff] }
 0x4e5   : > { %14751 = vst [vmem:[#allocation321_spill] sm:$0xff] %v12153_v22 }
 0x4e7   : > { %2723 = vmatmul.bf16.gmra.mxu0 %v11183_v24  ;;  %2860 = vmatmul.bf16.gmra.mxu1 %v11183_v24 }
 0x4e8   : > { %3001 = vmatmul.bf16.gmra.mxu2 %v11183_v24  ;;  %3154 = vmatmul.bf16.gmra.mxu3 %v11183_v24  ;;  %v10853_v24 = vld [vmem:[#allocation4 + $0x3c4] sm:$0xf] }
 0x4eb   : > { %v12159_v49 = vpop.f32.mrf.mxu2  ;;  %v12161_v21 = vpop.f32.mrf.mxu3 }
 0x4ec   : > { %14752 = vst [vmem:[#allocation322_spill] sm:$0xff] %v12159_v49  ;;  %v2694_v17 = vpop.f32.mrf.mxu0  ;;  %v2831_v36 = vpop.f32.mrf.mxu1  ;;  %v9517_v49 = vld [vmem:[#allocation4 + $0x3d8] sm:$0xf0] }
 0x4ed   : > { %14753 = vst [vmem:[#allocation323_spill] sm:$0xff] %v12161_v21  ;;  %v9520_v25 = vor.u32 %v10853_v24, %v9517_v49 }
 0x4ef   : > { %3961 = vmatpush.bf16.msrb.mxu1 %v9520_v25 }
 0x4f3   : > { %v12163_v33 = vpop.f32.mrf.mxu2  ;;  %v12165_v50 = vpop.f32.mrf.mxu3 }
 0x4f4   : > { %14754 = vst [vmem:[#allocation324_spill] sm:$0xff] %v12163_v33  ;;  %v2696_v42 = vpop.f32.mrf.mxu0  ;;  %v2833_v22 = vpop.f32.mrf.mxu1 }
 0x4f5   : > { %14755 = vst [vmem:[#allocation325_spill] sm:$0xff] %v12165_v50 }
 0x4f7   : > { %2727 = vmatmul.bf16.gmra.mxu0 %v11184_v47  ;;  %2864 = vmatmul.bf16.gmra.mxu1 %v11184_v47 }
 0x4f8   : > { %3006 = vmatmul.bf16.gmra.mxu2 %v11184_v47  ;;  %3159 = vmatmul.bf16.gmra.mxu3 %v11184_v47 }
 0x4fb   : > { %v2971_v21 = vpop.f32.mrf.mxu2  ;;  %v3124_v17 = vpop.f32.mrf.mxu3 }
 0x4fc   : > { %v12167_v36 = vpop.f32.mrf.mxu0  ;;  %v12169_v33 = vpop.f32.mrf.mxu1 }
 0x503   : > { %v12171_v22 = vpop.f32.mrf.mxu2  ;;  %v12173_v42 = vpop.f32.mrf.mxu3 }
 0x504   : > { %14756 = vst [vmem:[#allocation326_spill] sm:$0xff] %v12171_v22  ;;  %v12175_v50 = vpop.f32.mrf.mxu0  ;;  %v12177_v47 = vpop.f32.mrf.mxu1 }
 0x505   : > { %14757 = vst [vmem:[#allocation327_spill] sm:$0xff] %v12173_v42  ;;  %v11186_v42 = vld [vmem:[#allocation2 + $0x60] sm:$0xff] }
 0x507   : > { %2731 = vmatmul.bf16.gmra.mxu0 %v11185_v60  ;;  %2868 = vmatmul.bf16.gmra.mxu1 %v11185_v60 }
 0x508   : > { %3010 = vmatmul.bf16.gmra.mxu2 %v11185_v60  ;;  %3163 = vmatmul.bf16.gmra.mxu3 %v11185_v60  ;;  %v9571_v60 = vld [vmem:[#allocation4 + $0x428] sm:$0xf] }
 0x50b   : > { %v12179_v16 = vpop.f32.mrf.mxu2  ;;  %v12181_v51 = vpop.f32.mrf.mxu3 }
 0x50c   : > { %14758 = vst [vmem:[#allocation328_spill] sm:$0xff] %v12179_v16  ;;  %v2702_v4 = vpop.f32.mrf.mxu0  ;;  %v2839_v49 = vpop.f32.mrf.mxu1  ;;  %v10866_v16 = vld [vmem:[#allocation4 + $0x42c] sm:$0xf] }
 0x50d   : > { %14759 = vst [vmem:[#allocation329_spill] sm:$0xff] %v12181_v51  ;;  %v9572_v49 = vor.u32 %v10869_v3, %v9571_v60 }
 0x50f   : > { %4112 = vmatpush.bf16.msrb.mxu2 %v9572_v49 }
 0x513   : > { %v12183_v25 = vpop.f32.mrf.mxu2  ;;  %v12185_v21 = vpop.f32.mrf.mxu3 }
 0x514   : > { %14760 = vst [vmem:[#allocation330_spill] sm:$0xff] %v12183_v25  ;;  %v2704_v24 = vpop.f32.mrf.mxu0  ;;  %v2841_v17 = vpop.f32.mrf.mxu1  ;;  %v9573_v25 = vld [vmem:[#allocation4 + $0x440] sm:$0xf0] }
 0x515   : > { %14761 = vst [vmem:[#allocation331_spill] sm:$0xff] %v12185_v21  ;;  %v9576_v51 = vor.u32 %v10866_v16, %v9573_v25 }
 0x517   : > { %2735 = vmatmul.bf16.gmra.mxu0 %v11186_v42  ;;  %2872 = vmatmul.bf16.gmra.mxu1 %v11186_v42 }
 0x518   : > { %3015 = vmatmul.bf16.gmra.mxu2 %v11186_v42  ;;  %3168 = vmatmul.bf16.gmra.mxu3 %v11186_v42 }
 0x519   : > { %4249 = vmatpush.bf16.msrb.mxu3 %v9576_v51 }
 0x51b   : > { %v2980_v22 = vpop.f32.mrf.mxu2  ;;  %v3133_v15 = vpop.f32.mrf.mxu3 }
 0x51c   : > { %v12187_v14 = vpop.f32.mrf.mxu0  ;;  %v12189_v4 = vpop.f32.mrf.mxu1  ;;  %v11187_v15 = vld [vmem:[#allocation2 + $0x68] sm:$0xff] }
 0x51d   : > { %14762 = vst [vmem:[#allocation332_spill] sm:$0xff] %v12187_v14  ;;  %v11189_v14 = vld [vmem:[#allocation2 + $0x78] sm:$0xff] }
 0x51e   : > { %14763 = vst [vmem:[#allocation333_spill] sm:$0xff] %v12189_v4 }
 0x523   : > { %v12191_v24 = vpop.f32.mrf.mxu2  ;;  %v12193_v17 = vpop.f32.mrf.mxu3 }
 0x524   : > { %14764 = vst [vmem:[#allocation334_spill] sm:$0xff] %v12191_v24  ;;  %v12195_v21 = vpop.f32.mrf.mxu0  ;;  %v12197_v22 = vpop.f32.mrf.mxu1  ;;  %v11188_v24 = vld [vmem:[#allocation2 + $0x70] sm:$0xff] }
 0x525   : > { %14765 = vst [vmem:[#allocation335_spill] sm:$0xff] %v12193_v17 }
 0x526   : > { %14766 = vst [vmem:[#allocation336_spill] sm:$0xff] %v12195_v21  ;;  %v10850_v21 = vld [vmem:[#allocation4 + $0x3a4] sm:$0xf0] }
 0x527   : > { %14767 = vst [vmem:[#allocation337_spill] sm:$0xff] %v12197_v22  ;;  %2739 = vmatmul.bf16.gmra.mxu0 %v11187_v15  ;;  %2876 = vmatmul.bf16.gmra.mxu1 %v11187_v15  ;;  %v9491_v22 = vld [vmem:[#allocation4 + $0x390] sm:$0xf] }
 0x528   : > { %3019 = vmatmul.bf16.gmra.mxu2 %v11187_v15  ;;  %3172 = vmatmul.bf16.gmra.mxu3 %v11187_v15  ;;  %v10847_v15 = vld [vmem:[#allocation4 + $0x394] sm:$0xf]  ;;  %v9492_v4 = vor.u32 %v10850_v21, %v9491_v22 }
 0x52a   : > { %3809 = vmatpush.bf16.msrb.mxu0 %v9492_v4 }
 0x52b   : > { %v12199_v42 = vpop.f32.mrf.mxu2  ;;  %v12201_v3 = vpop.f32.mrf.mxu3 }
 0x52c   : > { %14768 = vst [vmem:[#allocation338_spill] sm:$0xff] %v12199_v42  ;;  %v2710_v16 = vpop.f32.mrf.mxu0  ;;  %v2847_v25 = vpop.f32.mrf.mxu1  ;;  %v9493_v42 = vld [vmem:[#allocation4 + $0x3a8] sm:$0xf0] }
 0x52d   : > { %14769 = vst [vmem:[#allocation339_spill] sm:$0xff] %v12201_v3  ;;  %v9496_v10 = vor.u32 %v10847_v15, %v9493_v42 }
 0x52f   : > { %3962 = vmatpush.bf16.msrb.mxu1 %v9496_v10 }
 0x533   : > { %v12203_v51 = vpop.f32.mrf.mxu2  ;;  %v12205_v60 = vpop.f32.mrf.mxu3 }
 0x534   : > { %14770 = vst [vmem:[#allocation340_spill] sm:$0xff] %v12203_v51  ;;  %v2712_v49 = vpop.f32.mrf.mxu0  ;;  %v2849_v17 = vpop.f32.mrf.mxu1 }
 0x535   : > { %14771 = vst [vmem:[#allocation341_spill] sm:$0xff] %v12205_v60 }
 0x537   : > { %2743 = vmatmul.bf16.gmra.mxu0 %v11188_v24  ;;  %2880 = vmatmul.bf16.gmra.mxu1 %v11188_v24 }
 0x538   : > { %3024 = vmatmul.bf16.gmra.mxu2 %v11188_v24  ;;  %3177 = vmatmul.bf16.gmra.mxu3 %v11188_v24 }
 0x53b   : > { %v2989_v3 = vpop.f32.mrf.mxu2  ;;  %v3142_v16 = vpop.f32.mrf.mxu3 }
 0x53c   : > { %v12207_v25 = vpop.f32.mrf.mxu0  ;;  %v12209_v51 = vpop.f32.mrf.mxu1 }
 0x53d   : > { %14772 = vst [vmem:[#allocation342_spill] sm:$0xff] %v12207_v25  ;;  %v11193_v25 = vld [vmem:[#allocation2 + $0x98] sm:$0xff] }
 0x53e   : > { %14773 = vst [vmem:[#allocation343_spill] sm:$0xff] %v12209_v51 }
 0x543   : > { %v12211_v17 = vpop.f32.mrf.mxu2  ;;  %v12213_v49 = vpop.f32.mrf.mxu3 }
 0x544   : > { %14774 = vst [vmem:[#allocation344_spill] sm:$0xff] %v12211_v17  ;;  %v12215_v60 = vpop.f32.mrf.mxu0  ;;  %v12217_v24 = vpop.f32.mrf.mxu1 }
 0x545   : > { %14775 = vst [vmem:[#allocation345_spill] sm:$0xff] %v12213_v49  ;;  %v11190_v49 = vld [vmem:[#allocation2 + $0x80] sm:$0xff] }
 0x546   : > { %14776 = vst [vmem:[#allocation346_spill] sm:$0xff] %v12215_v60  ;;  %v10863_v60 = vld [vmem:[#allocation4 + $0x40c] sm:$0xf0] }
 0x547   : > { %14777 = vst [vmem:[#allocation347_spill] sm:$0xff] %v12217_v24  ;;  %2747 = vmatmul.bf16.gmra.mxu0 %v11189_v14  ;;  %2884 = vmatmul.bf16.gmra.mxu1 %v11189_v14 }
 0x548   : > { %3028 = vmatmul.bf16.gmra.mxu2 %v11189_v14  ;;  %3181 = vmatmul.bf16.gmra.mxu3 %v11189_v14  ;;  %v9547_v14 = vld [vmem:[#allocation4 + $0x3f8] sm:$0xf] }
 0x54b   : > { %v12219_v21 = vpop.f32.mrf.mxu2  ;;  %v12221_v4 = vpop.f32.mrf.mxu3 }
 0x54c   : > { %14778 = vst [vmem:[#allocation348_spill] sm:$0xff] %v12219_v21  ;;  %v2718_v22 = vpop.f32.mrf.mxu0  ;;  %v2855_v42 = vpop.f32.mrf.mxu1  ;;  %v10860_v21 = vld [vmem:[#allocation4 + $0x3fc] sm:$0xf] }
 0x54d   : > { %14779 = vst [vmem:[#allocation349_spill] sm:$0xff] %v12221_v4  ;;  %v9548_v42 = vor.u32 %v10863_v60, %v9547_v14 }
 0x54f   : > { %4113 = vmatpush.bf16.msrb.mxu2 %v9548_v42 }
 0x553   : > { %v12223_v10 = vpop.f32.mrf.mxu2  ;;  %v12225_v3 = vpop.f32.mrf.mxu3 }
 0x554   : > { %14780 = vst [vmem:[#allocation350_spill] sm:$0xff] %v12223_v10  ;;  %v2720_v15 = vpop.f32.mrf.mxu0  ;;  %v2857_v16 = vpop.f32.mrf.mxu1  ;;  %v9549_v10 = vld [vmem:[#allocation4 + $0x410] sm:$0xf0] }
 0x555   : > { %14781 = vst [vmem:[#allocation351_spill] sm:$0xff] %v12225_v3  ;;  %v9552_v4 = vor.u32 %v10860_v21, %v9549_v10 }
 0x557   : > { %2751 = vmatmul.bf16.gmra.mxu0 %v11190_v49  ;;  %2888 = vmatmul.bf16.gmra.mxu1 %v11190_v49 }
 0x558   : > { %3033 = vmatmul.bf16.gmra.mxu2 %v11190_v49  ;;  %3186 = vmatmul.bf16.gmra.mxu3 %v11190_v49  ;;  %v11191_v49 = vld [vmem:[#allocation2 + $0x88] sm:$0xff] }
 0x559   : > { %4250 = vmatpush.bf16.msrb.mxu3 %v9552_v4 }
 0x55b   : > { %v2998_v17 = vpop.f32.mrf.mxu2  ;;  %v3151_v24 = vpop.f32.mrf.mxu3 }
 0x55c   : > { %v12227_v51 = vpop.f32.mrf.mxu0  ;;  %v12229_v22 = vpop.f32.mrf.mxu1 }
 0x55d   : > { %14782 = vst [vmem:[#allocation352_spill] sm:$0xff] %v12227_v51 }
 0x55e   : > { %14783 = vst [vmem:[#allocation353_spill] sm:$0xff] %v12229_v22 }
 0x563   : > { %v12231_v15 = vpop.f32.mrf.mxu2  ;;  %v12233_v16 = vpop.f32.mrf.mxu3 }
 0x564   : > { %14784 = vst [vmem:[#allocation354_spill] sm:$0xff] %v12231_v15  ;;  %v12235_v3 = vpop.f32.mrf.mxu0  ;;  %v12237_v17 = vpop.f32.mrf.mxu1  ;;  %v11192_v15 = vld [vmem:[#allocation2 + $0x90] sm:$0xff] }
 0x565   : > { %14785 = vst [vmem:[#allocation355_spill] sm:$0xff] %v12233_v16 }
 0x566   : > { %14786 = vst [vmem:[#allocation356_spill] sm:$0xff] %v12235_v3  ;;  %v10844_v3 = vld [vmem:[#allocation4 + $0x374] sm:$0xf0] }
 0x567   : > { %14787 = vst [vmem:[#allocation357_spill] sm:$0xff] %v12237_v17  ;;  %2755 = vmatmul.bf16.gmra.mxu0 %v11191_v49  ;;  %2892 = vmatmul.bf16.gmra.mxu1 %v11191_v49  ;;  %v9467_v17 = vld [vmem:[#allocation4 + $0x360] sm:$0xf] }
 0x568   : > { %3037 = vmatmul.bf16.gmra.mxu2 %v11191_v49  ;;  %3190 = vmatmul.bf16.gmra.mxu3 %v11191_v49  ;;  %v10841_v49 = vld [vmem:[#allocation4 + $0x364] sm:$0xf]  ;;  %v9468_v22 = vor.u32 %v10844_v3, %v9467_v17 }
 0x56a   : > { %3810 = vmatpush.bf16.msrb.mxu0 %v9468_v22 }
 0x56b   : > { %v12239_v24 = vpop.f32.mrf.mxu2  ;;  %v12241_v60 = vpop.f32.mrf.mxu3 }
 0x56c   : > { %14788 = vst [vmem:[#allocation358_spill] sm:$0xff] %v12239_v24  ;;  %v2726_v21 = vpop.f32.mrf.mxu0  ;;  %v2863_v10 = vpop.f32.mrf.mxu1  ;;  %v9469_v24 = vld [vmem:[#allocation4 + $0x378] sm:$0xf0] }
 0x56d   : > { %14789 = vst [vmem:[#allocation359_spill] sm:$0xff] %v12241_v60  ;;  %v9472_v51 = vor.u32 %v10841_v49, %v9469_v24 }
 0x56f   : > { %3963 = vmatpush.bf16.msrb.mxu1 %v9472_v51 }
 0x573   : > { %v12243_v4 = vpop.f32.mrf.mxu2  ;;  %v12245_v14 = vpop.f32.mrf.mxu3 }
 0x574   : > { %14790 = vst [vmem:[#allocation360_spill] sm:$0xff] %v12243_v4  ;;  %v2728_v42 = vpop.f32.mrf.mxu0  ;;  %v2865_v16 = vpop.f32.mrf.mxu1 }
 0x575   : > { %14791 = vst [vmem:[#allocation361_spill] sm:$0xff] %v12245_v14 }
 0x577   : > { %2759 = vmatmul.bf16.gmra.mxu0 %v11192_v15  ;;  %2896 = vmatmul.bf16.gmra.mxu1 %v11192_v15 }
 0x578   : > { %3042 = vmatmul.bf16.gmra.mxu2 %v11192_v15  ;;  %3195 = vmatmul.bf16.gmra.mxu3 %v11192_v15 }
 0x57b   : > { %v3007_v60 = vpop.f32.mrf.mxu2  ;;  %v3160_v21 = vpop.f32.mrf.mxu3 }
 0x57c   : > { %v12247_v10 = vpop.f32.mrf.mxu0  ;;  %v12249_v4 = vpop.f32.mrf.mxu1 }
 0x57d   : > { %14792 = vst [vmem:[#allocation362_spill] sm:$0xff] %v12247_v10  ;;  %v11197_v10 = vld [vmem:[#allocation2 + $0xb8] sm:$0xff] }
 0x57e   : > { %14793 = vst [vmem:[#allocation363_spill] sm:$0xff] %v12249_v4 }
 0x583   : > { %v12251_v16 = vpop.f32.mrf.mxu2  ;;  %v12253_v42 = vpop.f32.mrf.mxu3 }
 0x584   : > { %14794 = vst [vmem:[#allocation364_spill] sm:$0xff] %v12251_v16  ;;  %v12255_v14 = vpop.f32.mrf.mxu0  ;;  %v12257_v15 = vpop.f32.mrf.mxu1 }
 0x585   : > { %14795 = vst [vmem:[#allocation365_spill] sm:$0xff] %v12253_v42  ;;  %v11194_v42 = vld [vmem:[#allocation2 + $0xa0] sm:$0xff] }
 0x586   : > { %14796 = vst [vmem:[#allocation366_spill] sm:$0xff] %v12255_v14  ;;  %v10857_v14 = vld [vmem:[#allocation4 + $0x3dc] sm:$0xf0] }
 0x587   : > { %14797 = vst [vmem:[#allocation367_spill] sm:$0xff] %v12257_v15  ;;  %2763 = vmatmul.bf16.gmra.mxu0 %v11193_v25  ;;  %2900 = vmatmul.bf16.gmra.mxu1 %v11193_v25 }
 0x588   : > { %3046 = vmatmul.bf16.gmra.mxu2 %v11193_v25  ;;  %3199 = vmatmul.bf16.gmra.mxu3 %v11193_v25  ;;  %v9523_v25 = vld [vmem:[#allocation4 + $0x3c8] sm:$0xf] }
 0x58b   : > { %v12259_v3 = vpop.f32.mrf.mxu2  ;;  %v12261_v22 = vpop.f32.mrf.mxu3 }
 0x58c   : > { %14798 = vst [vmem:[#allocation368_spill] sm:$0xff] %v12259_v3  ;;  %v2734_v17 = vpop.f32.mrf.mxu0  ;;  %v2871_v24 = vpop.f32.mrf.mxu1  ;;  %v10854_v3 = vld [vmem:[#allocation4 + $0x3cc] sm:$0xf] }
 0x58d   : > { %14799 = vst [vmem:[#allocation369_spill] sm:$0xff] %v12261_v22  ;;  %v9524_v24 = vor.u32 %v10857_v14, %v9523_v25 }
 0x58f   : > { %4114 = vmatpush.bf16.msrb.mxu2 %v9524_v24 }
 0x593   : > { %v12263_v51 = vpop.f32.mrf.mxu2  ;;  %v12265_v60 = vpop.f32.mrf.mxu3 }
 0x594   : > { %14800 = vst [vmem:[#allocation370_spill] sm:$0xff] %v12263_v51  ;;  %v2736_v49 = vpop.f32.mrf.mxu0  ;;  %v2873_v21 = vpop.f32.mrf.mxu1  ;;  %v9525_v51 = vld [vmem:[#allocation4 + $0x3e0] sm:$0xf0] }
 0x595   : > { %14801 = vst [vmem:[#allocation371_spill] sm:$0xff] %v12265_v60  ;;  %v9528_v22 = vor.u32 %v10854_v3, %v9525_v51 }
 0x597   : > { %2767 = vmatmul.bf16.gmra.mxu0 %v11194_v42  ;;  %2904 = vmatmul.bf16.gmra.mxu1 %v11194_v42 }
 0x598   : > { %3051 = vmatmul.bf16.gmra.mxu2 %v11194_v42  ;;  %3204 = vmatmul.bf16.gmra.mxu3 %v11194_v42  ;;  %v11195_v42 = vld [vmem:[#allocation2 + $0xa8] sm:$0xff] }
 0x599   : > { %4251 = vmatpush.bf16.msrb.mxu3 %v9528_v22 }
 0x59b   : > { %v3016_v16 = vpop.f32.mrf.mxu2  ;;  %v3169_v15 = vpop.f32.mrf.mxu3 }
 0x59c   : > { %v12267_v4 = vpop.f32.mrf.mxu0  ;;  %v12269_v17 = vpop.f32.mrf.mxu1 }
 0x59d   : > { %14802 = vst [vmem:[#allocation372_spill] sm:$0xff] %v12267_v4 }
 0x59e   : > { %14803 = vst [vmem:[#allocation373_spill] sm:$0xff] %v12269_v17 }
 0x5a3   : > { %v12271_v49 = vpop.f32.mrf.mxu2  ;;  %v12273_v21 = vpop.f32.mrf.mxu3 }
 0x5a4   : > { %14804 = vst [vmem:[#allocation374_spill] sm:$0xff] %v12271_v49  ;;  %v12275_v60 = vpop.f32.mrf.mxu0  ;;  %v12277_v16 = vpop.f32.mrf.mxu1  ;;  %v11196_v49 = vld [vmem:[#allocation2 + $0xb0] sm:$0xff] }
 0x5a5   : > { %14805 = vst [vmem:[#allocation375_spill] sm:$0xff] %v12273_v21 }
 0x5a6   : > { %14806 = vst [vmem:[#allocation376_spill] sm:$0xff] %v12275_v60  ;;  %v10838_v60 = vld [vmem:[#allocation4 + $0x344] sm:$0xf0] }
 0x5a7   : > { %14807 = vst [vmem:[#allocation377_spill] sm:$0xff] %v12277_v16  ;;  %2771 = vmatmul.bf16.gmra.mxu0 %v11195_v42  ;;  %2908 = vmatmul.bf16.gmra.mxu1 %v11195_v42  ;;  %v9443_v16 = vld [vmem:[#allocation4 + $0x330] sm:$0xf] }
 0x5a8   : > { %3055 = vmatmul.bf16.gmra.mxu2 %v11195_v42  ;;  %3208 = vmatmul.bf16.gmra.mxu3 %v11195_v42  ;;  %v10835_v42 = vld [vmem:[#allocation4 + $0x334] sm:$0xf]  ;;  %v9444_v17 = vor.u32 %v10838_v60, %v9443_v16 }
 0x5aa   : > { %3811 = vmatpush.bf16.msrb.mxu0 %v9444_v17 }
 0x5ab   : > { %v12279_v15 = vpop.f32.mrf.mxu2  ;;  %v12281_v14 = vpop.f32.mrf.mxu3 }
 0x5ac   : > { %14808 = vst [vmem:[#allocation378_spill] sm:$0xff] %v12279_v15  ;;  %v2742_v3 = vpop.f32.mrf.mxu0  ;;  %v2879_v51 = vpop.f32.mrf.mxu1  ;;  %v9445_v15 = vld [vmem:[#allocation4 + $0x348] sm:$0xf0] }
 0x5ad   : > { %14809 = vst [vmem:[#allocation379_spill] sm:$0xff] %v12281_v14  ;;  %v9448_v4 = vor.u32 %v10835_v42, %v9445_v15 }
 0x5af   : > { %3964 = vmatpush.bf16.msrb.mxu1 %v9448_v4 }
 0x5b3   : > { %v12283_v22 = vpop.f32.mrf.mxu2  ;;  %v12285_v25 = vpop.f32.mrf.mxu3 }
 0x5b4   : > { %14810 = vst [vmem:[#allocation380_spill] sm:$0xff] %v12283_v22  ;;  %v2744_v24 = vpop.f32.mrf.mxu0  ;;  %v2881_v21 = vpop.f32.mrf.mxu1 }
 0x5b5   : > { %14811 = vst [vmem:[#allocation381_spill] sm:$0xff] %v12285_v25 }
 0x5b7   : > { %2775 = vmatmul.bf16.gmra.mxu0 %v11196_v49  ;;  %2912 = vmatmul.bf16.gmra.mxu1 %v11196_v49 }
 0x5b8   : > { %3060 = vmatmul.bf16.gmra.mxu2 %v11196_v49  ;;  %3213 = vmatmul.bf16.gmra.mxu3 %v11196_v49 }
 0x5bb   : > { %v3025_v14 = vpop.f32.mrf.mxu2  ;;  %v3178_v3 = vpop.f32.mrf.mxu3 }
 0x5bc   : > { %v12287_v51 = vpop.f32.mrf.mxu0  ;;  %v12289_v22 = vpop.f32.mrf.mxu1 }
 0x5bd   : > { %14812 = vst [vmem:[#allocation382_spill] sm:$0xff] %v12287_v51  ;;  %v11201_v51 = vld [vmem:[#allocation2 + $0xd8] sm:$0xff] }
 0x5be   : > { %14813 = vst [vmem:[#allocation383_spill] sm:$0xff] %v12289_v22 }
 0x5c3   : > { %v12291_v21 = vpop.f32.mrf.mxu2  ;;  %v12293_v24 = vpop.f32.mrf.mxu3 }
 0x5c4   : > { %14814 = vst [vmem:[#allocation384_spill] sm:$0xff] %v12291_v21  ;;  %v12295_v25 = vpop.f32.mrf.mxu0  ;;  %v12297_v49 = vpop.f32.mrf.mxu1 }
 0x5c5   : > { %14815 = vst [vmem:[#allocation385_spill] sm:$0xff] %v12293_v24  ;;  %v11198_v24 = vld [vmem:[#allocation2 + $0xc0] sm:$0xff] }
 0x5c6   : > { %14816 = vst [vmem:[#allocation386_spill] sm:$0xff] %v12295_v25  ;;  %v10851_v25 = vld [vmem:[#allocation4 + $0x3ac] sm:$0xf0] }
 0x5c7   : > { %14817 = vst [vmem:[#allocation387_spill] sm:$0xff] %v12297_v49  ;;  %2779 = vmatmul.bf16.gmra.mxu0 %v11197_v10  ;;  %2916 = vmatmul.bf16.gmra.mxu1 %v11197_v10 }
 0x5c8   : > { %3064 = vmatmul.bf16.gmra.mxu2 %v11197_v10  ;;  %3217 = vmatmul.bf16.gmra.mxu3 %v11197_v10  ;;  %v9499_v10 = vld [vmem:[#allocation4 + $0x398] sm:$0xf] }
 0x5cb   : > { %v12299_v60 = vpop.f32.mrf.mxu2  ;;  %v12301_v17 = vpop.f32.mrf.mxu3 }
 0x5cc   : > { %14818 = vst [vmem:[#allocation388_spill] sm:$0xff] %v12299_v60  ;;  %v2750_v16 = vpop.f32.mrf.mxu0  ;;  %v2887_v15 = vpop.f32.mrf.mxu1  ;;  %v10848_v60 = vld [vmem:[#allocation4 + $0x39c] sm:$0xf] }
 0x5cd   : > { %14819 = vst [vmem:[#allocation389_spill] sm:$0xff] %v12301_v17  ;;  %v9500_v15 = vor.u32 %v10851_v25, %v9499_v10 }
 0x5cf   : > { %4115 = vmatpush.bf16.msrb.mxu2 %v9500_v15 }
 0x5d3   : > { %v12303_v4 = vpop.f32.mrf.mxu2  ;;  %v12305_v14 = vpop.f32.mrf.mxu3 }
 0x5d4   : > { %14820 = vst [vmem:[#allocation390_spill] sm:$0xff] %v12303_v4  ;;  %v2752_v42 = vpop.f32.mrf.mxu0  ;;  %v2889_v3 = vpop.f32.mrf.mxu1  ;;  %v9501_v4 = vld [vmem:[#allocation4 + $0x3b0] sm:$0xf0] }
 0x5d5   : > { %14821 = vst [vmem:[#allocation391_spill] sm:$0xff] %v12305_v14  ;;  %v9504_v17 = vor.u32 %v10848_v60, %v9501_v4 }
 0x5d7   : > { %2783 = vmatmul.bf16.gmra.mxu0 %v11198_v24  ;;  %2920 = vmatmul.bf16.gmra.mxu1 %v11198_v24 }
 0x5d8   : > { %3069 = vmatmul.bf16.gmra.mxu2 %v11198_v24  ;;  %3222 = vmatmul.bf16.gmra.mxu3 %v11198_v24  ;;  %v11199_v24 = vld [vmem:[#allocation2 + $0xc8] sm:$0xff] }
 0x5d9   : > { %4252 = vmatpush.bf16.msrb.mxu3 %v9504_v17 }
 0x5db   : > { %v3034_v21 = vpop.f32.mrf.mxu2  ;;  %v3187_v49 = vpop.f32.mrf.mxu3 }
 0x5dc   : > { %v12307_v22 = vpop.f32.mrf.mxu0  ;;  %v12309_v16 = vpop.f32.mrf.mxu1 }
 0x5dd   : > { %14822 = vst [vmem:[#allocation392_spill] sm:$0xff] %v12307_v22 }
 0x5de   : > { %14823 = vst [vmem:[#allocation393_spill] sm:$0xff] %v12309_v16 }
 0x5e3   : > { %v12311_v42 = vpop.f32.mrf.mxu2  ;;  %v12313_v3 = vpop.f32.mrf.mxu3 }
 0x5e4   : > { %14824 = vst [vmem:[#allocation394_spill] sm:$0xff] %v12311_v42  ;;  %v12315_v14 = vpop.f32.mrf.mxu0  ;;  %v12317_v21 = vpop.f32.mrf.mxu1  ;;  %v11200_v42 = vld [vmem:[#allocation2 + $0xd0] sm:$0xff] }
 0x5e5   : > { %14825 = vst [vmem:[#allocation395_spill] sm:$0xff] %v12313_v3 }
 0x5e6   : > { %14826 = vst [vmem:[#allocation396_spill] sm:$0xff] %v12315_v14  ;;  %v10832_v14 = vld [vmem:[#allocation4 + $0x314] sm:$0xf0] }
 0x5e7   : > { %14827 = vst [vmem:[#allocation397_spill] sm:$0xff] %v12317_v21  ;;  %2787 = vmatmul.bf16.gmra.mxu0 %v11199_v24  ;;  %2924 = vmatmul.bf16.gmra.mxu1 %v11199_v24  ;;  %v9419_v21 = vld [vmem:[#allocation4 + $0x300] sm:$0xf] }
 0x5e8   : > { %3073 = vmatmul.bf16.gmra.mxu2 %v11199_v24  ;;  %3226 = vmatmul.bf16.gmra.mxu3 %v11199_v24  ;;  %v10829_v24 = vld [vmem:[#allocation4 + $0x304] sm:$0xf]  ;;  %v9420_v16 = vor.u32 %v10832_v14, %v9419_v21 }
 0x5ea   : > { %3812 = vmatpush.bf16.msrb.mxu0 %v9420_v16 }
 0x5eb   : > { %v12319_v49 = vpop.f32.mrf.mxu2  ;;  %v12321_v25 = vpop.f32.mrf.mxu3 }
 0x5ec   : > { %14828 = vst [vmem:[#allocation398_spill] sm:$0xff] %v12319_v49  ;;  %v2758_v60 = vpop.f32.mrf.mxu0  ;;  %v2895_v4 = vpop.f32.mrf.mxu1  ;;  %v9421_v49 = vld [vmem:[#allocation4 + $0x318] sm:$0xf0] }
 0x5ed   : > { %14829 = vst [vmem:[#allocation399_spill] sm:$0xff] %v12321_v25  ;;  %v9424_v22 = vor.u32 %v10829_v24, %v9421_v49 }
 0x5ef   : > { %3965 = vmatpush.bf16.msrb.mxu1 %v9424_v22 }
 0x5f3   : > { %v12323_v17 = vpop.f32.mrf.mxu2  ;;  %v12325_v10 = vpop.f32.mrf.mxu3 }
 0x5f4   : > { %14830 = vst [vmem:[#allocation400_spill] sm:$0xff] %v12323_v17  ;;  %v2760_v15 = vpop.f32.mrf.mxu0  ;;  %v2897_v3 = vpop.f32.mrf.mxu1 }
 0x5f5   : > { %14831 = vst [vmem:[#allocation401_spill] sm:$0xff] %v12325_v10 }
 0x5f7   : > { %2791 = vmatmul.bf16.gmra.mxu0 %v11200_v42  ;;  %2928 = vmatmul.bf16.gmra.mxu1 %v11200_v42 }
 0x5f8   : > { %3078 = vmatmul.bf16.gmra.mxu2 %v11200_v42  ;;  %3231 = vmatmul.bf16.gmra.mxu3 %v11200_v42 }
 0x5fb   : > { %v3043_v25 = vpop.f32.mrf.mxu2  ;;  %v3196_v60 = vpop.f32.mrf.mxu3 }
 0x5fc   : > { %v12327_v4 = vpop.f32.mrf.mxu0  ;;  %v12329_v17 = vpop.f32.mrf.mxu1 }
 0x5fd   : > { %14832 = vst [vmem:[#allocation402_spill] sm:$0xff] %v12327_v4 }
 0x5fe   : > { %14833 = vst [vmem:[#allocation403_spill] sm:$0xff] %v12329_v17 }
 0x603   : > { %v12331_v3 = vpop.f32.mrf.mxu2  ;;  %v12333_v15 = vpop.f32.mrf.mxu3 }
 0x604   : > { %14834 = vst [vmem:[#allocation404_spill] sm:$0xff] %v12331_v3  ;;  %v12335_v10 = vpop.f32.mrf.mxu0  ;;  %v12337_v42 = vpop.f32.mrf.mxu1 }
 0x605   : > { %14835 = vst [vmem:[#allocation405_spill] sm:$0xff] %v12333_v15  ;;  %v11202_v15 = vld [vmem:[#allocation2 + $0xe0] sm:$0xff] }
 0x606   : > { %14836 = vst [vmem:[#allocation406_spill] sm:$0xff] %v12335_v10  ;;  %v10845_v10 = vld [vmem:[#allocation4 + $0x37c] sm:$0xf0] }
 0x607   : > { %14837 = vst [vmem:[#allocation407_spill] sm:$0xff] %v12337_v42  ;;  %2795 = vmatmul.bf16.gmra.mxu0 %v11201_v51  ;;  %2932 = vmatmul.bf16.gmra.mxu1 %v11201_v51 }
 0x608   : > { %3082 = vmatmul.bf16.gmra.mxu2 %v11201_v51  ;;  %3235 = vmatmul.bf16.gmra.mxu3 %v11201_v51  ;;  %v9475_v51 = vld [vmem:[#allocation4 + $0x368] sm:$0xf] }
 0x60b   : > { %v12339_v14 = vpop.f32.mrf.mxu2  ;;  %v12341_v16 = vpop.f32.mrf.mxu3 }
 0x60c   : > { %14838 = vst [vmem:[#allocation408_spill] sm:$0xff] %v12339_v14  ;;  %v2766_v21 = vpop.f32.mrf.mxu0  ;;  %v2903_v49 = vpop.f32.mrf.mxu1  ;;  %v10842_v14 = vld [vmem:[#allocation4 + $0x36c] sm:$0xf] }
 0x60d   : > { %14839 = vst [vmem:[#allocation409_spill] sm:$0xff] %v12341_v16  ;;  %v9476_v49 = vor.u32 %v10845_v10, %v9475_v51  ;;  %v10839_v51 = vld [vmem:[#allocation4 + $0x34c] sm:$0xf0] }
 0x60f   : > { %4116 = vmatpush.bf16.msrb.mxu2 %v9476_v49  ;;  %v10836_v49 = vld [vmem:[#allocation4 + $0x33c] sm:$0xf] }
 0x613   : > { %v12343_v22 = vpop.f32.mrf.mxu2  ;;  %v12345_v25 = vpop.f32.mrf.mxu3 }
 0x614   : > { %14840 = vst [vmem:[#allocation410_spill] sm:$0xff] %v12343_v22  ;;  %v2768_v24 = vpop.f32.mrf.mxu0  ;;  %v2905_v60 = vpop.f32.mrf.mxu1  ;;  %v9477_v22 = vld [vmem:[#allocation4 + $0x380] sm:$0xf0] }
 0x615   : > { %14841 = vst [vmem:[#allocation411_spill] sm:$0xff] %v12345_v25  ;;  %v9480_v16 = vor.u32 %v10842_v14, %v9477_v22 }
 0x617   : > { %2799 = vmatmul.bf16.gmra.mxu0 %v11202_v15  ;;  %2936 = vmatmul.bf16.gmra.mxu1 %v11202_v15 }
 0x618   : > { %3087 = vmatmul.bf16.gmra.mxu2 %v11202_v15  ;;  %3240 = vmatmul.bf16.gmra.mxu3 %v11202_v15  ;;  %v11203_v15 = vld [vmem:[#allocation2 + $0xe8] sm:$0xff] }
 0x619   : > { %4253 = vmatpush.bf16.msrb.mxu3 %v9480_v16  ;;  %v9451_v16 = vld [vmem:[#allocation4 + $0x338] sm:$0xf] }
 0x61b   : > { %v3052_v3 = vpop.f32.mrf.mxu2  ;;  %v3205_v42 = vpop.f32.mrf.mxu3 }
 0x61c   : > { %v12347_v17 = vpop.f32.mrf.mxu0  ;;  %v12349_v21 = vpop.f32.mrf.mxu1 }
 0x61d   : > { %14842 = vst [vmem:[#allocation412_spill] sm:$0xff] %v12347_v17  ;;  %v10830_v17 = vld [vmem:[#allocation4 + $0x30c] sm:$0xf] }
 0x61e   : > { %14843 = vst [vmem:[#allocation413_spill] sm:$0xff] %v12349_v21 }
 0x623   : > { %v12351_v24 = vpop.f32.mrf.mxu2  ;;  %v12353_v60 = vpop.f32.mrf.mxu3 }
 0x624   : > { %14844 = vst [vmem:[#allocation414_spill] sm:$0xff] %v12351_v24  ;;  %v12355_v25 = vpop.f32.mrf.mxu0  ;;  %v12357_v3 = vpop.f32.mrf.mxu1  ;;  %v9452_v24 = vor.u32 %v10839_v51, %v9451_v16  ;;  %v9605_v51 = vld [vmem:[#allocation4 + $0x478] sm:$0xf0] }
 0x625   : > { %14845 = vst [vmem:[#allocation415_spill] sm:$0xff] %v12353_v60  ;;  %v9453_v60 = vld [vmem:[#allocation4 + $0x350] sm:$0xf0] }
 0x626   : > { %14846 = vst [vmem:[#allocation416_spill] sm:$0xff] %v12355_v25  ;;  %v9456_v21 = vor.u32 %v10836_v49, %v9453_v60  ;;  %4117 = vmatpush.bf16.msrb.mxu2 %v9452_v24  ;;  %v10833_v25 = vld [vmem:[#allocation4 + $0x31c] sm:$0xf0]  ;;  %v10876_v24 = vld [vmem:[#allocation4 + $0x474] sm:$0xf0] }
 0x627   : > { %14847 = vst [vmem:[#allocation417_spill] sm:$0xff] %v12357_v3  ;;  %2803 = vmatmul.bf16.gmra.mxu0 %v11203_v15  ;;  %2940 = vmatmul.bf16.gmra.mxu1 %v11203_v15  ;;  %v9427_v3 = vld [vmem:[#allocation4 + $0x308] sm:$0xf]  ;;  %v10873_v60 = vld [vmem:[#allocation4 + $0x464] sm:$0xf] }
 0x628   : > { %3091 = vmatmul.bf16.gmra.mxu2 %v11203_v15  ;;  %3244 = vmatmul.bf16.gmra.mxu3 %v11203_v15  ;;  %v9608_v49 = vor.u32 %v10873_v60, %v9605_v51  ;;  %v10797_v60 = vld [vmem:[#allocation2 + $0x20] sm:$0xff] }
 0x629   : > { %4254 = vmatpush.bf16.msrb.mxu3 %v9456_v21  ;;  %v9603_v21 = vld [vmem:[#allocation4 + $0x460] sm:$0xf] }
 0x62a   : > { %v9604_v16 = vor.u32 %v10876_v24, %v9603_v21  ;;  %4538 = vmatpush.bf16.msra.mxu1 %v9608_v49 }
 0x62b   : > { %v12359_v42 = vpop.f32.mrf.mxu2  ;;  %v12361_v10 = vpop.f32.mrf.mxu3 }
 0x62c   : > { %14848 = vst [vmem:[#allocation418_spill] sm:$0xff] %v12359_v42  ;;  %v2774_v14 = vpop.f32.mrf.mxu0  ;;  %v2911_v22 = vpop.f32.mrf.mxu1  ;;  %v9428_v42 = vor.u32 %v10833_v25, %v9427_v3  ;;  %4385 = vmatpush.bf16.msra.mxu0 %v9604_v16 }
 0x62d   : > { %14849 = vst [vmem:[#allocation419_spill] sm:$0xff] %v12361_v10  ;;  %v9432_v22 = vor.u32 %v10830_v17, %v9429_v5 }
 0x62e   : > { %4118 = vmatpush.bf16.msrb.mxu2 %v9428_v42 }
 0x62f   : > { %4255 = vmatpush.bf16.msrb.mxu3 %v9432_v22 }
 0x633   : > { %v12363_v4 = vpop.f32.mrf.mxu2  ;;  %v12365_v15 = vpop.f32.mrf.mxu3 }
 0x634   : > { %14850 = vst [vmem:[#allocation420_spill] sm:$0xff] %v12363_v4  ;;  %v2776_v10 = vpop.f32.mrf.mxu0  ;;  %v2913_v14 = vpop.f32.mrf.mxu1 }
 0x635   : > { %14851 = vst [vmem:[#allocation421_spill] sm:$0xff] %v12365_v15  ;;  %v11205_v10 = vld [vmem:[#allocation2 + $0xf8] sm:$0xff] }
 0x637   : > { %2807 = vmatmul.bf16.gmra.mxu0 %v11204_v55  ;;  %2944 = vmatmul.bf16.gmra.mxu1 %v11204_v55 }
 0x638   : > { %3096 = vmatmul.bf16.gmra.mxu2 %v11204_v55  ;;  %3249 = vmatmul.bf16.gmra.mxu3 %v11204_v55 }
 0x63b   : > { %v3061_v4 = vpop.f32.mrf.mxu2  ;;  %v3214_v15 = vpop.f32.mrf.mxu3 }
 0x63c   : > { %v12367_v25 = vpop.f32.mrf.mxu0  ;;  %v12369_v3 = vpop.f32.mrf.mxu1 }
 0x643   : > { %v12371_v5 = vpop.f32.mrf.mxu2  ;;  %v12373_v17 = vpop.f32.mrf.mxu3 }
 0x644   : > { %14852 = vst [vmem:[#allocation422_spill] sm:$0xff] %v12371_v5  ;;  %v12375_v42 = vpop.f32.mrf.mxu0  ;;  %v12377_v55 = vpop.f32.mrf.mxu1 }
 0x645   : > { %14853 = vst [vmem:[#allocation423_spill] sm:$0xff] %v12373_v17 }
 0x646   : > { %14854 = vst [vmem:[#allocation424_spill] sm:$0xff] %v12375_v42 }
 0x647   : > { %14855 = vst [vmem:[#allocation425_spill] sm:$0xff] %v12377_v55  ;;  %2811 = vmatmul.bf16.gmra.mxu0 %v11205_v10  ;;  %2948 = vmatmul.bf16.gmra.mxu1 %v11205_v10 }
 0x648   : > { %3100 = vmatmul.bf16.gmra.mxu2 %v11205_v10  ;;  %3253 = vmatmul.bf16.gmra.mxu3 %v11205_v10 }
 0x64b   : > { %v12379_v4 = vpop.f32.mrf.mxu2  ;;  %v12381_v15 = vpop.f32.mrf.mxu3 }
 0x64c   : > { %14856 = vst [vmem:[#allocation426_spill] sm:$0xff] %v12379_v4  ;;  %v2782_v14 = vpop.f32.mrf.mxu0  ;;  %v2919_v22 = vpop.f32.mrf.mxu1 }
 0x64d   : > { %14857 = vst [vmem:[#allocation427_spill] sm:$0xff] %v12381_v15  ;;  %v10798_v22 = vld [vmem:[#allocation2 + $0x28] sm:$0xff] }
 0x653   : > { %v12383_v21 = vpop.f32.mrf.mxu2  ;;  %v12385_v24 = vpop.f32.mrf.mxu3 }
 0x654   : > { %14858 = vst [vmem:[#allocation428_spill] sm:$0xff] %v12383_v21  ;;  %v2784_v16 = vpop.f32.mrf.mxu0  ;;  %v2921_v51 = vpop.f32.mrf.mxu1 }
 0x655   : > { %14859 = vst [vmem:[#allocation429_spill] sm:$0xff] %v12385_v24 }
 0x657   : > { %3813 = vmatmul.bf16.vlgmr.msrb.gmra.mxu0 %v10797_v60  ;;  %3966 = vmatmul.bf16.vlgmr.msrb.gmra.mxu1 %v10797_v60 }
 0x658   : > { %4119 = vmatmul.bf16.vlgmr.msrb.gmra.mxu2 %v10797_v60  ;;  %4256 = vmatmul.bf16.vlgmr.msrb.gmra.mxu3 %v10797_v60 }
 0x65b   : > { %v3070_v49 = vpop.f32.mrf.mxu2  ;;  %v3223_v17 = vpop.f32.mrf.mxu3 }
 0x65c   : > { %v12387_v10 = vpop.f32.mrf.mxu0  ;;  %v12389_v4 = vpop.f32.mrf.mxu1 }
 0x65d   : > { %14860 = vst [vmem:[#allocation430_spill] sm:$0xff] %v12387_v10 }
 0x65e   : > { %14861 = vst [vmem:[#allocation431_spill] sm:$0xff] %v12389_v4 }
 0x663   : > { %v12391_v15 = vpop.f32.mrf.mxu2  ;;  %v12393_v14 = vpop.f32.mrf.mxu3 }
 0x664   : > { %14862 = vst [vmem:[#allocation432_spill] sm:$0xff] %v12391_v15  ;;  %v12395_v21 = vpop.f32.mrf.mxu0  ;;  %v12397_v24 = vpop.f32.mrf.mxu1 }
 0x665   : > { %14863 = vst [vmem:[#allocation433_spill] sm:$0xff] %v12393_v14  ;;  %v10799_v14 = vld [vmem:[#allocation2 + $0x30] sm:$0xff] }
 0x666   : > { %14864 = vst [vmem:[#allocation434_spill] sm:$0xff] %v12395_v21  ;;  %v10870_v21 = vld [vmem:[#allocation4 + $0x444] sm:$0xf0] }
 0x667   : > { %14865 = vst [vmem:[#allocation435_spill] sm:$0xff] %v12397_v24  ;;  %3818 = vmatmul.bf16.gmra.mxu0 %v10798_v22  ;;  %3971 = vmatmul.bf16.gmra.mxu1 %v10798_v22  ;;  %v9579_v24 = vld [vmem:[#allocation4 + $0x430] sm:$0xf] }
 0x668   : > { %4123 = vmatmul.bf16.gmra.mxu2 %v10798_v22  ;;  %4260 = vmatmul.bf16.gmra.mxu3 %v10798_v22  ;;  %v10867_v22 = vld [vmem:[#allocation4 + $0x434] sm:$0xf]  ;;  %v9580_v10 = vor.u32 %v10870_v21, %v9579_v24 }
 0x66a   : > { %4386 = vmatpush.bf16.msra.mxu0 %v9580_v10 }
 0x66b   : > { %v12399_v60 = vpop.f32.mrf.mxu2  ;;  %v12401_v17 = vpop.f32.mrf.mxu3 }
 0x66c   : > { %14866 = vst [vmem:[#allocation436_spill] sm:$0xff] %v12399_v60  ;;  %v2790_v16 = vpop.f32.mrf.mxu0  ;;  %v2927_v51 = vpop.f32.mrf.mxu1  ;;  %v9581_v60 = vld [vmem:[#allocation4 + $0x448] sm:$0xf0] }
 0x66d   : > { %14867 = vst [vmem:[#allocation437_spill] sm:$0xff] %v12401_v17  ;;  %v9584_v55 = vor.u32 %v10867_v22, %v9581_v60  ;;  %v10801_v22 = vld [vmem:[#allocation2 + $0x40] sm:$0xff] }
 0x66f   : > { %4539 = vmatpush.bf16.msra.mxu1 %v9584_v55 }
 0x673   : > { %v12403_v49 = vpop.f32.mrf.mxu2  ;;  %v12405_v15 = vpop.f32.mrf.mxu3 }
 0x674   : > { %14868 = vst [vmem:[#allocation438_spill] sm:$0xff] %v12403_v49  ;;  %v2792_v5 = vpop.f32.mrf.mxu0  ;;  %v2929_v4 = vpop.f32.mrf.mxu1 }
 0x675   : > { %14869 = vst [vmem:[#allocation439_spill] sm:$0xff] %v12405_v15  ;;  %v10800_v15 = vld [vmem:[#allocation2 + $0x38] sm:$0xff] }
 0x677   : > { %3822 = vmatmul.bf16.gmra.mxu0 %v10799_v14  ;;  %3975 = vmatmul.bf16.gmra.mxu1 %v10799_v14 }
 0x678   : > { %4127 = vmatmul.bf16.gmra.mxu2 %v10799_v14  ;;  %4264 = vmatmul.bf16.gmra.mxu3 %v10799_v14 }
 0x67b   : > { %v3079_v17 = vpop.f32.mrf.mxu2  ;;  %v3232_v16 = vpop.f32.mrf.mxu3 }
 0x67c   : > { %v12407_v51 = vpop.f32.mrf.mxu0  ;;  %v12409_v49 = vpop.f32.mrf.mxu1 }
 0x67d   : > { %14870 = vst [vmem:[#allocation440_spill] sm:$0xff] %v12407_v51 }
 0x67e   : > { %14871 = vst [vmem:[#allocation441_spill] sm:$0xff] %v12409_v49 }
 0x683   : > { %v12411_v5 = vpop.f32.mrf.mxu2  ;;  %v12413_v4 = vpop.f32.mrf.mxu3 }
 0x684   : > { %14872 = vst [vmem:[#allocation442_spill] sm:$0xff] %v12411_v5  ;;  %v12415_v14 = vpop.f32.mrf.mxu0  ;;  %v12417_v42 = vpop.f32.mrf.mxu1 }
 0x685   : > { %14873 = vst [vmem:[#allocation443_spill] sm:$0xff] %v12413_v4 }
 0x686   : > { %14874 = vst [vmem:[#allocation444_spill] sm:$0xff] %v12415_v14 }
 0x687   : > { %14875 = vst [vmem:[#allocation445_spill] sm:$0xff] %v12417_v42  ;;  %3827 = vmatmul.bf16.gmra.mxu0 %v10800_v15  ;;  %3980 = vmatmul.bf16.gmra.mxu1 %v10800_v15 }
 0x688   : > { %4131 = vmatmul.bf16.gmra.mxu2 %v10800_v15  ;;  %4268 = vmatmul.bf16.gmra.mxu3 %v10800_v15 }
 0x68b   : > { %v12419_v21 = vpop.f32.mrf.mxu2  ;;  %v12421_v24 = vpop.f32.mrf.mxu3 }
 0x68c   : > { %14876 = vst [vmem:[#allocation446_spill] sm:$0xff] %v12419_v21  ;;  %v2798_v10 = vpop.f32.mrf.mxu0  ;;  %v2935_v60 = vpop.f32.mrf.mxu1 }
 0x68d   : > { %14877 = vst [vmem:[#allocation447_spill] sm:$0xff] %v12421_v24  ;;  %v10802_v60 = vld [vmem:[#allocation2 + $0x48] sm:$0xff] }
 0x693   : > { %v12423_v55 = vpop.f32.mrf.mxu2  ;;  %v12425_v17 = vpop.f32.mrf.mxu3 }
 0x694   : > { %14878 = vst [vmem:[#allocation448_spill] sm:$0xff] %v12423_v55  ;;  %v2800_v16 = vpop.f32.mrf.mxu0  ;;  %v2937_v4 = vpop.f32.mrf.mxu1 }
 0x695   : > { %14879 = vst [vmem:[#allocation449_spill] sm:$0xff] %v12425_v17 }
 0x697   : > { %3831 = vmatmul.bf16.gmra.mxu0 %v10801_v22  ;;  %3984 = vmatmul.bf16.gmra.mxu1 %v10801_v22 }
 0x698   : > { %4135 = vmatmul.bf16.gmra.mxu2 %v10801_v22  ;;  %4272 = vmatmul.bf16.gmra.mxu3 %v10801_v22 }
 0x69b   : > { %v3088_v5 = vpop.f32.mrf.mxu2  ;;  %v3241_v42 = vpop.f32.mrf.mxu3 }
 0x69c   : > { %v12427_v15 = vpop.f32.mrf.mxu0  ;;  %v12429_v21 = vpop.f32.mrf.mxu1 }
 0x69d   : > { %14880 = vst [vmem:[#allocation450_spill] sm:$0xff] %v12427_v15 }
 0x69e   : > { %14881 = vst [vmem:[#allocation451_spill] sm:$0xff] %v12429_v21 }
 0x6a3   : > { %v12431_v24 = vpop.f32.mrf.mxu2  ;;  %v12433_v10 = vpop.f32.mrf.mxu3 }
 0x6a4   : > { %14882 = vst [vmem:[#allocation452_spill] sm:$0xff] %v12431_v24  ;;  %v12435_v55 = vpop.f32.mrf.mxu0  ;;  %v12437_v17 = vpop.f32.mrf.mxu1 }
 0x6a5   : > { %14883 = vst [vmem:[#allocation453_spill] sm:$0xff] %v12433_v10  ;;  %v10803_v10 = vld [vmem:[#allocation2 + $0x50] sm:$0xff] }
 0x6a6   : > { %14884 = vst [vmem:[#allocation454_spill] sm:$0xff] %v12435_v55  ;;  %v10864_v55 = vld [vmem:[#allocation4 + $0x414] sm:$0xf0] }
 0x6a7   : > { %14885 = vst [vmem:[#allocation455_spill] sm:$0xff] %v12437_v17  ;;  %3836 = vmatmul.bf16.gmra.mxu0 %v10802_v60  ;;  %3989 = vmatmul.bf16.gmra.mxu1 %v10802_v60  ;;  %v9555_v17 = vld [vmem:[#allocation4 + $0x400] sm:$0xf] }
 0x6a8   : > { %4139 = vmatmul.bf16.gmra.mxu2 %v10802_v60  ;;  %4276 = vmatmul.bf16.gmra.mxu3 %v10802_v60  ;;  %v10861_v60 = vld [vmem:[#allocation4 + $0x404] sm:$0xf]  ;;  %v9556_v14 = vor.u32 %v10864_v55, %v9555_v17 }
 0x6aa   : > { %4387 = vmatpush.bf16.msra.mxu0 %v9556_v14 }
 0x6ab   : > { %v12439_v4 = vpop.f32.mrf.mxu2  ;;  %v12441_v42 = vpop.f32.mrf.mxu3 }
 0x6ac   : > { %14886 = vst [vmem:[#allocation456_spill] sm:$0xff] %v12439_v4  ;;  %v2806_v5 = vpop.f32.mrf.mxu0  ;;  %v2943_v22 = vpop.f32.mrf.mxu1  ;;  %v9557_v4 = vld [vmem:[#allocation4 + $0x418] sm:$0xf0] }
 0x6ad   : > { %14887 = vst [vmem:[#allocation457_spill] sm:$0xff] %v12441_v42  ;;  %v9560_v49 = vor.u32 %v10861_v60, %v9557_v4 }
 0x6af   : > { %4540 = vmatpush.bf16.msra.mxu1 %v9560_v49  ;;  %v2383_v49 = vadd.f32 %v11763_v26, %v11432_v56  ;;  %v2385_v56 = vadd.f32 %v11771_v19, %v11436_v1 }
 0x6b3   : > { %v12443_v16 = vpop.f32.mrf.mxu2  ;;  %v12445_v24 = vpop.f32.mrf.mxu3 }
 0x6b4   : > { %14888 = vst [vmem:[#allocation458_spill] sm:$0xff] %v12443_v16  ;;  %v2808_v21 = vpop.f32.mrf.mxu0  ;;  %v2945_v15 = vpop.f32.mrf.mxu1 }
 0x6b5   : > { %14889 = vst [vmem:[#allocation459_spill] sm:$0xff] %v12445_v24  ;;  %v10804_v24 = vld [vmem:[#allocation2 + $0x58] sm:$0xff] }
 0x6b7   : > { %3840 = vmatmul.bf16.gmra.mxu0 %v10803_v10  ;;  %3993 = vmatmul.bf16.gmra.mxu1 %v10803_v10 }
 0x6b8   : > { %4143 = vmatmul.bf16.gmra.mxu2 %v10803_v10  ;;  %4280 = vmatmul.bf16.gmra.mxu3 %v10803_v10 }
 0x6bb   : > { %v3097_v42 = vpop.f32.mrf.mxu2  ;;  %v3250_v5 = vpop.f32.mrf.mxu3 }
 0x6bc   : > { %v12447_v22 = vpop.f32.mrf.mxu0  ;;  %v12449_v16 = vpop.f32.mrf.mxu1  ;;  %v2536_v42 = vadd.f32 %v11765_v13, %v11434_v57  ;;  %v2538_v57 = vadd.f32 %v11773_v27, %v11438_v2 }
 0x6c3   : > { %v12451_v21 = vpop.f32.mrf.mxu2  ;;  %v12453_v15 = vpop.f32.mrf.mxu3 }
 0x6c4   : > { %14890 = vst [vmem:[#allocation460_spill] sm:$0xff] %v12451_v21  ;;  %v12455_v10 = vpop.f32.mrf.mxu0  ;;  %v12457_v51 = vpop.f32.mrf.mxu1 }
 0x6c5   : > { %14891 = vst [vmem:[#allocation461_spill] sm:$0xff] %v12453_v15  ;;  %v10805_v15 = vld [vmem:[#allocation2 + $0x60] sm:$0xff] }
 0x6c6   : > { %14892 = vst [vmem:[#allocation462_spill] sm:$0xff] %v12455_v10 }
 0x6c7   : > { %14893 = vst [vmem:[#allocation463_spill] sm:$0xff] %v12457_v51  ;;  %3845 = vmatmul.bf16.gmra.mxu0 %v10804_v24  ;;  %3998 = vmatmul.bf16.gmra.mxu1 %v10804_v24 }
 0x6c8   : > { %4147 = vmatmul.bf16.gmra.mxu2 %v10804_v24  ;;  %4284 = vmatmul.bf16.gmra.mxu3 %v10804_v24 }
 0x6cb   : > { %v12459_v55 = vpop.f32.mrf.mxu2  ;;  %v12461_v14 = vpop.f32.mrf.mxu3 }
 0x6cc   : > { %14894 = vst [vmem:[#allocation464_spill] sm:$0xff] %v12459_v55  ;;  %v2814_v17 = vpop.f32.mrf.mxu0  ;;  %v2951_v4 = vpop.f32.mrf.mxu1  ;;  %v5043_v55 = vlaneseq }
 0x6cd   : > { %14895 = vst [vmem:[#allocation465_spill] sm:$0xff] %v12461_v14 }
 0x6ce   : > { %v12471_v17 = vshrl.u32 %v5043_v55, 7 }
 0x6d0   : > { %vm5045_vm0 = vcmp.lt.s32.totalorder %v12471_v17, 1  ;;  %vm5270_vm1 = vcmp.lt.s32.totalorder %v12471_v17, 7 }
 0x6d3   : > { %v12467_v60 = vpop.f32.mrf.mxu2  ;;  %v12469_v5 = vpop.f32.mrf.mxu3 }
 0x6d4   : > { %14896 = vst [vmem:[#allocation466_spill] sm:$0xff] %v12467_v60  ;;  %v3814_v21 = vpop.f32.mrf.mxu0  ;;  %v3967_v51 = vpop.f32.mrf.mxu1 }
 0x6d5   : > { %14897 = vst [vmem:[#allocation467_spill] sm:$0xff] %v12469_v5  ;;  %v4691_v24 = vadd.f32 %v3814_v21, %v2383_v49  ;;  %v4692_v10 = vadd.f32 %v3967_v51, %v2536_v42  ;;  %v11028_v21 = vld [vmem:[%s14434_s3 + $0xb8] sm:$0xff] }
 0x6d6   : > { %v11036_v51 = vld [vmem:[%s14434_s3 + $0xf8] sm:$0xff]  ;;  %6143 = vmatpush.bf16.msra.mxu2 %v11028_v21 }
 0x6d7   : > { %3849 = vmatmul.bf16.gmra.mxu0 %v10805_v15  ;;  %4002 = vmatmul.bf16.gmra.mxu1 %v10805_v15  ;;  %v4947_v1 = vrot.slane %v4691_v24, 7  ;;  %v4948_v2 = vrot.slane %v4692_v10, 7  ;;  %v2541_v10 = vadd.f32 %v11781_v48, %v11446_v9  ;;  %v2830_v48 = vadd.f32 %v12157_v58, %v11450_v12 }
 0x6d8   : > { %4151 = vmatmul.bf16.gmra.mxu2 %v10805_v15  ;;  %4288 = vmatmul.bf16.gmra.mxu3 %v10805_v15 }
 0x6d9   : > { %6312 = vmatpush.bf16.msra.mxu3 %v11036_v51  ;;  %v10806_v51 = vld [vmem:[#allocation2 + $0x68] sm:$0xff] }
 0x6db   : > { %v4120_v26 = vpop.f32.mrf.mxu2  ;;  %v4257_v13 = vpop.f32.mrf.mxu3 }
 0x6dc   : > { %v3816_v4 = vpop.f32.mrf.mxu0  ;;  %v3969_v15 = vpop.f32.mrf.mxu1  ;;  %v2690_v13 = vadd.f32 %v12147_v37, %v11440_v6 }
 0x6dd   : > { %v4693_v55 = vadd.f32 %v3816_v4, %v2385_v56  ;;  %v4694_v49 = vadd.f32 %v3969_v15, %v2538_v57  ;;  %v2827_v56 = vadd.f32 %v12149_v35, %v11442_v7  ;;  %v2388_v57 = vadd.f32 %v11779_v59, %v11444_v8 }
 0x6de   : > { %v2693_v59 = vadd.f32 %v12155_v31, %v11448_v11 }
 0x6df   : > { %v4949_v19 = vrot.slane %v4693_v55, 7  ;;  %v4950_v27 = vrot.slane %v4694_v49, 7 }
 0x6e1   : > { %v5108_v42 = vsel %vm5045_vm0, %v4947_v1, %v4949_v19  ;;  %v5109_v26 = vsel %vm5045_vm0, %v4948_v2, %v4950_v27 }
 0x6e3   : > { %v4121_v24 = vpop.f32.mrf.mxu2  ;;  %v4258_v21 = vpop.f32.mrf.mxu3 }
 0x6e4   : > { %v4695_v4 = vadd.f32 %v4121_v24, %v2690_v13  ;;  %v4696_v15 = vadd.f32 %v4258_v21, %v2827_v56  ;;  %v3819_v55 = vpop.f32.mrf.mxu0  ;;  %v3972_v49 = vpop.f32.mrf.mxu1  ;;  %v10807_v21 = vld [vmem:[#allocation2 + $0x70] sm:$0xff] }
 0x6e5   : > { %v4699_v1 = vadd.f32 %v3819_v55, %v2388_v57  ;;  %v4700_v2 = vadd.f32 %v3972_v49, %v2541_v10  ;;  %v10858_v55 = vld [vmem:[#allocation4 + $0x3e4] sm:$0xf0]  ;;  %v10855_v49 = vld [vmem:[#allocation4 + $0x3d4] sm:$0xf] }
 0x6e6   : > { %v12496_v5 = vadd.f32 %v5108_v42, %v4695_v4  ;;  %v12498_v6 = vadd.f32 %v5109_v26, %v4696_v15  ;;  %v9531_v15 = vld [vmem:[#allocation4 + $0x3d0] sm:$0xf] }
 0x6e7   : > { %v4951_v7 = vrot.slane %v4699_v1, 7  ;;  %v4952_v37 = vrot.slane %v4700_v2, 7  ;;  %3854 = vmatmul.bf16.gmra.mxu0 %v10806_v51  ;;  %4007 = vmatmul.bf16.gmra.mxu1 %v10806_v51  ;;  %v9532_v1 = vor.u32 %v10858_v55, %v9531_v15  ;;  %v9533_v2 = vld [vmem:[#allocation4 + $0x3e8] sm:$0xf0] }
 0x6e8   : > { %4155 = vmatmul.bf16.gmra.mxu2 %v10806_v51  ;;  %4292 = vmatmul.bf16.gmra.mxu3 %v10806_v51 }
 0x6e9   : > { %v5106_v8 = vsel %vm5045_vm0, %v4949_v19, %v4951_v7  ;;  %v5107_v9 = vsel %vm5045_vm0, %v4950_v27, %v4952_v37  ;;  %v2392_v19 = vadd.f32 %v11787_v23, %v11454_v28  ;;  %v2545_v27 = vadd.f32 %v11789_v63, %v11456_v29  ;;  %4388 = vmatpush.bf16.msra.mxu0 %v9532_v1 }
 0x6ea   : > { %v9536_v28 = vor.u32 %v10855_v49, %v9533_v2  ;;  %v2394_v29 = vadd.f32 %v11795_v30, %v11458_v38  ;;  %v2547_v23 = vadd.f32 %v11797_v54, %v11460_v39  ;;  %v2698_v39 = vadd.f32 %v12167_v36, %v11462_v40 }
 0x6eb   : > { %v4124_v35 = vpop.f32.mrf.mxu2  ;;  %v4261_v42 = vpop.f32.mrf.mxu3  ;;  %v2835_v30 = vadd.f32 %v12169_v33, %v11464_v41  ;;  %v2397_v54 = vadd.f32 %v11803_v34, %v11466_v43  ;;  %v2701_v34 = vadd.f32 %v12175_v50, %v11470_v45 }
 0x6ec   : > { %v4701_v26 = vadd.f32 %v4124_v35, %v2693_v59  ;;  %v4702_v13 = vadd.f32 %v4261_v42, %v2830_v48  ;;  %v3821_v56 = vpop.f32.mrf.mxu0  ;;  %v3974_v57 = vpop.f32.mrf.mxu1  ;;  %4541 = vmatpush.bf16.msra.mxu1 %v9536_v28 }
 0x6ed   : > { %v2550_v56 = vadd.f32 %v11805_v20, %v11468_v44  ;;  %v2838_v20 = vadd.f32 %v12177_v47, %v11472_v46 }
 0x6ee   : > { %v12508_v10 = vadd.f32 %v5106_v8, %v4701_v26  ;;  %v12510_v24 = vadd.f32 %v5107_v9, %v4702_v13 }
 0x6f3   : > { %v4126_v11 = vpop.f32.mrf.mxu2  ;;  %v4263_v31 = vpop.f32.mrf.mxu3 }
 0x6f4   : > { %v3823_v12 = vpop.f32.mrf.mxu0  ;;  %v3976_v58 = vpop.f32.mrf.mxu1 }
 0x6f5   : > { %v4707_v51 = vadd.f32 %v3823_v12, %v2392_v19  ;;  %v4708_v4 = vadd.f32 %v3976_v58, %v2545_v27  ;;  %v10808_v27 = vld [vmem:[#allocation2 + $0x78] sm:$0xff] }
 0x6f7   : > { %3858 = vmatmul.bf16.gmra.mxu0 %v10807_v21  ;;  %4011 = vmatmul.bf16.gmra.mxu1 %v10807_v21  ;;  %v4953_v48 = vrot.slane %v4707_v51, 7  ;;  %v4954_v35 = vrot.slane %v4708_v4, 7 }
 0x6f8   : > { %4159 = vmatmul.bf16.gmra.mxu2 %v10807_v21  ;;  %4296 = vmatmul.bf16.gmra.mxu3 %v10807_v21 }
 0x6fb   : > { %v4128_v63 = vpop.f32.mrf.mxu2  ;;  %v4265_v7 = vpop.f32.mrf.mxu3 }
 0x6fc   : > { %v3825_v37 = vpop.f32.mrf.mxu0  ;;  %v3978_v8 = vpop.f32.mrf.mxu1  ;;  %v2554_v63 = vadd.f32 %v11813_v18, %v11477_v53  ;;  %v10809_v7 = vld [vmem:[#allocation2 + $0x80] sm:$0xff]  ;;  %v11027_v53 = vld [vmem:[%s14434_s3 + $0xb0] sm:$0xff] }
 0x6fd   : > { %v4709_v9 = vadd.f32 %v3825_v37, %v2394_v29  ;;  %v4710_v59 = vadd.f32 %v3978_v8, %v2547_v23  ;;  %v2401_v23 = vadd.f32 %v11811_v32, %v11475_v0  ;;  %v11035_v18 = vld [vmem:[%s14434_s3 + $0xf0] sm:$0xff]  ;;  %6144 = vmatpush.bf16.msra.mxu2 %v11027_v53 }
 0x6fe   : > { %6313 = vmatpush.bf16.msra.mxu3 %v11035_v18 }
 0x6ff   : > { %v4955_v42 = vrot.slane %v4709_v9, 7  ;;  %v4956_v26 = vrot.slane %v4710_v59, 7  ;;  %v2403_v9 = vadd.f32 %v11819_v52, %v11479_v61  ;;  %v14898_v59 = vld [vmem:[#allocation157_spill] sm:$0xff] }
 0x700   : > { %v2556_v0 = vadd.f32 %v14898_v59, %v11481_v62 }
 0x701   : > { %v5104_v13 = vsel %vm5045_vm0, %v4953_v48, %v4955_v42  ;;  %v5105_v38 = vsel %vm5045_vm0, %v4954_v35, %v4956_v26 }
 0x703   : > { %v4129_v57 = vpop.f32.mrf.mxu2  ;;  %v4266_v19 = vpop.f32.mrf.mxu3 }
 0x704   : > { %v4711_v11 = vadd.f32 %v4129_v57, %v2698_v39  ;;  %v4712_v31 = vadd.f32 %v4266_v19, %v2835_v30  ;;  %v3828_v21 = vpop.f32.mrf.mxu0  ;;  %v3981_v12 = vpop.f32.mrf.mxu1  ;;  %v14901_v19 = vld [vmem:[#allocation8_spill] sm:$0xff] }
 0x705   : > { %v4715_v58 = vadd.f32 %v3828_v21, %v2397_v54  ;;  %v4716_v51 = vadd.f32 %v3981_v12, %v2550_v56  ;;  %v14899_v54 = vld [vmem:[#allocation7_spill] sm:$0xff]  ;;  %v14900_v56 = vld [vmem:[#allocation332_spill] sm:$0xff] }
 0x706   : > { %v12532_v4 = vadd.f32 %v5104_v13, %v4711_v11  ;;  %v12534_v40 = vadd.f32 %v5105_v38, %v4712_v31  ;;  %v2706_v57 = vadd.f32 %v14900_v56, %v14899_v54  ;;  %v14903_v31 = vld [vmem:[#allocation9_spill] sm:$0xff]  ;;  %v14904_v21 = vld [vmem:[#allocation160_spill] sm:$0xff] }
 0x707   : > { %v4957_v41 = vrot.slane %v4715_v58, 7  ;;  %v4958_v33 = vrot.slane %v4716_v51, 7  ;;  %3863 = vmatmul.bf16.gmra.mxu0 %v10808_v27  ;;  %4016 = vmatmul.bf16.gmra.mxu1 %v10808_v27  ;;  %v2406_v12 = vadd.f32 %v14904_v21, %v14903_v31  ;;  %v14905_v58 = vld [vmem:[#allocation10_spill] sm:$0xff]  ;;  %v14906_v51 = vld [vmem:[#allocation161_spill] sm:$0xff]  ;;  %v10849_v21 = vld [vmem:[#allocation4 + $0x3a4] sm:$0xf] }
 0x708   : > { %4163 = vmatmul.bf16.gmra.mxu2 %v10808_v27  ;;  %4300 = vmatmul.bf16.gmra.mxu3 %v10808_v27  ;;  %v14902_v27 = vld [vmem:[#allocation333_spill] sm:$0xff]  ;;  %v10852_v31 = vld [vmem:[#allocation4 + $0x3b4] sm:$0xf0] }
 0x709   : > { %v5102_v43 = vsel %vm5045_vm0, %v4955_v42, %v4957_v41  ;;  %v5103_v44 = vsel %vm5045_vm0, %v4956_v26, %v4958_v33  ;;  %v2843_v11 = vadd.f32 %v14902_v27, %v14901_v19  ;;  %v2559_v41 = vadd.f32 %v14906_v51, %v14905_v58  ;;  %v10811_v54 = vld [vmem:[#allocation2 + $0x90] sm:$0xff]  ;;  %v9509_v58 = vld [vmem:[#allocation4 + $0x3b8] sm:$0xf0] }
 0x70a   : > { %v9512_v51 = vor.u32 %v10849_v21, %v9509_v58 }
 0x70b   : > { %v4132_v36 = vpop.f32.mrf.mxu2  ;;  %v4269_v15 = vpop.f32.mrf.mxu3 }
 0x70c   : > { %v4717_v55 = vadd.f32 %v4132_v36, %v2701_v34  ;;  %v4718_v49 = vadd.f32 %v4269_v15, %v2838_v20  ;;  %v3830_v1 = vpop.f32.mrf.mxu0  ;;  %v3983_v2 = vpop.f32.mrf.mxu1  ;;  %4542 = vmatpush.bf16.msra.mxu1 %v9512_v51 }
 0x70e   : > { %v12544_v28 = vadd.f32 %v5102_v43, %v4717_v55  ;;  %v12546_v29 = vadd.f32 %v5103_v44, %v4718_v49  ;;  %v10810_v44 = vld [vmem:[#allocation2 + $0x88] sm:$0xff] }
 0x713   : > { %v4134_v45 = vpop.f32.mrf.mxu2  ;;  %v4271_v50 = vpop.f32.mrf.mxu3 }
 0x714   : > { %v3832_v46 = vpop.f32.mrf.mxu0  ;;  %v3985_v47 = vpop.f32.mrf.mxu1 }
 0x715   : > { %v4723_v37 = vadd.f32 %v3832_v46, %v2401_v23  ;;  %v4724_v8 = vadd.f32 %v3985_v47, %v2554_v63  ;;  %v14908_v46 = vld [vmem:[#allocation336_spill] sm:$0xff] }
 0x717   : > { %3867 = vmatmul.bf16.gmra.mxu0 %v10809_v7  ;;  %4020 = vmatmul.bf16.gmra.mxu1 %v10809_v7  ;;  %v4959_v61 = vrot.slane %v4723_v37, 7  ;;  %v4960_v52 = vrot.slane %v4724_v8, 7  ;;  %v14909_v37 = vld [vmem:[#allocation12_spill] sm:$0xff]  ;;  %v14910_v8 = vld [vmem:[#allocation337_spill] sm:$0xff] }
 0x718   : > { %4167 = vmatmul.bf16.gmra.mxu2 %v10809_v7  ;;  %4304 = vmatmul.bf16.gmra.mxu3 %v10809_v7  ;;  %v14907_v7 = vld [vmem:[#allocation11_spill] sm:$0xff] }
 0x719   : > { %v2709_v47 = vadd.f32 %v14908_v46, %v14907_v7 }
 0x71b   : > { %v4136_v32 = vpop.f32.mrf.mxu2  ;;  %v4273_v48 = vpop.f32.mrf.mxu3 }
 0x71c   : > { %v3834_v35 = vpop.f32.mrf.mxu0  ;;  %v3987_v42 = vpop.f32.mrf.mxu1 }
 0x71d   : > { %v4725_v26 = vadd.f32 %v3834_v35, %v2403_v9  ;;  %v4726_v13 = vadd.f32 %v3987_v42, %v2556_v0  ;;  %v2846_v9 = vadd.f32 %v14910_v8, %v14909_v37  ;;  %v14919_v8 = vld [vmem:[#allocation17_spill] sm:$0xff] }
 0x71f   : > { %v4961_v38 = vrot.slane %v4725_v26, 7  ;;  %v4962_v62 = vrot.slane %v4726_v13, 7  ;;  %v14911_v26 = vld [vmem:[#allocation13_spill] sm:$0xff]  ;;  %v14912_v13 = vld [vmem:[#allocation164_spill] sm:$0xff] }
 0x721   : > { %v5100_v39 = vsel %vm5045_vm0, %v4959_v61, %v4961_v38  ;;  %v5101_v30 = vsel %vm5045_vm0, %v4960_v52, %v4962_v62  ;;  %v2410_v61 = vadd.f32 %v14912_v13, %v14911_v26  ;;  %v14913_v52 = vld [vmem:[#allocation14_spill] sm:$0xff]  ;;  %v14925_v13 = vld [vmem:[#allocation20_spill] sm:$0xff] }
 0x723   : > { %v4137_v33 = vpop.f32.mrf.mxu2  ;;  %v4274_v43 = vpop.f32.mrf.mxu3 }
 0x724   : > { %v4727_v34 = vadd.f32 %v4137_v33, %v2706_v57  ;;  %v4728_v20 = vadd.f32 %v4274_v43, %v2843_v11  ;;  %v3837_v36 = vpop.f32.mrf.mxu0  ;;  %v3990_v15 = vpop.f32.mrf.mxu1  ;;  %v9507_v11 = vld [vmem:[#allocation4 + $0x3a0] sm:$0xf]  ;;  %v14916_v33 = vld [vmem:[#allocation168_spill] sm:$0xff] }
 0x725   : > { %v4731_v55 = vadd.f32 %v3837_v36, %v2406_v12  ;;  %v4732_v49 = vadd.f32 %v3990_v15, %v2559_v41  ;;  %v9508_v12 = vor.u32 %v10852_v31, %v9507_v11  ;;  %v14915_v41 = vld [vmem:[#allocation15_spill] sm:$0xff] }
 0x726   : > { %v12574_v1 = vadd.f32 %v5100_v39, %v4727_v34  ;;  %v12576_v2 = vadd.f32 %v5101_v30, %v4728_v20  ;;  %v2412_v43 = vadd.f32 %v14916_v33, %v14915_v41  ;;  %v14918_v34 = vld [vmem:[#allocation169_spill] sm:$0xff]  ;;  %v14928_v33 = vld [vmem:[#allocation346_spill] sm:$0xff] }
 0x727   : > { %v4963_v23 = vrot.slane %v4731_v55, 7  ;;  %v4964_v63 = vrot.slane %v4732_v49, 7  ;;  %3872 = vmatmul.bf16.gmra.mxu0 %v10810_v44  ;;  %4025 = vmatmul.bf16.gmra.mxu1 %v10810_v44  ;;  %v14927_v41 = vld [vmem:[#allocation21_spill] sm:$0xff] }
 0x728   : > { %4171 = vmatmul.bf16.gmra.mxu2 %v10810_v44  ;;  %4308 = vmatmul.bf16.gmra.mxu3 %v10810_v44  ;;  %v14917_v44 = vld [vmem:[#allocation16_spill] sm:$0xff] }
 0x729   : > { %v5098_v45 = vsel %vm5045_vm0, %v4961_v38, %v4963_v23  ;;  %v5099_v50 = vsel %vm5045_vm0, %v4962_v62, %v4964_v63  ;;  %v14914_v38 = vld [vmem:[#allocation165_spill] sm:$0xff]  ;;  %v2565_v20 = vadd.f32 %v14918_v34, %v14917_v44  ;;  %4389 = vmatpush.bf16.msra.mxu0 %v9508_v12  ;;  %v14929_v44 = vld [vmem:[#allocation22_spill] sm:$0xff]  ;;  %v14930_v34 = vld [vmem:[#allocation347_spill] sm:$0xff] }
 0x72a   : > { %v2563_v62 = vadd.f32 %v14914_v38, %v14913_v52 }
 0x72b   : > { %v4140_v59 = vpop.f32.mrf.mxu2  ;;  %v4277_v0 = vpop.f32.mrf.mxu3 }
 0x72c   : > { %v4733_v32 = vadd.f32 %v4140_v59, %v2709_v47  ;;  %v4734_v48 = vadd.f32 %v4277_v0, %v2846_v9  ;;  %v3839_v53 = vpop.f32.mrf.mxu0  ;;  %v3992_v18 = vpop.f32.mrf.mxu1  ;;  %v14920_v9 = vld [vmem:[#allocation342_spill] sm:$0xff] }
 0x72d   : > { %v2714_v59 = vadd.f32 %v14920_v9, %v14919_v8  ;;  %v14921_v0 = vld [vmem:[#allocation18_spill] sm:$0xff]  ;;  %v14923_v53 = vld [vmem:[#allocation19_spill] sm:$0xff]  ;;  %v14924_v18 = vld [vmem:[#allocation172_spill] sm:$0xff] }
 0x72e   : > { %v12586_v35 = vadd.f32 %v5098_v45, %v4733_v32  ;;  %v12588_v42 = vadd.f32 %v5099_v50, %v4734_v48  ;;  %v14922_v32 = vld [vmem:[#allocation343_spill] sm:$0xff]  ;;  %v2415_v26 = vadd.f32 %v14924_v18, %v14923_v53  ;;  %v14934_v8 = vld [vmem:[#allocation177_spill] sm:$0xff] }
 0x72f   : > { %v2851_v48 = vadd.f32 %v14922_v32, %v14921_v0  ;;  %v10813_v32 = vld [vmem:[#allocation2 + $0xa0] sm:$0xff] }
 0x733   : > { %v4142_v39 = vpop.f32.mrf.mxu2  ;;  %v4279_v30 = vpop.f32.mrf.mxu3 }
 0x734   : > { %v3841_v56 = vpop.f32.mrf.mxu0  ;;  %v3994_v57 = vpop.f32.mrf.mxu1  ;;  %v10812_v39 = vld [vmem:[#allocation2 + $0x98] sm:$0xff] }
 0x735   : > { %v4739_v19 = vadd.f32 %v3841_v56, %v2410_v61  ;;  %v4740_v27 = vadd.f32 %v3994_v57, %v2563_v62  ;;  %v14926_v61 = vld [vmem:[#allocation173_spill] sm:$0xff] }
 0x736   : > { %v2568_v52 = vadd.f32 %v14926_v61, %v14925_v13  ;;  %v14935_v13 = vld [vmem:[#allocation25_spill] sm:$0xff]  ;;  %v14936_v61 = vld [vmem:[#allocation180_spill] sm:$0xff] }
 0x737   : > { %3876 = vmatmul.bf16.gmra.mxu0 %v10811_v54  ;;  %4029 = vmatmul.bf16.gmra.mxu1 %v10811_v54  ;;  %v4965_v45 = vrot.slane %v4739_v19, 7  ;;  %v4966_v50 = vrot.slane %v4740_v27, 7 }
 0x738   : > { %4175 = vmatmul.bf16.gmra.mxu2 %v10811_v54  ;;  %4312 = vmatmul.bf16.gmra.mxu3 %v10811_v54 }
 0x73b   : > { %v4144_v36 = vpop.f32.mrf.mxu2  ;;  %v4281_v15 = vpop.f32.mrf.mxu3 }
 0x73c   : > { %v3843_v55 = vpop.f32.mrf.mxu0  ;;  %v3996_v49 = vpop.f32.mrf.mxu1 }
 0x73d   : > { %v4741_v23 = vadd.f32 %v3843_v55, %v2412_v43  ;;  %v4742_v63 = vadd.f32 %v3996_v49, %v2565_v20  ;;  %v2717_v43 = vadd.f32 %v14928_v33, %v14927_v41  ;;  %v2854_v20 = vadd.f32 %v14930_v34, %v14929_v44  ;;  %v14939_v34 = vld [vmem:[#allocation27_spill] sm:$0xff] }
 0x73f   : > { %v4967_v7 = vrot.slane %v4741_v23, 7  ;;  %v4968_v46 = vrot.slane %v4742_v63, 7 }
 0x741   : > { %v5096_v47 = vsel %vm5045_vm0, %v4965_v45, %v4967_v7  ;;  %v5097_v37 = vsel %vm5045_vm0, %v4966_v50, %v4968_v46 }
 0x743   : > { %v4145_v38 = vpop.f32.mrf.mxu2  ;;  %v4282_v62 = vpop.f32.mrf.mxu3 }
 0x744   : > { %v4743_v30 = vadd.f32 %v4145_v38, %v2714_v59  ;;  %v4744_v54 = vadd.f32 %v4282_v62, %v2851_v48  ;;  %v3846_v56 = vpop.f32.mrf.mxu0  ;;  %v3999_v57 = vpop.f32.mrf.mxu1  ;;  %v14937_v38 = vld [vmem:[#allocation26_spill] sm:$0xff]  ;;  %v14938_v62 = vld [vmem:[#allocation181_spill] sm:$0xff] }
 0x745   : > { %v4747_v19 = vadd.f32 %v3846_v56, %v2415_v26  ;;  %v4748_v27 = vadd.f32 %v3999_v57, %v2568_v52  ;;  %v2421_v52 = vadd.f32 %v14936_v61, %v14935_v13  ;;  %v11026_v56 = vld [vmem:[%s14434_s3 + $0xa8] sm:$0xff] }
 0x746   : > { %v12610_v11 = vadd.f32 %v5096_v47, %v4743_v30  ;;  %v12612_v31 = vadd.f32 %v5097_v37, %v4744_v54  ;;  %v14932_v47 = vld [vmem:[#allocation176_spill] sm:$0xff]  ;;  %6145 = vmatpush.bf16.msra.mxu2 %v11026_v56 }
 0x747   : > { %v4969_v21 = vrot.slane %v4747_v19, 7  ;;  %v4970_v12 = vrot.slane %v4748_v27, 7  ;;  %3881 = vmatmul.bf16.gmra.mxu0 %v10812_v39  ;;  %4034 = vmatmul.bf16.gmra.mxu1 %v10812_v39  ;;  %v11034_v57 = vld [vmem:[%s14434_s3 + $0xe8] sm:$0xff] }
 0x748   : > { %4179 = vmatmul.bf16.gmra.mxu2 %v10812_v39  ;;  %4316 = vmatmul.bf16.gmra.mxu3 %v10812_v39  ;;  %v2574_v39 = vadd.f32 %v14938_v62, %v14937_v38 }
 0x749   : > { %v5094_v58 = vsel %vm5045_vm0, %v4967_v7, %v4969_v21  ;;  %v5095_v51 = vsel %vm5045_vm0, %v4968_v46, %v4970_v12  ;;  %v14931_v7 = vld [vmem:[#allocation23_spill] sm:$0xff]  ;;  %v14933_v46 = vld [vmem:[#allocation24_spill] sm:$0xff]  ;;  %6314 = vmatpush.bf16.msra.mxu3 %v11034_v57 }
 0x74a   : > { %v2419_v37 = vadd.f32 %v14932_v47, %v14931_v7  ;;  %v2572_v9 = vadd.f32 %v14934_v8, %v14933_v46  ;;  %v14945_v47 = vld [vmem:[#allocation30_spill] sm:$0xff]  ;;  %v14949_v57 = vld [vmem:[#allocation32_spill] sm:$0xff] }
 0x74b   : > { %v4148_v36 = vpop.f32.mrf.mxu2  ;;  %v4285_v15 = vpop.f32.mrf.mxu3 }
 0x74c   : > { %v4749_v55 = vadd.f32 %v4148_v36, %v2717_v43  ;;  %v4750_v49 = vadd.f32 %v4285_v15, %v2854_v20  ;;  %v3848_v23 = vpop.f32.mrf.mxu0  ;;  %v4001_v63 = vpop.f32.mrf.mxu1  ;;  %v14940_v20 = vld [vmem:[#allocation352_spill] sm:$0xff] }
 0x74d   : > { %v2722_v36 = vadd.f32 %v14940_v20, %v14939_v34  ;;  %v14941_v15 = vld [vmem:[#allocation28_spill] sm:$0xff]  ;;  %v14943_v23 = vld [vmem:[#allocation29_spill] sm:$0xff] }
 0x74e   : > { %v12622_v45 = vadd.f32 %v5094_v58, %v4749_v55  ;;  %v12624_v50 = vadd.f32 %v5095_v51, %v4750_v49  ;;  %v14942_v55 = vld [vmem:[#allocation353_spill] sm:$0xff]  ;;  %v14944_v63 = vld [vmem:[#allocation184_spill] sm:$0xff] }
 0x74f   : > { %v2859_v49 = vadd.f32 %v14942_v55, %v14941_v15  ;;  %v2424_v7 = vadd.f32 %v14944_v63, %v14943_v23  ;;  %v14954_v55 = vld [vmem:[#allocation189_spill] sm:$0xff] }
 0x753   : > { %v4150_v59 = vpop.f32.mrf.mxu2  ;;  %v4287_v0 = vpop.f32.mrf.mxu3 }
 0x754   : > { %v3850_v48 = vpop.f32.mrf.mxu0  ;;  %v4003_v53 = vpop.f32.mrf.mxu1  ;;  %v10814_v59 = vld [vmem:[#allocation2 + $0xa8] sm:$0xff] }
 0x755   : > { %v4755_v18 = vadd.f32 %v3850_v48, %v2419_v37  ;;  %v4756_v26 = vadd.f32 %v4003_v53, %v2572_v9  ;;  %v14946_v37 = vld [vmem:[#allocation185_spill] sm:$0xff] }
 0x756   : > { %v2577_v46 = vadd.f32 %v14946_v37, %v14945_v47 }
 0x757   : > { %3885 = vmatmul.bf16.gmra.mxu0 %v10813_v32  ;;  %4038 = vmatmul.bf16.gmra.mxu1 %v10813_v32  ;;  %v4971_v58 = vrot.slane %v4755_v18, 7  ;;  %v4972_v51 = vrot.slane %v4756_v26, 7 }
 0x758   : > { %4183 = vmatmul.bf16.gmra.mxu2 %v10813_v32  ;;  %4320 = vmatmul.bf16.gmra.mxu3 %v10813_v32 }
 0x75b   : > { %v4152_v30 = vpop.f32.mrf.mxu2  ;;  %v4289_v54 = vpop.f32.mrf.mxu3 }
 0x75c   : > { %v3852_v19 = vpop.f32.mrf.mxu0  ;;  %v4005_v27 = vpop.f32.mrf.mxu1  ;;  %v14947_v30 = vld [vmem:[#allocation31_spill] sm:$0xff]  ;;  %v14948_v54 = vld [vmem:[#allocation356_spill] sm:$0xff] }
 0x75d   : > { %v4757_v21 = vadd.f32 %v3852_v19, %v2421_v52  ;;  %v4758_v12 = vadd.f32 %v4005_v27, %v2574_v39  ;;  %v2725_v56 = vadd.f32 %v14948_v54, %v14947_v30  ;;  %v14950_v19 = vld [vmem:[#allocation357_spill] sm:$0xff] }
 0x75e   : > { %v2862_v27 = vadd.f32 %v14950_v19, %v14949_v57 }
 0x75f   : > { %v4973_v41 = vrot.slane %v4757_v21, 7  ;;  %v4974_v33 = vrot.slane %v4758_v12, 7 }
 0x761   : > { %v5092_v43 = vsel %vm5045_vm0, %v4971_v58, %v4973_v41  ;;  %v5093_v44 = vsel %vm5045_vm0, %v4972_v51, %v4974_v33 }
 0x763   : > { %v4153_v8 = vpop.f32.mrf.mxu2  ;;  %v4290_v9 = vpop.f32.mrf.mxu3 }
 0x764   : > { %v4759_v0 = vadd.f32 %v4153_v8, %v2722_v36  ;;  %v4760_v32 = vadd.f32 %v4290_v9, %v2859_v49  ;;  %v3855_v48 = vpop.f32.mrf.mxu0  ;;  %v4008_v53 = vpop.f32.mrf.mxu1  ;;  %v14952_v36 = vld [vmem:[#allocation188_spill] sm:$0xff]  ;;  %v9483_v9 = vld [vmem:[#allocation4 + $0x370] sm:$0xf] }
 0x765   : > { %v4763_v18 = vadd.f32 %v3855_v48, %v2424_v7  ;;  %v4764_v26 = vadd.f32 %v4008_v53, %v2577_v46  ;;  %v10815_v7 = vld [vmem:[#allocation2 + $0xb0] sm:$0xff]  ;;  %v9485_v48 = vld [vmem:[#allocation4 + $0x388] sm:$0xf0] }
 0x766   : > { %v12652_v13 = vadd.f32 %v5092_v43, %v4759_v0  ;;  %v12654_v61 = vadd.f32 %v5093_v44, %v4760_v32  ;;  %v10843_v0 = vld [vmem:[#allocation4 + $0x374] sm:$0xf] }
 0x767   : > { %v4975_v52 = vrot.slane %v4763_v18, 7  ;;  %v4976_v38 = vrot.slane %v4764_v26, 7  ;;  %3890 = vmatmul.bf16.gmra.mxu0 %v10814_v59  ;;  %4043 = vmatmul.bf16.gmra.mxu1 %v10814_v59  ;;  %v9488_v53 = vor.u32 %v10843_v0, %v9485_v48  ;;  %v14955_v18 = vld [vmem:[#allocation35_spill] sm:$0xff]  ;;  %v14956_v26 = vld [vmem:[#allocation192_spill] sm:$0xff] }
 0x768   : > { %4187 = vmatmul.bf16.gmra.mxu2 %v10814_v59  ;;  %4324 = vmatmul.bf16.gmra.mxu3 %v10814_v59  ;;  %v10846_v59 = vld [vmem:[#allocation4 + $0x384] sm:$0xf0] }
 0x769   : > { %v5090_v62 = vsel %vm5045_vm0, %v4973_v41, %v4975_v52  ;;  %v5091_v39 = vsel %vm5045_vm0, %v4974_v33, %v4976_v38  ;;  %v14951_v41 = vld [vmem:[#allocation33_spill] sm:$0xff]  ;;  %v14953_v33 = vld [vmem:[#allocation34_spill] sm:$0xff]  ;;  %v9484_v32 = vor.u32 %v10846_v59, %v9483_v9  ;;  %v2430_v52 = vadd.f32 %v14956_v26, %v14955_v18  ;;  %v14957_v38 = vld [vmem:[#allocation36_spill] sm:$0xff]  ;;  %4543 = vmatpush.bf16.msra.mxu1 %v9488_v53 }
 0x76a   : > { %v2428_v15 = vadd.f32 %v14952_v36, %v14951_v41  ;;  %v2581_v49 = vadd.f32 %v14954_v55, %v14953_v33  ;;  %v14959_v41 = vld [vmem:[#allocation37_spill] sm:$0xff]  ;;  %v14960_v36 = vld [vmem:[#allocation362_spill] sm:$0xff]  ;;  %v14962_v55 = vld [vmem:[#allocation363_spill] sm:$0xff] }
 0x76b   : > { %v4156_v21 = vpop.f32.mrf.mxu2  ;;  %v4293_v12 = vpop.f32.mrf.mxu3  ;;  %4390 = vmatpush.bf16.msra.mxu0 %v9484_v32  ;;  %v14961_v33 = vld [vmem:[#allocation38_spill] sm:$0xff] }
 0x76c   : > { %v4765_v58 = vadd.f32 %v4156_v21, %v2725_v56  ;;  %v4766_v51 = vadd.f32 %v4293_v12, %v2862_v27  ;;  %v3857_v43 = vpop.f32.mrf.mxu0  ;;  %v4010_v44 = vpop.f32.mrf.mxu1  ;;  %v10816_v59 = vld [vmem:[#allocation2 + $0xb8] sm:$0xff] }
 0x76e   : > { %v12664_v34 = vadd.f32 %v5090_v62, %v4765_v58  ;;  %v12666_v20 = vadd.f32 %v5091_v39, %v4766_v51  ;;  %v14958_v62 = vld [vmem:[#allocation193_spill] sm:$0xff] }
 0x76f   : > { %v2583_v39 = vadd.f32 %v14958_v62, %v14957_v38 }
 0x773   : > { %v4158_v23 = vpop.f32.mrf.mxu2  ;;  %v4295_v63 = vpop.f32.mrf.mxu3 }
 0x774   : > { %v3859_v47 = vpop.f32.mrf.mxu0  ;;  %v4012_v37 = vpop.f32.mrf.mxu1  ;;  %v14963_v23 = vld [vmem:[#allocation39_spill] sm:$0xff]  ;;  %v14964_v63 = vld [vmem:[#allocation196_spill] sm:$0xff] }
 0x775   : > { %v4771_v46 = vadd.f32 %v3859_v47, %v2428_v15  ;;  %v4772_v8 = vadd.f32 %v4012_v37, %v2581_v49  ;;  %v2730_v15 = vadd.f32 %v14960_v36, %v14959_v41  ;;  %v2867_v49 = vadd.f32 %v14962_v55, %v14961_v33  ;;  %v14965_v47 = vld [vmem:[#allocation40_spill] sm:$0xff]  ;;  %v14966_v37 = vld [vmem:[#allocation197_spill] sm:$0xff] }
 0x777   : > { %3894 = vmatmul.bf16.gmra.mxu0 %v10815_v7  ;;  %4047 = vmatmul.bf16.gmra.mxu1 %v10815_v7  ;;  %v4977_v21 = vrot.slane %v4771_v46, 7  ;;  %v4978_v12 = vrot.slane %v4772_v8, 7  ;;  %v2586_v46 = vadd.f32 %v14966_v37, %v14965_v47 }
 0x778   : > { %4191 = vmatmul.bf16.gmra.mxu2 %v10815_v7  ;;  %4328 = vmatmul.bf16.gmra.mxu3 %v10815_v7  ;;  %v2433_v7 = vadd.f32 %v14964_v63, %v14963_v23  ;;  %v14972_v23 = vld [vmem:[#allocation200_spill] sm:$0xff] }
 0x77b   : > { %v4160_v30 = vpop.f32.mrf.mxu2  ;;  %v4297_v54 = vpop.f32.mrf.mxu3 }
 0x77c   : > { %v3861_v56 = vpop.f32.mrf.mxu0  ;;  %v4014_v57 = vpop.f32.mrf.mxu1 }
 0x77d   : > { %v4773_v19 = vadd.f32 %v3861_v56, %v2430_v52  ;;  %v4774_v27 = vadd.f32 %v4014_v57, %v2583_v39  ;;  %v14967_v56 = vld [vmem:[#allocation41_spill] sm:$0xff]  ;;  %v14968_v57 = vld [vmem:[#allocation366_spill] sm:$0xff] }
 0x77f   : > { %v4979_v58 = vrot.slane %v4773_v19, 7  ;;  %v4980_v51 = vrot.slane %v4774_v27, 7  ;;  %v2733_v19 = vadd.f32 %v14968_v57, %v14967_v56  ;;  %v14969_v27 = vld [vmem:[#allocation42_spill] sm:$0xff]  ;;  %v11025_v56 = vld [vmem:[%s14434_s3 + $0xa0] sm:$0xff] }
 0x780   : > { %v11033_v57 = vld [vmem:[%s14434_s3 + $0xe0] sm:$0xff]  ;;  %6146 = vmatpush.bf16.msra.mxu2 %v11025_v56 }
 0x781   : > { %v5088_v43 = vsel %vm5045_vm0, %v4977_v21, %v4979_v58  ;;  %v5089_v44 = vsel %vm5045_vm0, %v4978_v12, %v4980_v51  ;;  %v14970_v21 = vld [vmem:[#allocation367_spill] sm:$0xff]  ;;  %6315 = vmatpush.bf16.msra.mxu3 %v11033_v57 }
 0x782   : > { %v2870_v12 = vadd.f32 %v14970_v21, %v14969_v27 }
 0x783   : > { %v4161_v8 = vpop.f32.mrf.mxu2  ;;  %v4298_v9 = vpop.f32.mrf.mxu3 }
 0x784   : > { %v4775_v0 = vadd.f32 %v4161_v8, %v2730_v15  ;;  %v4776_v32 = vadd.f32 %v4298_v9, %v2867_v49  ;;  %v3864_v48 = vpop.f32.mrf.mxu0  ;;  %v4017_v53 = vpop.f32.mrf.mxu1  ;;  %v10817_v8 = vld [vmem:[#allocation2 + $0xc0] sm:$0xff] }
 0x785   : > { %v4779_v18 = vadd.f32 %v3864_v48, %v2433_v7  ;;  %v4780_v26 = vadd.f32 %v4017_v53, %v2586_v46  ;;  %v14974_v7 = vld [vmem:[#allocation201_spill] sm:$0xff]  ;;  %v14976_v53 = vld [vmem:[#allocation204_spill] sm:$0xff] }
 0x786   : > { %v12688_v52 = vadd.f32 %v5088_v43, %v4775_v0  ;;  %v12690_v38 = vadd.f32 %v5089_v44, %v4776_v32  ;;  %v14975_v48 = vld [vmem:[#allocation45_spill] sm:$0xff] }
 0x787   : > { %v4981_v62 = vrot.slane %v4779_v18, 7  ;;  %v4982_v39 = vrot.slane %v4780_v26, 7  ;;  %3899 = vmatmul.bf16.gmra.mxu0 %v10816_v59  ;;  %4052 = vmatmul.bf16.gmra.mxu1 %v10816_v59  ;;  %v2439_v18 = vadd.f32 %v14976_v53, %v14975_v48  ;;  %v14977_v26 = vld [vmem:[#allocation46_spill] sm:$0xff]  ;;  %v10818_v53 = vld [vmem:[#allocation2 + $0xc8] sm:$0xff] }
 0x788   : > { %4195 = vmatmul.bf16.gmra.mxu2 %v10816_v59  ;;  %4332 = vmatmul.bf16.gmra.mxu3 %v10816_v59 }
 0x789   : > { %v5086_v30 = vsel %vm5045_vm0, %v4979_v58, %v4981_v62  ;;  %v5087_v54 = vsel %vm5045_vm0, %v4980_v51, %v4982_v39  ;;  %v14971_v58 = vld [vmem:[#allocation43_spill] sm:$0xff]  ;;  %v14973_v51 = vld [vmem:[#allocation44_spill] sm:$0xff]  ;;  %v14978_v62 = vld [vmem:[#allocation205_spill] sm:$0xff] }
 0x78a   : > { %v2437_v63 = vadd.f32 %v14972_v23, %v14971_v58  ;;  %v2590_v47 = vadd.f32 %v14974_v7, %v14973_v51  ;;  %v2592_v39 = vadd.f32 %v14978_v62, %v14977_v26  ;;  %v14979_v58 = vld [vmem:[#allocation47_spill] sm:$0xff]  ;;  %v14980_v23 = vld [vmem:[#allocation372_spill] sm:$0xff]  ;;  %v14982_v7 = vld [vmem:[#allocation373_spill] sm:$0xff] }
 0x78b   : > { %v4164_v43 = vpop.f32.mrf.mxu2  ;;  %v4301_v44 = vpop.f32.mrf.mxu3  ;;  %v14981_v51 = vld [vmem:[#allocation48_spill] sm:$0xff] }
 0x78c   : > { %v4781_v41 = vadd.f32 %v4164_v43, %v2733_v19  ;;  %v4782_v36 = vadd.f32 %v4301_v44, %v2870_v12  ;;  %v3866_v15 = vpop.f32.mrf.mxu0  ;;  %v4019_v33 = vpop.f32.mrf.mxu1 }
 0x78e   : > { %v12700_v55 = vadd.f32 %v5086_v30, %v4781_v41  ;;  %v12702_v49 = vadd.f32 %v5087_v54, %v4782_v36 }
 0x793   : > { %v4166_v37 = vpop.f32.mrf.mxu2  ;;  %v4303_v46 = vpop.f32.mrf.mxu3 }
 0x794   : > { %v3868_v9 = vpop.f32.mrf.mxu0  ;;  %v4021_v59 = vpop.f32.mrf.mxu1  ;;  %v14983_v37 = vld [vmem:[#allocation49_spill] sm:$0xff]  ;;  %v14984_v46 = vld [vmem:[#allocation208_spill] sm:$0xff] }
 0x795   : > { %v4787_v0 = vadd.f32 %v3868_v9, %v2437_v63  ;;  %v4788_v32 = vadd.f32 %v4021_v59, %v2590_v47  ;;  %v2738_v63 = vadd.f32 %v14980_v23, %v14979_v58  ;;  %v2875_v47 = vadd.f32 %v14982_v7, %v14981_v51  ;;  %v14985_v9 = vld [vmem:[#allocation50_spill] sm:$0xff]  ;;  %v14986_v59 = vld [vmem:[#allocation209_spill] sm:$0xff]  ;;  %v14989_v23 = vld [vmem:[#allocation52_spill] sm:$0xff] }
 0x797   : > { %3903 = vmatmul.bf16.gmra.mxu0 %v10817_v8  ;;  %4056 = vmatmul.bf16.gmra.mxu1 %v10817_v8  ;;  %v4983_v43 = vrot.slane %v4787_v0, 7  ;;  %v4984_v44 = vrot.slane %v4788_v32, 7  ;;  %v2595_v0 = vadd.f32 %v14986_v59, %v14985_v9  ;;  %v14992_v59 = vld [vmem:[#allocation212_spill] sm:$0xff] }
 0x798   : > { %4199 = vmatmul.bf16.gmra.mxu2 %v10817_v8  ;;  %4336 = vmatmul.bf16.gmra.mxu3 %v10817_v8  ;;  %v2442_v8 = vadd.f32 %v14984_v46, %v14983_v37 }
 0x79b   : > { %v4168_v30 = vpop.f32.mrf.mxu2  ;;  %v4305_v54 = vpop.f32.mrf.mxu3 }
 0x79c   : > { %v3870_v19 = vpop.f32.mrf.mxu0  ;;  %v4023_v27 = vpop.f32.mrf.mxu1 }
 0x79d   : > { %v4789_v21 = vadd.f32 %v3870_v19, %v2439_v18  ;;  %v4790_v12 = vadd.f32 %v4023_v27, %v2592_v39 }
 0x79f   : > { %v4985_v41 = vrot.slane %v4789_v21, 7  ;;  %v4986_v36 = vrot.slane %v4790_v12, 7 }
 0x7a1   : > { %v5084_v15 = vsel %vm5045_vm0, %v4983_v43, %v4985_v41  ;;  %v5085_v33 = vsel %vm5045_vm0, %v4984_v44, %v4986_v36  ;;  %v14987_v43 = vld [vmem:[#allocation51_spill] sm:$0xff]  ;;  %v14988_v44 = vld [vmem:[#allocation376_spill] sm:$0xff] }
 0x7a2   : > { %v2741_v58 = vadd.f32 %v14988_v44, %v14987_v43  ;;  %v9461_v43 = vld [vmem:[#allocation4 + $0x358] sm:$0xf0] }
 0x7a3   : > { %v4169_v32 = vpop.f32.mrf.mxu2  ;;  %v4306_v48 = vpop.f32.mrf.mxu3 }
 0x7a4   : > { %v4791_v18 = vadd.f32 %v4169_v32, %v2738_v63  ;;  %v4792_v26 = vadd.f32 %v4306_v48, %v2875_v47  ;;  %v3873_v62 = vpop.f32.mrf.mxu0  ;;  %v4026_v39 = vpop.f32.mrf.mxu1  ;;  %v14994_v32 = vld [vmem:[#allocation213_spill] sm:$0xff] }
 0x7a5   : > { %v4795_v30 = vadd.f32 %v3873_v62, %v2442_v8  ;;  %v4796_v54 = vadd.f32 %v4026_v39, %v2595_v0 }
 0x7a6   : > { %v12730_v56 = vadd.f32 %v5084_v15, %v4791_v18  ;;  %v12732_v57 = vadd.f32 %v5085_v33, %v4792_v26  ;;  %v14990_v15 = vld [vmem:[#allocation377_spill] sm:$0xff] }
 0x7a7   : > { %v4987_v19 = vrot.slane %v4795_v30, 7  ;;  %v4988_v27 = vrot.slane %v4796_v54, 7  ;;  %3908 = vmatmul.bf16.gmra.mxu0 %v10818_v53  ;;  %4061 = vmatmul.bf16.gmra.mxu1 %v10818_v53  ;;  %v2878_v63 = vadd.f32 %v14990_v15, %v14989_v23  ;;  %v10819_v26 = vld [vmem:[#allocation2 + $0xd0] sm:$0xff]  ;;  %v14996_v23 = vld [vmem:[#allocation216_spill] sm:$0xff] }
 0x7a8   : > { %4203 = vmatmul.bf16.gmra.mxu2 %v10818_v53  ;;  %4340 = vmatmul.bf16.gmra.mxu3 %v10818_v53 }
 0x7a9   : > { %v5082_v21 = vsel %vm5045_vm0, %v4985_v41, %v4987_v19  ;;  %v5083_v12 = vsel %vm5045_vm0, %v4986_v36, %v4988_v27  ;;  %v14991_v41 = vld [vmem:[#allocation53_spill] sm:$0xff]  ;;  %v14993_v36 = vld [vmem:[#allocation54_spill] sm:$0xff]  ;;  %v9459_v19 = vld [vmem:[#allocation4 + $0x340] sm:$0xf] }
 0x7aa   : > { %v2446_v0 = vadd.f32 %v14992_v59, %v14991_v41  ;;  %v2599_v48 = vadd.f32 %v14994_v32, %v14993_v36  ;;  %v10840_v27 = vld [vmem:[#allocation4 + $0x354] sm:$0xf0] }
 0x7ab   : > { %v4172_v33 = vpop.f32.mrf.mxu2  ;;  %v4309_v51 = vpop.f32.mrf.mxu3 }
 0x7ac   : > { %v4797_v7 = vadd.f32 %v4172_v33, %v2741_v58  ;;  %v4798_v47 = vadd.f32 %v4309_v51, %v2878_v63  ;;  %v3875_v37 = vpop.f32.mrf.mxu0  ;;  %v4028_v46 = vpop.f32.mrf.mxu1  ;;  %v14995_v58 = vld [vmem:[#allocation55_spill] sm:$0xff]  ;;  %v14997_v63 = vld [vmem:[#allocation56_spill] sm:$0xff]  ;;  %v14998_v33 = vld [vmem:[#allocation217_spill] sm:$0xff] }
 0x7ad   : > { %v2448_v15 = vadd.f32 %v14996_v23, %v14995_v58  ;;  %v2601_v51 = vadd.f32 %v14998_v33, %v14997_v63  ;;  %v15005_v58 = vld [vmem:[#allocation60_spill] sm:$0xff]  ;;  %v10820_v63 = vld [vmem:[#allocation2 + $0xd8] sm:$0xff] }
 0x7ae   : > { %v12742_v8 = vadd.f32 %v5082_v21, %v4797_v7  ;;  %v12744_v9 = vadd.f32 %v5083_v12, %v4798_v47  ;;  %v10837_v21 = vld [vmem:[#allocation4 + $0x344] sm:$0xf]  ;;  %v9460_v12 = vor.u32 %v10840_v27, %v9459_v19  ;;  %v15001_v19 = vld [vmem:[#allocation58_spill] sm:$0xff] }
 0x7af   : > { %v9464_v44 = vor.u32 %v10837_v21, %v9461_v43  ;;  %v15002_v27 = vld [vmem:[#allocation383_spill] sm:$0xff]  ;;  %v15004_v43 = vld [vmem:[#allocation220_spill] sm:$0xff] }
 0x7b0   : > { %4391 = vmatpush.bf16.msra.mxu0 %v9460_v12  ;;  %v2883_v21 = vadd.f32 %v15002_v27, %v15001_v19  ;;  %v15003_v12 = vld [vmem:[#allocation59_spill] sm:$0xff]  ;;  %v15008_v19 = vld [vmem:[#allocation386_spill] sm:$0xff] }
 0x7b1   : > { %4544 = vmatpush.bf16.msra.mxu1 %v9464_v44  ;;  %v2451_v44 = vadd.f32 %v15004_v43, %v15003_v12 }
 0x7b3   : > { %v4174_v53 = vpop.f32.mrf.mxu2  ;;  %v4311_v18 = vpop.f32.mrf.mxu3 }
 0x7b4   : > { %v3877_v62 = vpop.f32.mrf.mxu0  ;;  %v4030_v39 = vpop.f32.mrf.mxu1 }
 0x7b5   : > { %v4803_v30 = vadd.f32 %v3877_v62, %v2446_v0  ;;  %v4804_v54 = vadd.f32 %v4030_v39, %v2599_v48  ;;  %v15000_v62 = vld [vmem:[#allocation382_spill] sm:$0xff] }
 0x7b7   : > { %3912 = vmatmul.bf16.gmra.mxu0 %v10819_v26  ;;  %4065 = vmatmul.bf16.gmra.mxu1 %v10819_v26  ;;  %v4989_v0 = vrot.slane %v4803_v30, 7  ;;  %v4990_v36 = vrot.slane %v4804_v54, 7  ;;  %v15006_v30 = vld [vmem:[#allocation221_spill] sm:$0xff] }
 0x7b8   : > { %4207 = vmatmul.bf16.gmra.mxu2 %v10819_v26  ;;  %4344 = vmatmul.bf16.gmra.mxu3 %v10819_v26  ;;  %v14999_v26 = vld [vmem:[#allocation57_spill] sm:$0xff]  ;;  %v2604_v54 = vadd.f32 %v15006_v30, %v15005_v58 }
 0x7b9   : > { %v2746_v39 = vadd.f32 %v15000_v62, %v14999_v26 }
 0x7bb   : > { %v4176_v7 = vpop.f32.mrf.mxu2  ;;  %v4313_v47 = vpop.f32.mrf.mxu3 }
 0x7bc   : > { %v3879_v37 = vpop.f32.mrf.mxu0  ;;  %v4032_v46 = vpop.f32.mrf.mxu1 }
 0x7bd   : > { %v4805_v41 = vadd.f32 %v3879_v37, %v2448_v15  ;;  %v4806_v59 = vadd.f32 %v4032_v46, %v2601_v51 }
 0x7bf   : > { %v4991_v32 = vrot.slane %v4805_v41, 7  ;;  %v4992_v48 = vrot.slane %v4806_v59, 7 }
 0x7c1   : > { %v5080_v53 = vsel %vm5045_vm0, %v4989_v0, %v4991_v32  ;;  %v5081_v18 = vsel %vm5045_vm0, %v4990_v36, %v4992_v48 }
 0x7c3   : > { %v4177_v23 = vpop.f32.mrf.mxu2  ;;  %v4314_v15 = vpop.f32.mrf.mxu3 }
 0x7c4   : > { %v4807_v33 = vadd.f32 %v4177_v23, %v2746_v39  ;;  %v4808_v51 = vadd.f32 %v4314_v15, %v2883_v21  ;;  %v3882_v7 = vpop.f32.mrf.mxu0  ;;  %v4035_v47 = vpop.f32.mrf.mxu1  ;;  %v15007_v39 = vld [vmem:[#allocation61_spill] sm:$0xff]  ;;  %v15009_v21 = vld [vmem:[#allocation62_spill] sm:$0xff] }
 0x7c5   : > { %v4811_v37 = vadd.f32 %v3882_v7, %v2451_v44  ;;  %v4812_v46 = vadd.f32 %v4035_v47, %v2604_v54  ;;  %v2749_v27 = vadd.f32 %v15008_v19, %v15007_v39 }
 0x7c6   : > { %v12766_v41 = vadd.f32 %v5080_v53, %v4807_v33  ;;  %v12768_v59 = vadd.f32 %v5081_v18, %v4808_v51  ;;  %v15010_v53 = vld [vmem:[#allocation387_spill] sm:$0xff]  ;;  %v15014_v51 = vld [vmem:[#allocation225_spill] sm:$0xff] }
 0x7c7   : > { %v4993_v0 = vrot.slane %v4811_v37, 7  ;;  %v4994_v36 = vrot.slane %v4812_v46, 7  ;;  %3917 = vmatmul.bf16.gmra.mxu0 %v10820_v63  ;;  %4070 = vmatmul.bf16.gmra.mxu1 %v10820_v63  ;;  %v2886_v12 = vadd.f32 %v15010_v53, %v15009_v21  ;;  %v10821_v46 = vld [vmem:[#allocation2 + $0xe0] sm:$0xff]  ;;  %v15017_v21 = vld [vmem:[#allocation66_spill] sm:$0xff]  ;;  %v15018_v53 = vld [vmem:[#allocation229_spill] sm:$0xff] }
 0x7c8   : > { %4211 = vmatmul.bf16.gmra.mxu2 %v10820_v63  ;;  %4348 = vmatmul.bf16.gmra.mxu3 %v10820_v63  ;;  %v15012_v63 = vld [vmem:[#allocation224_spill] sm:$0xff] }
 0x7c9   : > { %v5078_v26 = vsel %vm5045_vm0, %v4991_v32, %v4993_v0  ;;  %v5079_v62 = vsel %vm5045_vm0, %v4992_v48, %v4994_v36  ;;  %v15011_v32 = vld [vmem:[#allocation63_spill] sm:$0xff]  ;;  %v15013_v48 = vld [vmem:[#allocation64_spill] sm:$0xff] }
 0x7ca   : > { %v2455_v33 = vadd.f32 %v15012_v63, %v15011_v32  ;;  %v2608_v7 = vadd.f32 %v15014_v51, %v15013_v48 }
 0x7cb   : > { %v4180_v18 = vpop.f32.mrf.mxu2  ;;  %v4317_v43 = vpop.f32.mrf.mxu3 }
 0x7cc   : > { %v4813_v44 = vadd.f32 %v4180_v18, %v2749_v27  ;;  %v4814_v58 = vadd.f32 %v4317_v43, %v2886_v12  ;;  %v3884_v30 = vpop.f32.mrf.mxu0  ;;  %v4037_v54 = vpop.f32.mrf.mxu1  ;;  %v2610_v12 = vadd.f32 %v15018_v53, %v15017_v21  ;;  %v15024_v53 = vld [vmem:[#allocation232_spill] sm:$0xff] }
 0x7ce   : > { %v12778_v23 = vadd.f32 %v5078_v26, %v4813_v44  ;;  %v12780_v15 = vadd.f32 %v5079_v62, %v4814_v58  ;;  %v15015_v26 = vld [vmem:[#allocation65_spill] sm:$0xff]  ;;  %v15016_v62 = vld [vmem:[#allocation228_spill] sm:$0xff]  ;;  %v11024_v44 = vld [vmem:[%s14434_s3 + $0x98] sm:$0xff] }
 0x7cf   : > { %v2457_v27 = vadd.f32 %v15016_v62, %v15015_v26  ;;  %v11032_v58 = vld [vmem:[%s14434_s3 + $0xd8] sm:$0xff]  ;;  %6147 = vmatpush.bf16.msra.mxu2 %v11024_v44  ;;  %v15021_v26 = vld [vmem:[#allocation68_spill] sm:$0xff]  ;;  %v15022_v62 = vld [vmem:[#allocation393_spill] sm:$0xff] }
 0x7d0   : > { %6316 = vmatpush.bf16.msra.mxu3 %v11032_v58  ;;  %v2891_v21 = vadd.f32 %v15022_v62, %v15021_v26  ;;  %v10822_v58 = vld [vmem:[#allocation2 + $0xe8] sm:$0xff] }
 0x7d3   : > { %v4182_v47 = vpop.f32.mrf.mxu2  ;;  %v4319_v37 = vpop.f32.mrf.mxu3 }
 0x7d4   : > { %v3886_v0 = vpop.f32.mrf.mxu0  ;;  %v4039_v36 = vpop.f32.mrf.mxu1 }
 0x7d5   : > { %v4819_v39 = vadd.f32 %v3886_v0, %v2455_v33  ;;  %v4820_v19 = vadd.f32 %v4039_v36, %v2608_v7  ;;  %v15020_v0 = vld [vmem:[#allocation392_spill] sm:$0xff] }
 0x7d7   : > { %3921 = vmatmul.bf16.gmra.mxu0 %v10821_v46  ;;  %4074 = vmatmul.bf16.gmra.mxu1 %v10821_v46  ;;  %v4995_v33 = vrot.slane %v4819_v39, 7  ;;  %v4996_v48 = vrot.slane %v4820_v19, 7  ;;  %v15026_v39 = vld [vmem:[#allocation233_spill] sm:$0xff] }
 0x7d8   : > { %4215 = vmatmul.bf16.gmra.mxu2 %v10821_v46  ;;  %4352 = vmatmul.bf16.gmra.mxu3 %v10821_v46  ;;  %v15019_v46 = vld [vmem:[#allocation67_spill] sm:$0xff] }
 0x7d9   : > { %v2754_v36 = vadd.f32 %v15020_v0, %v15019_v46 }
 0x7db   : > { %v4184_v18 = vpop.f32.mrf.mxu2  ;;  %v4321_v43 = vpop.f32.mrf.mxu3 }
 0x7dc   : > { %v3888_v30 = vpop.f32.mrf.mxu0  ;;  %v4041_v54 = vpop.f32.mrf.mxu1  ;;  %v15025_v18 = vld [vmem:[#allocation70_spill] sm:$0xff] }
 0x7dd   : > { %v4821_v32 = vadd.f32 %v3888_v30, %v2457_v27  ;;  %v4822_v63 = vadd.f32 %v4041_v54, %v2610_v12  ;;  %v15023_v27 = vld [vmem:[#allocation69_spill] sm:$0xff]  ;;  %v2613_v19 = vadd.f32 %v15026_v39, %v15025_v18 }
 0x7de   : > { %v2460_v12 = vadd.f32 %v15024_v53, %v15023_v27  ;;  %v15029_v27 = vld [vmem:[#allocation396_spill] sm:$0xff] }
 0x7df   : > { %v4997_v51 = vrot.slane %v4821_v32, 7  ;;  %v4998_v7 = vrot.slane %v4822_v63, 7 }
 0x7e1   : > { %v5076_v47 = vsel %vm5045_vm0, %v4995_v33, %v4997_v51  ;;  %v5077_v37 = vsel %vm5045_vm0, %v4996_v48, %v4998_v7 }
 0x7e3   : > { %v4185_v43 = vpop.f32.mrf.mxu2  ;;  %v4322_v44 = vpop.f32.mrf.mxu3 }
 0x7e4   : > { %v4823_v30 = vadd.f32 %v4185_v43, %v2754_v36  ;;  %v4824_v54 = vadd.f32 %v4322_v44, %v2891_v21  ;;  %v3891_v32 = vpop.f32.mrf.mxu0  ;;  %v4044_v63 = vpop.f32.mrf.mxu1  ;;  %v15028_v21 = vld [vmem:[#allocation71_spill] sm:$0xff] }
 0x7e5   : > { %v4827_v33 = vadd.f32 %v3891_v32, %v2460_v12  ;;  %v4828_v48 = vadd.f32 %v4044_v63, %v2613_v19  ;;  %v2757_v53 = vadd.f32 %v15029_v27, %v15028_v21  ;;  %v15030_v12 = vld [vmem:[#allocation72_spill] sm:$0xff]  ;;  %v10823_v21 = vld [vmem:[#allocation2 + $0xf0] sm:$0xff] }
 0x7e6   : > { %v12808_v60 = vadd.f32 %v5076_v47, %v4823_v30  ;;  %v12810_v46 = vadd.f32 %v5077_v37, %v4824_v54  ;;  %v15031_v47 = vld [vmem:[#allocation397_spill] sm:$0xff]  ;;  %v15035_v32 = vld [vmem:[#allocation236_spill] sm:$0xff] }
 0x7e7   : > { %v4999_v0 = vrot.slane %v4827_v33, 7  ;;  %v5000_v26 = vrot.slane %v4828_v48, 7  ;;  %3926 = vmatmul.bf16.gmra.mxu0 %v10822_v58  ;;  %4079 = vmatmul.bf16.gmra.mxu1 %v10822_v58  ;;  %v2894_v18 = vadd.f32 %v15031_v47, %v15030_v12  ;;  %v15037_v33 = vld [vmem:[#allocation237_spill] sm:$0xff] }
 0x7e8   : > { %15027 = vst [vmem:[#allocation157_spill] sm:$0xff] %v12810_v46  ;;  %4219 = vmatmul.bf16.gmra.mxu2 %v10822_v58  ;;  %4356 = vmatmul.bf16.gmra.mxu3 %v10822_v58 }
 0x7e9   : > { %v5074_v62 = vsel %vm5045_vm0, %v4997_v51, %v4999_v0  ;;  %v5075_v36 = vsel %vm5045_vm0, %v4998_v7, %v5000_v26  ;;  %v15034_v51 = vld [vmem:[#allocation73_spill] sm:$0xff]  ;;  %v15036_v7 = vld [vmem:[#allocation74_spill] sm:$0xff] }
 0x7ea   : > { %v2464_v63 = vadd.f32 %v15035_v32, %v15034_v51  ;;  %v2617_v48 = vadd.f32 %v15037_v33, %v15036_v7  ;;  %v15040_v51 = vld [vmem:[#allocation76_spill] sm:$0xff]  ;;  %v15041_v32 = vld [vmem:[#allocation241_spill] sm:$0xff] }
 0x7eb   : > { %v4188_v37 = vpop.f32.mrf.mxu2  ;;  %v4325_v39 = vpop.f32.mrf.mxu3  ;;  %v2619_v7 = vadd.f32 %v15041_v32, %v15040_v51  ;;  %v15044_v51 = vld [vmem:[#allocation78_spill] sm:$0xff] }
 0x7ec   : > { %v4829_v19 = vadd.f32 %v4188_v37, %v2757_v53  ;;  %v4830_v43 = vadd.f32 %v4325_v39, %v2894_v18  ;;  %v3893_v44 = vpop.f32.mrf.mxu0  ;;  %v4046_v30 = vpop.f32.mrf.mxu1  ;;  %v10831_v18 = vld [vmem:[#allocation4 + $0x314] sm:$0xf]  ;;  %v9437_v39 = vld [vmem:[#allocation4 + $0x328] sm:$0xf0] }
 0x7ed   : > { %v15039_v44 = vld [vmem:[#allocation240_spill] sm:$0xff] }
 0x7ee   : > { %v12820_v54 = vadd.f32 %v5074_v62, %v4829_v19  ;;  %v12822_v58 = vadd.f32 %v5075_v36, %v4830_v43  ;;  %v9435_v62 = vld [vmem:[#allocation4 + $0x310] sm:$0xf]  ;;  %v10834_v36 = vld [vmem:[#allocation4 + $0x324] sm:$0xf0]  ;;  %v9440_v19 = vor.u32 %v10831_v18, %v9437_v39  ;;  %v15038_v43 = vld [vmem:[#allocation75_spill] sm:$0xff] }
 0x7ef   : > { %v9436_v37 = vor.u32 %v10834_v36, %v9435_v62  ;;  %v2466_v30 = vadd.f32 %v15039_v44, %v15038_v43  ;;  %v15042_v39 = vld [vmem:[#allocation77_spill] sm:$0xff]  ;;  %v15043_v43 = vld [vmem:[#allocation402_spill] sm:$0xff] }
 0x7f0   : > { %15032 = vst [vmem:[#allocation7_spill] sm:$0xff] %v12820_v54  ;;  %4545 = vmatpush.bf16.msra.mxu1 %v9440_v19  ;;  %v2762_v44 = vadd.f32 %v15043_v43, %v15042_v39  ;;  %v15047_v19 = vld [vmem:[#allocation244_spill] sm:$0xff] }
 0x7f1   : > { %15033 = vst [vmem:[#allocation332_spill] sm:$0xff] %v12822_v58  ;;  %4392 = vmatpush.bf16.msra.mxu0 %v9436_v37  ;;  %v15045_v37 = vld [vmem:[#allocation403_spill] sm:$0xff] }
 0x7f2   : > { %v2899_v32 = vadd.f32 %v15045_v37, %v15044_v51 }
 0x7f3   : > { %v4190_v0 = vpop.f32.mrf.mxu2  ;;  %v4327_v26 = vpop.f32.mrf.mxu3 }
 0x7f4   : > { %v3895_v27 = vpop.f32.mrf.mxu0  ;;  %v4048_v12 = vpop.f32.mrf.mxu1 }
 0x7f5   : > { %v4835_v47 = vadd.f32 %v3895_v27, %v2464_v63  ;;  %v4836_v53 = vadd.f32 %v4048_v12, %v2617_v48 }
 0x7f7   : > { %3930 = vmatmul.bf16.gmra.mxu0 %v10823_v21  ;;  %4083 = vmatmul.bf16.gmra.mxu1 %v10823_v21  ;;  %v5001_v27 = vrot.slane %v4835_v47, 7  ;;  %v5002_v12 = vrot.slane %v4836_v53, 7  ;;  %v15049_v47 = vld [vmem:[#allocation245_spill] sm:$0xff] }
 0x7f8   : > { %4223 = vmatmul.bf16.gmra.mxu2 %v10823_v21  ;;  %4360 = vmatmul.bf16.gmra.mxu3 %v10823_v21 }
 0x7fb   : > { %v4192_v33 = vpop.f32.mrf.mxu2  ;;  %v4329_v0 = vpop.f32.mrf.mxu3 }
 0x7fc   : > { %v3897_v63 = vpop.f32.mrf.mxu0  ;;  %v4050_v48 = vpop.f32.mrf.mxu1  ;;  %v15046_v33 = vld [vmem:[#allocation79_spill] sm:$0xff] }
 0x7fd   : > { %v4837_v26 = vadd.f32 %v3897_v63, %v2466_v30  ;;  %v4838_v21 = vadd.f32 %v4050_v48, %v2619_v7  ;;  %v2469_v30 = vadd.f32 %v15047_v19, %v15046_v33  ;;  %v15048_v7 = vld [vmem:[#allocation80_spill] sm:$0xff]  ;;  %v10824_v48 = vld [vmem:[#allocation2 + $0xf8] sm:$0xff] }
 0x7fe   : > { %v2622_v53 = vadd.f32 %v15049_v47, %v15048_v7  ;;  %v15053_v33 = vld [vmem:[#allocation406_spill] sm:$0xff] }
 0x7ff   : > { %v5003_v14 = vrot.slane %v4837_v26, 7  ;;  %v5004_v62 = vrot.slane %v4838_v21, 7 }
 0x801   : > { %v5072_v36 = vsel %vm5045_vm0, %v5001_v27, %v5003_v14  ;;  %v5073_v18 = vsel %vm5045_vm0, %v5002_v12, %v5004_v62 }
 0x803   : > { %v4193_v0 = vpop.f32.mrf.mxu2  ;;  %v4330_v63 = vpop.f32.mrf.mxu3 }
 0x804   : > { %v4839_v26 = vadd.f32 %v4193_v0, %v2762_v44  ;;  %v4840_v21 = vadd.f32 %v4330_v63, %v2899_v32  ;;  %v3900_v27 = vpop.f32.mrf.mxu0  ;;  %v4053_v58 = vpop.f32.mrf.mxu1  ;;  %v15052_v32 = vld [vmem:[#allocation81_spill] sm:$0xff] }
 0x805   : > { %v4843_v12 = vadd.f32 %v3900_v27, %v2469_v30  ;;  %v4844_v54 = vadd.f32 %v4053_v58, %v2622_v53  ;;  %v2765_v19 = vadd.f32 %v15053_v33, %v15052_v32  ;;  %v15054_v58 = vld [vmem:[#allocation82_spill] sm:$0xff]  ;;  %v15061_v27 = vld [vmem:[#allocation249_spill] sm:$0xff]  ;;  %v10825_v32 = vld [vmem:[#allocation2 + $0x100] sm:$0xff] }
 0x806   : > { %v12844_v46 = vadd.f32 %v5072_v36, %v4839_v26  ;;  %v12846_v39 = vadd.f32 %v5073_v18, %v4840_v21  ;;  %v15055_v36 = vld [vmem:[#allocation407_spill] sm:$0xff]  ;;  %v15059_v26 = vld [vmem:[#allocation248_spill] sm:$0xff] }
 0x807   : > { %v5005_v43 = vrot.slane %v4843_v12, 7  ;;  %v5006_v51 = vrot.slane %v4844_v54, 7  ;;  %3935 = vmatmul.bf16.gmra.mxu0 %v10824_v48  ;;  %4088 = vmatmul.bf16.gmra.mxu1 %v10824_v48  ;;  %v2902_v30 = vadd.f32 %v15055_v36, %v15054_v58 }
 0x808   : > { %15050 = vst [vmem:[#allocation8_spill] sm:$0xff] %v12844_v46  ;;  %4227 = vmatmul.bf16.gmra.mxu2 %v10824_v48  ;;  %4364 = vmatmul.bf16.gmra.mxu3 %v10824_v48 }
 0x809   : > { %15051 = vst [vmem:[#allocation333_spill] sm:$0xff] %v12846_v39  ;;  %v5070_v37 = vsel %vm5045_vm0, %v5003_v14, %v5005_v43  ;;  %v5071_v44 = vsel %vm5045_vm0, %v5004_v62, %v5006_v51  ;;  %v15058_v14 = vld [vmem:[#allocation83_spill] sm:$0xff]  ;;  %v15060_v62 = vld [vmem:[#allocation84_spill] sm:$0xff] }
 0x80a   : > { %v2473_v21 = vadd.f32 %v15059_v26, %v15058_v14  ;;  %v2626_v12 = vadd.f32 %v15061_v27, %v15060_v62  ;;  %v11031_v14 = vld [vmem:[%s14434_s3 + $0xd0] sm:$0xff] }
 0x80b   : > { %v4196_v18 = vpop.f32.mrf.mxu2  ;;  %v4333_v7 = vpop.f32.mrf.mxu3  ;;  %6317 = vmatpush.bf16.msra.mxu3 %v11031_v14  ;;  %v15072_v14 = vld [vmem:[#allocation90_spill] sm:$0xff] }
 0x80c   : > { %v4845_v47 = vadd.f32 %v4196_v18, %v2765_v19  ;;  %v4846_v54 = vadd.f32 %v4333_v7, %v2902_v30  ;;  %v3902_v53 = vpop.f32.mrf.mxu0  ;;  %v4055_v0 = vpop.f32.mrf.mxu1  ;;  %v15064_v18 = vld [vmem:[#allocation86_spill] sm:$0xff]  ;;  %v15065_v7 = vld [vmem:[#allocation253_spill] sm:$0xff] }
 0x80d   : > { %v11023_v0 = vld [vmem:[%s14434_s3 + $0x90] sm:$0xff] }
 0x80e   : > { %v12856_v63 = vadd.f32 %v5070_v37, %v4845_v47  ;;  %v12858_v48 = vadd.f32 %v5071_v44, %v4846_v54  ;;  %v15062_v37 = vld [vmem:[#allocation85_spill] sm:$0xff]  ;;  %v15063_v44 = vld [vmem:[#allocation252_spill] sm:$0xff]  ;;  %v2628_v47 = vadd.f32 %v15065_v7, %v15064_v18  ;;  %6148 = vmatpush.bf16.msra.mxu2 %v11023_v0 }
 0x80f   : > { %v2475_v30 = vadd.f32 %v15063_v44, %v15062_v37  ;;  %v15066_v37 = vld [vmem:[#allocation87_spill] sm:$0xff]  ;;  %v15067_v44 = vld [vmem:[#allocation412_spill] sm:$0xff] }
 0x810   : > { %15056 = vst [vmem:[#allocation9_spill] sm:$0xff] %v12856_v63  ;;  %v2770_v18 = vadd.f32 %v15067_v44, %v15066_v37  ;;  %v15068_v7 = vld [vmem:[#allocation88_spill] sm:$0xff] }
 0x811   : > { %15057 = vst [vmem:[#allocation160_spill] sm:$0xff] %v12858_v48 }
 0x813   : > { %v4198_v43 = vpop.f32.mrf.mxu2  ;;  %v4335_v51 = vpop.f32.mrf.mxu3 }
 0x814   : > { %v3904_v33 = vpop.f32.mrf.mxu0  ;;  %v4057_v58 = vpop.f32.mrf.mxu1 }
 0x815   : > { %v4851_v36 = vadd.f32 %v3904_v33, %v2473_v21  ;;  %v4852_v19 = vadd.f32 %v4057_v58, %v2626_v12 }
 0x817   : > { %3939 = vmatmul.bf16.gmra.mxu0 %v10825_v32  ;;  %4092 = vmatmul.bf16.gmra.mxu1 %v10825_v32  ;;  %v5007_v12 = vrot.slane %v4851_v36, 7  ;;  %v5008_v43 = vrot.slane %v4852_v19, 7  ;;  %v15073_v36 = vld [vmem:[#allocation257_spill] sm:$0xff] }
 0x818   : > { %4231 = vmatmul.bf16.gmra.mxu2 %v10825_v32  ;;  %4368 = vmatmul.bf16.gmra.mxu3 %v10825_v32  ;;  %v2631_v19 = vadd.f32 %v15073_v36, %v15072_v14 }
 0x81b   : > { %v4200_v54 = vpop.f32.mrf.mxu2  ;;  %v4337_v53 = vpop.f32.mrf.mxu3 }
 0x81c   : > { %v3906_v26 = vpop.f32.mrf.mxu0  ;;  %v4059_v21 = vpop.f32.mrf.mxu1  ;;  %v15069_v54 = vld [vmem:[#allocation413_spill] sm:$0xff] }
 0x81d   : > { %v4853_v62 = vadd.f32 %v3906_v26, %v2475_v30  ;;  %v4854_v27 = vadd.f32 %v4059_v21, %v2628_v47  ;;  %v2907_v53 = vadd.f32 %v15069_v54, %v15068_v7  ;;  %v15070_v30 = vld [vmem:[#allocation89_spill] sm:$0xff]  ;;  %v15071_v47 = vld [vmem:[#allocation256_spill] sm:$0xff] }
 0x81e   : > { %v2478_v0 = vadd.f32 %v15071_v47, %v15070_v30  ;;  %v15075_v30 = vld [vmem:[#allocation416_spill] sm:$0xff] }
 0x81f   : > { %v5009_v51 = vrot.slane %v4853_v62, 7  ;;  %v5010_v32 = vrot.slane %v4854_v27, 7  ;;  %v10826_v62 = vld [vmem:[#allocation2 + $0x108] sm:$0xff] }
 0x821   : > { %v5068_v33 = vsel %vm5045_vm0, %v5007_v12, %v5009_v51  ;;  %v5069_v58 = vsel %vm5045_vm0, %v5008_v43, %v5010_v32 }
 0x823   : > { %v4201_v26 = vpop.f32.mrf.mxu2  ;;  %v4338_v21 = vpop.f32.mrf.mxu3 }
 0x824   : > { %v4855_v27 = vadd.f32 %v4201_v26, %v2770_v18  ;;  %v4856_v12 = vadd.f32 %v4338_v21, %v2907_v53  ;;  %v3909_v48 = vpop.f32.mrf.mxu0  ;;  %v4062_v63 = vpop.f32.mrf.mxu1  ;;  %v15074_v53 = vld [vmem:[#allocation91_spill] sm:$0xff] }
 0x825   : > { %v4859_v43 = vadd.f32 %v3909_v48, %v2478_v0  ;;  %v4860_v39 = vadd.f32 %v4062_v63, %v2631_v19  ;;  %v2773_v48 = vadd.f32 %v15075_v30, %v15074_v53  ;;  %v15076_v63 = vld [vmem:[#allocation92_spill] sm:$0xff]  ;;  %v10827_v53 = vld [vmem:[#allocation2 + $0x110] sm:$0xff] }
 0x826   : > { %v12886_v46 = vadd.f32 %v5068_v33, %v4855_v27  ;;  %v12888_v37 = vadd.f32 %v5069_v58, %v4856_v12  ;;  %v15077_v33 = vld [vmem:[#allocation417_spill] sm:$0xff] }
 0x827   : > { %v5011_v44 = vrot.slane %v4859_v43, 7  ;;  %v5012_v7 = vrot.slane %v4860_v39, 7  ;;  %3944 = vmatmul.bf16.gmra.mxu0 %v10826_v62  ;;  %4097 = vmatmul.bf16.gmra.mxu1 %v10826_v62  ;;  %v2910_v47 = vadd.f32 %v15077_v33, %v15076_v63  ;;  %v15083_v12 = vld [vmem:[#allocation261_spill] sm:$0xff] }
 0x828   : > { %4235 = vmatmul.bf16.gmra.mxu2 %v10826_v62  ;;  %4372 = vmatmul.bf16.gmra.mxu3 %v10826_v62  ;;  %v15081_v62 = vld [vmem:[#allocation260_spill] sm:$0xff] }
 0x829   : > { %v5066_v54 = vsel %vm5045_vm0, %v5009_v51, %v5011_v44  ;;  %v5067_v18 = vsel %vm5045_vm0, %v5010_v32, %v5012_v7  ;;  %v15080_v51 = vld [vmem:[#allocation93_spill] sm:$0xff]  ;;  %v15082_v32 = vld [vmem:[#allocation94_spill] sm:$0xff] }
 0x82a   : > { %v2482_v27 = vadd.f32 %v15081_v62, %v15080_v51  ;;  %v2635_v43 = vadd.f32 %v15083_v12, %v15082_v32 }
 0x82b   : > { %v4204_v58 = vpop.f32.mrf.mxu2  ;;  %v4341_v0 = vpop.f32.mrf.mxu3 }
 0x82c   : > { %v4861_v14 = vadd.f32 %v4204_v58, %v2773_v48  ;;  %v4862_v39 = vadd.f32 %v4341_v0, %v2910_v47  ;;  %v3911_v36 = vpop.f32.mrf.mxu0  ;;  %v4064_v19 = vpop.f32.mrf.mxu1  ;;  %v15086_v58 = vld [vmem:[#allocation96_spill] sm:$0xff]  ;;  %v15087_v0 = vld [vmem:[#allocation265_spill] sm:$0xff] }
 0x82e   : > { %v12898_v26 = vadd.f32 %v5066_v54, %v4861_v14  ;;  %v12900_v21 = vadd.f32 %v5067_v18, %v4862_v39  ;;  %v15084_v54 = vld [vmem:[#allocation95_spill] sm:$0xff]  ;;  %v15085_v18 = vld [vmem:[#allocation264_spill] sm:$0xff]  ;;  %v2637_v14 = vadd.f32 %v15087_v0, %v15086_v58 }
 0x82f   : > { %v2484_v47 = vadd.f32 %v15085_v18, %v15084_v54  ;;  %v15089_v54 = vld [vmem:[#allocation98_spill] sm:$0xff]  ;;  %v15090_v58 = vld [vmem:[#allocation99_spill] sm:$0xff]  ;;  %v15091_v0 = vld [vmem:[#allocation268_spill] sm:$0xff] }
 0x830   : > { %15078 = vst [vmem:[#allocation10_spill] sm:$0xff] %v12898_v26  ;;  %v2915_v18 = vadd.f32 %v12369_v3, %v15089_v54 }
 0x831   : > { %15079 = vst [vmem:[#allocation161_spill] sm:$0xff] %v12900_v21 }
 0x833   : > { %v4206_v44 = vpop.f32.mrf.mxu2  ;;  %v4343_v7 = vpop.f32.mrf.mxu3 }
 0x834   : > { %v3913_v30 = vpop.f32.mrf.mxu0  ;;  %v4066_v63 = vpop.f32.mrf.mxu1 }
 0x835   : > { %v4867_v33 = vadd.f32 %v3913_v30, %v2482_v27  ;;  %v4868_v48 = vadd.f32 %v4066_v63, %v2635_v43  ;;  %v15088_v30 = vld [vmem:[#allocation97_spill] sm:$0xff] }
 0x836   : > { %v2778_v63 = vadd.f32 %v12367_v25, %v15088_v30 }
 0x837   : > { %3948 = vmatmul.bf16.gmra.mxu0 %v10827_v53  ;;  %4101 = vmatmul.bf16.gmra.mxu1 %v10827_v53  ;;  %v5013_v12 = vrot.slane %v4867_v33, 7  ;;  %v5014_v44 = vrot.slane %v4868_v48, 7  ;;  %v15093_v33 = vld [vmem:[#allocation269_spill] sm:$0xff] }
 0x838   : > { %4239 = vmatmul.bf16.gmra.mxu2 %v10827_v53  ;;  %4376 = vmatmul.bf16.gmra.mxu3 %v10827_v53 }
 0x83b   : > { %v4208_v39 = vpop.f32.mrf.mxu2  ;;  %v4345_v36 = vpop.f32.mrf.mxu3 }
 0x83c   : > { %v3915_v19 = vpop.f32.mrf.mxu0  ;;  %v4068_v51 = vpop.f32.mrf.mxu1 }
 0x83d   : > { %v4869_v62 = vadd.f32 %v3915_v19, %v2484_v47  ;;  %v4870_v32 = vadd.f32 %v4068_v51, %v2637_v14  ;;  %v2487_v47 = vadd.f32 %v15091_v0, %v15090_v58  ;;  %v15092_v14 = vld [vmem:[#allocation100_spill] sm:$0xff]  ;;  %v10828_v19 = vld [vmem:[#allocation2 + $0x118] sm:$0xff] }
 0x83e   : > { %v2640_v48 = vadd.f32 %v15093_v33, %v15092_v14  ;;  %v15096_v58 = vld [vmem:[#allocation424_spill] sm:$0xff] }
 0x83f   : > { %v5015_v27 = vrot.slane %v4869_v62, 7  ;;  %v5016_v43 = vrot.slane %v4870_v32, 7 }
 0x841   : > { %v5064_v7 = vsel %vm5045_vm0, %v5013_v12, %v5015_v27  ;;  %v5065_v53 = vsel %vm5045_vm0, %v5014_v44, %v5016_v43 }
 0x843   : > { %v4209_v39 = vpop.f32.mrf.mxu2  ;;  %v4346_v36 = vpop.f32.mrf.mxu3 }
 0x844   : > { %v4871_v51 = vadd.f32 %v4209_v39, %v2778_v63  ;;  %v4872_v62 = vadd.f32 %v4346_v36, %v2915_v18  ;;  %v3918_v32 = vpop.f32.mrf.mxu0  ;;  %v4071_v12 = vpop.f32.mrf.mxu1  ;;  %v15095_v18 = vld [vmem:[#allocation101_spill] sm:$0xff] }
 0x845   : > { %v4875_v44 = vadd.f32 %v3918_v32, %v2487_v47  ;;  %v4876_v21 = vadd.f32 %v4071_v12, %v2640_v48  ;;  %v2781_v0 = vadd.f32 %v15096_v58, %v15095_v18  ;;  %v15097_v47 = vld [vmem:[#allocation102_spill] sm:$0xff]  ;;  %v15104_v12 = vld [vmem:[#allocation273_spill] sm:$0xff] }
 0x846   : > { %v12922_v26 = vadd.f32 %v5064_v7, %v4871_v51  ;;  %v12924_v25 = vadd.f32 %v5065_v53, %v4872_v62  ;;  %v15098_v7 = vld [vmem:[#allocation425_spill] sm:$0xff]  ;;  %v15102_v62 = vld [vmem:[#allocation272_spill] sm:$0xff] }
 0x847   : > { %v5017_v3 = vrot.slane %v4875_v44, 7  ;;  %v5018_v30 = vrot.slane %v4876_v21, 7  ;;  %3953 = vmatmul.bf16.gmra.mxu0 %v10828_v19  ;;  %4106 = vmatmul.bf16.gmra.mxu1 %v10828_v19  ;;  %v2918_v14 = vadd.f32 %v15098_v7, %v15097_v47 }
 0x848   : > { %15094 = vst [vmem:[#allocation11_spill] sm:$0xff] %v12924_v25  ;;  %4243 = vmatmul.bf16.gmra.mxu2 %v10828_v19  ;;  %4380 = vmatmul.bf16.gmra.mxu3 %v10828_v19 }
 0x849   : > { %v5062_v54 = vsel %vm5045_vm0, %v5015_v27, %v5017_v3  ;;  %v5063_v63 = vsel %vm5045_vm0, %v5016_v43, %v5018_v30  ;;  %v15101_v27 = vld [vmem:[#allocation103_spill] sm:$0xff]  ;;  %v15103_v43 = vld [vmem:[#allocation104_spill] sm:$0xff] }
 0x84a   : > { %v2491_v32 = vadd.f32 %v15102_v62, %v15101_v27  ;;  %v2644_v44 = vadd.f32 %v15104_v12, %v15103_v43  ;;  %v11030_v27 = vld [vmem:[%s14434_s3 + $0xc8] sm:$0xff] }
 0x84b   : > { %v4212_v53 = vpop.f32.mrf.mxu2  ;;  %v4349_v33 = vpop.f32.mrf.mxu3  ;;  %6318 = vmatpush.bf16.msra.mxu3 %v11030_v27  ;;  %v15115_v27 = vld [vmem:[#allocation110_spill] sm:$0xff] }
 0x84c   : > { %v4877_v48 = vadd.f32 %v4212_v53, %v2781_v0  ;;  %v4878_v21 = vadd.f32 %v4349_v33, %v2918_v14  ;;  %v3920_v39 = vpop.f32.mrf.mxu0  ;;  %v4073_v36 = vpop.f32.mrf.mxu1  ;;  %v11206_v0 = vld [vmem:[#allocation2 + $0x20] sm:$0xff]  ;;  %v15105_v14 = vld [vmem:[#allocation105_spill] sm:$0xff] }
 0x84d   : > { %v15108_v33 = vld [vmem:[#allocation277_spill] sm:$0xff]  ;;  %v11022_v36 = vld [vmem:[%s14434_s3 + $0x88] sm:$0xff] }
 0x84e   : > { %v12934_v51 = vadd.f32 %v5062_v54, %v4877_v48  ;;  %v12936_v19 = vadd.f32 %v5063_v63, %v4878_v21  ;;  %v15106_v54 = vld [vmem:[#allocation276_spill] sm:$0xff]  ;;  %v15107_v63 = vld [vmem:[#allocation106_spill] sm:$0xff]  ;;  %6149 = vmatpush.bf16.msra.mxu2 %v11022_v36 }
 0x84f   : > { %v2493_v53 = vadd.f32 %v15106_v54, %v15105_v14  ;;  %v2646_v48 = vadd.f32 %v15108_v33, %v15107_v63  ;;  %v15109_v14 = vld [vmem:[#allocation107_spill] sm:$0xff]  ;;  %v15110_v54 = vld [vmem:[#allocation430_spill] sm:$0xff]  ;;  %v15111_v33 = vld [vmem:[#allocation108_spill] sm:$0xff] }
 0x850   : > { %15099 = vst [vmem:[#allocation336_spill] sm:$0xff] %v12934_v51  ;;  %v2786_v63 = vadd.f32 %v15110_v54, %v15109_v14 }
 0x851   : > { %15100 = vst [vmem:[#allocation12_spill] sm:$0xff] %v12936_v19 }
 0x853   : > { %v4214_v3 = vpop.f32.mrf.mxu2  ;;  %v4351_v30 = vpop.f32.mrf.mxu3 }
 0x854   : > { %v3922_v18 = vpop.f32.mrf.mxu0  ;;  %v4075_v58 = vpop.f32.mrf.mxu1 }
 0x855   : > { %v4883_v47 = vadd.f32 %v3922_v18, %v2491_v32  ;;  %v4884_v7 = vadd.f32 %v4075_v58, %v2644_v44 }
 0x857   : > { %4393 = vmatmul.bf16.vlgmr.msra.gmra.mxu0 %v11206_v0  ;;  %4546 = vmatmul.bf16.vlgmr.msra.gmra.mxu1 %v11206_v0  ;;  %v5019_v44 = vrot.slane %v4883_v47, 7  ;;  %v5020_v3 = vrot.slane %v4884_v7, 7  ;;  %v15116_v47 = vld [vmem:[#allocation281_spill] sm:$0xff] }
 0x858   : > { %v2649_v7 = vadd.f32 %v15116_v47, %v15115_v27 }
 0x85b   : > { %v4216_v21 = vpop.f32.mrf.mxu2  ;;  %v4353_v39 = vpop.f32.mrf.mxu3 }
 0x85c   : > { %v3924_v62 = vpop.f32.mrf.mxu0  ;;  %v4077_v32 = vpop.f32.mrf.mxu1  ;;  %v15112_v21 = vld [vmem:[#allocation431_spill] sm:$0xff] }
 0x85d   : > { %v4885_v43 = vadd.f32 %v3924_v62, %v2493_v53  ;;  %v4886_v12 = vadd.f32 %v4077_v32, %v2646_v48  ;;  %v2923_v39 = vadd.f32 %v15112_v21, %v15111_v33  ;;  %v15113_v53 = vld [vmem:[#allocation109_spill] sm:$0xff]  ;;  %v15114_v48 = vld [vmem:[#allocation280_spill] sm:$0xff] }
 0x85e   : > { %v2496_v36 = vadd.f32 %v15114_v48, %v15113_v53  ;;  %v11207_v21 = vld [vmem:[#allocation2 + $0x28] sm:$0xff]  ;;  %v15120_v48 = vld [vmem:[#allocation434_spill] sm:$0xff] }
 0x85f   : > { %v5021_v30 = vrot.slane %v4885_v43, 7  ;;  %v5022_v18 = vrot.slane %v4886_v12, 7 }
 0x861   : > { %v5060_v58 = vsel %vm5045_vm0, %v5019_v44, %v5021_v30  ;;  %v5061_v0 = vsel %vm5045_vm0, %v5020_v3, %v5022_v18 }
 0x863   : > { %v4217_v62 = vpop.f32.mrf.mxu2  ;;  %v4354_v32 = vpop.f32.mrf.mxu3 }
 0x864   : > { %v4887_v43 = vadd.f32 %v4217_v62, %v2786_v63  ;;  %v4888_v12 = vadd.f32 %v4354_v32, %v2923_v39  ;;  %v3927_v44 = vpop.f32.mrf.mxu0  ;;  %v4080_v19 = vpop.f32.mrf.mxu1  ;;  %v15119_v39 = vld [vmem:[#allocation111_spill] sm:$0xff] }
 0x865   : > { %v4891_v51 = vadd.f32 %v3927_v44, %v2496_v36  ;;  %v4892_v3 = vadd.f32 %v4080_v19, %v2649_v7  ;;  %v2789_v27 = vadd.f32 %v15120_v48, %v15119_v39  ;;  %v15121_v36 = vld [vmem:[#allocation112_spill] sm:$0xff]  ;;  %v15122_v19 = vld [vmem:[#allocation435_spill] sm:$0xff] }
 0x866   : > { %v12964_v25 = vadd.f32 %v5060_v58, %v4887_v43  ;;  %v12966_v14 = vadd.f32 %v5061_v0, %v4888_v12  ;;  %v2926_v58 = vadd.f32 %v15122_v19, %v15121_v36  ;;  %v15126_v44 = vld [vmem:[#allocation284_spill] sm:$0xff] }
 0x867   : > { %v5023_v54 = vrot.slane %v4891_v51, 7  ;;  %v5024_v33 = vrot.slane %v4892_v3, 7  ;;  %4397 = vmatmul.bf16.gmra.mxu0 %v11207_v21  ;;  %4550 = vmatmul.bf16.gmra.mxu1 %v11207_v21 }
 0x868   : > { %15117 = vst [vmem:[#allocation337_spill] sm:$0xff] %v12964_v25 }
 0x869   : > { %15118 = vst [vmem:[#allocation13_spill] sm:$0xff] %v12966_v14  ;;  %v5058_v53 = vsel %vm5045_vm0, %v5021_v30, %v5023_v54  ;;  %v5059_v63 = vsel %vm5045_vm0, %v5022_v18, %v5024_v33  ;;  %v15125_v30 = vld [vmem:[#allocation113_spill] sm:$0xff]  ;;  %v15127_v18 = vld [vmem:[#allocation114_spill] sm:$0xff] }
 0x86a   : > { %v2500_v3 = vadd.f32 %v15126_v44, %v15125_v30  ;;  %v15128_v54 = vld [vmem:[#allocation285_spill] sm:$0xff] }
 0x86b   : > { %v4220_v47 = vpop.f32.mrf.mxu2  ;;  %v4357_v0 = vpop.f32.mrf.mxu3  ;;  %v2653_v33 = vadd.f32 %v15128_v54, %v15127_v18 }
 0x86c   : > { %v4893_v7 = vadd.f32 %v4220_v47, %v2789_v27  ;;  %v4894_v51 = vadd.f32 %v4357_v0, %v2926_v58  ;;  %v3929_v62 = vpop.f32.mrf.mxu0  ;;  %v4082_v32 = vpop.f32.mrf.mxu1  ;;  %v11208_v27 = vld [vmem:[#allocation2 + $0x30] sm:$0xff]  ;;  %v15129_v58 = vld [vmem:[#allocation115_spill] sm:$0xff] }
 0x86d   : > { %v15132_v0 = vld [vmem:[#allocation289_spill] sm:$0xff] }
 0x86e   : > { %v12976_v43 = vadd.f32 %v5058_v53, %v4893_v7  ;;  %v12978_v12 = vadd.f32 %v5059_v63, %v4894_v51  ;;  %v15130_v53 = vld [vmem:[#allocation288_spill] sm:$0xff] }
 0x86f   : > { %v2502_v47 = vadd.f32 %v15130_v53, %v15129_v58  ;;  %v15131_v63 = vld [vmem:[#allocation116_spill] sm:$0xff]  ;;  %v15135_v53 = vld [vmem:[#allocation118_spill] sm:$0xff] }
 0x870   : > { %15123 = vst [vmem:[#allocation164_spill] sm:$0xff] %v12976_v43  ;;  %v2655_v7 = vadd.f32 %v15132_v0, %v15131_v63  ;;  %v15136_v63 = vld [vmem:[#allocation441_spill] sm:$0xff] }
 0x871   : > { %15124 = vst [vmem:[#allocation14_spill] sm:$0xff] %v12978_v12  ;;  %v2931_v0 = vadd.f32 %v15136_v63, %v15135_v53  ;;  %v11209_v63 = vld [vmem:[#allocation2 + $0x38] sm:$0xff] }
 0x873   : > { %v4222_v21 = vpop.f32.mrf.mxu2  ;;  %v4359_v39 = vpop.f32.mrf.mxu3 }
 0x874   : > { %v3931_v48 = vpop.f32.mrf.mxu0  ;;  %v4084_v36 = vpop.f32.mrf.mxu1 }
 0x875   : > { %v4899_v19 = vadd.f32 %v3931_v48, %v2500_v3  ;;  %v4900_v14 = vadd.f32 %v4084_v36, %v2653_v33  ;;  %v15133_v36 = vld [vmem:[#allocation117_spill] sm:$0xff] }
 0x877   : > { %4402 = vmatmul.bf16.gmra.mxu0 %v11208_v27  ;;  %4555 = vmatmul.bf16.gmra.mxu1 %v11208_v27  ;;  %v5025_v54 = vrot.slane %v4899_v19, 7  ;;  %v5026_v21 = vrot.slane %v4900_v14, 7  ;;  %v15134_v27 = vld [vmem:[#allocation440_spill] sm:$0xff]  ;;  %v15140_v19 = vld [vmem:[#allocation293_spill] sm:$0xff] }
 0x878   : > { %v2794_v58 = vadd.f32 %v15134_v27, %v15133_v36 }
 0x87b   : > { %v4224_v51 = vpop.f32.mrf.mxu2  ;;  %v4361_v62 = vpop.f32.mrf.mxu3 }
 0x87c   : > { %v3933_v32 = vpop.f32.mrf.mxu0  ;;  %v4086_v30 = vpop.f32.mrf.mxu1  ;;  %v15137_v51 = vld [vmem:[#allocation119_spill] sm:$0xff]  ;;  %v15138_v62 = vld [vmem:[#allocation292_spill] sm:$0xff] }
 0x87d   : > { %v4901_v44 = vadd.f32 %v3933_v32, %v2502_v47  ;;  %v4902_v18 = vadd.f32 %v4086_v30, %v2655_v7  ;;  %v2505_v47 = vadd.f32 %v15138_v62, %v15137_v51  ;;  %v15139_v7 = vld [vmem:[#allocation120_spill] sm:$0xff] }
 0x87e   : > { %v2658_v14 = vadd.f32 %v15140_v19, %v15139_v7  ;;  %v15144_v62 = vld [vmem:[#allocation444_spill] sm:$0xff] }
 0x87f   : > { %v5027_v39 = vrot.slane %v4901_v44, 7  ;;  %v5028_v3 = vrot.slane %v4902_v18, 7 }
 0x881   : > { %v5056_v33 = vsel %vm5045_vm0, %v5025_v54, %v5027_v39  ;;  %v5057_v48 = vsel %vm5045_vm0, %v5026_v21, %v5028_v3 }
 0x883   : > { %v4225_v32 = vpop.f32.mrf.mxu2  ;;  %v4362_v30 = vpop.f32.mrf.mxu3 }
 0x884   : > { %v4903_v44 = vadd.f32 %v4225_v32, %v2794_v58  ;;  %v4904_v18 = vadd.f32 %v4362_v30, %v2931_v0  ;;  %v3936_v54 = vpop.f32.mrf.mxu0  ;;  %v4089_v12 = vpop.f32.mrf.mxu1  ;;  %v15143_v0 = vld [vmem:[#allocation121_spill] sm:$0xff] }
 0x885   : > { %v4907_v43 = vadd.f32 %v3936_v54, %v2505_v47  ;;  %v4908_v21 = vadd.f32 %v4089_v12, %v2658_v14  ;;  %v2797_v7 = vadd.f32 %v15144_v62, %v15143_v0  ;;  %v15145_v47 = vld [vmem:[#allocation122_spill] sm:$0xff]  ;;  %v15146_v12 = vld [vmem:[#allocation445_spill] sm:$0xff]  ;;  %v15150_v54 = vld [vmem:[#allocation296_spill] sm:$0xff] }
 0x886   : > { %v13000_v25 = vadd.f32 %v5056_v33, %v4903_v44  ;;  %v13002_v36 = vadd.f32 %v5057_v48, %v4904_v18  ;;  %v2934_v33 = vadd.f32 %v15146_v12, %v15145_v47 }
 0x887   : > { %v5029_v27 = vrot.slane %v4907_v43, 7  ;;  %v5030_v53 = vrot.slane %v4908_v21, 7  ;;  %4406 = vmatmul.bf16.gmra.mxu0 %v11209_v63  ;;  %4559 = vmatmul.bf16.gmra.mxu1 %v11209_v63 }
 0x888   : > { %15141 = vst [vmem:[#allocation165_spill] sm:$0xff] %v13000_v25 }
 0x889   : > { %15142 = vst [vmem:[#allocation15_spill] sm:$0xff] %v13002_v36  ;;  %v5054_v51 = vsel %vm5045_vm0, %v5027_v39, %v5029_v27  ;;  %v5055_v58 = vsel %vm5045_vm0, %v5028_v3, %v5030_v53  ;;  %v15149_v39 = vld [vmem:[#allocation123_spill] sm:$0xff]  ;;  %v15151_v3 = vld [vmem:[#allocation124_spill] sm:$0xff]  ;;  %v15152_v27 = vld [vmem:[#allocation297_spill] sm:$0xff] }
 0x88a   : > { %v2509_v21 = vadd.f32 %v15150_v54, %v15149_v39  ;;  %v2662_v53 = vadd.f32 %v15152_v27, %v15151_v3  ;;  %v11029_v39 = vld [vmem:[%s14434_s3 + $0xc0] sm:$0xff] }
 0x88b   : > { %v4228_v19 = vpop.f32.mrf.mxu2  ;;  %v4365_v48 = vpop.f32.mrf.mxu3  ;;  %6319 = vmatpush.bf16.msra.mxu3 %v11029_v39  ;;  %v15163_v39 = vld [vmem:[#allocation130_spill] sm:$0xff] }
 0x88c   : > { %v4909_v14 = vadd.f32 %v4228_v19, %v2797_v7  ;;  %v4910_v43 = vadd.f32 %v4365_v48, %v2934_v33  ;;  %v3938_v32 = vpop.f32.mrf.mxu0  ;;  %v4091_v30 = vpop.f32.mrf.mxu1  ;;  %v11210_v7 = vld [vmem:[#allocation2 + $0x40] sm:$0xff]  ;;  %v15153_v33 = vld [vmem:[#allocation125_spill] sm:$0xff] }
 0x88d   : > { %v15156_v48 = vld [vmem:[#allocation301_spill] sm:$0xff]  ;;  %v11021_v30 = vld [vmem:[%s14434_s3 + $0x80] sm:$0xff] }
 0x88e   : > { %v13012_v44 = vadd.f32 %v5054_v51, %v4909_v14  ;;  %v13014_v18 = vadd.f32 %v5055_v58, %v4910_v43  ;;  %v15154_v51 = vld [vmem:[#allocation300_spill] sm:$0xff]  ;;  %v15155_v58 = vld [vmem:[#allocation126_spill] sm:$0xff]  ;;  %6150 = vmatpush.bf16.msra.mxu2 %v11021_v30 }
 0x88f   : > { %v2511_v19 = vadd.f32 %v15154_v51, %v15153_v33  ;;  %v2664_v14 = vadd.f32 %v15156_v48, %v15155_v58  ;;  %v15157_v33 = vld [vmem:[#allocation127_spill] sm:$0xff]  ;;  %v15158_v51 = vld [vmem:[#allocation450_spill] sm:$0xff]  ;;  %v15159_v48 = vld [vmem:[#allocation128_spill] sm:$0xff] }
 0x890   : > { %15147 = vst [vmem:[#allocation168_spill] sm:$0xff] %v13012_v44  ;;  %v2802_v58 = vadd.f32 %v15158_v51, %v15157_v33 }
 0x891   : > { %15148 = vst [vmem:[#allocation16_spill] sm:$0xff] %v13014_v18 }
 0x893   : > { %v4230_v63 = vpop.f32.mrf.mxu2  ;;  %v4367_v0 = vpop.f32.mrf.mxu3 }
 0x894   : > { %v3940_v62 = vpop.f32.mrf.mxu0  ;;  %v4093_v47 = vpop.f32.mrf.mxu1 }
 0x895   : > { %v4915_v12 = vadd.f32 %v3940_v62, %v2509_v21  ;;  %v4916_v36 = vadd.f32 %v4093_v47, %v2662_v53 }
 0x897   : > { %4411 = vmatmul.bf16.gmra.mxu0 %v11210_v7  ;;  %4564 = vmatmul.bf16.gmra.mxu1 %v11210_v7  ;;  %v5031_v53 = vrot.slane %v4915_v12, 7  ;;  %v5032_v63 = vrot.slane %v4916_v36, 7  ;;  %v15164_v12 = vld [vmem:[#allocation305_spill] sm:$0xff] }
 0x898   : > { %v2667_v36 = vadd.f32 %v15164_v12, %v15163_v39 }
 0x89b   : > { %v4232_v43 = vpop.f32.mrf.mxu2  ;;  %v4369_v32 = vpop.f32.mrf.mxu3 }
 0x89c   : > { %v3942_v54 = vpop.f32.mrf.mxu0  ;;  %v4095_v21 = vpop.f32.mrf.mxu1  ;;  %v15160_v43 = vld [vmem:[#allocation451_spill] sm:$0xff] }
 0x89d   : > { %v4917_v3 = vadd.f32 %v3942_v54, %v2511_v19  ;;  %v4918_v27 = vadd.f32 %v4095_v21, %v2664_v14  ;;  %v2939_v32 = vadd.f32 %v15160_v43, %v15159_v48  ;;  %v15161_v19 = vld [vmem:[#allocation129_spill] sm:$0xff]  ;;  %v15162_v14 = vld [vmem:[#allocation304_spill] sm:$0xff] }
 0x89e   : > { %v2514_v30 = vadd.f32 %v15162_v14, %v15161_v19  ;;  %v11211_v43 = vld [vmem:[#allocation2 + $0x48] sm:$0xff]  ;;  %v15167_v14 = vld [vmem:[#allocation454_spill] sm:$0xff] }
 0x89f   : > { %v5033_v0 = vrot.slane %v4917_v3, 7  ;;  %v5034_v62 = vrot.slane %v4918_v27, 7 }
 0x8a1   : > { %v5052_v47 = vsel %vm5045_vm0, %v5031_v53, %v5033_v0  ;;  %v5053_v7 = vsel %vm5045_vm0, %v5032_v63, %v5034_v62 }
 0x8a3   : > { %v4233_v54 = vpop.f32.mrf.mxu2  ;;  %v4370_v21 = vpop.f32.mrf.mxu3 }
 0x8a4   : > { %v4919_v3 = vadd.f32 %v4233_v54, %v2802_v58  ;;  %v4920_v27 = vadd.f32 %v4370_v21, %v2939_v32  ;;  %v3945_v53 = vpop.f32.mrf.mxu0  ;;  %v4098_v18 = vpop.f32.mrf.mxu1  ;;  %v15166_v32 = vld [vmem:[#allocation131_spill] sm:$0xff] }
 0x8a5   : > { %v4923_v44 = vadd.f32 %v3945_v53, %v2514_v30  ;;  %v4924_v63 = vadd.f32 %v4098_v18, %v2667_v36  ;;  %v2805_v39 = vadd.f32 %v15167_v14, %v15166_v32  ;;  %v15168_v30 = vld [vmem:[#allocation132_spill] sm:$0xff]  ;;  %v15169_v18 = vld [vmem:[#allocation455_spill] sm:$0xff] }
 0x8a6   : > { %v13042_v25 = vadd.f32 %v5052_v47, %v4919_v3  ;;  %v13044_v33 = vadd.f32 %v5053_v7, %v4920_v27  ;;  %v2942_v47 = vadd.f32 %v15169_v18, %v15168_v30  ;;  %v15172_v53 = vld [vmem:[#allocation308_spill] sm:$0xff] }
 0x8a7   : > { %v5035_v51 = vrot.slane %v4923_v44, 7  ;;  %v5036_v48 = vrot.slane %v4924_v63, 7  ;;  %4415 = vmatmul.bf16.gmra.mxu0 %v11211_v43  ;;  %4568 = vmatmul.bf16.gmra.mxu1 %v11211_v43 }
 0x8a8   : > { %15165 = vst [vmem:[#allocation169_spill] sm:$0xff] %v13044_v33 }
 0x8a9   : > { %v5050_v19 = vsel %vm5045_vm0, %v5033_v0, %v5035_v51  ;;  %v5051_v58 = vsel %vm5045_vm0, %v5034_v62, %v5036_v48  ;;  %v15171_v0 = vld [vmem:[#allocation133_spill] sm:$0xff]  ;;  %v15173_v62 = vld [vmem:[#allocation134_spill] sm:$0xff] }
 0x8aa   : > { %v2518_v63 = vadd.f32 %v15172_v53, %v15171_v0  ;;  %v15174_v51 = vld [vmem:[#allocation309_spill] sm:$0xff] }
 0x8ab   : > { %v4236_v12 = vpop.f32.mrf.mxu2  ;;  %v4373_v7 = vpop.f32.mrf.mxu3  ;;  %v2671_v48 = vadd.f32 %v15174_v51, %v15173_v62 }
 0x8ac   : > { %v4925_v36 = vadd.f32 %v4236_v12, %v2805_v39  ;;  %v4926_v44 = vadd.f32 %v4373_v7, %v2942_v47  ;;  %v3947_v54 = vpop.f32.mrf.mxu0  ;;  %v4100_v21 = vpop.f32.mrf.mxu1  ;;  %v11212_v39 = vld [vmem:[#allocation2 + $0x50] sm:$0xff]  ;;  %v15175_v47 = vld [vmem:[#allocation135_spill] sm:$0xff] }
 0x8ad   : > { %v15178_v7 = vld [vmem:[#allocation313_spill] sm:$0xff] }
 0x8ae   : > { %v13054_v3 = vadd.f32 %v5050_v19, %v4925_v36  ;;  %v13056_v27 = vadd.f32 %v5051_v58, %v4926_v44  ;;  %v15176_v19 = vld [vmem:[#allocation312_spill] sm:$0xff] }
 0x8af   : > { %v2520_v12 = vadd.f32 %v15176_v19, %v15175_v47  ;;  %v15177_v58 = vld [vmem:[#allocation136_spill] sm:$0xff]  ;;  %v15180_v47 = vld [vmem:[#allocation138_spill] sm:$0xff] }
 0x8b0   : > { %15170 = vst [vmem:[#allocation17_spill] sm:$0xff] %v13056_v27  ;;  %v2673_v36 = vadd.f32 %v15178_v7, %v15177_v58  ;;  %v2947_v19 = vadd.f32 %v12449_v16, %v15180_v47  ;;  %v15181_v58 = vld [vmem:[#allocation139_spill] sm:$0xff]  ;;  %v15182_v7 = vld [vmem:[#allocation316_spill] sm:$0xff]  ;;  %v11213_v47 = vld [vmem:[#allocation2 + $0x58] sm:$0xff] }
 0x8b3   : > { %v4238_v43 = vpop.f32.mrf.mxu2  ;;  %v4375_v32 = vpop.f32.mrf.mxu3 }
 0x8b4   : > { %v3949_v14 = vpop.f32.mrf.mxu0  ;;  %v4102_v30 = vpop.f32.mrf.mxu1 }
 0x8b5   : > { %v4931_v18 = vadd.f32 %v3949_v14, %v2518_v63  ;;  %v4932_v33 = vadd.f32 %v4102_v30, %v2671_v48  ;;  %v15179_v30 = vld [vmem:[#allocation137_spill] sm:$0xff] }
 0x8b7   : > { %4420 = vmatmul.bf16.gmra.mxu0 %v11212_v39  ;;  %4573 = vmatmul.bf16.gmra.mxu1 %v11212_v39  ;;  %v5037_v51 = vrot.slane %v4931_v18, 7  ;;  %v5038_v43 = vrot.slane %v4932_v33, 7  ;;  %v2810_v39 = vadd.f32 %v12447_v22, %v15179_v30  ;;  %v15184_v18 = vld [vmem:[#allocation317_spill] sm:$0xff] }
 0x8bb   : > { %v4240_v44 = vpop.f32.mrf.mxu2  ;;  %v4377_v54 = vpop.f32.mrf.mxu3 }
 0x8bc   : > { %v3951_v21 = vpop.f32.mrf.mxu0  ;;  %v4104_v0 = vpop.f32.mrf.mxu1 }
 0x8bd   : > { %v4933_v53 = vadd.f32 %v3951_v21, %v2520_v12  ;;  %v4934_v62 = vadd.f32 %v4104_v0, %v2673_v36  ;;  %v2523_v12 = vadd.f32 %v15182_v7, %v15181_v58  ;;  %v15183_v36 = vld [vmem:[#allocation140_spill] sm:$0xff]  ;;  %v15186_v7 = vld [vmem:[#allocation462_spill] sm:$0xff] }
 0x8be   : > { %v2676_v33 = vadd.f32 %v15184_v18, %v15183_v36  ;;  %v15188_v18 = vld [vmem:[#allocation463_spill] sm:$0xff] }
 0x8bf   : > { %v5039_v32 = vrot.slane %v4933_v53, 7  ;;  %v5040_v63 = vrot.slane %v4934_v62, 7 }
 0x8c1   : > { %v5048_v48 = vsel %vm5045_vm0, %v5037_v51, %v5039_v32  ;;  %v5049_v14 = vsel %vm5045_vm0, %v5038_v43, %v5040_v63 }
 0x8c3   : > { %v4241_v44 = vpop.f32.mrf.mxu2  ;;  %v4378_v54 = vpop.f32.mrf.mxu3 }
 0x8c4   : > { %v4935_v21 = vadd.f32 %v4241_v44, %v2810_v39  ;;  %v4936_v0 = vadd.f32 %v4378_v54, %v2947_v19  ;;  %v3954_v53 = vpop.f32.mrf.mxu0  ;;  %v4107_v62 = vpop.f32.mrf.mxu1  ;;  %v15185_v19 = vld [vmem:[#allocation141_spill] sm:$0xff] }
 0x8c5   : > { %v4939_v51 = vadd.f32 %v3954_v53, %v2523_v12  ;;  %v4940_v43 = vadd.f32 %v4107_v62, %v2676_v33  ;;  %v2813_v36 = vadd.f32 %v15186_v7, %v15185_v19  ;;  %v15187_v12 = vld [vmem:[#allocation142_spill] sm:$0xff] }
 0x8c6   : > { %v13078_v27 = vadd.f32 %v5048_v48, %v4935_v21  ;;  %v13080_v22 = vadd.f32 %v5049_v14, %v4936_v0  ;;  %v2950_v48 = vadd.f32 %v15188_v18, %v15187_v12  ;;  %v10956_v7 = vld [vmem:[%s14434_s3 + $0x78] sm:$0xff]  ;;  %v15192_v12 = vld [vmem:[#allocation320_spill] sm:$0xff] }
 0x8c7   : > { %v5041_v30 = vrot.slane %v4939_v51, 7  ;;  %v5042_v16 = vrot.slane %v4940_v43, 7  ;;  %4424 = vmatmul.bf16.gmra.mxu0 %v11213_v47  ;;  %4577 = vmatmul.bf16.gmra.mxu1 %v11213_v47  ;;  %v11116_v47 = vld [vmem:[%s14434_s3 + $0x178] sm:$0xff] }
 0x8c8   : > { %7918 = vmatpush.bf16.msrb.mxu3 %v11116_v47  ;;  %7066 = vmatpush.bf16.msrb.mxu1 %v10956_v7 }
 0x8c9   : > { %v5046_v58 = vsel %vm5045_vm0, %v5039_v32, %v5041_v30  ;;  %v5047_v39 = vsel %vm5045_vm0, %v5040_v63, %v5042_v16  ;;  %v11214_v30 = vld [vmem:[#allocation2 + $0x60] sm:$0xff]  ;;  %v11108_v16 = vld [vmem:[%s14434_s3 + $0x138] sm:$0xff] }
 0x8ca   : > { %7749 = vmatpush.bf16.msrb.mxu2 %v11108_v16 }
 0x8cb   : > { %v4244_v33 = vpop.f32.mrf.mxu2  ;;  %v4381_v14 = vpop.f32.mrf.mxu3 }
 0x8cc   : > { %v4941_v44 = vadd.f32 %v4244_v33, %v2813_v36  ;;  %v4942_v54 = vadd.f32 %v4381_v14, %v2950_v48  ;;  %v3956_v21 = vpop.f32.mrf.mxu0  ;;  %v4109_v0 = vpop.f32.mrf.mxu1  ;;  %v15191_v36 = vld [vmem:[#allocation143_spill] sm:$0xff]  ;;  %v15193_v48 = vld [vmem:[#allocation144_spill] sm:$0xff]  ;;  %v15194_v33 = vld [vmem:[#allocation321_spill] sm:$0xff] }
 0x8cd   : > { %v2964_v18 = vadd.f32 %v15192_v12, %v15191_v36  ;;  %v3117_v14 = vadd.f32 %v15194_v33, %v15193_v48  ;;  %v15197_v0 = vld [vmem:[#allocation146_spill] sm:$0xff]  ;;  %v5399_v36 = vld [vmem:[%s14433_s2] sm:$0x3] }
 0x8ce   : > { %v13090_v53 = vadd.f32 %v5046_v58, %v4941_v44  ;;  %v13092_v62 = vadd.f32 %v5047_v39, %v4942_v54  ;;  %v10948_v39 = vld [vmem:[%s14434_s3 + $0x38] sm:$0xff]  ;;  %v15195_v44 = vld [vmem:[#allocation145_spill] sm:$0xff] }
 0x8cf   : > { %6897 = vmatpush.bf16.msrb.mxu0 %v10948_v39  ;;  %v15196_v54 = vld [vmem:[#allocation322_spill] sm:$0xff] }
 0x8d0   : > { %15189 = vst [vmem:[#allocation342_spill] sm:$0xff] %v13090_v53  ;;  %v2967_v21 = vadd.f32 %v15196_v54, %v15195_v44  ;;  %v11215_v44 = vld [vmem:[#allocation2 + $0x68] sm:$0xff]  ;;  %v13118_v54 = vperm.slane %v5399_v36, 0 }
 0x8d1   : > { %15190 = vst [vmem:[#allocation18_spill] sm:$0xff] %v13092_v62 }
 0x8d3   : > { %v4246_v32 = vpop.f32.mrf.mxu2  ;;  %v4383_v51 = vpop.f32.mrf.mxu3 }
 0x8d4   : > { %v4394_v43 = vpop.f32.mrf.mxu0  ;;  %v4547_v63 = vpop.f32.mrf.mxu1  ;;  %v15198_v32 = vld [vmem:[#allocation323_spill] sm:$0xff] }
 0x8d5   : > { %v3120_v51 = vadd.f32 %v15198_v32, %v15197_v0  ;;  %v15199_v0 = vld [vmem:[#allocation147_spill] sm:$0xff]  ;;  %v15200_v32 = vld [vmem:[#allocation324_spill] sm:$0xff] }
 0x8d7   : > { %4429 = vmatmul.bf16.gmra.mxu0 %v11214_v30  ;;  %4582 = vmatmul.bf16.gmra.mxu1 %v11214_v30 }
 0x8dc   : > { %v4395_v19 = vpop.f32.mrf.mxu0  ;;  %v4548_v58 = vpop.f32.mrf.mxu1 }
 0x8dd   : > { %v4697_v43 = vadd.f32 %v4395_v19, %v2964_v18  ;;  %v4698_v63 = vadd.f32 %v4548_v58, %v3117_v14  ;;  %v13120_v19 = vperm.slane %v5399_v36, 1 }
 0x8df   : > { %v5174_v39 = vrot.slane %v4697_v43, 1  ;;  %v5175_v7 = vrot.slane %v4698_v63, 1  ;;  %v15201_v43 = vld [vmem:[#allocation148_spill] sm:$0xff]  ;;  %v15202_v63 = vld [vmem:[#allocation325_spill] sm:$0xff] }
 0x8e4   : > { %v4398_v30 = vpop.f32.mrf.mxu0  ;;  %v4551_v16 = vpop.f32.mrf.mxu1 }
 0x8e5   : > { %v4703_v47 = vadd.f32 %v4398_v30, %v2967_v21  ;;  %v4704_v12 = vadd.f32 %v4551_v16, %v3120_v51  ;;  %v2969_v51 = vadd.f32 %v15200_v32, %v15199_v0  ;;  %v3122_v30 = vadd.f32 %v15202_v63, %v15201_v43  ;;  %v10957_v43 = vld [vmem:[#allocation3 + $0x24] sm:$0xf] }
 0x8e7   : > { %v5176_v48 = vrot.slane %v4703_v47, 1  ;;  %v5177_v33 = vrot.slane %v4704_v12, 1  ;;  %4433 = vmatmul.bf16.gmra.mxu0 %v11215_v44  ;;  %4586 = vmatmul.bf16.gmra.mxu1 %v11215_v44 }
 0x8e9   : > { %v5333_v58 = vsel %vm5270_vm1, %v5174_v39, %v5176_v48  ;;  %v5334_v18 = vsel %vm5270_vm1, %v5175_v7, %v5177_v33 }
 0x8ea   : > { %v5335_v14 = vadd.f32 %v5333_v58, %v12496_v5  ;;  %v5336_v21 = vadd.f32 %v5334_v18, %v12498_v6 }
 0x8ec   : > { %v5405_v16 = vadd.f32 %v13118_v54, %v5335_v14  ;;  %v5406_v47 = vadd.f32 %v13120_v19, %v5336_v21  ;;  %v4400_v36 = vpop.f32.mrf.mxu0  ;;  %v4553_v12 = vpop.f32.mrf.mxu1 }
 0x8ed   : > { %v4705_v39 = vadd.f32 %v4400_v36, %v2969_v51  ;;  %v4706_v44 = vadd.f32 %v4553_v12, %v3122_v30  ;;  %v9643_v51 = vld [vmem:[#allocation3 + $0x20] sm:$0xf]  ;;  %v15205_v12 = vld [vmem:[#allocation150_spill] sm:$0xff] }
 0x8ee   : > { %v5469_v62 = vpack.c.bf16 %v5406_v47, %v5405_v16  ;;  %v15203_v16 = vld [vmem:[#allocation149_spill] sm:$0xff]  ;;  %v15204_v47 = vld [vmem:[#allocation326_spill] sm:$0xff] }
 0x8ef   : > { %v5178_v7 = vrot.slane %v4705_v39, 1  ;;  %v5179_v53 = vrot.slane %v4706_v44, 1  ;;  %v2973_v36 = vadd.f32 %v15204_v47, %v15203_v16  ;;  %v15206_v39 = vld [vmem:[#allocation327_spill] sm:$0xff] }
 0x8f0   : > { %5502 = vst [vmem:[#allocation3 + $0x28] sm:$0xff] %v5469_v62  ;;  %v11216_v62 = vld [vmem:[#allocation2 + $0x70] sm:$0xff]  ;;  %v3126_v44 = vadd.f32 %v15206_v39, %v15205_v12  ;;  %v11217_v39 = vld [vmem:[#allocation2 + $0x78] sm:$0xff] }
 0x8f1   : > { %v5331_v5 = vsel %vm5270_vm1, %v5176_v48, %v5178_v7  ;;  %v5332_v6 = vsel %vm5270_vm1, %v5177_v33, %v5179_v53  ;;  %v15207_v7 = vld [vmem:[#allocation151_spill] sm:$0xff] }
 0x8f2   : > { %v5337_v58 = vadd.f32 %v5331_v5, %v12508_v10  ;;  %v5338_v18 = vadd.f32 %v5332_v6, %v12510_v24  ;;  %v15208_v5 = vld [vmem:[#allocation328_spill] sm:$0xff] }
 0x8f3   : > { %v2976_v6 = vadd.f32 %v15208_v5, %v15207_v7 }
 0x8f4   : > { %v5407_v14 = vadd.f32 %v13118_v54, %v5337_v58  ;;  %v5408_v21 = vadd.f32 %v13120_v19, %v5338_v18  ;;  %v4403_v0 = vpop.f32.mrf.mxu0  ;;  %v4556_v32 = vpop.f32.mrf.mxu1  ;;  %v15209_v58 = vld [vmem:[#allocation152_spill] sm:$0xff]  ;;  %v15210_v18 = vld [vmem:[#allocation329_spill] sm:$0xff] }
 0x8f6   : > { %v5470_v63 = vpack.c.bf16 %v5408_v21, %v5407_v14  ;;  %v3129_v14 = vadd.f32 %v15210_v18, %v15209_v58  ;;  %v15212_v58 = vld [vmem:[#allocation330_spill] sm:$0xff] }
 0x8f7   : > { %4438 = vmatmul.bf16.gmra.mxu0 %v11216_v62  ;;  %4591 = vmatmul.bf16.gmra.mxu1 %v11216_v62  ;;  %v10958_v48 = vld [vmem:[#allocation3 + $0x24] sm:$0xf0]  ;;  %v9645_v30 = vld [vmem:[#allocation3 + $0x28] sm:$0xf0] }
 0x8f8   : > { %5503 = vst [vmem:[#allocation3 + $0x30] sm:$0xff] %v5470_v63  ;;  %v9644_v53 = vor.u32 %v10958_v48, %v9643_v51  ;;  %v9648_v33 = vor.u32 %v10957_v43, %v9645_v30  ;;  %v10960_v43 = vld [vmem:[#allocation3 + $0x34] sm:$0xf0] }
 0x8fa   : > { %6151 = vmatmul.bf16.vlgmr.msra.gmra.mxu2 %v9644_v53  ;;  %6320 = vmatmul.bf16.vlgmr.msra.gmra.mxu3 %v9648_v33  ;;  %v9653_v53 = vld [vmem:[#allocation3 + $0x38] sm:$0xf0] }
 0x8fc   : > { %v4404_v10 = vpop.f32.mrf.mxu0  ;;  %v4557_v24 = vpop.f32.mrf.mxu1 }
 0x8fd   : > { %v4713_v21 = vadd.f32 %v4404_v10, %v2973_v36  ;;  %v4714_v0 = vadd.f32 %v4557_v24, %v3126_v44 }
 0x8ff   : > { %v9651_v48 = vld [vmem:[#allocation3 + $0x30] sm:$0xf]  ;;  %v10959_v30 = vld [vmem:[#allocation3 + $0x34] sm:$0xf]  ;;  %v5180_v33 = vrot.slane %v4713_v21, 1  ;;  %v5181_v16 = vrot.slane %v4714_v0, 1 }
 0x900   : > { %v9652_v7 = vor.u32 %v10960_v43, %v9651_v48  ;;  %v9656_v5 = vor.u32 %v10959_v30, %v9653_v53  ;;  %v15214_v21 = vld [vmem:[#allocation331_spill] sm:$0xff] }
 0x904   : > { %v4407_v32 = vpop.f32.mrf.mxu0  ;;  %v4560_v51 = vpop.f32.mrf.mxu1 }
 0x905   : > { %v4719_v63 = vadd.f32 %v4407_v32, %v2976_v6  ;;  %v4720_v62 = vadd.f32 %v4560_v51, %v3129_v14  ;;  %v15211_v6 = vld [vmem:[#allocation153_spill] sm:$0xff]  ;;  %v15213_v14 = vld [vmem:[#allocation154_spill] sm:$0xff] }
 0x906   : > { %v2978_v18 = vadd.f32 %v15212_v58, %v15211_v6  ;;  %v3131_v0 = vadd.f32 %v15214_v21, %v15213_v14  ;;  %v11218_v58 = vld [vmem:[#allocation2 + $0x80] sm:$0xff] }
 0x907   : > { %v5182_v47 = vrot.slane %v4719_v63, 1  ;;  %v5183_v12 = vrot.slane %v4720_v62, 1  ;;  %4442 = vmatmul.bf16.gmra.mxu0 %v11217_v39  ;;  %4595 = vmatmul.bf16.gmra.mxu1 %v11217_v39 }
 0x909   : > { %v5329_v10 = vsel %vm5270_vm1, %v5180_v33, %v5182_v47  ;;  %v5330_v24 = vsel %vm5270_vm1, %v5181_v16, %v5183_v12 }
 0x90a   : > { %v5339_v36 = vadd.f32 %v5329_v10, %v12532_v4  ;;  %v5340_v44 = vadd.f32 %v5330_v24, %v12534_v40  ;;  %6156 = vmatmul.bf16.gmra.mxu2 %v9652_v7  ;;  %6325 = vmatmul.bf16.gmra.mxu3 %v9656_v5 }
 0x90c   : > { %v5409_v32 = vadd.f32 %v13118_v54, %v5339_v36  ;;  %v5410_v51 = vadd.f32 %v13120_v19, %v5340_v44  ;;  %v4409_v43 = vpop.f32.mrf.mxu0  ;;  %v4562_v63 = vpop.f32.mrf.mxu1  ;;  %v9659_v36 = vld [vmem:[#allocation3 + $0x40] sm:$0xf]  ;;  %v10961_v44 = vld [vmem:[#allocation3 + $0x44] sm:$0xf] }
 0x90d   : > { %v4721_v62 = vadd.f32 %v4409_v43, %v2978_v18  ;;  %v4722_v48 = vadd.f32 %v4562_v63, %v3131_v0  ;;  %v15215_v43 = vld [vmem:[#allocation155_spill] sm:$0xff]  ;;  %v15216_v63 = vld [vmem:[#allocation334_spill] sm:$0xff] }
 0x90e   : > { %v5471_v30 = vpack.c.bf16 %v5410_v51, %v5409_v32  ;;  %v10947_v32 = vld [vmem:[%s14434_s3 + $0x30] sm:$0xff] }
 0x90f   : > { %v5184_v4 = vrot.slane %v4721_v62, 1  ;;  %v5185_v53 = vrot.slane %v4722_v48, 1  ;;  %v10955_v51 = vld [vmem:[%s14434_s3 + $0x70] sm:$0xff]  ;;  %v2982_v62 = vadd.f32 %v15216_v63, %v15215_v43  ;;  %v15217_v48 = vld [vmem:[#allocation156_spill] sm:$0xff]  ;;  %6898 = vmatpush.bf16.msrb.mxu0 %v10947_v32 }
 0x910   : > { %5504 = vst [vmem:[#allocation3 + $0x48] sm:$0xff] %v5471_v30  ;;  %v15218_v30 = vld [vmem:[#allocation335_spill] sm:$0xff]  ;;  %7067 = vmatpush.bf16.msrb.mxu1 %v10955_v51  ;;  %v11219_v51 = vld [vmem:[#allocation2 + $0x88] sm:$0xff] }
 0x911   : > { %v5327_v40 = vsel %vm5270_vm1, %v5182_v47, %v5184_v4  ;;  %v5328_v33 = vsel %vm5270_vm1, %v5183_v12, %v5185_v53  ;;  %v3135_v4 = vadd.f32 %v15218_v30, %v15217_v48  ;;  %v15219_v53 = vld [vmem:[#allocation158_spill] sm:$0xff] }
 0x912   : > { %v5341_v16 = vadd.f32 %v5327_v40, %v12544_v28  ;;  %v5342_v39 = vadd.f32 %v5328_v33, %v12546_v29  ;;  %v11107_v28 = vld [vmem:[%s14434_s3 + $0x130] sm:$0xff]  ;;  %v15220_v40 = vld [vmem:[#allocation338_spill] sm:$0xff] }
 0x913   : > { %v11115_v29 = vld [vmem:[%s14434_s3 + $0x170] sm:$0xff]  ;;  %7750 = vmatpush.bf16.msrb.mxu2 %v11107_v28  ;;  %v2985_v33 = vadd.f32 %v15220_v40, %v15219_v53  ;;  %v15223_v30 = vld [vmem:[#allocation162_spill] sm:$0xff]  ;;  %v15225_v40 = vld [vmem:[#allocation163_spill] sm:$0xff] }
 0x914   : > { %v5411_v7 = vadd.f32 %v13118_v54, %v5341_v16  ;;  %v5412_v5 = vadd.f32 %v13120_v19, %v5342_v39  ;;  %v4412_v10 = vpop.f32.mrf.mxu0  ;;  %v4565_v24 = vpop.f32.mrf.mxu1  ;;  %7919 = vmatpush.bf16.msrb.mxu3 %v11115_v29  ;;  %v15221_v16 = vld [vmem:[#allocation159_spill] sm:$0xff] }
 0x915   : > { %v15222_v39 = vld [vmem:[#allocation339_spill] sm:$0xff] }
 0x916   : > { %v5472_v6 = vpack.c.bf16 %v5412_v5, %v5411_v7  ;;  %v3138_v7 = vadd.f32 %v15222_v39, %v15221_v16 }
 0x917   : > { %4447 = vmatmul.bf16.gmra.mxu0 %v11218_v58  ;;  %4600 = vmatmul.bf16.gmra.mxu1 %v11218_v58  ;;  %v10962_v47 = vld [vmem:[#allocation3 + $0x44] sm:$0xf0]  ;;  %v9661_v18 = vld [vmem:[#allocation3 + $0x48] sm:$0xf0] }
 0x918   : > { %5505 = vst [vmem:[#allocation3 + $0x50] sm:$0xff] %v5472_v6  ;;  %v9660_v12 = vor.u32 %v10962_v47, %v9659_v36  ;;  %v9664_v14 = vor.u32 %v10961_v44, %v9661_v18  ;;  %v10964_v44 = vld [vmem:[#allocation3 + $0x54] sm:$0xf0] }
 0x91a   : > { %6161 = vmatmul.bf16.gmra.mxu2 %v9660_v12  ;;  %6330 = vmatmul.bf16.gmra.mxu3 %v9664_v14  ;;  %v9669_v12 = vld [vmem:[#allocation3 + $0x58] sm:$0xf0] }
 0x91c   : > { %v4413_v21 = vpop.f32.mrf.mxu0  ;;  %v4566_v0 = vpop.f32.mrf.mxu1 }
 0x91d   : > { %v4729_v5 = vadd.f32 %v4413_v21, %v2982_v62  ;;  %v4730_v10 = vadd.f32 %v4566_v0, %v3135_v4  ;;  %v15224_v4 = vld [vmem:[#allocation340_spill] sm:$0xff] }
 0x91e   : > { %v2987_v53 = vadd.f32 %v15224_v4, %v15223_v30  ;;  %v15227_v30 = vld [vmem:[#allocation166_spill] sm:$0xff]  ;;  %v15228_v4 = vld [vmem:[#allocation344_spill] sm:$0xff] }
 0x91f   : > { %v9667_v47 = vld [vmem:[#allocation3 + $0x50] sm:$0xf]  ;;  %v10963_v18 = vld [vmem:[#allocation3 + $0x54] sm:$0xf]  ;;  %v5186_v14 = vrot.slane %v4729_v5, 1  ;;  %v5187_v28 = vrot.slane %v4730_v10, 1 }
 0x920   : > { %v9668_v43 = vor.u32 %v10964_v44, %v9667_v47  ;;  %v9672_v63 = vor.u32 %v10963_v18, %v9669_v12 }
 0x924   : > { %v4416_v24 = vpop.f32.mrf.mxu0  ;;  %v4569_v36 = vpop.f32.mrf.mxu1 }
 0x925   : > { %v4735_v6 = vadd.f32 %v4416_v24, %v2985_v33  ;;  %v4736_v58 = vadd.f32 %v4569_v36, %v3138_v7  ;;  %v15226_v33 = vld [vmem:[#allocation341_spill] sm:$0xff] }
 0x926   : > { %v3140_v16 = vadd.f32 %v15226_v33, %v15225_v40  ;;  %v15229_v40 = vld [vmem:[#allocation167_spill] sm:$0xff]  ;;  %v15230_v33 = vld [vmem:[#allocation345_spill] sm:$0xff] }
 0x927   : > { %v5188_v29 = vrot.slane %v4735_v6, 1  ;;  %v5189_v32 = vrot.slane %v4736_v58, 1  ;;  %4451 = vmatmul.bf16.gmra.mxu0 %v11219_v51  ;;  %4604 = vmatmul.bf16.gmra.mxu1 %v11219_v51 }
 0x929   : > { %v5325_v21 = vsel %vm5270_vm1, %v5186_v14, %v5188_v29  ;;  %v5326_v0 = vsel %vm5270_vm1, %v5187_v28, %v5189_v32 }
 0x92a   : > { %v5343_v62 = vadd.f32 %v5325_v21, %v12574_v1  ;;  %v5344_v48 = vadd.f32 %v5326_v0, %v12576_v2  ;;  %6166 = vmatmul.bf16.gmra.mxu2 %v9668_v43  ;;  %6335 = vmatmul.bf16.gmra.mxu3 %v9672_v63  ;;  %v9675_v43 = vld [vmem:[#allocation3 + $0x60] sm:$0xf]  ;;  %v10965_v63 = vld [vmem:[#allocation3 + $0x64] sm:$0xf]  ;;  %v11220_v0 = vld [vmem:[#allocation2 + $0x90] sm:$0xff] }
 0x92c   : > { %v5413_v39 = vadd.f32 %v13118_v54, %v5343_v62  ;;  %v5414_v7 = vadd.f32 %v13120_v19, %v5344_v48  ;;  %v4418_v5 = vpop.f32.mrf.mxu0  ;;  %v4571_v10 = vpop.f32.mrf.mxu1 }
 0x92d   : > { %v4737_v24 = vadd.f32 %v4418_v5, %v2987_v53  ;;  %v4738_v36 = vadd.f32 %v4571_v10, %v3140_v16  ;;  %v2991_v53 = vadd.f32 %v15228_v4, %v15227_v30  ;;  %v3144_v16 = vadd.f32 %v15230_v33, %v15229_v40  ;;  %v15233_v10 = vld [vmem:[#allocation171_spill] sm:$0xff]  ;;  %v15235_v30 = vld [vmem:[#allocation174_spill] sm:$0xff] }
 0x92e   : > { %v5473_v44 = vpack.c.bf16 %v5414_v7, %v5413_v39  ;;  %v15231_v39 = vld [vmem:[#allocation170_spill] sm:$0xff]  ;;  %v15232_v7 = vld [vmem:[#allocation348_spill] sm:$0xff]  ;;  %v15237_v40 = vld [vmem:[#allocation175_spill] sm:$0xff] }
 0x92f   : > { %v5190_v1 = vrot.slane %v4737_v24, 1  ;;  %v5191_v6 = vrot.slane %v4738_v36, 1  ;;  %v2994_v5 = vadd.f32 %v15232_v7, %v15231_v39  ;;  %v15234_v24 = vld [vmem:[#allocation349_spill] sm:$0xff]  ;;  %v15236_v4 = vld [vmem:[#allocation350_spill] sm:$0xff]  ;;  %v15238_v33 = vld [vmem:[#allocation351_spill] sm:$0xff] }
 0x930   : > { %5506 = vst [vmem:[#allocation3 + $0x68] sm:$0xff] %v5473_v44  ;;  %v3147_v36 = vadd.f32 %v15234_v24, %v15233_v10 }
 0x931   : > { %v5323_v2 = vsel %vm5270_vm1, %v5188_v29, %v5190_v1  ;;  %v5324_v58 = vsel %vm5270_vm1, %v5189_v32, %v5191_v6 }
 0x932   : > { %v5345_v47 = vadd.f32 %v5323_v2, %v12586_v35  ;;  %v5346_v18 = vadd.f32 %v5324_v58, %v12588_v42  ;;  %v10968_v58 = vld [vmem:[#allocation3 + $0x74] sm:$0xf0] }
 0x934   : > { %v5415_v12 = vadd.f32 %v13118_v54, %v5345_v47  ;;  %v5416_v14 = vadd.f32 %v13120_v19, %v5346_v18  ;;  %v4421_v28 = vpop.f32.mrf.mxu0  ;;  %v4574_v51 = vpop.f32.mrf.mxu1 }
 0x935   : > { %v9685_v28 = vld [vmem:[#allocation3 + $0x78] sm:$0xf0] }
 0x936   : > { %v5474_v21 = vpack.c.bf16 %v5416_v14, %v5415_v12 }
 0x937   : > { %4456 = vmatmul.bf16.gmra.mxu0 %v11220_v0  ;;  %4609 = vmatmul.bf16.gmra.mxu1 %v11220_v0  ;;  %v10966_v29 = vld [vmem:[#allocation3 + $0x64] sm:$0xf0]  ;;  %v9677_v62 = vld [vmem:[#allocation3 + $0x68] sm:$0xf0]  ;;  %v11221_v0 = vld [vmem:[#allocation2 + $0x98] sm:$0xff] }
 0x938   : > { %5507 = vst [vmem:[#allocation3 + $0x70] sm:$0xff] %v5474_v21  ;;  %v9676_v32 = vor.u32 %v10966_v29, %v9675_v43  ;;  %v9680_v48 = vor.u32 %v10965_v63, %v9677_v62 }
 0x93a   : > { %6171 = vmatmul.bf16.gmra.mxu2 %v9676_v32  ;;  %6340 = vmatmul.bf16.gmra.mxu3 %v9680_v48 }
 0x93c   : > { %v4422_v35 = vpop.f32.mrf.mxu0  ;;  %v4575_v42 = vpop.f32.mrf.mxu1 }
 0x93d   : > { %v4745_v44 = vadd.f32 %v4422_v35, %v2991_v53  ;;  %v4746_v1 = vadd.f32 %v4575_v42, %v3144_v16  ;;  %v2996_v53 = vadd.f32 %v15236_v4, %v15235_v30  ;;  %v3149_v16 = vadd.f32 %v15238_v33, %v15237_v40  ;;  %v15239_v30 = vld [vmem:[#allocation178_spill] sm:$0xff]  ;;  %v15241_v40 = vld [vmem:[#allocation179_spill] sm:$0xff] }
 0x93e   : > { %v15240_v4 = vld [vmem:[#allocation354_spill] sm:$0xff]  ;;  %v15242_v33 = vld [vmem:[#allocation355_spill] sm:$0xff] }
 0x93f   : > { %v9683_v12 = vld [vmem:[#allocation3 + $0x70] sm:$0xf]  ;;  %v10967_v14 = vld [vmem:[#allocation3 + $0x74] sm:$0xf]  ;;  %v5192_v51 = vrot.slane %v4745_v44, 1  ;;  %v5193_v43 = vrot.slane %v4746_v1, 1 }
 0x940   : > { %v9684_v29 = vor.u32 %v10968_v58, %v9683_v12  ;;  %v9688_v62 = vor.u32 %v10967_v14, %v9685_v28  ;;  %v9691_v28 = vld [vmem:[#allocation3 + $0x80] sm:$0xf] }
 0x944   : > { %v4425_v6 = vpop.f32.mrf.mxu0  ;;  %v4578_v2 = vpop.f32.mrf.mxu1 }
 0x945   : > { %v4751_v47 = vadd.f32 %v4425_v6, %v2994_v5  ;;  %v4752_v18 = vadd.f32 %v4578_v2, %v3147_v36 }
 0x947   : > { %v5194_v63 = vrot.slane %v4751_v47, 1  ;;  %v5195_v21 = vrot.slane %v4752_v18, 1  ;;  %4460 = vmatmul.bf16.gmra.mxu0 %v11221_v0  ;;  %4613 = vmatmul.bf16.gmra.mxu1 %v11221_v0  ;;  %v11222_v0 = vld [vmem:[#allocation2 + $0xa0] sm:$0xff] }
 0x949   : > { %v5321_v32 = vsel %vm5270_vm1, %v5192_v51, %v5194_v63  ;;  %v5322_v48 = vsel %vm5270_vm1, %v5193_v43, %v5195_v21  ;;  %v10969_v51 = vld [vmem:[#allocation3 + $0x84] sm:$0xf] }
 0x94a   : > { %v5347_v35 = vadd.f32 %v5321_v32, %v12610_v11  ;;  %v5348_v42 = vadd.f32 %v5322_v48, %v12612_v31  ;;  %6176 = vmatmul.bf16.gmra.mxu2 %v9684_v29  ;;  %6345 = vmatmul.bf16.gmra.mxu3 %v9688_v62 }
 0x94c   : > { %v5417_v39 = vadd.f32 %v13118_v54, %v5347_v35  ;;  %v5418_v7 = vadd.f32 %v13120_v19, %v5348_v42  ;;  %v4427_v5 = vpop.f32.mrf.mxu0  ;;  %v4580_v10 = vpop.f32.mrf.mxu1  ;;  %v10946_v35 = vld [vmem:[%s14434_s3 + $0x28] sm:$0xff] }
 0x94d   : > { %v4753_v24 = vadd.f32 %v4427_v5, %v2996_v53  ;;  %v4754_v36 = vadd.f32 %v4580_v10, %v3149_v16  ;;  %v10954_v42 = vld [vmem:[%s14434_s3 + $0x68] sm:$0xff]  ;;  %v3000_v53 = vadd.f32 %v15240_v4, %v15239_v30  ;;  %v3153_v16 = vadd.f32 %v15242_v33, %v15241_v40  ;;  %6899 = vmatpush.bf16.msrb.mxu0 %v10946_v35  ;;  %v15245_v10 = vld [vmem:[#allocation183_spill] sm:$0xff]  ;;  %v15250_v30 = vld [vmem:[#allocation361_spill] sm:$0xff] }
 0x94e   : > { %v5475_v44 = vpack.c.bf16 %v5418_v7, %v5417_v39  ;;  %7068 = vmatpush.bf16.msrb.mxu1 %v10954_v42  ;;  %v15243_v39 = vld [vmem:[#allocation182_spill] sm:$0xff]  ;;  %v15249_v42 = vld [vmem:[#allocation187_spill] sm:$0xff] }
 0x94f   : > { %v5196_v11 = vrot.slane %v4753_v24, 1  ;;  %v5197_v1 = vrot.slane %v4754_v36, 1  ;;  %v15244_v7 = vld [vmem:[#allocation358_spill] sm:$0xff]  ;;  %v15246_v24 = vld [vmem:[#allocation359_spill] sm:$0xff]  ;;  %v3158_v4 = vadd.f32 %v15250_v30, %v15249_v42 }
 0x950   : > { %5508 = vst [vmem:[#allocation3 + $0x88] sm:$0xff] %v5475_v44  ;;  %v3003_v5 = vadd.f32 %v15244_v7, %v15243_v39  ;;  %v3156_v36 = vadd.f32 %v15246_v24, %v15245_v10  ;;  %v15257_v30 = vld [vmem:[#allocation195_spill] sm:$0xff] }
 0x951   : > { %v5319_v31 = vsel %vm5270_vm1, %v5194_v63, %v5196_v11  ;;  %v5320_v6 = vsel %vm5270_vm1, %v5195_v21, %v5197_v1 }
 0x952   : > { %v5349_v2 = vadd.f32 %v5319_v31, %v12622_v45  ;;  %v5350_v58 = vadd.f32 %v5320_v6, %v12624_v50  ;;  %v11106_v45 = vld [vmem:[%s14434_s3 + $0x128] sm:$0xff]  ;;  %v10972_v6 = vld [vmem:[#allocation3 + $0x94] sm:$0xf0] }
 0x953   : > { %v11114_v50 = vld [vmem:[%s14434_s3 + $0x168] sm:$0xff]  ;;  %7751 = vmatpush.bf16.msrb.mxu2 %v11106_v45 }
 0x954   : > { %v5419_v47 = vadd.f32 %v13118_v54, %v5349_v2  ;;  %v5420_v18 = vadd.f32 %v13120_v19, %v5350_v58  ;;  %v4430_v12 = vpop.f32.mrf.mxu0  ;;  %v4583_v14 = vpop.f32.mrf.mxu1  ;;  %7920 = vmatpush.bf16.msrb.mxu3 %v11114_v50 }
 0x955   : > { %v9701_v12 = vld [vmem:[#allocation3 + $0x98] sm:$0xf0] }
 0x956   : > { %v5476_v43 = vpack.c.bf16 %v5420_v18, %v5419_v47 }
 0x957   : > { %4465 = vmatmul.bf16.gmra.mxu0 %v11222_v0  ;;  %4618 = vmatmul.bf16.gmra.mxu1 %v11222_v0  ;;  %v10970_v63 = vld [vmem:[#allocation3 + $0x84] sm:$0xf0]  ;;  %v9693_v29 = vld [vmem:[#allocation3 + $0x88] sm:$0xf0] }
 0x958   : > { %5509 = vst [vmem:[#allocation3 + $0x90] sm:$0xff] %v5476_v43  ;;  %v9692_v21 = vor.u32 %v10970_v63, %v9691_v28  ;;  %v9696_v62 = vor.u32 %v10969_v51, %v9693_v29  ;;  %v11223_v0 = vld [vmem:[#allocation2 + $0xa8] sm:$0xff] }
 0x95a   : > { %6181 = vmatmul.bf16.gmra.mxu2 %v9692_v21  ;;  %6350 = vmatmul.bf16.gmra.mxu3 %v9696_v62 }
 0x95c   : > { %v4431_v32 = vpop.f32.mrf.mxu0  ;;  %v4584_v48 = vpop.f32.mrf.mxu1 }
 0x95d   : > { %v4761_v44 = vadd.f32 %v4431_v32, %v3000_v53  ;;  %v4762_v11 = vadd.f32 %v4584_v48, %v3153_v16  ;;  %v15247_v32 = vld [vmem:[#allocation186_spill] sm:$0xff]  ;;  %v15248_v48 = vld [vmem:[#allocation360_spill] sm:$0xff] }
 0x95e   : > { %v3005_v35 = vadd.f32 %v15248_v48, %v15247_v32  ;;  %v15255_v48 = vld [vmem:[#allocation194_spill] sm:$0xff] }
 0x95f   : > { %v9699_v47 = vld [vmem:[#allocation3 + $0x90] sm:$0xf]  ;;  %v10971_v18 = vld [vmem:[#allocation3 + $0x94] sm:$0xf]  ;;  %v5198_v14 = vrot.slane %v4761_v44, 1  ;;  %v5199_v28 = vrot.slane %v4762_v11, 1 }
 0x960   : > { %v9700_v63 = vor.u32 %v10972_v6, %v9699_v47  ;;  %v9704_v29 = vor.u32 %v10971_v18, %v9701_v12  ;;  %v11224_v18 = vld [vmem:[#allocation2 + $0xb0] sm:$0xff] }
 0x964   : > { %v4434_v1 = vpop.f32.mrf.mxu0  ;;  %v4587_v31 = vpop.f32.mrf.mxu1 }
 0x965   : > { %v4767_v2 = vadd.f32 %v4434_v1, %v3003_v5  ;;  %v4768_v58 = vadd.f32 %v4587_v31, %v3156_v36 }
 0x967   : > { %v5200_v51 = vrot.slane %v4767_v2, 1  ;;  %v5201_v43 = vrot.slane %v4768_v58, 1  ;;  %4469 = vmatmul.bf16.gmra.mxu0 %v11223_v0  ;;  %4622 = vmatmul.bf16.gmra.mxu1 %v11223_v0  ;;  %v9707_v2 = vld [vmem:[#allocation3 + $0xa0] sm:$0xf]  ;;  %v10973_v58 = vld [vmem:[#allocation3 + $0xa4] sm:$0xf] }
 0x969   : > { %v5317_v21 = vsel %vm5270_vm1, %v5198_v14, %v5200_v51  ;;  %v5318_v62 = vsel %vm5270_vm1, %v5199_v28, %v5201_v43 }
 0x96a   : > { %v5351_v45 = vadd.f32 %v5317_v21, %v12652_v13  ;;  %v5352_v50 = vadd.f32 %v5318_v62, %v12654_v61  ;;  %6186 = vmatmul.bf16.gmra.mxu2 %v9700_v63  ;;  %6355 = vmatmul.bf16.gmra.mxu3 %v9704_v29  ;;  %v15251_v29 = vld [vmem:[#allocation190_spill] sm:$0xff]  ;;  %v15252_v21 = vld [vmem:[#allocation364_spill] sm:$0xff] }
 0x96b   : > { %v3009_v62 = vadd.f32 %v15252_v21, %v15251_v29  ;;  %v15262_v29 = vld [vmem:[#allocation371_spill] sm:$0xff] }
 0x96c   : > { %v5421_v53 = vadd.f32 %v13118_v54, %v5351_v45  ;;  %v5422_v40 = vadd.f32 %v13120_v19, %v5352_v50  ;;  %v4436_v33 = vpop.f32.mrf.mxu0  ;;  %v4589_v16 = vpop.f32.mrf.mxu1  ;;  %v15253_v45 = vld [vmem:[#allocation191_spill] sm:$0xff]  ;;  %v15254_v50 = vld [vmem:[#allocation365_spill] sm:$0xff] }
 0x96d   : > { %v4769_v39 = vadd.f32 %v4436_v33, %v3005_v35  ;;  %v4770_v7 = vadd.f32 %v4589_v16, %v3158_v4  ;;  %v3162_v32 = vadd.f32 %v15254_v50, %v15253_v45  ;;  %v15256_v35 = vld [vmem:[#allocation368_spill] sm:$0xff]  ;;  %v15258_v4 = vld [vmem:[#allocation369_spill] sm:$0xff] }
 0x96e   : > { %v5477_v5 = vpack.c.bf16 %v5422_v40, %v5421_v53  ;;  %v3012_v42 = vadd.f32 %v15256_v35, %v15255_v48  ;;  %v3165_v53 = vadd.f32 %v15258_v4, %v15257_v30 }
 0x96f   : > { %v5202_v13 = vrot.slane %v4769_v39, 1  ;;  %v5203_v10 = vrot.slane %v4770_v7, 1  ;;  %v10976_v7 = vld [vmem:[#allocation3 + $0xb4] sm:$0xf0] }
 0x970   : > { %5510 = vst [vmem:[#allocation3 + $0xa8] sm:$0xff] %v5477_v5 }
 0x971   : > { %v5315_v61 = vsel %vm5270_vm1, %v5200_v51, %v5202_v13  ;;  %v5316_v24 = vsel %vm5270_vm1, %v5201_v43, %v5203_v10 }
 0x972   : > { %v5353_v36 = vadd.f32 %v5315_v61, %v12664_v34  ;;  %v5354_v44 = vadd.f32 %v5316_v24, %v12666_v20 }
 0x974   : > { %v5423_v11 = vadd.f32 %v13118_v54, %v5353_v36  ;;  %v5424_v1 = vadd.f32 %v13120_v19, %v5354_v44  ;;  %v4439_v31 = vpop.f32.mrf.mxu0  ;;  %v4592_v6 = vpop.f32.mrf.mxu1  ;;  %v9717_v44 = vld [vmem:[#allocation3 + $0xb8] sm:$0xf0] }
 0x976   : > { %v5478_v47 = vpack.c.bf16 %v5424_v1, %v5423_v11 }
 0x977   : > { %4474 = vmatmul.bf16.gmra.mxu0 %v11224_v18  ;;  %4627 = vmatmul.bf16.gmra.mxu1 %v11224_v18  ;;  %v10974_v12 = vld [vmem:[#allocation3 + $0xa4] sm:$0xf0]  ;;  %v9709_v14 = vld [vmem:[#allocation3 + $0xa8] sm:$0xf0] }
 0x978   : > { %5511 = vst [vmem:[#allocation3 + $0xb0] sm:$0xff] %v5478_v47  ;;  %v9708_v28 = vor.u32 %v10974_v12, %v9707_v2  ;;  %v9712_v51 = vor.u32 %v10973_v58, %v9709_v14  ;;  %v11225_v58 = vld [vmem:[#allocation2 + $0xb8] sm:$0xff] }
 0x97a   : > { %6191 = vmatmul.bf16.gmra.mxu2 %v9708_v28  ;;  %6360 = vmatmul.bf16.gmra.mxu3 %v9712_v51 }
 0x97c   : > { %v4440_v34 = vpop.f32.mrf.mxu0  ;;  %v4593_v20 = vpop.f32.mrf.mxu1 }
 0x97d   : > { %v6152_v43 = vpop.f32.mrf.mxu2  ;;  %v6321_v0 = vpop.f32.mrf.mxu3  ;;  %v4777_v40 = vadd.f32 %v4440_v34, %v3009_v62  ;;  %v4778_v33 = vadd.f32 %v4593_v20, %v3162_v32  ;;  %v15259_v34 = vld [vmem:[#allocation198_spill] sm:$0xff] }
 0x97e   : > { %v13278_v63 = vadd.f32 %v6321_v0, %v6152_v43  ;;  %v15260_v20 = vld [vmem:[#allocation370_spill] sm:$0xff]  ;;  %v15261_v0 = vld [vmem:[#allocation199_spill] sm:$0xff] }
 0x97f   : > { %v9715_v24 = vld [vmem:[#allocation3 + $0xb0] sm:$0xf]  ;;  %v10975_v36 = vld [vmem:[#allocation3 + $0xb4] sm:$0xf]  ;;  %v5204_v1 = vrot.slane %v4777_v40, 1  ;;  %v5205_v31 = vrot.slane %v4778_v33, 1  ;;  %v3014_v43 = vadd.f32 %v15260_v20, %v15259_v34  ;;  %v3167_v21 = vadd.f32 %v15262_v29, %v15261_v0 }
 0x980   : > { %v9716_v47 = vor.u32 %v10976_v7, %v9715_v24  ;;  %v9720_v18 = vor.u32 %v10975_v36, %v9717_v44  ;;  %v9723_v36 = vld [vmem:[#allocation3 + $0xc0] sm:$0xf]  ;;  %v10977_v44 = vld [vmem:[#allocation3 + $0xc4] sm:$0xf]  ;;  %v15263_v0 = vld [vmem:[#allocation202_spill] sm:$0xff] }
 0x981   : > { %v10945_v20 = vld [vmem:[%s14434_s3 + $0x20] sm:$0xff]  ;;  %v15264_v29 = vld [vmem:[#allocation374_spill] sm:$0xff] }
 0x982   : > { %6900 = vmatpush.bf16.msrb.mxu0 %v10945_v20 }
 0x984   : > { %v4443_v16 = vpop.f32.mrf.mxu0  ;;  %v4596_v39 = vpop.f32.mrf.mxu1 }
 0x985   : > { %v4783_v5 = vadd.f32 %v4443_v16, %v3012_v42  ;;  %v4784_v13 = vadd.f32 %v4596_v39, %v3165_v53  ;;  %v6154_v10 = vpop.f32.mrf.mxu2  ;;  %v6323_v61 = vpop.f32.mrf.mxu3 }
 0x986   : > { %v13288_v11 = vadd.f32 %v6323_v61, %v6154_v10 }
 0x987   : > { %v5206_v6 = vrot.slane %v4783_v5, 1  ;;  %v5207_v2 = vrot.slane %v4784_v13, 1  ;;  %4478 = vmatmul.bf16.gmra.mxu0 %v11225_v58  ;;  %4631 = vmatmul.bf16.gmra.mxu1 %v11225_v58 }
 0x989   : > { %v5313_v12 = vsel %vm5270_vm1, %v5204_v1, %v5206_v6  ;;  %v5314_v14 = vsel %vm5270_vm1, %v5205_v31, %v5207_v2 }
 0x98a   : > { %v5355_v28 = vadd.f32 %v5313_v12, %v12688_v52  ;;  %v5356_v51 = vadd.f32 %v5314_v14, %v12690_v38  ;;  %6196 = vmatmul.bf16.gmra.mxu2 %v9716_v47  ;;  %6365 = vmatmul.bf16.gmra.mxu3 %v9720_v18  ;;  %v11105_v47 = vld [vmem:[%s14434_s3 + $0x120] sm:$0xff] }
 0x98b   : > { %v11113_v18 = vld [vmem:[%s14434_s3 + $0x160] sm:$0xff]  ;;  %7752 = vmatpush.bf16.msrb.mxu2 %v11105_v47 }
 0x98c   : > { %v5425_v62 = vadd.f32 %v13118_v54, %v5355_v28  ;;  %v5426_v45 = vadd.f32 %v13120_v19, %v5356_v51  ;;  %v4445_v50 = vpop.f32.mrf.mxu0  ;;  %v4598_v32 = vpop.f32.mrf.mxu1  ;;  %7921 = vmatpush.bf16.msrb.mxu3 %v11113_v18 }
 0x98d   : > { %v4785_v48 = vadd.f32 %v4445_v50, %v3014_v43  ;;  %v4786_v35 = vadd.f32 %v4598_v32, %v3167_v21  ;;  %v6157_v42 = vpop.f32.mrf.mxu2  ;;  %v6326_v52 = vpop.f32.mrf.mxu3  ;;  %v10953_v43 = vld [vmem:[%s14434_s3 + $0x60] sm:$0xff]  ;;  %v3018_v21 = vadd.f32 %v15264_v29, %v15263_v0  ;;  %v15267_v32 = vld [vmem:[#allocation206_spill] sm:$0xff]  ;;  %v15274_v0 = vld [vmem:[#allocation381_spill] sm:$0xff] }
 0x98e   : > { %v5479_v30 = vpack.c.bf16 %v5426_v45, %v5425_v62  ;;  %v13302_v38 = vadd.f32 %v6326_v52, %v6157_v42  ;;  %v15265_v62 = vld [vmem:[#allocation203_spill] sm:$0xff]  ;;  %7069 = vmatpush.bf16.msrb.mxu1 %v10953_v43 }
 0x98f   : > { %v5208_v4 = vrot.slane %v4785_v48, 1  ;;  %v5209_v53 = vrot.slane %v4786_v35, 1  ;;  %v15266_v45 = vld [vmem:[#allocation375_spill] sm:$0xff]  ;;  %v15268_v48 = vld [vmem:[#allocation378_spill] sm:$0xff] }
 0x990   : > { %5512 = vst [vmem:[#allocation3 + $0xc8] sm:$0xff] %v5479_v30  ;;  %v3171_v50 = vadd.f32 %v15266_v45, %v15265_v62  ;;  %v3021_v35 = vadd.f32 %v15268_v48, %v15267_v32  ;;  %v15269_v42 = vld [vmem:[#allocation207_spill] sm:$0xff] }
 0x991   : > { %v5311_v40 = vsel %vm5270_vm1, %v5206_v6, %v5208_v4  ;;  %v5312_v33 = vsel %vm5270_vm1, %v5207_v2, %v5209_v53  ;;  %v11226_v6 = vld [vmem:[#allocation2 + $0xc0] sm:$0xff] }
 0x992   : > { %v5357_v16 = vadd.f32 %v5311_v40, %v12700_v55  ;;  %v5358_v39 = vadd.f32 %v5312_v33, %v12702_v49  ;;  %v15270_v52 = vld [vmem:[#allocation379_spill] sm:$0xff] }
 0x993   : > { %v3174_v30 = vadd.f32 %v15270_v52, %v15269_v42  ;;  %v15273_v43 = vld [vmem:[#allocation211_spill] sm:$0xff] }
 0x994   : > { %v5427_v7 = vadd.f32 %v13118_v54, %v5357_v16  ;;  %v5428_v5 = vadd.f32 %v13120_v19, %v5358_v39  ;;  %v4448_v13 = vpop.f32.mrf.mxu0  ;;  %v4601_v10 = vpop.f32.mrf.mxu1  ;;  %v10980_v16 = vld [vmem:[#allocation3 + $0xd4] sm:$0xf0]  ;;  %v3176_v29 = vadd.f32 %v15274_v0, %v15273_v43  ;;  %v15278_v43 = vld [vmem:[#allocation385_spill] sm:$0xff] }
 0x995   : > { %v6159_v61 = vpop.f32.mrf.mxu2  ;;  %v6328_v24 = vpop.f32.mrf.mxu3 }
 0x996   : > { %v5480_v1 = vpack.c.bf16 %v5428_v5, %v5427_v7  ;;  %v13312_v31 = vadd.f32 %v6328_v24, %v6159_v61  ;;  %v9733_v24 = vld [vmem:[#allocation3 + $0xd8] sm:$0xf0] }
 0x997   : > { %4483 = vmatmul.bf16.gmra.mxu0 %v11226_v6  ;;  %4636 = vmatmul.bf16.gmra.mxu1 %v11226_v6  ;;  %v10978_v2 = vld [vmem:[#allocation3 + $0xc4] sm:$0xf0]  ;;  %v9725_v55 = vld [vmem:[#allocation3 + $0xc8] sm:$0xf0] }
 0x998   : > { %5513 = vst [vmem:[#allocation3 + $0xd0] sm:$0xff] %v5480_v1  ;;  %v9724_v49 = vor.u32 %v10978_v2, %v9723_v36  ;;  %v9728_v58 = vor.u32 %v10977_v44, %v9725_v55  ;;  %v11227_v55 = vld [vmem:[#allocation2 + $0xc8] sm:$0xff] }
 0x99a   : > { %6201 = vmatmul.bf16.gmra.mxu2 %v9724_v49  ;;  %6370 = vmatmul.bf16.gmra.mxu3 %v9728_v58 }
 0x99c   : > { %v4449_v12 = vpop.f32.mrf.mxu0  ;;  %v4602_v14 = vpop.f32.mrf.mxu1 }
 0x99d   : > { %v6162_v28 = vpop.f32.mrf.mxu2  ;;  %v6331_v51 = vpop.f32.mrf.mxu3  ;;  %v4793_v4 = vadd.f32 %v4449_v12, %v3018_v21  ;;  %v4794_v53 = vadd.f32 %v4602_v14, %v3171_v50 }
 0x99e   : > { %v13320_v34 = vadd.f32 %v6331_v51, %v6162_v28  ;;  %v15271_v28 = vld [vmem:[#allocation210_spill] sm:$0xff]  ;;  %v15272_v51 = vld [vmem:[#allocation380_spill] sm:$0xff] }
 0x99f   : > { %v9731_v10 = vld [vmem:[#allocation3 + $0xd0] sm:$0xf]  ;;  %v10979_v61 = vld [vmem:[#allocation3 + $0xd4] sm:$0xf]  ;;  %v5210_v44 = vrot.slane %v4793_v4, 1  ;;  %v5211_v1 = vrot.slane %v4794_v53, 1  ;;  %v3023_v20 = vadd.f32 %v15272_v51, %v15271_v28 }
 0x9a0   : > { %v9732_v49 = vor.u32 %v10980_v16, %v9731_v10  ;;  %v9736_v58 = vor.u32 %v10979_v61, %v9733_v24  ;;  %v9739_v61 = vld [vmem:[#allocation3 + $0xe0] sm:$0xf]  ;;  %v10981_v24 = vld [vmem:[#allocation3 + $0xe4] sm:$0xf]  ;;  %v15276_v28 = vld [vmem:[#allocation384_spill] sm:$0xff] }
 0x9a4   : > { %v4452_v40 = vpop.f32.mrf.mxu0  ;;  %v4605_v33 = vpop.f32.mrf.mxu1 }
 0x9a5   : > { %v4799_v39 = vadd.f32 %v4452_v40, %v3021_v35  ;;  %v4800_v7 = vadd.f32 %v4605_v33, %v3174_v30  ;;  %v6164_v5 = vpop.f32.mrf.mxu2  ;;  %v6333_v13 = vpop.f32.mrf.mxu3 }
 0x9a6   : > { %v13336_v36 = vadd.f32 %v6333_v13, %v6164_v5 }
 0x9a7   : > { %v5212_v6 = vrot.slane %v4799_v39, 1  ;;  %v5213_v2 = vrot.slane %v4800_v7, 1  ;;  %4487 = vmatmul.bf16.gmra.mxu0 %v11227_v55  ;;  %4640 = vmatmul.bf16.gmra.mxu1 %v11227_v55 }
 0x9a9   : > { %v5309_v47 = vsel %vm5270_vm1, %v5210_v44, %v5212_v6  ;;  %v5310_v18 = vsel %vm5270_vm1, %v5211_v1, %v5213_v2 }
 0x9aa   : > { %v5359_v12 = vadd.f32 %v5309_v47, %v12730_v56  ;;  %v5360_v14 = vadd.f32 %v5310_v18, %v12732_v57  ;;  %6206 = vmatmul.bf16.gmra.mxu2 %v9732_v49  ;;  %6375 = vmatmul.bf16.gmra.mxu3 %v9736_v58 }
 0x9ac   : > { %v5429_v21 = vadd.f32 %v13118_v54, %v5359_v12  ;;  %v5430_v62 = vadd.f32 %v13120_v19, %v5360_v14  ;;  %v4454_v45 = vpop.f32.mrf.mxu0  ;;  %v4607_v50 = vpop.f32.mrf.mxu1  ;;  %v15275_v14 = vld [vmem:[#allocation214_spill] sm:$0xff] }
 0x9ad   : > { %v4801_v32 = vadd.f32 %v4454_v45, %v3023_v20  ;;  %v4802_v48 = vadd.f32 %v4607_v50, %v3176_v29  ;;  %v6167_v35 = vpop.f32.mrf.mxu2  ;;  %v6336_v56 = vpop.f32.mrf.mxu3  ;;  %v3027_v51 = vadd.f32 %v15276_v28, %v15275_v14  ;;  %v15277_v20 = vld [vmem:[#allocation215_spill] sm:$0xff]  ;;  %v15279_v29 = vld [vmem:[#allocation218_spill] sm:$0xff]  ;;  %v15282_v50 = vld [vmem:[#allocation389_spill] sm:$0xff] }
 0x9ae   : > { %v5481_v42 = vpack.c.bf16 %v5430_v62, %v5429_v21  ;;  %v13350_v57 = vadd.f32 %v6336_v56, %v6167_v35  ;;  %v3180_v0 = vadd.f32 %v15278_v43, %v15277_v20  ;;  %v15280_v21 = vld [vmem:[#allocation388_spill] sm:$0xff]  ;;  %v15281_v45 = vld [vmem:[#allocation219_spill] sm:$0xff] }
 0x9af   : > { %v5214_v52 = vrot.slane %v4801_v32, 1  ;;  %v5215_v30 = vrot.slane %v4802_v48, 1  ;;  %v3030_v62 = vadd.f32 %v15280_v21, %v15279_v29  ;;  %v3183_v32 = vadd.f32 %v15282_v50, %v15281_v45  ;;  %v15286_v14 = vld [vmem:[#allocation391_spill] sm:$0xff] }
 0x9b0   : > { %5514 = vst [vmem:[#allocation3 + $0xe8] sm:$0xff] %v5481_v42 }
 0x9b1   : > { %v5307_v4 = vsel %vm5270_vm1, %v5212_v6, %v5214_v52  ;;  %v5308_v53 = vsel %vm5270_vm1, %v5213_v2, %v5215_v30  ;;  %v11228_v6 = vld [vmem:[#allocation2 + $0xd0] sm:$0xff]  ;;  %v10984_v52 = vld [vmem:[#allocation3 + $0xf4] sm:$0xf0] }
 0x9b2   : > { %v5361_v40 = vadd.f32 %v5307_v4, %v12742_v8  ;;  %v5362_v33 = vadd.f32 %v5308_v53, %v12744_v9 }
 0x9b4   : > { %v5431_v16 = vadd.f32 %v13118_v54, %v5361_v40  ;;  %v5432_v39 = vadd.f32 %v13120_v19, %v5362_v33  ;;  %v4457_v7 = vpop.f32.mrf.mxu0  ;;  %v4610_v5 = vpop.f32.mrf.mxu1 }
 0x9b5   : > { %v6169_v13 = vpop.f32.mrf.mxu2  ;;  %v6338_v10 = vpop.f32.mrf.mxu3 }
 0x9b6   : > { %v5482_v44 = vpack.c.bf16 %v5432_v39, %v5431_v16  ;;  %v13360_v1 = vadd.f32 %v6338_v10, %v6169_v13  ;;  %v9749_v39 = vld [vmem:[#allocation3 + $0xf8] sm:$0xf0] }
 0x9b7   : > { %4492 = vmatmul.bf16.gmra.mxu0 %v11228_v6  ;;  %4645 = vmatmul.bf16.gmra.mxu1 %v11228_v6  ;;  %v10982_v2 = vld [vmem:[#allocation3 + $0xe4] sm:$0xf0]  ;;  %v9741_v8 = vld [vmem:[#allocation3 + $0xe8] sm:$0xf0] }
 0x9b8   : > { %5515 = vst [vmem:[#allocation3 + $0xf0] sm:$0xff] %v5482_v44  ;;  %v9740_v9 = vor.u32 %v10982_v2, %v9739_v61  ;;  %v9744_v55 = vor.u32 %v10981_v24, %v9741_v8  ;;  %v11229_v24 = vld [vmem:[#allocation2 + $0xd8] sm:$0xff] }
 0x9ba   : > { %6211 = vmatmul.bf16.gmra.mxu2 %v9740_v9  ;;  %6380 = vmatmul.bf16.gmra.mxu3 %v9744_v55 }
 0x9bc   : > { %v4458_v49 = vpop.f32.mrf.mxu0  ;;  %v4611_v58 = vpop.f32.mrf.mxu1 }
 0x9bd   : > { %v6172_v47 = vpop.f32.mrf.mxu2  ;;  %v6341_v18 = vpop.f32.mrf.mxu3  ;;  %v4809_v48 = vadd.f32 %v4458_v49, %v3027_v51  ;;  %v4810_v35 = vadd.f32 %v4611_v58, %v3180_v0  ;;  %v15283_v49 = vld [vmem:[#allocation222_spill] sm:$0xff] }
 0x9be   : > { %v13362_v12 = vadd.f32 %v6341_v18, %v6172_v47  ;;  %v15284_v58 = vld [vmem:[#allocation390_spill] sm:$0xff]  ;;  %v15285_v18 = vld [vmem:[#allocation223_spill] sm:$0xff] }
 0x9bf   : > { %v9747_v33 = vld [vmem:[#allocation3 + $0xf0] sm:$0xf]  ;;  %v10983_v16 = vld [vmem:[#allocation3 + $0xf4] sm:$0xf]  ;;  %v5216_v5 = vrot.slane %v4809_v48, 1  ;;  %v5217_v13 = vrot.slane %v4810_v35, 1  ;;  %v3032_v47 = vadd.f32 %v15284_v58, %v15283_v49  ;;  %v3185_v28 = vadd.f32 %v15286_v14, %v15285_v18 }
 0x9c0   : > { %v9748_v44 = vor.u32 %v10984_v52, %v9747_v33  ;;  %v9752_v6 = vor.u32 %v10983_v16, %v9749_v39  ;;  %v9755_v16 = vld [vmem:[#allocation3 + $0x100] sm:$0xf]  ;;  %v10985_v39 = vld [vmem:[#allocation3 + $0x104] sm:$0xf]  ;;  %v10944_v58 = vld [vmem:[%s14434_s3 + $0x18] sm:$0xff] }
 0x9c1   : > { %v15287_v18 = vld [vmem:[#allocation226_spill] sm:$0xff]  ;;  %6901 = vmatpush.bf16.msrb.mxu0 %v10944_v58  ;;  %v15297_v58 = vld [vmem:[#allocation400_spill] sm:$0xff] }
 0x9c2   : > { %v15288_v14 = vld [vmem:[#allocation394_spill] sm:$0xff] }
 0x9c4   : > { %v4461_v56 = vpop.f32.mrf.mxu0  ;;  %v4614_v42 = vpop.f32.mrf.mxu1 }
 0x9c5   : > { %v4815_v30 = vadd.f32 %v4461_v56, %v3030_v62  ;;  %v4816_v4 = vadd.f32 %v4614_v42, %v3183_v32  ;;  %v6174_v53 = vpop.f32.mrf.mxu2  ;;  %v6343_v40 = vpop.f32.mrf.mxu3 }
 0x9c6   : > { %v13372_v7 = vadd.f32 %v6343_v40, %v6174_v53 }
 0x9c7   : > { %v5218_v10 = vrot.slane %v4815_v30, 1  ;;  %v5219_v61 = vrot.slane %v4816_v4, 1  ;;  %4496 = vmatmul.bf16.gmra.mxu0 %v11229_v24  ;;  %4649 = vmatmul.bf16.gmra.mxu1 %v11229_v24 }
 0x9c9   : > { %v5305_v2 = vsel %vm5270_vm1, %v5216_v5, %v5218_v10  ;;  %v5306_v8 = vsel %vm5270_vm1, %v5217_v13, %v5219_v61 }
 0x9ca   : > { %v5363_v9 = vadd.f32 %v5305_v2, %v12766_v41  ;;  %v5364_v55 = vadd.f32 %v5306_v8, %v12768_v59  ;;  %6216 = vmatmul.bf16.gmra.mxu2 %v9748_v44  ;;  %6385 = vmatmul.bf16.gmra.mxu3 %v9752_v6  ;;  %v11104_v44 = vld [vmem:[%s14434_s3 + $0x118] sm:$0xff] }
 0x9cb   : > { %v11112_v6 = vld [vmem:[%s14434_s3 + $0x158] sm:$0xff]  ;;  %7753 = vmatpush.bf16.msrb.mxu2 %v11104_v44 }
 0x9cc   : > { %v5433_v51 = vadd.f32 %v13118_v54, %v5363_v9  ;;  %v5434_v20 = vadd.f32 %v13120_v19, %v5364_v55  ;;  %v4463_v43 = vpop.f32.mrf.mxu0  ;;  %v4616_v0 = vpop.f32.mrf.mxu1  ;;  %7922 = vmatpush.bf16.msrb.mxu3 %v11112_v6 }
 0x9cd   : > { %v4817_v29 = vadd.f32 %v4463_v43, %v3032_v47  ;;  %v4818_v21 = vadd.f32 %v4616_v0, %v3185_v28  ;;  %v6177_v62 = vpop.f32.mrf.mxu2  ;;  %v6346_v41 = vpop.f32.mrf.mxu3  ;;  %v10952_v47 = vld [vmem:[%s14434_s3 + $0x58] sm:$0xff]  ;;  %v3036_v28 = vadd.f32 %v15288_v14, %v15287_v18  ;;  %v15298_v18 = vld [vmem:[#allocation235_spill] sm:$0xff]  ;;  %v15299_v14 = vld [vmem:[#allocation401_spill] sm:$0xff] }
 0x9ce   : > { %v5483_v45 = vpack.c.bf16 %v5434_v20, %v5433_v51  ;;  %v13386_v59 = vadd.f32 %v6346_v41, %v6177_v62  ;;  %v15289_v51 = vld [vmem:[#allocation227_spill] sm:$0xff]  ;;  %7070 = vmatpush.bf16.msrb.mxu1 %v10952_v47  ;;  %v15291_v0 = vld [vmem:[#allocation230_spill] sm:$0xff] }
 0x9cf   : > { %v5220_v50 = vrot.slane %v4817_v29, 1  ;;  %v5221_v32 = vrot.slane %v4818_v21, 1  ;;  %v15290_v20 = vld [vmem:[#allocation395_spill] sm:$0xff]  ;;  %v15292_v29 = vld [vmem:[#allocation398_spill] sm:$0xff] }
 0x9d0   : > { %5516 = vst [vmem:[#allocation3 + $0x108] sm:$0xff] %v5483_v45  ;;  %v3189_v43 = vadd.f32 %v15290_v20, %v15289_v51  ;;  %v3039_v21 = vadd.f32 %v15292_v29, %v15291_v0  ;;  %v15293_v62 = vld [vmem:[#allocation231_spill] sm:$0xff] }
 0x9d1   : > { %v5303_v48 = vsel %vm5270_vm1, %v5218_v10, %v5220_v50  ;;  %v5304_v35 = vsel %vm5270_vm1, %v5219_v61, %v5221_v32  ;;  %v11230_v10 = vld [vmem:[#allocation2 + $0xe0] sm:$0xff] }
 0x9d2   : > { %v5365_v56 = vadd.f32 %v5303_v48, %v12778_v23  ;;  %v5366_v42 = vadd.f32 %v5304_v35, %v12780_v15  ;;  %v15294_v41 = vld [vmem:[#allocation399_spill] sm:$0xff] }
 0x9d3   : > { %v3192_v45 = vadd.f32 %v15294_v41, %v15293_v62 }
 0x9d4   : > { %v5435_v52 = vadd.f32 %v13118_v54, %v5365_v56  ;;  %v5436_v30 = vadd.f32 %v13120_v19, %v5366_v42  ;;  %v4466_v4 = vpop.f32.mrf.mxu0  ;;  %v4619_v53 = vpop.f32.mrf.mxu1  ;;  %v10988_v56 = vld [vmem:[#allocation3 + $0x114] sm:$0xf0] }
 0x9d5   : > { %v6179_v40 = vpop.f32.mrf.mxu2  ;;  %v6348_v33 = vpop.f32.mrf.mxu3 }
 0x9d6   : > { %v5484_v5 = vpack.c.bf16 %v5436_v30, %v5435_v52  ;;  %v13396_v13 = vadd.f32 %v6348_v33, %v6179_v40  ;;  %v9765_v33 = vld [vmem:[#allocation3 + $0x118] sm:$0xf0] }
 0x9d7   : > { %4501 = vmatmul.bf16.gmra.mxu0 %v11230_v10  ;;  %4654 = vmatmul.bf16.gmra.mxu1 %v11230_v10  ;;  %v10986_v61 = vld [vmem:[#allocation3 + $0x104] sm:$0xf0]  ;;  %v9757_v23 = vld [vmem:[#allocation3 + $0x108] sm:$0xf0] }
 0x9d8   : > { %5517 = vst [vmem:[#allocation3 + $0x110] sm:$0xff] %v5484_v5  ;;  %v9756_v15 = vor.u32 %v10986_v61, %v9755_v16  ;;  %v9760_v24 = vor.u32 %v10985_v39, %v9757_v23  ;;  %v11231_v23 = vld [vmem:[#allocation2 + $0xe8] sm:$0xff] }
 0x9da   : > { %6221 = vmatmul.bf16.gmra.mxu2 %v9756_v15  ;;  %6390 = vmatmul.bf16.gmra.mxu3 %v9760_v24 }
 0x9dc   : > { %v4467_v2 = vpop.f32.mrf.mxu0  ;;  %v4620_v8 = vpop.f32.mrf.mxu1 }
 0x9dd   : > { %v6182_v9 = vpop.f32.mrf.mxu2  ;;  %v6351_v55 = vpop.f32.mrf.mxu3  ;;  %v4825_v50 = vadd.f32 %v4467_v2, %v3036_v28  ;;  %v4826_v32 = vadd.f32 %v4620_v8, %v3189_v43  ;;  %v15295_v8 = vld [vmem:[#allocation157_spill] sm:$0xff]  ;;  %v3194_v28 = vadd.f32 %v15299_v14, %v15298_v18  ;;  %v15302_v14 = vld [vmem:[#allocation238_spill] sm:$0xff] }
 0x9de   : > { %v13404_v49 = vadd.f32 %v6351_v55, %v6182_v9  ;;  %v15296_v55 = vld [vmem:[#allocation234_spill] sm:$0xff] }
 0x9df   : > { %v9763_v53 = vld [vmem:[#allocation3 + $0x110] sm:$0xf]  ;;  %v10987_v40 = vld [vmem:[#allocation3 + $0x114] sm:$0xf]  ;;  %v5222_v39 = vrot.slane %v4825_v50, 1  ;;  %v5223_v5 = vrot.slane %v4826_v32, 1  ;;  %v3041_v47 = vadd.f32 %v15297_v58, %v15296_v55 }
 0x9e0   : > { %v9764_v15 = vor.u32 %v10988_v56, %v9763_v53  ;;  %v9768_v24 = vor.u32 %v10987_v40, %v9765_v33  ;;  %v15300_v56 = vld [vmem:[#allocation7_spill] sm:$0xff] }
 0x9e4   : > { %v4470_v48 = vpop.f32.mrf.mxu0  ;;  %v4623_v35 = vpop.f32.mrf.mxu1 }
 0x9e5   : > { %v4831_v42 = vadd.f32 %v4470_v48, %v3039_v21  ;;  %v4832_v52 = vadd.f32 %v4623_v35, %v3192_v45  ;;  %v6184_v30 = vpop.f32.mrf.mxu2  ;;  %v6353_v4 = vpop.f32.mrf.mxu3 }
 0x9e6   : > { %v13420_v16 = vadd.f32 %v6353_v4, %v6184_v30 }
 0x9e7   : > { %v5224_v10 = vrot.slane %v4831_v42, 1  ;;  %v5225_v61 = vrot.slane %v4832_v52, 1  ;;  %4505 = vmatmul.bf16.gmra.mxu0 %v11231_v23  ;;  %4658 = vmatmul.bf16.gmra.mxu1 %v11231_v23  ;;  %v15301_v52 = vld [vmem:[#allocation332_spill] sm:$0xff]  ;;  %v9771_v23 = vld [vmem:[#allocation3 + $0x120] sm:$0xf] }
 0x9e9   : > { %v5301_v44 = vsel %vm5270_vm1, %v5222_v39, %v5224_v10  ;;  %v5302_v6 = vsel %vm5270_vm1, %v5223_v5, %v5225_v61 }
 0x9ea   : > { %v5367_v2 = vadd.f32 %v5301_v44, %v12808_v60  ;;  %v5368_v9 = vadd.f32 %v5302_v6, %v15295_v8  ;;  %6226 = vmatmul.bf16.gmra.mxu2 %v9764_v15  ;;  %6395 = vmatmul.bf16.gmra.mxu3 %v9768_v24  ;;  %v10989_v15 = vld [vmem:[#allocation3 + $0x124] sm:$0xf] }
 0x9ec   : > { %v5437_v51 = vadd.f32 %v13118_v54, %v5367_v2  ;;  %v5438_v20 = vadd.f32 %v13120_v19, %v5368_v9  ;;  %v4472_v43 = vpop.f32.mrf.mxu0  ;;  %v4625_v0 = vpop.f32.mrf.mxu1 }
 0x9ed   : > { %v4833_v29 = vadd.f32 %v4472_v43, %v3041_v47  ;;  %v4834_v21 = vadd.f32 %v4625_v0, %v3194_v28  ;;  %v6187_v62 = vpop.f32.mrf.mxu2  ;;  %v6356_v60 = vpop.f32.mrf.mxu3  ;;  %v15303_v28 = vld [vmem:[#allocation404_spill] sm:$0xff]  ;;  %v15305_v43 = vld [vmem:[#allocation405_spill] sm:$0xff] }
 0x9ee   : > { %v5485_v41 = vpack.c.bf16 %v5438_v20, %v5437_v51  ;;  %v13434_v45 = vadd.f32 %v6356_v60, %v6187_v62  ;;  %v3045_v51 = vadd.f32 %v15303_v28, %v15302_v14  ;;  %v15304_v20 = vld [vmem:[#allocation239_spill] sm:$0xff]  ;;  %v15312_v28 = vld [vmem:[#allocation246_spill] sm:$0xff] }
 0x9ef   : > { %v5226_v50 = vrot.slane %v4833_v29, 1  ;;  %v5227_v32 = vrot.slane %v4834_v21, 1  ;;  %v3198_v0 = vadd.f32 %v15305_v43, %v15304_v20  ;;  %v15306_v29 = vld [vmem:[#allocation242_spill] sm:$0xff]  ;;  %v15307_v21 = vld [vmem:[#allocation408_spill] sm:$0xff]  ;;  %v15308_v60 = vld [vmem:[#allocation243_spill] sm:$0xff] }
 0x9f0   : > { %5518 = vst [vmem:[#allocation3 + $0x128] sm:$0xff] %v5485_v41  ;;  %v3048_v62 = vadd.f32 %v15307_v21, %v15306_v29  ;;  %v15309_v41 = vld [vmem:[#allocation409_spill] sm:$0xff]  ;;  %v15314_v43 = vld [vmem:[#allocation247_spill] sm:$0xff] }
 0x9f1   : > { %v5299_v48 = vsel %vm5270_vm1, %v5224_v10, %v5226_v50  ;;  %v5300_v35 = vsel %vm5270_vm1, %v5225_v61, %v5227_v32  ;;  %v11232_v10 = vld [vmem:[#allocation2 + $0xf0] sm:$0xff]  ;;  %v3201_v50 = vadd.f32 %v15309_v41, %v15308_v60 }
 0x9f2   : > { %v5369_v42 = vadd.f32 %v5299_v48, %v15300_v56  ;;  %v5370_v30 = vadd.f32 %v5300_v35, %v15301_v52 }
 0x9f4   : > { %v5439_v4 = vadd.f32 %v13118_v54, %v5369_v42  ;;  %v5440_v53 = vadd.f32 %v13120_v19, %v5370_v30  ;;  %v4475_v40 = vpop.f32.mrf.mxu0  ;;  %v4628_v33 = vpop.f32.mrf.mxu1  ;;  %v10992_v42 = vld [vmem:[#allocation3 + $0x134] sm:$0xf0] }
 0x9f5   : > { %v6189_v39 = vpop.f32.mrf.mxu2  ;;  %v6358_v5 = vpop.f32.mrf.mxu3 }
 0x9f6   : > { %v5486_v24 = vpack.c.bf16 %v5440_v53, %v5439_v4  ;;  %v13444_v44 = vadd.f32 %v6358_v5, %v6189_v39  ;;  %v9781_v39 = vld [vmem:[#allocation3 + $0x138] sm:$0xf0] }
 0x9f7   : > { %4510 = vmatmul.bf16.gmra.mxu0 %v11232_v10  ;;  %4663 = vmatmul.bf16.gmra.mxu1 %v11232_v10  ;;  %v10990_v61 = vld [vmem:[#allocation3 + $0x124] sm:$0xf0]  ;;  %v9773_v6 = vld [vmem:[#allocation3 + $0x128] sm:$0xf0] }
 0x9f8   : > { %5519 = vst [vmem:[#allocation3 + $0x130] sm:$0xff] %v5486_v24  ;;  %v9772_v2 = vor.u32 %v10990_v61, %v9771_v23  ;;  %v9776_v8 = vor.u32 %v10989_v15, %v9773_v6  ;;  %v11233_v61 = vld [vmem:[#allocation2 + $0xf8] sm:$0xff] }
 0x9fa   : > { %6231 = vmatmul.bf16.gmra.mxu2 %v9772_v2  ;;  %6400 = vmatmul.bf16.gmra.mxu3 %v9776_v8 }
 0x9fc   : > { %v4476_v9 = vpop.f32.mrf.mxu0  ;;  %v4629_v55 = vpop.f32.mrf.mxu1 }
 0x9fd   : > { %v6192_v58 = vpop.f32.mrf.mxu2  ;;  %v6361_v47 = vpop.f32.mrf.mxu3  ;;  %v4841_v32 = vadd.f32 %v4476_v9, %v3045_v51  ;;  %v4842_v48 = vadd.f32 %v4629_v55, %v3198_v0  ;;  %v15310_v55 = vld [vmem:[#allocation8_spill] sm:$0xff]  ;;  %v15313_v51 = vld [vmem:[#allocation410_spill] sm:$0xff]  ;;  %v15315_v0 = vld [vmem:[#allocation411_spill] sm:$0xff] }
 0x9fe   : > { %v13446_v18 = vadd.f32 %v6361_v47, %v6192_v58  ;;  %v15311_v47 = vld [vmem:[#allocation333_spill] sm:$0xff]  ;;  %v3050_v20 = vadd.f32 %v15313_v51, %v15312_v28  ;;  %v3203_v29 = vadd.f32 %v15315_v0, %v15314_v43 }
 0x9ff   : > { %v9779_v40 = vld [vmem:[#allocation3 + $0x130] sm:$0xf]  ;;  %v10991_v33 = vld [vmem:[#allocation3 + $0x134] sm:$0xf]  ;;  %v5228_v23 = vrot.slane %v4841_v32, 1  ;;  %v5229_v15 = vrot.slane %v4842_v48, 1 }
 0xa00   : > { %v9780_v6 = vor.u32 %v10992_v42, %v9779_v40  ;;  %v9784_v2 = vor.u32 %v10991_v33, %v9781_v39  ;;  %v15316_v40 = vld [vmem:[#allocation9_spill] sm:$0xff]  ;;  %v15317_v39 = vld [vmem:[#allocation160_spill] sm:$0xff] }
 0xa01   : > { %v11103_v43 = vld [vmem:[%s14434_s3 + $0x110] sm:$0xff] }
 0xa02   : > { %v11111_v0 = vld [vmem:[%s14434_s3 + $0x150] sm:$0xff]  ;;  %7754 = vmatpush.bf16.msrb.mxu2 %v11103_v43 }
 0xa03   : > { %7923 = vmatpush.bf16.msrb.mxu3 %v11111_v0 }
 0xa04   : > { %v4479_v35 = vpop.f32.mrf.mxu0  ;;  %v4632_v56 = vpop.f32.mrf.mxu1 }
 0xa05   : > { %v4847_v52 = vadd.f32 %v4479_v35, %v3048_v62  ;;  %v4848_v30 = vadd.f32 %v4632_v56, %v3201_v50  ;;  %v6194_v4 = vpop.f32.mrf.mxu2  ;;  %v6363_v53 = vpop.f32.mrf.mxu3 }
 0xa06   : > { %v13456_v5 = vadd.f32 %v6363_v53, %v6194_v4 }
 0xa07   : > { %v5230_v24 = vrot.slane %v4847_v52, 1  ;;  %v5231_v10 = vrot.slane %v4848_v30, 1  ;;  %4514 = vmatmul.bf16.gmra.mxu0 %v11233_v61  ;;  %4667 = vmatmul.bf16.gmra.mxu1 %v11233_v61 }
 0xa09   : > { %v5297_v8 = vsel %vm5270_vm1, %v5228_v23, %v5230_v24  ;;  %v5298_v9 = vsel %vm5270_vm1, %v5229_v15, %v5231_v10 }
 0xa0a   : > { %v5371_v58 = vadd.f32 %v5297_v8, %v15310_v55  ;;  %v5372_v14 = vadd.f32 %v5298_v9, %v15311_v47  ;;  %6236 = vmatmul.bf16.gmra.mxu2 %v9780_v6  ;;  %6405 = vmatmul.bf16.gmra.mxu3 %v9784_v2  ;;  %v9787_v55 = vld [vmem:[#allocation3 + $0x140] sm:$0xf] }
 0xa0c   : > { %v5441_v21 = vadd.f32 %v13118_v54, %v5371_v58  ;;  %v5442_v62 = vadd.f32 %v13120_v19, %v5372_v14  ;;  %v4481_v60 = vpop.f32.mrf.mxu0  ;;  %v4634_v41 = vpop.f32.mrf.mxu1  ;;  %v10993_v58 = vld [vmem:[#allocation3 + $0x144] sm:$0xf] }
 0xa0d   : > { %v4849_v50 = vadd.f32 %v4481_v60, %v3050_v20  ;;  %v4850_v32 = vadd.f32 %v4634_v41, %v3203_v29  ;;  %v6197_v48 = vpop.f32.mrf.mxu2  ;;  %v6366_v35 = vpop.f32.mrf.mxu3 }
 0xa0e   : > { %v5487_v56 = vpack.c.bf16 %v5442_v62, %v5441_v21  ;;  %v13470_v42 = vadd.f32 %v6366_v35, %v6197_v48  ;;  %v15318_v48 = vld [vmem:[#allocation250_spill] sm:$0xff] }
 0xa0f   : > { %v5232_v52 = vrot.slane %v4849_v50, 1  ;;  %v5233_v30 = vrot.slane %v4850_v32, 1  ;;  %v10943_v50 = vld [vmem:[%s14434_s3 + $0x10] sm:$0xff]  ;;  %v15319_v35 = vld [vmem:[#allocation414_spill] sm:$0xff] }
 0xa10   : > { %5520 = vst [vmem:[#allocation3 + $0x148] sm:$0xff] %v5487_v56  ;;  %v10951_v32 = vld [vmem:[%s14434_s3 + $0x50] sm:$0xff]  ;;  %v3054_v56 = vadd.f32 %v15319_v35, %v15318_v48  ;;  %6902 = vmatpush.bf16.msrb.mxu0 %v10943_v50  ;;  %v11235_v50 = vld [vmem:[#allocation2 + $0x108] sm:$0xff] }
 0xa11   : > { %v5295_v4 = vsel %vm5270_vm1, %v5230_v24, %v5232_v52  ;;  %v5296_v53 = vsel %vm5270_vm1, %v5231_v10, %v5233_v30  ;;  %v11234_v24 = vld [vmem:[#allocation2 + $0x100] sm:$0xff]  ;;  %7071 = vmatpush.bf16.msrb.mxu1 %v10951_v32 }
 0xa12   : > { %v5373_v33 = vadd.f32 %v5295_v4, %v15316_v40  ;;  %v5374_v23 = vadd.f32 %v5296_v53, %v15317_v39  ;;  %v15320_v52 = vld [vmem:[#allocation251_spill] sm:$0xff]  ;;  %v15322_v53 = vld [vmem:[#allocation254_spill] sm:$0xff] }
 0xa13   : > { %v15321_v30 = vld [vmem:[#allocation415_spill] sm:$0xff]  ;;  %v15323_v40 = vld [vmem:[#allocation418_spill] sm:$0xff] }
 0xa14   : > { %v5443_v15 = vadd.f32 %v13118_v54, %v5373_v33  ;;  %v5444_v61 = vadd.f32 %v13120_v19, %v5374_v23  ;;  %v4484_v6 = vpop.f32.mrf.mxu0  ;;  %v4637_v2 = vpop.f32.mrf.mxu1  ;;  %v3207_v4 = vadd.f32 %v15321_v30, %v15320_v52  ;;  %v3057_v33 = vadd.f32 %v15323_v40, %v15322_v53  ;;  %v15324_v39 = vld [vmem:[#allocation255_spill] sm:$0xff]  ;;  %v15326_v52 = vld [vmem:[#allocation258_spill] sm:$0xff]  ;;  %v15327_v30 = vld [vmem:[#allocation420_spill] sm:$0xff] }
 0xa15   : > { %v6199_v8 = vpop.f32.mrf.mxu2  ;;  %v6368_v9 = vpop.f32.mrf.mxu3  ;;  %v15325_v23 = vld [vmem:[#allocation419_spill] sm:$0xff]  ;;  %v15329_v40 = vld [vmem:[#allocation421_spill] sm:$0xff] }
 0xa16   : > { %v5488_v47 = vpack.c.bf16 %v5444_v61, %v5443_v15  ;;  %v13480_v14 = vadd.f32 %v6368_v9, %v6199_v8  ;;  %v3210_v15 = vadd.f32 %v15325_v23, %v15324_v39  ;;  %v10996_v9 = vld [vmem:[#allocation3 + $0x154] sm:$0xf0]  ;;  %v15328_v53 = vld [vmem:[#allocation259_spill] sm:$0xff] }
 0xa17   : > { %4519 = vmatmul.bf16.gmra.mxu0 %v11234_v24  ;;  %4672 = vmatmul.bf16.gmra.mxu1 %v11234_v24  ;;  %v10994_v10 = vld [vmem:[#allocation3 + $0x144] sm:$0xf0]  ;;  %v9789_v28 = vld [vmem:[#allocation3 + $0x148] sm:$0xf0] }
 0xa18   : > { %5521 = vst [vmem:[#allocation3 + $0x150] sm:$0xff] %v5488_v47  ;;  %v9788_v51 = vor.u32 %v10994_v10, %v9787_v55  ;;  %v9792_v20 = vor.u32 %v10993_v58, %v9789_v28 }
 0xa1a   : > { %6241 = vmatmul.bf16.gmra.mxu2 %v9788_v51  ;;  %6410 = vmatmul.bf16.gmra.mxu3 %v9792_v20  ;;  %v9797_v51 = vld [vmem:[#allocation3 + $0x158] sm:$0xf0] }
 0xa1c   : > { %v4485_v29 = vpop.f32.mrf.mxu0  ;;  %v4638_v21 = vpop.f32.mrf.mxu1 }
 0xa1d   : > { %v6202_v62 = vpop.f32.mrf.mxu2  ;;  %v6371_v60 = vpop.f32.mrf.mxu3  ;;  %v4857_v61 = vadd.f32 %v4485_v29, %v3054_v56  ;;  %v4858_v6 = vadd.f32 %v4638_v21, %v3207_v4  ;;  %v3059_v4 = vadd.f32 %v15327_v30, %v15326_v52  ;;  %v9803_v52 = vld [vmem:[#allocation3 + $0x160] sm:$0xf]  ;;  %v10997_v30 = vld [vmem:[#allocation3 + $0x164] sm:$0xf] }
 0xa1e   : > { %v13488_v41 = vadd.f32 %v6371_v60, %v6202_v62 }
 0xa1f   : > { %v9795_v10 = vld [vmem:[#allocation3 + $0x150] sm:$0xf]  ;;  %v10995_v28 = vld [vmem:[#allocation3 + $0x154] sm:$0xf]  ;;  %v5234_v43 = vrot.slane %v4857_v61, 1  ;;  %v5235_v0 = vrot.slane %v4858_v6, 1 }
 0xa20   : > { %v9796_v29 = vor.u32 %v10996_v9, %v9795_v10  ;;  %v9800_v21 = vor.u32 %v10995_v28, %v9797_v51  ;;  %v15330_v51 = vld [vmem:[#allocation10_spill] sm:$0xff] }
 0xa24   : > { %v4488_v2 = vpop.f32.mrf.mxu0  ;;  %v4641_v8 = vpop.f32.mrf.mxu1 }
 0xa25   : > { %v4863_v55 = vadd.f32 %v4488_v2, %v3057_v33  ;;  %v4864_v58 = vadd.f32 %v4641_v8, %v3210_v15  ;;  %v6204_v47 = vpop.f32.mrf.mxu2  ;;  %v6373_v24 = vpop.f32.mrf.mxu3  ;;  %v3212_v33 = vadd.f32 %v15329_v40, %v15328_v53  ;;  %v11236_v40 = vld [vmem:[#allocation2 + $0x110] sm:$0xff] }
 0xa26   : > { %v13504_v20 = vadd.f32 %v6373_v24, %v6204_v47  ;;  %v10942_v47 = vld [vmem:[%s14434_s3 + $0x8] sm:$0xff] }
 0xa27   : > { %v5236_v62 = vrot.slane %v4863_v55, 1  ;;  %v5237_v60 = vrot.slane %v4864_v58, 1  ;;  %4523 = vmatmul.bf16.gmra.mxu0 %v11235_v50  ;;  %4676 = vmatmul.bf16.gmra.mxu1 %v11235_v50  ;;  %v10950_v24 = vld [vmem:[%s14434_s3 + $0x48] sm:$0xff] }
 0xa28   : > { %6903 = vmatpush.bf16.msrb.mxu0 %v10942_v47  ;;  %7072 = vmatpush.bf16.msrb.mxu1 %v10950_v24  ;;  %v15334_v47 = vld [vmem:[#allocation263_spill] sm:$0xff] }
 0xa29   : > { %v5293_v32 = vsel %vm5270_vm1, %v5234_v43, %v5236_v62  ;;  %v5294_v48 = vsel %vm5270_vm1, %v5235_v0, %v5237_v60  ;;  %v15331_v0 = vld [vmem:[#allocation161_spill] sm:$0xff]  ;;  %v15335_v24 = vld [vmem:[#allocation423_spill] sm:$0xff] }
 0xa2a   : > { %v5375_v35 = vadd.f32 %v5293_v32, %v12886_v46  ;;  %v5376_v56 = vadd.f32 %v5294_v48, %v12888_v37  ;;  %6246 = vmatmul.bf16.gmra.mxu2 %v9796_v29  ;;  %6415 = vmatmul.bf16.gmra.mxu3 %v9800_v21  ;;  %v10941_v29 = vld [vmem:[%s14434_s3] sm:$0xff] }
 0xa2b   : > { %v10949_v21 = vld [vmem:[%s14434_s3 + $0x40] sm:$0xff] }
 0xa2c   : > { %v5445_v39 = vadd.f32 %v13118_v54, %v5375_v35  ;;  %v5446_v23 = vadd.f32 %v13120_v19, %v5376_v56  ;;  %v4490_v15 = vpop.f32.mrf.mxu0  ;;  %v4643_v61 = vpop.f32.mrf.mxu1  ;;  %6904 = vmatpush.bf16.msrb.mxu0 %v10941_v29  ;;  %7073 = vmatpush.bf16.msrb.mxu1 %v10949_v21 }
 0xa2d   : > { %v4865_v6 = vadd.f32 %v4490_v15, %v3059_v4  ;;  %v4866_v2 = vadd.f32 %v4643_v61, %v3212_v33  ;;  %v6207_v8 = vpop.f32.mrf.mxu2  ;;  %v6376_v46 = vpop.f32.mrf.mxu3 }
 0xa2e   : > { %v5489_v9 = vpack.c.bf16 %v5446_v23, %v5445_v39  ;;  %v13518_v37 = vadd.f32 %v6376_v46, %v6207_v8 }
 0xa2f   : > { %v5238_v55 = vrot.slane %v4865_v6, 1  ;;  %v5239_v58 = vrot.slane %v4866_v2, 1 }
 0xa30   : > { %5522 = vst [vmem:[#allocation3 + $0x168] sm:$0xff] %v5489_v9  ;;  %v15332_v9 = vld [vmem:[#allocation262_spill] sm:$0xff] }
 0xa31   : > { %v5291_v10 = vsel %vm5270_vm1, %v5236_v62, %v5238_v55  ;;  %v5292_v28 = vsel %vm5270_vm1, %v5237_v60, %v5239_v58  ;;  %v15333_v55 = vld [vmem:[#allocation422_spill] sm:$0xff] }
 0xa32   : > { %v5377_v43 = vadd.f32 %v5291_v10, %v15330_v51  ;;  %v5378_v50 = vadd.f32 %v5292_v28, %v15331_v0  ;;  %v3063_v58 = vadd.f32 %v15333_v55, %v15332_v9  ;;  %v3216_v10 = vadd.f32 %v15335_v24, %v15334_v47  ;;  %v15336_v28 = vld [vmem:[#allocation266_spill] sm:$0xff]  ;;  %v15338_v0 = vld [vmem:[#allocation267_spill] sm:$0xff] }
 0xa33   : > { %v15337_v51 = vld [vmem:[#allocation426_spill] sm:$0xff]  ;;  %v15340_v24 = vld [vmem:[#allocation11_spill] sm:$0xff] }
 0xa34   : > { %v5447_v32 = vadd.f32 %v13118_v54, %v5377_v43  ;;  %v5448_v62 = vadd.f32 %v13120_v19, %v5378_v50  ;;  %v4493_v48 = vpop.f32.mrf.mxu0  ;;  %v4646_v60 = vpop.f32.mrf.mxu1  ;;  %v3066_v43 = vadd.f32 %v15337_v51, %v15336_v28  ;;  %v15339_v50 = vld [vmem:[#allocation427_spill] sm:$0xff]  ;;  %v11237_v9 = vld [vmem:[#allocation2 + $0x118] sm:$0xff]  ;;  %v15342_v51 = vld [vmem:[#allocation428_spill] sm:$0xff] }
 0xa35   : > { %v6209_v35 = vpop.f32.mrf.mxu2  ;;  %v6378_v56 = vpop.f32.mrf.mxu3  ;;  %v3219_v29 = vadd.f32 %v15339_v50, %v15338_v0  ;;  %v11000_v60 = vld [vmem:[#allocation3 + $0x174] sm:$0xf0]  ;;  %v15343_v0 = vld [vmem:[#allocation271_spill] sm:$0xff]  ;;  %v15344_v50 = vld [vmem:[#allocation429_spill] sm:$0xff] }
 0xa36   : > { %v5490_v4 = vpack.c.bf16 %v5448_v62, %v5447_v32  ;;  %v13540_v53 = vadd.f32 %v6378_v56, %v6209_v35  ;;  %v15341_v28 = vld [vmem:[#allocation270_spill] sm:$0xff] }
 0xa37   : > { %4528 = vmatmul.bf16.gmra.mxu0 %v11236_v40  ;;  %4681 = vmatmul.bf16.gmra.mxu1 %v11236_v40  ;;  %v10998_v33 = vld [vmem:[#allocation3 + $0x164] sm:$0xf0]  ;;  %v9805_v39 = vld [vmem:[#allocation3 + $0x168] sm:$0xf0] }
 0xa38   : > { %5523 = vst [vmem:[#allocation3 + $0x170] sm:$0xff] %v5490_v4  ;;  %v9804_v23 = vor.u32 %v10998_v33, %v9803_v52  ;;  %v9808_v15 = vor.u32 %v10997_v30, %v9805_v39  ;;  %v9813_v33 = vld [vmem:[#allocation3 + $0x178] sm:$0xf0] }
 0xa3a   : > { %6251 = vmatmul.bf16.gmra.mxu2 %v9804_v23  ;;  %6420 = vmatmul.bf16.gmra.mxu3 %v9808_v15 }
 0xa3c   : > { %v4494_v61 = vpop.f32.mrf.mxu0  ;;  %v4647_v6 = vpop.f32.mrf.mxu1 }
 0xa3d   : > { %v6212_v2 = vpop.f32.mrf.mxu2  ;;  %v6381_v8 = vpop.f32.mrf.mxu3  ;;  %v4873_v21 = vadd.f32 %v4494_v61, %v3063_v58  ;;  %v4874_v32 = vadd.f32 %v4647_v6, %v3216_v10 }
 0xa3e   : > { %v13542_v46 = vadd.f32 %v6381_v8, %v6212_v2 }
 0xa3f   : > { %v9811_v4 = vld [vmem:[#allocation3 + $0x170] sm:$0xf]  ;;  %v10999_v40 = vld [vmem:[#allocation3 + $0x174] sm:$0xf]  ;;  %v5240_v23 = vrot.slane %v4873_v21, 1  ;;  %v5241_v15 = vrot.slane %v4874_v32, 1 }
 0xa40   : > { %v9812_v61 = vor.u32 %v11000_v60, %v9811_v4  ;;  %v9816_v6 = vor.u32 %v10999_v40, %v9813_v33  ;;  %v9963_v33 = vld [vmem:[#allocation3] sm:$0xf] }
 0xa44   : > { %v4497_v62 = vpop.f32.mrf.mxu0  ;;  %v4650_v48 = vpop.f32.mrf.mxu1 }
 0xa45   : > { %v4879_v35 = vadd.f32 %v4497_v62, %v3066_v43  ;;  %v4880_v56 = vadd.f32 %v4650_v48, %v3219_v29  ;;  %v6214_v52 = vpop.f32.mrf.mxu2  ;;  %v6383_v30 = vpop.f32.mrf.mxu3  ;;  %v3068_v43 = vadd.f32 %v15342_v51, %v15341_v28  ;;  %v3221_v29 = vadd.f32 %v15344_v50, %v15343_v0 }
 0xa46   : > { %v13552_v39 = vadd.f32 %v6383_v30, %v6214_v52 }
 0xa47   : > { %v5242_v2 = vrot.slane %v4879_v35, 1  ;;  %v5243_v8 = vrot.slane %v4880_v56, 1  ;;  %4532 = vmatmul.bf16.gmra.mxu0 %v11237_v9  ;;  %4685 = vmatmul.bf16.gmra.mxu1 %v11237_v9  ;;  %v9965_v9 = vld [vmem:[#allocation3 + $0x8] sm:$0xf0] }
 0xa49   : > { %v5289_v55 = vsel %vm5270_vm1, %v5240_v23, %v5242_v2  ;;  %v5290_v58 = vsel %vm5270_vm1, %v5241_v15, %v5243_v8  ;;  %v10878_v23 = vld [vmem:[#allocation3 + $0x4] sm:$0xf0]  ;;  %v10877_v15 = vld [vmem:[#allocation3 + $0x4] sm:$0xf] }
 0xa4a   : > { %v5379_v47 = vadd.f32 %v5289_v55, %v12922_v26  ;;  %v5380_v10 = vadd.f32 %v5290_v58, %v15340_v24  ;;  %6256 = vmatmul.bf16.gmra.mxu2 %v9812_v61  ;;  %6425 = vmatmul.bf16.gmra.mxu3 %v9816_v6  ;;  %v15345_v55 = vld [vmem:[#allocation336_spill] sm:$0xff]  ;;  %v9968_v28 = vor.u32 %v10877_v15, %v9965_v9  ;;  %v9971_v9 = vld [vmem:[#allocation3 + $0x10] sm:$0xf] }
 0xa4c   : > { %v5449_v21 = vadd.f32 %v13118_v54, %v5379_v47  ;;  %v5450_v32 = vadd.f32 %v13120_v19, %v5380_v10  ;;  %v4499_v62 = vpop.f32.mrf.mxu0  ;;  %v4652_v48 = vpop.f32.mrf.mxu1  ;;  %v15346_v47 = vld [vmem:[#allocation12_spill] sm:$0xff]  ;;  %v9964_v10 = vor.u32 %v10878_v23, %v9963_v33 }
 0xa4d   : > { %v4881_v60 = vadd.f32 %v4499_v62, %v3068_v43  ;;  %v4882_v35 = vadd.f32 %v4652_v48, %v3221_v29  ;;  %v6217_v56 = vpop.f32.mrf.mxu2  ;;  %v6386_v26 = vpop.f32.mrf.mxu3  ;;  %v11001_v62 = vld [vmem:[#allocation3 + $0x184] sm:$0xf] }
 0xa4e   : > { %v5491_v52 = vpack.c.bf16 %v5450_v32, %v5449_v21  ;;  %v13566_v30 = vadd.f32 %v6386_v26, %v6217_v56  ;;  %v9819_v32 = vld [vmem:[#allocation3 + $0x180] sm:$0xf]  ;;  %v11102_v26 = vld [vmem:[%s14434_s3 + $0x108] sm:$0xff] }
 0xa4f   : > { %v5244_v4 = vrot.slane %v4881_v60, 1  ;;  %v5245_v40 = vrot.slane %v4882_v35, 1  ;;  %7755 = vmatpush.bf16.msrb.mxu2 %v11102_v26  ;;  %v11004_v26 = vld [vmem:[#allocation3 + $0x194] sm:$0xf0] }
 0xa50   : > { %5524 = vst [vmem:[#allocation3 + $0x188] sm:$0xff] %v5491_v52  ;;  %v11110_v52 = vld [vmem:[%s14434_s3 + $0x148] sm:$0xff] }
 0xa51   : > { %v5287_v61 = vsel %vm5270_vm1, %v5242_v2, %v5244_v4  ;;  %v5288_v6 = vsel %vm5270_vm1, %v5243_v8, %v5245_v40  ;;  %7924 = vmatpush.bf16.msrb.mxu3 %v11110_v52 }
 0xa52   : > { %v5381_v58 = vadd.f32 %v5287_v61, %v15345_v55  ;;  %v5382_v24 = vadd.f32 %v5288_v6, %v15346_v47  ;;  %v10880_v61 = vld [vmem:[#allocation3 + $0x14] sm:$0xf0]  ;;  %v10879_v6 = vld [vmem:[#allocation3 + $0x14] sm:$0xf]  ;;  %v9973_v55 = vld [vmem:[#allocation3 + $0x18] sm:$0xf0] }
 0xa53   : > { %v15350_v47 = vld [vmem:[#allocation432_spill] sm:$0xff] }
 0xa54   : > { %v5451_v51 = vadd.f32 %v13118_v54, %v5381_v58  ;;  %v5452_v43 = vadd.f32 %v13120_v19, %v5382_v24  ;;  %v4502_v0 = vpop.f32.mrf.mxu0  ;;  %v4655_v50 = vpop.f32.mrf.mxu1  ;;  %v15349_v58 = vld [vmem:[#allocation274_spill] sm:$0xff] }
 0xa55   : > { %v6219_v29 = vpop.f32.mrf.mxu2  ;;  %v6388_v21 = vpop.f32.mrf.mxu3  ;;  %v3072_v24 = vadd.f32 %v15350_v47, %v15349_v58  ;;  %v15354_v0 = vld [vmem:[#allocation436_spill] sm:$0xff] }
 0xa56   : > { %v5492_v2 = vpack.c.bf16 %v5452_v43, %v5451_v51  ;;  %v13576_v48 = vadd.f32 %v6388_v21, %v6219_v29  ;;  %v15353_v43 = vld [vmem:[#allocation278_spill] sm:$0xff]  ;;  %v15355_v29 = vld [vmem:[#allocation279_spill] sm:$0xff]  ;;  %v15356_v21 = vld [vmem:[#allocation437_spill] sm:$0xff] }
 0xa57   : > { %6905 = vmatmul.bf16.vlgmr.msrb.gmra.mxu0 %v9964_v10  ;;  %7074 = vmatmul.bf16.vlgmr.msrb.gmra.mxu1 %v9968_v28  ;;  %v11002_v8 = vld [vmem:[#allocation3 + $0x184] sm:$0xf0]  ;;  %v9821_v60 = vld [vmem:[#allocation3 + $0x188] sm:$0xf0]  ;;  %v15351_v10 = vld [vmem:[#allocation275_spill] sm:$0xff]  ;;  %v3075_v50 = vadd.f32 %v15354_v0, %v15353_v43 }
 0xa58   : > { %15347 = vst [vmem:[#allocation343_spill] sm:$0xff] %v13576_v48  ;;  %v9820_v35 = vor.u32 %v11002_v8, %v9819_v32  ;;  %v9824_v56 = vor.u32 %v11001_v62, %v9821_v60  ;;  %v15352_v28 = vld [vmem:[#allocation433_spill] sm:$0xff]  ;;  %v3228_v32 = vadd.f32 %v15356_v21, %v15355_v29  ;;  %v9972_v8 = vor.u32 %v10880_v61, %v9971_v9  ;;  %v15361_v21 = vld [vmem:[#allocation438_spill] sm:$0xff] }
 0xa59   : > { %5525 = vst [vmem:[#allocation3 + $0x190] sm:$0xff] %v5492_v2  ;;  %v3225_v51 = vadd.f32 %v15352_v28, %v15351_v10  ;;  %v9976_v60 = vor.u32 %v10879_v6, %v9973_v55  ;;  %v9829_v10 = vld [vmem:[#allocation3 + $0x198] sm:$0xf0]  ;;  %v15358_v6 = vld [vmem:[#allocation337_spill] sm:$0xff] }
 0xa5a   : > { %6261 = vmatmul.bf16.gmra.mxu2 %v9820_v35  ;;  %6430 = vmatmul.bf16.gmra.mxu3 %v9824_v56 }
 0xa5c   : > { %v4503_v4 = vpop.f32.mrf.mxu0  ;;  %v4656_v40 = vpop.f32.mrf.mxu1 }
 0xa5d   : > { %v6222_v33 = vpop.f32.mrf.mxu2  ;;  %v6391_v23 = vpop.f32.mrf.mxu3  ;;  %v4889_v62 = vadd.f32 %v4503_v4, %v3072_v24  ;;  %v4890_v2 = vadd.f32 %v4656_v40, %v3225_v51  ;;  %v15359_v24 = vld [vmem:[#allocation13_spill] sm:$0xff] }
 0xa5e   : > { %v13584_v15 = vadd.f32 %v6391_v23, %v6222_v33 }
 0xa5f   : > { %v5246_v43 = vrot.slane %v4889_v62, 1  ;;  %v5247_v0 = vrot.slane %v4890_v2, 1  ;;  %v15362_v62 = vld [vmem:[#allocation283_spill] sm:$0xff] }
 0xa60   : > { %15348 = vst [vmem:[#allocation19_spill] sm:$0xff] %v13584_v15  ;;  %v9827_v47 = vld [vmem:[#allocation3 + $0x190] sm:$0xf]  ;;  %v11003_v15 = vld [vmem:[#allocation3 + $0x194] sm:$0xf]  ;;  %v15363_v2 = vld [vmem:[#allocation439_spill] sm:$0xff] }
 0xa61   : > { %v9828_v4 = vor.u32 %v11004_v26, %v9827_v47  ;;  %v9832_v40 = vor.u32 %v11003_v15, %v9829_v10 }
 0xa64   : > { %v4506_v35 = vpop.f32.mrf.mxu0  ;;  %v4659_v56 = vpop.f32.mrf.mxu1 }
 0xa65   : > { %v4895_v52 = vadd.f32 %v4506_v35, %v3075_v50  ;;  %v4896_v33 = vadd.f32 %v4659_v56, %v3228_v32  ;;  %v6224_v23 = vpop.f32.mrf.mxu2  ;;  %v6393_v58 = vpop.f32.mrf.mxu3  ;;  %v15360_v50 = vld [vmem:[#allocation282_spill] sm:$0xff] }
 0xa66   : > { %v13594_v28 = vadd.f32 %v6393_v58, %v6224_v23  ;;  %v3077_v32 = vadd.f32 %v15361_v21, %v15360_v50  ;;  %v9981_v50 = vld [vmem:[#allocation3 + $0x28] sm:$0xf0] }
 0xa67   : > { %v5248_v48 = vrot.slane %v4895_v52, 1  ;;  %v5249_v29 = vrot.slane %v4896_v33, 1  ;;  %6910 = vmatmul.bf16.gmra.mxu0 %v9972_v8  ;;  %7079 = vmatmul.bf16.gmra.mxu1 %v9976_v60  ;;  %v3230_v8 = vadd.f32 %v15363_v2, %v15362_v62 }
 0xa68   : > { %15357 = vst [vmem:[#allocation172_spill] sm:$0xff] %v13594_v28 }
 0xa69   : > { %v5285_v9 = vsel %vm5270_vm1, %v5246_v43, %v5248_v48  ;;  %v5286_v61 = vsel %vm5270_vm1, %v5247_v0, %v5249_v29 }
 0xa6a   : > { %v5383_v55 = vadd.f32 %v5285_v9, %v15358_v6  ;;  %v5384_v51 = vadd.f32 %v5286_v61, %v15359_v24  ;;  %6266 = vmatmul.bf16.gmra.mxu2 %v9828_v4  ;;  %6435 = vmatmul.bf16.gmra.mxu3 %v9832_v40  ;;  %v9979_v40 = vld [vmem:[#allocation3 + $0x20] sm:$0xf]  ;;  %v15365_v9 = vld [vmem:[#allocation164_spill] sm:$0xff]  ;;  %v15366_v6 = vld [vmem:[#allocation14_spill] sm:$0xff] }
 0xa6b   : > { %v10882_v24 = vld [vmem:[#allocation3 + $0x24] sm:$0xf0] }
 0xa6c   : > { %v5453_v15 = vadd.f32 %v13118_v54, %v5383_v55  ;;  %v5454_v60 = vadd.f32 %v13120_v19, %v5384_v51  ;;  %v4508_v35 = vpop.f32.mrf.mxu0  ;;  %v4661_v56 = vpop.f32.mrf.mxu1  ;;  %v10881_v51 = vld [vmem:[#allocation3 + $0x24] sm:$0xf] }
 0xa6d   : > { %v4897_v26 = vadd.f32 %v4508_v35, %v3077_v32  ;;  %v4898_v52 = vadd.f32 %v4661_v56, %v3230_v8  ;;  %v6227_v33 = vpop.f32.mrf.mxu2  ;;  %v6396_v23 = vpop.f32.mrf.mxu3  ;;  %v9835_v35 = vld [vmem:[#allocation3 + $0x1a0] sm:$0xf] }
 0xa6e   : > { %v5493_v58 = vpack.c.bf16 %v5454_v60, %v5453_v15  ;;  %v13608_v47 = vadd.f32 %v6396_v23, %v6227_v33  ;;  %v9984_v60 = vor.u32 %v10881_v51, %v9981_v50  ;;  %v10884_v50 = vld [vmem:[#allocation3 + $0x34] sm:$0xf0] }
 0xa6f   : > { %v5250_v10 = vrot.slane %v4897_v26, 1  ;;  %v5251_v43 = vrot.slane %v4898_v52, 1 }
 0xa70   : > { %15364 = vst [vmem:[#allocation20_spill] sm:$0xff] %v13608_v47 }
 0xa71   : > { %5526 = vst [vmem:[#allocation3 + $0x1a8] sm:$0xff] %v5493_v58  ;;  %v5283_v0 = vsel %vm5270_vm1, %v5248_v48, %v5250_v10  ;;  %v5284_v4 = vsel %vm5270_vm1, %v5249_v29, %v5251_v43  ;;  %v9980_v48 = vor.u32 %v10882_v24, %v9979_v40  ;;  %v11005_v29 = vld [vmem:[#allocation3 + $0x1a4] sm:$0xf] }
 0xa72   : > { %v5385_v61 = vadd.f32 %v5283_v0, %v15365_v9  ;;  %v5386_v55 = vadd.f32 %v5284_v4, %v15366_v6  ;;  %v15369_v9 = vld [vmem:[#allocation286_spill] sm:$0xff]  ;;  %v15372_v24 = vld [vmem:[#allocation443_spill] sm:$0xff] }
 0xa74   : > { %v5455_v21 = vadd.f32 %v13118_v54, %v5385_v61  ;;  %v5456_v32 = vadd.f32 %v13120_v19, %v5386_v55  ;;  %v4511_v62 = vpop.f32.mrf.mxu0  ;;  %v4664_v2 = vpop.f32.mrf.mxu1  ;;  %v15370_v61 = vld [vmem:[#allocation442_spill] sm:$0xff]  ;;  %v15371_v55 = vld [vmem:[#allocation287_spill] sm:$0xff] }
 0xa75   : > { %v6229_v8 = vpop.f32.mrf.mxu2  ;;  %v6398_v15 = vpop.f32.mrf.mxu3  ;;  %v3081_v6 = vadd.f32 %v15370_v61, %v15369_v9  ;;  %v3234_v51 = vadd.f32 %v15372_v24, %v15371_v55  ;;  %v9989_v62 = vld [vmem:[#allocation3 + $0x38] sm:$0xf0] }
 0xa76   : > { %v5494_v56 = vpack.c.bf16 %v5456_v32, %v5455_v21  ;;  %v13618_v26 = vadd.f32 %v6398_v15, %v6229_v8  ;;  %v9987_v21 = vld [vmem:[#allocation3 + $0x30] sm:$0xf]  ;;  %v10883_v32 = vld [vmem:[#allocation3 + $0x34] sm:$0xf]  ;;  %v15373_v2 = vld [vmem:[#allocation290_spill] sm:$0xff] }
 0xa77   : > { %6915 = vmatmul.bf16.gmra.mxu0 %v9980_v48  ;;  %7084 = vmatmul.bf16.gmra.mxu1 %v9984_v60  ;;  %v15374_v8 = vld [vmem:[#allocation446_spill] sm:$0xff]  ;;  %v15375_v48 = vld [vmem:[#allocation291_spill] sm:$0xff]  ;;  %v9988_v61 = vor.u32 %v10884_v50, %v9987_v21  ;;  %v9992_v55 = vor.u32 %v10883_v32, %v9989_v62  ;;  %v15378_v50 = vld [vmem:[#allocation165_spill] sm:$0xff] }
 0xa78   : > { %15367 = vst [vmem:[#allocation173_spill] sm:$0xff] %v13618_v26  ;;  %v11006_v52 = vld [vmem:[#allocation3 + $0x1a4] sm:$0xf0]  ;;  %v9837_v33 = vld [vmem:[#allocation3 + $0x1a8] sm:$0xf0]  ;;  %v3084_v15 = vadd.f32 %v15374_v8, %v15373_v2  ;;  %v15376_v60 = vld [vmem:[#allocation447_spill] sm:$0xff] }
 0xa79   : > { %5527 = vst [vmem:[#allocation3 + $0x1b0] sm:$0xff] %v5494_v56  ;;  %v9836_v23 = vor.u32 %v11006_v52, %v9835_v35  ;;  %v9840_v58 = vor.u32 %v11005_v29, %v9837_v33  ;;  %v3237_v35 = vadd.f32 %v15376_v60, %v15375_v48  ;;  %v9845_v26 = vld [vmem:[#allocation3 + $0x1b8] sm:$0xf0]  ;;  %v15379_v32 = vld [vmem:[#allocation15_spill] sm:$0xff]  ;;  %v15381_v60 = vld [vmem:[#allocation448_spill] sm:$0xff] }
 0xa7b   : > { %6271 = vmatmul.bf16.gmra.mxu2 %v9836_v23  ;;  %6440 = vmatmul.bf16.gmra.mxu3 %v9840_v58  ;;  %v11008_v23 = vld [vmem:[#allocation3 + $0x1b4] sm:$0xf0] }
 0xa7c   : > { %v4512_v10 = vpop.f32.mrf.mxu0  ;;  %v4665_v43 = vpop.f32.mrf.mxu1 }
 0xa7d   : > { %v6232_v0 = vpop.f32.mrf.mxu2  ;;  %v6401_v4 = vpop.f32.mrf.mxu3  ;;  %v4905_v29 = vadd.f32 %v4512_v10, %v3081_v6  ;;  %v4906_v56 = vadd.f32 %v4665_v43, %v3234_v51 }
 0xa7e   : > { %v13620_v40 = vadd.f32 %v6401_v4, %v6232_v0 }
 0xa7f   : > { %v5252_v2 = vrot.slane %v4905_v29, 1  ;;  %v5253_v8 = vrot.slane %v4906_v56, 1  ;;  %v15382_v29 = vld [vmem:[#allocation295_spill] sm:$0xff]  ;;  %v15383_v56 = vld [vmem:[#allocation449_spill] sm:$0xff] }
 0xa80   : > { %15368 = vst [vmem:[#allocation21_spill] sm:$0xff] %v13620_v40  ;;  %v9843_v24 = vld [vmem:[#allocation3 + $0x1b0] sm:$0xf]  ;;  %v11007_v40 = vld [vmem:[#allocation3 + $0x1b4] sm:$0xf] }
 0xa81   : > { %v9844_v10 = vor.u32 %v11008_v23, %v9843_v24  ;;  %v9848_v43 = vor.u32 %v11007_v40, %v9845_v26 }
 0xa84   : > { %v4515_v52 = vpop.f32.mrf.mxu0  ;;  %v4668_v33 = vpop.f32.mrf.mxu1 }
 0xa85   : > { %v4911_v58 = vadd.f32 %v4515_v52, %v3084_v15  ;;  %v4912_v0 = vadd.f32 %v4668_v33, %v3237_v35  ;;  %v6234_v4 = vpop.f32.mrf.mxu2  ;;  %v6403_v9 = vpop.f32.mrf.mxu3  ;;  %v15380_v15 = vld [vmem:[#allocation294_spill] sm:$0xff]  ;;  %v3239_v52 = vadd.f32 %v15383_v56, %v15382_v29 }
 0xa86   : > { %v13630_v47 = vadd.f32 %v6403_v9, %v6234_v4  ;;  %v3086_v35 = vadd.f32 %v15381_v60, %v15380_v15  ;;  %v9997_v15 = vld [vmem:[#allocation3 + $0x48] sm:$0xf0] }
 0xa87   : > { %v5254_v28 = vrot.slane %v4911_v58, 1  ;;  %v5255_v48 = vrot.slane %v4912_v0, 1  ;;  %6920 = vmatmul.bf16.gmra.mxu0 %v9988_v61  ;;  %7089 = vmatmul.bf16.gmra.mxu1 %v9992_v55 }
 0xa88   : > { %15377 = vst [vmem:[#allocation346_spill] sm:$0xff] %v13630_v47 }
 0xa89   : > { %v5281_v6 = vsel %vm5270_vm1, %v5252_v2, %v5254_v28  ;;  %v5282_v51 = vsel %vm5270_vm1, %v5253_v8, %v5255_v48 }
 0xa8a   : > { %v5387_v21 = vadd.f32 %v5281_v6, %v15378_v50  ;;  %v5388_v62 = vadd.f32 %v5282_v51, %v15379_v32  ;;  %v15385_v6 = vld [vmem:[#allocation168_spill] sm:$0xff] }
 0xa8b   : > { %6276 = vmatmul.bf16.gmra.mxu2 %v9844_v10  ;;  %6445 = vmatmul.bf16.gmra.mxu3 %v9848_v43  ;;  %v9995_v43 = vld [vmem:[#allocation3 + $0x40] sm:$0xf]  ;;  %v15386_v50 = vld [vmem:[#allocation16_spill] sm:$0xff] }
 0xa8c   : > { %v5457_v26 = vadd.f32 %v13118_v54, %v5387_v21  ;;  %v5458_v40 = vadd.f32 %v13120_v19, %v5388_v62  ;;  %v4517_v33 = vpop.f32.mrf.mxu0  ;;  %v4670_v23 = vpop.f32.mrf.mxu1  ;;  %v10886_v32 = vld [vmem:[#allocation3 + $0x44] sm:$0xf0]  ;;  %v10885_v62 = vld [vmem:[#allocation3 + $0x44] sm:$0xf] }
 0xa8d   : > { %v4913_v58 = vadd.f32 %v4517_v33, %v3086_v35  ;;  %v4914_v0 = vadd.f32 %v4670_v23, %v3239_v52  ;;  %v6237_v4 = vpop.f32.mrf.mxu2  ;;  %v6406_v9 = vpop.f32.mrf.mxu3  ;;  %v9851_v33 = vld [vmem:[#allocation3 + $0x1c0] sm:$0xf] }
 0xa8e   : > { %v5495_v61 = vpack.c.bf16 %v5458_v40, %v5457_v26  ;;  %v13644_v55 = vadd.f32 %v6406_v9, %v6237_v4  ;;  %v10000_v40 = vor.u32 %v10885_v62, %v9997_v15  ;;  %v15391_v62 = vld [vmem:[#allocation299_spill] sm:$0xff]  ;;  %v15392_v15 = vld [vmem:[#allocation453_spill] sm:$0xff] }
 0xa8f   : > { %v5256_v24 = vrot.slane %v4913_v58, 1  ;;  %v5257_v2 = vrot.slane %v4914_v0, 1 }
 0xa90   : > { %15384 = vst [vmem:[#allocation22_spill] sm:$0xff] %v13644_v55 }
 0xa91   : > { %5528 = vst [vmem:[#allocation3 + $0x1c8] sm:$0xff] %v5495_v61  ;;  %v5279_v8 = vsel %vm5270_vm1, %v5254_v28, %v5256_v24  ;;  %v5280_v10 = vsel %vm5270_vm1, %v5255_v48, %v5257_v2  ;;  %v9996_v28 = vor.u32 %v10886_v32, %v9995_v43  ;;  %v11009_v48 = vld [vmem:[#allocation3 + $0x1c4] sm:$0xf] }
 0xa92   : > { %v5389_v51 = vadd.f32 %v5279_v8, %v15385_v6  ;;  %v5390_v21 = vadd.f32 %v5280_v10, %v15386_v50  ;;  %v11101_v24 = vld [vmem:[%s14434_s3 + $0x100] sm:$0xff]  ;;  %v15389_v50 = vld [vmem:[#allocation298_spill] sm:$0xff] }
 0xa93   : > { %v11109_v2 = vld [vmem:[%s14434_s3 + $0x140] sm:$0xff]  ;;  %7756 = vmatpush.bf16.msrb.mxu2 %v11101_v24  ;;  %v11012_v24 = vld [vmem:[#allocation3 + $0x1d4] sm:$0xf0] }
 0xa94   : > { %v5459_v60 = vadd.f32 %v13118_v54, %v5389_v51  ;;  %v5460_v35 = vadd.f32 %v13120_v19, %v5390_v21  ;;  %v4520_v29 = vpop.f32.mrf.mxu0  ;;  %v4673_v56 = vpop.f32.mrf.mxu1  ;;  %7925 = vmatpush.bf16.msrb.mxu3 %v11109_v2  ;;  %v15390_v21 = vld [vmem:[#allocation452_spill] sm:$0xff] }
 0xa95   : > { %v6239_v52 = vpop.f32.mrf.mxu2  ;;  %v6408_v26 = vpop.f32.mrf.mxu3  ;;  %v3090_v32 = vadd.f32 %v15390_v21, %v15389_v50  ;;  %v10003_v29 = vld [vmem:[#allocation3 + $0x50] sm:$0xf]  ;;  %v10887_v56 = vld [vmem:[#allocation3 + $0x54] sm:$0xf] }
 0xa96   : > { %v5496_v23 = vpack.c.bf16 %v5460_v35, %v5459_v60  ;;  %v13654_v58 = vadd.f32 %v6408_v26, %v6239_v52  ;;  %v3243_v60 = vadd.f32 %v15392_v15, %v15391_v62  ;;  %v10888_v35 = vld [vmem:[#allocation3 + $0x54] sm:$0xf0]  ;;  %v10005_v52 = vld [vmem:[#allocation3 + $0x58] sm:$0xf0] }
 0xa97   : > { %6925 = vmatmul.bf16.gmra.mxu0 %v9996_v28  ;;  %7094 = vmatmul.bf16.gmra.mxu1 %v10000_v40  ;;  %v15393_v26 = vld [vmem:[#allocation302_spill] sm:$0xff]  ;;  %v15394_v28 = vld [vmem:[#allocation456_spill] sm:$0xff]  ;;  %v10004_v21 = vor.u32 %v10888_v35, %v10003_v29  ;;  %v10008_v62 = vor.u32 %v10887_v56, %v10005_v52  ;;  %v15397_v29 = vld [vmem:[#allocation169_spill] sm:$0xff] }
 0xa98   : > { %15387 = vst [vmem:[#allocation347_spill] sm:$0xff] %v13654_v58  ;;  %v11010_v0 = vld [vmem:[#allocation3 + $0x1c4] sm:$0xf0]  ;;  %v9853_v4 = vld [vmem:[#allocation3 + $0x1c8] sm:$0xf0]  ;;  %v3093_v40 = vadd.f32 %v15394_v28, %v15393_v26  ;;  %v15398_v52 = vld [vmem:[#allocation306_spill] sm:$0xff] }
 0xa99   : > { %5529 = vst [vmem:[#allocation3 + $0x1d0] sm:$0xff] %v5496_v23  ;;  %v9852_v9 = vor.u32 %v11010_v0, %v9851_v33  ;;  %v9856_v61 = vor.u32 %v11009_v48, %v9853_v4  ;;  %v15395_v33 = vld [vmem:[#allocation303_spill] sm:$0xff]  ;;  %v15396_v48 = vld [vmem:[#allocation457_spill] sm:$0xff]  ;;  %v9861_v58 = vld [vmem:[#allocation3 + $0x1d8] sm:$0xf0] }
 0xa9a   : > { %v3246_v23 = vadd.f32 %v15396_v48, %v15395_v33 }
 0xa9b   : > { %6281 = vmatmul.bf16.gmra.mxu2 %v9852_v9  ;;  %6450 = vmatmul.bf16.gmra.mxu3 %v9856_v61 }
 0xa9c   : > { %v4521_v8 = vpop.f32.mrf.mxu0  ;;  %v4674_v10 = vpop.f32.mrf.mxu1 }
 0xa9d   : > { %v6242_v43 = vpop.f32.mrf.mxu2  ;;  %v6411_v6 = vpop.f32.mrf.mxu3  ;;  %v4921_v0 = vadd.f32 %v4521_v8, %v3090_v32  ;;  %v4922_v4 = vadd.f32 %v4674_v10, %v3243_v60 }
 0xa9e   : > { %v13662_v51 = vadd.f32 %v6411_v6, %v6242_v43 }
 0xa9f   : > { %v5258_v26 = vrot.slane %v4921_v0, 1  ;;  %v5259_v28 = vrot.slane %v4922_v4, 1  ;;  %v15401_v0 = vld [vmem:[#allocation459_spill] sm:$0xff] }
 0xaa0   : > { %15388 = vst [vmem:[#allocation23_spill] sm:$0xff] %v13662_v51  ;;  %v9859_v15 = vld [vmem:[#allocation3 + $0x1d0] sm:$0xf]  ;;  %v11011_v51 = vld [vmem:[#allocation3 + $0x1d4] sm:$0xf] }
 0xaa1   : > { %v9860_v8 = vor.u32 %v11012_v24, %v9859_v15  ;;  %v9864_v10 = vor.u32 %v11011_v51, %v9861_v58 }
 0xaa4   : > { %v4524_v9 = vpop.f32.mrf.mxu0  ;;  %v4677_v61 = vpop.f32.mrf.mxu1 }
 0xaa5   : > { %v4927_v2 = vadd.f32 %v4524_v9, %v3093_v40  ;;  %v4928_v43 = vadd.f32 %v4677_v61, %v3246_v23  ;;  %v6244_v6 = vpop.f32.mrf.mxu2  ;;  %v6413_v50 = vpop.f32.mrf.mxu3  ;;  %v15399_v40 = vld [vmem:[#allocation458_spill] sm:$0xff]  ;;  %v15400_v23 = vld [vmem:[#allocation307_spill] sm:$0xff] }
 0xaa6   : > { %v13672_v55 = vadd.f32 %v6413_v50, %v6244_v6  ;;  %v3095_v48 = vadd.f32 %v15399_v40, %v15398_v52  ;;  %v3248_v4 = vadd.f32 %v15401_v0, %v15400_v23 }
 0xaa7   : > { %v5260_v47 = vrot.slane %v4927_v2, 1  ;;  %v5261_v33 = vrot.slane %v4928_v43, 1  ;;  %6930 = vmatmul.bf16.gmra.mxu0 %v10004_v21  ;;  %7099 = vmatmul.bf16.gmra.mxu1 %v10008_v62 }
 0xaa9   : > { %v5277_v32 = vsel %vm5270_vm1, %v5258_v26, %v5260_v47  ;;  %v5278_v60 = vsel %vm5270_vm1, %v5259_v28, %v5261_v33  ;;  %v10011_v28 = vld [vmem:[#allocation3 + $0x60] sm:$0xf] }
 0xaaa   : > { %v5391_v35 = vadd.f32 %v5277_v32, %v13042_v25  ;;  %v5392_v56 = vadd.f32 %v5278_v60, %v15397_v29  ;;  %v10890_v60 = vld [vmem:[#allocation3 + $0x64] sm:$0xf0]  ;;  %v10013_v29 = vld [vmem:[#allocation3 + $0x68] sm:$0xf0] }
 0xaab   : > { %6286 = vmatmul.bf16.gmra.mxu2 %v9860_v8  ;;  %6455 = vmatmul.bf16.gmra.mxu3 %v9864_v10  ;;  %v15402_v10 = vld [vmem:[#allocation17_spill] sm:$0xff] }
 0xaac   : > { %v5461_v58 = vadd.f32 %v13118_v54, %v5391_v35  ;;  %v5462_v51 = vadd.f32 %v13120_v19, %v5392_v56  ;;  %v4526_v9 = vpop.f32.mrf.mxu0  ;;  %v4679_v61 = vpop.f32.mrf.mxu1  ;;  %v10889_v35 = vld [vmem:[#allocation3 + $0x64] sm:$0xf] }
 0xaad   : > { %v4929_v24 = vadd.f32 %v4526_v9, %v3095_v48  ;;  %v4930_v2 = vadd.f32 %v4679_v61, %v3248_v4  ;;  %v6247_v43 = vpop.f32.mrf.mxu2  ;;  %v6416_v25 = vpop.f32.mrf.mxu3  ;;  %v10016_v4 = vor.u32 %v10889_v35, %v10013_v29  ;;  %v10019_v35 = vld [vmem:[#allocation3 + $0x70] sm:$0xf]  ;;  %v10891_v29 = vld [vmem:[#allocation3 + $0x74] sm:$0xf] }
 0xaae   : > { %v5497_v6 = vpack.c.bf16 %v5462_v51, %v5461_v58  ;;  %v13686_v50 = vadd.f32 %v6416_v25, %v6247_v43  ;;  %v9867_v58 = vld [vmem:[#allocation3 + $0x1e0] sm:$0xf] }
 0xaaf   : > { %v5262_v21 = vrot.slane %v4929_v24, 1  ;;  %v5263_v62 = vrot.slane %v4930_v2, 1 }
 0xab0   : > { %5530 = vst [vmem:[#allocation3 + $0x1e8] sm:$0xff] %v5497_v6 }
 0xab1   : > { %v5275_v15 = vsel %vm5270_vm1, %v5260_v47, %v5262_v21  ;;  %v5276_v26 = vsel %vm5270_vm1, %v5261_v33, %v5263_v62  ;;  %v10012_v47 = vor.u32 %v10890_v60, %v10011_v28  ;;  %v11013_v33 = vld [vmem:[#allocation3 + $0x1e4] sm:$0xf]  ;;  %v10892_v60 = vld [vmem:[#allocation3 + $0x74] sm:$0xf0] }
 0xab2   : > { %v5393_v8 = vadd.f32 %v5275_v15, %v13054_v3  ;;  %v5394_v32 = vadd.f32 %v5276_v26, %v15402_v10  ;;  %v15405_v15 = vld [vmem:[#allocation310_spill] sm:$0xff]  ;;  %v15406_v26 = vld [vmem:[#allocation460_spill] sm:$0xff]  ;;  %v15408_v10 = vld [vmem:[#allocation461_spill] sm:$0xff] }
 0xab3   : > { %v3099_v28 = vadd.f32 %v15406_v26, %v15405_v15 }
 0xab4   : > { %v5463_v56 = vadd.f32 %v13118_v54, %v5393_v8  ;;  %v5464_v52 = vadd.f32 %v13120_v19, %v5394_v32  ;;  %v4529_v40 = vpop.f32.mrf.mxu0  ;;  %v4682_v48 = vpop.f32.mrf.mxu1  ;;  %v15407_v8 = vld [vmem:[#allocation311_spill] sm:$0xff] }
 0xab5   : > { %v6249_v23 = vpop.f32.mrf.mxu2  ;;  %v6418_v0 = vpop.f32.mrf.mxu3  ;;  %v3252_v32 = vadd.f32 %v15408_v10, %v15407_v8  ;;  %v15410_v40 = vld [vmem:[#allocation464_spill] sm:$0xff]  ;;  %v9877_v10 = vld [vmem:[#allocation3 + $0x1f8] sm:$0xf0] }
 0xab6   : > { %v5498_v51 = vpack.c.bf16 %v5464_v52, %v5463_v56  ;;  %v13696_v9 = vadd.f32 %v6418_v0, %v6249_v23  ;;  %v10021_v56 = vld [vmem:[#allocation3 + $0x78] sm:$0xf0]  ;;  %v15411_v23 = vld [vmem:[#allocation315_spill] sm:$0xff]  ;;  %v15412_v0 = vld [vmem:[#allocation465_spill] sm:$0xff] }
 0xab7   : > { %6935 = vmatmul.bf16.gmra.mxu0 %v10012_v47  ;;  %7104 = vmatmul.bf16.gmra.mxu1 %v10016_v4  ;;  %v11014_v3 = vld [vmem:[#allocation3 + $0x1e4] sm:$0xf0]  ;;  %v9869_v61 = vld [vmem:[#allocation3 + $0x1e8] sm:$0xf0]  ;;  %v15409_v52 = vld [vmem:[#allocation314_spill] sm:$0xff]  ;;  %v3255_v47 = vadd.f32 %v15412_v0, %v15411_v23  ;;  %v10024_v15 = vor.u32 %v10891_v29, %v10021_v56 }
 0xab8   : > { %15403 = vst [vmem:[#allocation176_spill] sm:$0xff] %v13696_v9  ;;  %v9868_v24 = vor.u32 %v11014_v3, %v9867_v58  ;;  %v9872_v2 = vor.u32 %v11013_v33, %v9869_v61  ;;  %v3102_v48 = vadd.f32 %v15410_v40, %v15409_v52  ;;  %v11016_v3 = vld [vmem:[#allocation3 + $0x1f4] sm:$0xf0]  ;;  %v15415_v0 = vld [vmem:[#allocation319_spill] sm:$0xff] }
 0xab9   : > { %5531 = vst [vmem:[#allocation3 + $0x1f0] sm:$0xff] %v5498_v51  ;;  %v15413_v29 = vld [vmem:[#allocation318_spill] sm:$0xff] }
 0xaba   : > { %v15414_v56 = vld [vmem:[#allocation466_spill] sm:$0xff] }
 0xabb   : > { %6291 = vmatmul.bf16.gmra.mxu2 %v9868_v24  ;;  %6460 = vmatmul.bf16.gmra.mxu3 %v9872_v2 }
 0xabc   : > { %v4530_v43 = vpop.f32.mrf.mxu0  ;;  %v4683_v25 = vpop.f32.mrf.mxu1 }
 0xabd   : > { %v6252_v6 = vpop.f32.mrf.mxu2  ;;  %v6421_v21 = vpop.f32.mrf.mxu3  ;;  %v4937_v4 = vadd.f32 %v4530_v43, %v3099_v28  ;;  %v4938_v58 = vadd.f32 %v4683_v25, %v3252_v32 }
 0xabe   : > { %v13698_v62 = vadd.f32 %v6421_v21, %v6252_v6  ;;  %v10020_v21 = vor.u32 %v10892_v60, %v10019_v35 }
 0xabf   : > { %v5264_v52 = vrot.slane %v4937_v4, 1  ;;  %v5265_v40 = vrot.slane %v4938_v58, 1 }
 0xac0   : > { %15404 = vst [vmem:[#allocation24_spill] sm:$0xff] %v13698_v62  ;;  %v9875_v26 = vld [vmem:[#allocation3 + $0x1f0] sm:$0xf]  ;;  %v11015_v8 = vld [vmem:[#allocation3 + $0x1f4] sm:$0xf] }
 0xac1   : > { %v9876_v43 = vor.u32 %v11016_v3, %v9875_v26  ;;  %v9880_v25 = vor.u32 %v11015_v8, %v9877_v10  ;;  %v10027_v10 = vld [vmem:[#allocation3 + $0x80] sm:$0xf] }
 0xac4   : > { %v4533_v33 = vpop.f32.mrf.mxu0  ;;  %v4686_v51 = vpop.f32.mrf.mxu1 }
 0xac5   : > { %v4943_v61 = vadd.f32 %v4533_v33, %v3102_v48  ;;  %v4944_v24 = vadd.f32 %v4686_v51, %v3255_v47  ;;  %v6254_v2 = vpop.f32.mrf.mxu2  ;;  %v6423_v6 = vpop.f32.mrf.mxu3  ;;  %v3104_v48 = vadd.f32 %v15414_v56, %v15413_v29  ;;  %v15416_v47 = vld [vmem:[#allocation467_spill] sm:$0xff] }
 0xac6   : > { %v13708_v62 = vadd.f32 %v6423_v6, %v6254_v2  ;;  %v3257_v4 = vadd.f32 %v15416_v47, %v15415_v0 }
 0xac7   : > { %v5266_v9 = vrot.slane %v4943_v61, 1  ;;  %v5267_v23 = vrot.slane %v4944_v24, 1  ;;  %6940 = vmatmul.bf16.gmra.mxu0 %v10020_v21  ;;  %7109 = vmatmul.bf16.gmra.mxu1 %v10024_v15 }
 0xac9   : > { %v5273_v28 = vsel %vm5270_vm1, %v5264_v52, %v5266_v9  ;;  %v5274_v32 = vsel %vm5270_vm1, %v5265_v40, %v5267_v23  ;;  %v15417_v52 = vld [vmem:[#allocation342_spill] sm:$0xff] }
 0xaca   : > { %v5395_v60 = vadd.f32 %v5273_v28, %v13078_v27  ;;  %v5396_v35 = vadd.f32 %v5274_v32, %v13080_v22  ;;  %v10894_v28 = vld [vmem:[#allocation3 + $0x84] sm:$0xf0]  ;;  %v10893_v32 = vld [vmem:[#allocation3 + $0x84] sm:$0xf] }
 0xacb   : > { %6296 = vmatmul.bf16.gmra.mxu2 %v9876_v43  ;;  %6465 = vmatmul.bf16.gmra.mxu3 %v9880_v25  ;;  %v15418_v43 = vld [vmem:[#allocation18_spill] sm:$0xff] }
 0xacc   : > { %v5465_v58 = vadd.f32 %v13118_v54, %v5395_v60  ;;  %v5466_v33 = vadd.f32 %v13120_v19, %v5396_v35  ;;  %v4535_v51 = vpop.f32.mrf.mxu0  ;;  %v4688_v3 = vpop.f32.mrf.mxu1  ;;  %v10029_v60 = vld [vmem:[#allocation3 + $0x88] sm:$0xf0] }
 0xacd   : > { %v4945_v61 = vadd.f32 %v4535_v51, %v3104_v48  ;;  %v4946_v24 = vadd.f32 %v4688_v3, %v3257_v4  ;;  %v6257_v2 = vpop.f32.mrf.mxu2  ;;  %v6426_v27 = vpop.f32.mrf.mxu3  ;;  %v10028_v4 = vor.u32 %v10894_v28, %v10027_v10  ;;  %v10896_v10 = vld [vmem:[#allocation3 + $0x94] sm:$0xf0] }
 0xace   : > { %v5499_v6 = vpack.c.bf16 %v5466_v33, %v5465_v58  ;;  %v13722_v22 = vadd.f32 %v6426_v27, %v6257_v2  ;;  %v9883_v58 = vld [vmem:[#allocation3 + $0x200] sm:$0xf]  ;;  %v11017_v33 = vld [vmem:[#allocation3 + $0x204] sm:$0xf] }
 0xacf   : > { %v5268_v21 = vrot.slane %v4945_v61, 1  ;;  %v5269_v15 = vrot.slane %v4946_v24, 1 }
 0xad0   : > { %5532 = vst [vmem:[#allocation3 + $0x208] sm:$0xff] %v5499_v6 }
 0xad1   : > { %v5271_v26 = vsel %vm5270_vm1, %v5266_v9, %v5268_v21  ;;  %v5272_v8 = vsel %vm5270_vm1, %v5267_v23, %v5269_v15  ;;  %v10032_v23 = vor.u32 %v10893_v32, %v10029_v60  ;;  %v11020_v32 = vld [vmem:[#allocation3 + $0x214] sm:$0xf0] }
 0xad2   : > { %v5397_v40 = vadd.f32 %v5271_v26, %v15417_v52  ;;  %v5398_v25 = vadd.f32 %v5272_v8, %v15418_v43  ;;  %v10035_v52 = vld [vmem:[#allocation3 + $0x90] sm:$0xf]  ;;  %v10037_v43 = vld [vmem:[#allocation3 + $0x98] sm:$0xf0] }
 0xad4   : > { %v5467_v35 = vadd.f32 %v13118_v54, %v5397_v40  ;;  %v5468_v29 = vadd.f32 %v13120_v19, %v5398_v25  ;;  %v6906_v56 = vpop.f32.mrf.mxu0  ;;  %v7075_v48 = vpop.f32.mrf.mxu1  ;;  %v10895_v40 = vld [vmem:[#allocation3 + $0x94] sm:$0xf] }
 0xad5   : > { %v6907_v0 = vadd.f32 %v6906_v56, %v13278_v63  ;;  %v6259_v9 = vpop.f32.mrf.mxu2  ;;  %v6428_v47 = vpop.f32.mrf.mxu3  ;;  %v10036_v56 = vor.u32 %v10896_v10, %v10035_v52  ;;  %v10315_v52 = vld [vmem:[#allocation3 + $0x40] sm:$0xf] }
 0xad6   : > { %v5500_v51 = vpack.c.bf16 %v5468_v29, %v5467_v35  ;;  %v13733_v3 = vadd.f32 %v6428_v47, %v6259_v9  ;;  %v9893_v9 = vld [vmem:[#allocation3 + $0x218] sm:$0xf0] }
 0xad7   : > { %v13735_v61 = vadd.f32 %v7075_v48, %v6907_v0  ;;  %6945 = vmatmul.bf16.gmra.mxu0 %v10028_v4  ;;  %7114 = vmatmul.bf16.gmra.mxu1 %v10032_v23  ;;  %v11018_v54 = vld [vmem:[#allocation3 + $0x204] sm:$0xf0]  ;;  %v9885_v24 = vld [vmem:[#allocation3 + $0x208] sm:$0xf0]  ;;  %v10040_v48 = vor.u32 %v10895_v40, %v10037_v43 }
 0xad8   : > { %5533 = vst [vmem:[#allocation3 + $0x210] sm:$0xff] %v5500_v51  ;;  %v9884_v19 = vor.u32 %v11018_v54, %v9883_v58  ;;  %v9888_v2 = vor.u32 %v11017_v33, %v9885_v24 }
 0xadb   : > { %6301 = vmatmul.bf16.gmra.mxu2 %v9884_v19  ;;  %6470 = vmatmul.bf16.gmra.mxu3 %v9888_v2 }
 0xadc   : > { %v6908_v63 = vpop.f32.mrf.mxu0  ;;  %v7077_v27 = vpop.f32.mrf.mxu1 }
 0xadd   : > { %v6909_v6 = vadd.f32 %v6908_v63, %v13288_v11  ;;  %v6262_v21 = vpop.f32.mrf.mxu2  ;;  %v6431_v15 = vpop.f32.mrf.mxu3  ;;  %v10043_v63 = vld [vmem:[#allocation3 + $0xa0] sm:$0xf] }
 0xade   : > { %v13738_v26 = vadd.f32 %v6431_v15, %v6262_v21  ;;  %v10045_v21 = vld [vmem:[#allocation3 + $0xa8] sm:$0xf0] }
 0xadf   : > { %v13740_v8 = vadd.f32 %v7077_v27, %v6909_v6  ;;  %v9891_v11 = vld [vmem:[#allocation3 + $0x210] sm:$0xf]  ;;  %v11019_v0 = vld [vmem:[#allocation3 + $0x214] sm:$0xf]  ;;  %v10898_v27 = vld [vmem:[#allocation3 + $0xa4] sm:$0xf0] }
 0xae0   : > { %v9892_v23 = vor.u32 %v11020_v32, %v9891_v11  ;;  %v9896_v58 = vor.u32 %v11019_v0, %v9893_v9  ;;  %v10897_v6 = vld [vmem:[#allocation3 + $0xa4] sm:$0xf] }
 0xae1   : > { %v10048_v32 = vor.u32 %v10897_v6, %v10045_v21  ;;  %v11040_v21 = vld [vmem:[#allocation3 + $0x54] sm:$0xf0] }
 0xae4   : > { %v6911_v25 = vpop.f32.mrf.mxu0  ;;  %v7080_v28 = vpop.f32.mrf.mxu1 }
 0xae5   : > { %v6912_v60 = vadd.f32 %v6911_v25, %v13302_v38  ;;  %v6264_v35 = vpop.f32.mrf.mxu2  ;;  %v6433_v29 = vpop.f32.mrf.mxu3 }
 0xae6   : > { %v13743_v47 = vadd.f32 %v6433_v29, %v6264_v35  ;;  %v10317_v35 = vld [vmem:[#allocation3 + $0x48] sm:$0xf0] }
 0xae7   : > { %v13745_v4 = vadd.f32 %v7080_v28, %v6912_v60  ;;  %6950 = vmatmul.bf16.gmra.mxu0 %v10036_v56  ;;  %7119 = vmatmul.bf16.gmra.mxu1 %v10040_v48  ;;  %v10044_v28 = vor.u32 %v10898_v27, %v10043_v63  ;;  %v11037_v60 = vld [vmem:[#allocation3 + $0x44] sm:$0xf]  ;;  %v10053_v63 = vld [vmem:[#allocation3 + $0xb8] sm:$0xf0] }
 0xae8   : > { %15419 = vst [vmem:[#allocation177_spill] sm:$0xff] %v13743_v47  ;;  %v10320_v11 = vor.u32 %v11037_v60, %v10317_v35 }
 0xaeb   : > { %6306 = vmatmul.bf16.gmra.mxu2 %v9892_v23  ;;  %6475 = vmatmul.bf16.gmra.mxu3 %v9896_v58 }
 0xaec   : > { %v6913_v33 = vpop.f32.mrf.mxu0  ;;  %v7082_v51 = vpop.f32.mrf.mxu1 }
 0xaed   : > { %v6914_v38 = vadd.f32 %v6913_v33, %v13312_v31  ;;  %v6267_v54 = vpop.f32.mrf.mxu2  ;;  %v6436_v24 = vpop.f32.mrf.mxu3  ;;  %v11038_v31 = vld [vmem:[#allocation3 + $0x44] sm:$0xf0] }
 0xaee   : > { %v13748_v19 = vadd.f32 %v6436_v24, %v6267_v54  ;;  %v10316_v48 = vor.u32 %v11038_v31, %v10315_v52  ;;  %v10051_v54 = vld [vmem:[#allocation3 + $0xb0] sm:$0xf]  ;;  %v10899_v24 = vld [vmem:[#allocation3 + $0xb4] sm:$0xf] }
 0xaef   : > { %v13750_v2 = vadd.f32 %v7082_v51, %v6914_v38  ;;  %v10900_v38 = vld [vmem:[#allocation3 + $0xb4] sm:$0xf0] }
 0xaf0   : > { %15420 = vst [vmem:[#allocation25_spill] sm:$0xff] %v13748_v19 }
 0xaf4   : > { %v6916_v15 = vpop.f32.mrf.mxu0  ;;  %v7085_v10 = vpop.f32.mrf.mxu1 }
 0xaf5   : > { %v6917_v40 = vadd.f32 %v6916_v15, %v13320_v34  ;;  %v6269_v43 = vpop.f32.mrf.mxu2  ;;  %v6438_v25 = vpop.f32.mrf.mxu3 }
 0xaf6   : > { %v13753_v29 = vadd.f32 %v6438_v25, %v6269_v43  ;;  %v10056_v43 = vor.u32 %v10899_v24, %v10053_v63  ;;  %v11039_v25 = vld [vmem:[#allocation3 + $0x54] sm:$0xf]  ;;  %v10061_v24 = vld [vmem:[#allocation3 + $0xc8] sm:$0xf0] }
 0xaf7   : > { %v13755_v56 = vadd.f32 %v7085_v10, %v6917_v40  ;;  %6955 = vmatmul.bf16.gmra.mxu0 %v10044_v28  ;;  %7124 = vmatmul.bf16.gmra.mxu1 %v10048_v32  ;;  %v10052_v40 = vor.u32 %v10900_v38, %v10051_v54  ;;  %v10325_v28 = vld [vmem:[#allocation3 + $0x58] sm:$0xf0]  ;;  %v10902_v38 = vld [vmem:[#allocation3 + $0xc4] sm:$0xf0]  ;;  %v10901_v54 = vld [vmem:[#allocation3 + $0xc4] sm:$0xf] }
 0xaf8   : > { %15421 = vst [vmem:[#allocation180_spill] sm:$0xff] %v13753_v29  ;;  %v10328_v35 = vor.u32 %v11039_v25, %v10325_v28 }
 0xafb   : > { %7757 = vmatmul.bf16.vlgmr.msrb.gmra.mxu2 %v10316_v48  ;;  %7926 = vmatmul.bf16.vlgmr.msrb.gmra.mxu3 %v10320_v11 }
 0xafc   : > { %v6918_v0 = vpop.f32.mrf.mxu0  ;;  %v7087_v9 = vpop.f32.mrf.mxu1 }
 0xafd   : > { %v6919_v34 = vadd.f32 %v6918_v0, %v13336_v36  ;;  %v10323_v36 = vld [vmem:[#allocation3 + $0x50] sm:$0xf] }
 0xafe   : > { %v6272_v23 = vpop.f32.mrf.mxu2  ;;  %v6441_v58 = vpop.f32.mrf.mxu3  ;;  %v10324_v60 = vor.u32 %v11040_v21, %v10323_v36  ;;  %v10333_v36 = vld [vmem:[#allocation3 + $0x68] sm:$0xf0] }
 0xaff   : > { %v13758_v33 = vadd.f32 %v6441_v58, %v6272_v23  ;;  %v13760_v51 = vadd.f32 %v7087_v9, %v6919_v34  ;;  %v10059_v58 = vld [vmem:[#allocation3 + $0xc0] sm:$0xf] }
 0xb04   : > { %v6921_v27 = vpop.f32.mrf.mxu0  ;;  %v7090_v6 = vpop.f32.mrf.mxu1 }
 0xb05   : > { %v6922_v15 = vadd.f32 %v6921_v27, %v13350_v57 }
 0xb06   : > { %v6274_v10 = vpop.f32.mrf.mxu2  ;;  %v6443_v52 = vpop.f32.mrf.mxu3 }
 0xb07   : > { %v13763_v32 = vadd.f32 %v6443_v52, %v6274_v10  ;;  %v13765_v31 = vadd.f32 %v7090_v6, %v6922_v15  ;;  %6960 = vmatmul.bf16.gmra.mxu0 %v10052_v40  ;;  %7129 = vmatmul.bf16.gmra.mxu1 %v10056_v43  ;;  %v10331_v6 = vld [vmem:[#allocation3 + $0x60] sm:$0xf]  ;;  %v10060_v52 = vor.u32 %v10902_v38, %v10059_v58  ;;  %v11041_v43 = vld [vmem:[#allocation3 + $0x64] sm:$0xf]  ;;  %v10904_v38 = vld [vmem:[#allocation3 + $0xd4] sm:$0xf0] }
 0xb08   : > { %v10064_v40 = vor.u32 %v10901_v54, %v10061_v24  ;;  %v10067_v54 = vld [vmem:[#allocation3 + $0xd0] sm:$0xf]  ;;  %v10903_v24 = vld [vmem:[#allocation3 + $0xd4] sm:$0xf] }
 0xb09   : > { %15422 = vst [vmem:[#allocation26_spill] sm:$0xff] %v13763_v32 }
 0xb0b   : > { %7762 = vmatmul.bf16.gmra.mxu2 %v10324_v60  ;;  %7931 = vmatmul.bf16.gmra.mxu3 %v10328_v35  ;;  %v10336_v35 = vor.u32 %v11041_v43, %v10333_v36  ;;  %v11043_v43 = vld [vmem:[#allocation3 + $0x74] sm:$0xf]  ;;  %v10341_v36 = vld [vmem:[#allocation3 + $0x78] sm:$0xf0] }
 0xb0c   : > { %v6923_v48 = vpop.f32.mrf.mxu0  ;;  %v7092_v11 = vpop.f32.mrf.mxu1 }
 0xb0d   : > { %v6924_v57 = vadd.f32 %v6923_v48, %v13360_v1  ;;  %v11042_v1 = vld [vmem:[#allocation3 + $0x64] sm:$0xf0] }
 0xb0e   : > { %v6277_v0 = vpop.f32.mrf.mxu2  ;;  %v6446_v9 = vpop.f32.mrf.mxu3  ;;  %v10332_v60 = vor.u32 %v11042_v1, %v10331_v6  ;;  %v11044_v6 = vld [vmem:[#allocation3 + $0x74] sm:$0xf0] }
 0xb0f   : > { %v13768_v34 = vadd.f32 %v6446_v9, %v6277_v0  ;;  %v13770_v23 = vadd.f32 %v7092_v11, %v6924_v57 }
 0xb11   : > { %15423 = vst [vmem:[#allocation181_spill] sm:$0xff] %v13768_v34 }
 0xb14   : > { %v6926_v63 = vpop.f32.mrf.mxu0  ;;  %v7095_v27 = vpop.f32.mrf.mxu1 }
 0xb15   : > { %v6927_v21 = vadd.f32 %v6926_v63, %v13362_v12  ;;  %v10069_v63 = vld [vmem:[#allocation3 + $0xd8] sm:$0xf0] }
 0xb16   : > { %v6279_v15 = vpop.f32.mrf.mxu2  ;;  %v6448_v10 = vpop.f32.mrf.mxu3  ;;  %v10072_v1 = vor.u32 %v10903_v24, %v10069_v63  ;;  %v10075_v63 = vld [vmem:[#allocation3 + $0xe0] sm:$0xf] }
 0xb17   : > { %v13773_v25 = vadd.f32 %v6448_v10, %v6279_v15  ;;  %v13775_v28 = vadd.f32 %v7095_v27, %v6927_v21  ;;  %6965 = vmatmul.bf16.gmra.mxu0 %v10060_v52  ;;  %7134 = vmatmul.bf16.gmra.mxu1 %v10064_v40  ;;  %v10068_v40 = vor.u32 %v10904_v38, %v10067_v54 }
 0xb19   : > { %15424 = vst [vmem:[#allocation27_spill] sm:$0xff] %v13773_v25 }
 0xb1b   : > { %7767 = vmatmul.bf16.gmra.mxu2 %v10332_v60  ;;  %7936 = vmatmul.bf16.gmra.mxu3 %v10336_v35 }
 0xb1c   : > { %v6928_v48 = vpop.f32.mrf.mxu0  ;;  %v7097_v11 = vpop.f32.mrf.mxu1 }
 0xb1d   : > { %v6929_v12 = vadd.f32 %v6928_v48, %v13372_v7  ;;  %v10339_v7 = vld [vmem:[#allocation3 + $0x70] sm:$0xf] }
 0xb1e   : > { %v6282_v57 = vpop.f32.mrf.mxu2  ;;  %v6451_v0 = vpop.f32.mrf.mxu3  ;;  %v10340_v48 = vor.u32 %v11044_v6, %v10339_v7  ;;  %v10347_v6 = vld [vmem:[#allocation3 + $0x80] sm:$0xf] }
 0xb1f   : > { %v13778_v9 = vadd.f32 %v6451_v0, %v6282_v57  ;;  %v13780_v58 = vadd.f32 %v7097_v11, %v6929_v12  ;;  %v10344_v11 = vor.u32 %v11043_v43, %v10341_v36 }
 0xb24   : > { %v6931_v27 = vpop.f32.mrf.mxu0  ;;  %v7100_v21 = vpop.f32.mrf.mxu1 }
 0xb25   : > { %v6932_v15 = vadd.f32 %v6931_v27, %v13386_v59  ;;  %v10906_v27 = vld [vmem:[#allocation3 + $0xe4] sm:$0xf0] }
 0xb26   : > { %v6284_v10 = vpop.f32.mrf.mxu2  ;;  %v6453_v52 = vpop.f32.mrf.mxu3  ;;  %v10076_v43 = vor.u32 %v10906_v27, %v10075_v63 }
 0xb27   : > { %v13783_v60 = vadd.f32 %v6453_v52, %v6284_v10  ;;  %v13785_v35 = vadd.f32 %v7100_v21, %v6932_v15  ;;  %6970 = vmatmul.bf16.gmra.mxu0 %v10068_v40  ;;  %7139 = vmatmul.bf16.gmra.mxu1 %v10072_v1  ;;  %v10905_v21 = vld [vmem:[#allocation3 + $0xe4] sm:$0xf]  ;;  %v10077_v15 = vld [vmem:[#allocation3 + $0xe8] sm:$0xf0] }
 0xb28   : > { %v10080_v36 = vor.u32 %v10905_v21, %v10077_v15  ;;  %v10908_v15 = vld [vmem:[#allocation3 + $0xf4] sm:$0xf0] }
 0xb29   : > { %15425 = vst [vmem:[#allocation352_spill] sm:$0xff] %v13783_v60 }
 0xb2b   : > { %7772 = vmatmul.bf16.gmra.mxu2 %v10340_v48  ;;  %7941 = vmatmul.bf16.gmra.mxu3 %v10344_v11  ;;  %v11045_v48 = vld [vmem:[#allocation3 + $0x84] sm:$0xf]  ;;  %v10349_v11 = vld [vmem:[#allocation3 + $0x88] sm:$0xf0] }
 0xb2c   : > { %v6933_v12 = vpop.f32.mrf.mxu0  ;;  %v7102_v57 = vpop.f32.mrf.mxu1 }
 0xb2d   : > { %v6934_v59 = vadd.f32 %v6933_v12, %v13396_v13  ;;  %v11046_v13 = vld [vmem:[#allocation3 + $0x84] sm:$0xf0] }
 0xb2e   : > { %v6287_v0 = vpop.f32.mrf.mxu2  ;;  %v6456_v38 = vpop.f32.mrf.mxu3 }
 0xb2f   : > { %v13788_v54 = vadd.f32 %v6456_v38, %v6287_v0  ;;  %v13790_v24 = vadd.f32 %v7102_v57, %v6934_v59  ;;  %v10348_v59 = vor.u32 %v11046_v13, %v10347_v6  ;;  %v10352_v0 = vor.u32 %v11045_v48, %v10349_v11  ;;  %v11048_v6 = vld [vmem:[#allocation3 + $0x94] sm:$0xf0] }
 0xb31   : > { %15426 = vst [vmem:[#allocation28_spill] sm:$0xff] %v13788_v54 }
 0xb34   : > { %v6936_v10 = vpop.f32.mrf.mxu0  ;;  %v7105_v52 = vpop.f32.mrf.mxu1 }
 0xb35   : > { %v6937_v40 = vadd.f32 %v6936_v10, %v13404_v49 }
 0xb36   : > { %v6289_v1 = vpop.f32.mrf.mxu2  ;;  %v6458_v7 = vpop.f32.mrf.mxu3 }
 0xb37   : > { %v13793_v12 = vadd.f32 %v6458_v7, %v6289_v1  ;;  %v13795_v57 = vadd.f32 %v7105_v52, %v6937_v40  ;;  %6975 = vmatmul.bf16.gmra.mxu0 %v10076_v43  ;;  %7144 = vmatmul.bf16.gmra.mxu1 %v10080_v36  ;;  %v10083_v1 = vld [vmem:[#allocation3 + $0xf0] sm:$0xf]  ;;  %v10907_v52 = vld [vmem:[#allocation3 + $0xf4] sm:$0xf]  ;;  %v10085_v40 = vld [vmem:[#allocation3 + $0xf8] sm:$0xf0] }
 0xb38   : > { %v10084_v11 = vor.u32 %v10908_v15, %v10083_v1 }
 0xb39   : > { %15427 = vst [vmem:[#allocation353_spill] sm:$0xff] %v13793_v12 }
 0xb3b   : > { %7777 = vmatmul.bf16.gmra.mxu2 %v10348_v59  ;;  %7946 = vmatmul.bf16.gmra.mxu3 %v10352_v0  ;;  %v10088_v59 = vor.u32 %v10907_v52, %v10085_v40  ;;  %v11047_v0 = vld [vmem:[#allocation3 + $0x94] sm:$0xf]  ;;  %v10091_v40 = vld [vmem:[#allocation3 + $0x100] sm:$0xf] }
 0xb3c   : > { %v6938_v38 = vpop.f32.mrf.mxu0  ;;  %v7107_v54 = vpop.f32.mrf.mxu1 }
 0xb3d   : > { %v6939_v49 = vadd.f32 %v6938_v38, %v13420_v16  ;;  %v10355_v16 = vld [vmem:[#allocation3 + $0x90] sm:$0xf]  ;;  %v10357_v38 = vld [vmem:[#allocation3 + $0x98] sm:$0xf0] }
 0xb3e   : > { %v6292_v10 = vpop.f32.mrf.mxu2  ;;  %v6461_v63 = vpop.f32.mrf.mxu3 }
 0xb3f   : > { %v13798_v27 = vadd.f32 %v6461_v63, %v6292_v10  ;;  %v13800_v21 = vadd.f32 %v7107_v54, %v6939_v49  ;;  %v10356_v49 = vor.u32 %v11048_v6, %v10355_v16  ;;  %v10360_v63 = vor.u32 %v11047_v0, %v10357_v38  ;;  %v10363_v6 = vld [vmem:[#allocation3 + $0xa0] sm:$0xf] }
 0xb44   : > { %v6941_v7 = vpop.f32.mrf.mxu0  ;;  %v7110_v43 = vpop.f32.mrf.mxu1 }
 0xb45   : > { %v6942_v36 = vadd.f32 %v6941_v7, %v13434_v45 }
 0xb46   : > { %v6294_v13 = vpop.f32.mrf.mxu2  ;;  %v6463_v48 = vpop.f32.mrf.mxu3 }
 0xb47   : > { %v13803_v10 = vadd.f32 %v6463_v48, %v6294_v13  ;;  %v13805_v54 = vadd.f32 %v7110_v43, %v6942_v36  ;;  %6980 = vmatmul.bf16.gmra.mxu0 %v10084_v11  ;;  %7149 = vmatmul.bf16.gmra.mxu1 %v10088_v59  ;;  %v10910_v13 = vld [vmem:[#allocation3 + $0x104] sm:$0xf0]  ;;  %v10909_v43 = vld [vmem:[#allocation3 + $0x104] sm:$0xf]  ;;  %v10093_v36 = vld [vmem:[#allocation3 + $0x108] sm:$0xf0] }
 0xb48   : > { %v10092_v38 = vor.u32 %v10910_v13, %v10091_v40 }
 0xb49   : > { %15428 = vst [vmem:[#allocation29_spill] sm:$0xff] %v13803_v10 }
 0xb4b   : > { %7782 = vmatmul.bf16.gmra.mxu2 %v10356_v49  ;;  %7951 = vmatmul.bf16.gmra.mxu3 %v10360_v63  ;;  %v10096_v49 = vor.u32 %v10909_v43, %v10093_v36  ;;  %v10365_v63 = vld [vmem:[#allocation3 + $0xa8] sm:$0xf0]  ;;  %v10912_v36 = vld [vmem:[#allocation3 + $0x114] sm:$0xf0] }
 0xb4c   : > { %v6943_v12 = vpop.f32.mrf.mxu0  ;;  %v7112_v60 = vpop.f32.mrf.mxu1 }
 0xb4d   : > { %v6944_v45 = vadd.f32 %v6943_v12, %v13444_v44  ;;  %v11050_v44 = vld [vmem:[#allocation3 + $0xa4] sm:$0xf0]  ;;  %v11049_v12 = vld [vmem:[#allocation3 + $0xa4] sm:$0xf] }
 0xb4e   : > { %v6297_v7 = vpop.f32.mrf.mxu2  ;;  %v6466_v15 = vpop.f32.mrf.mxu3 }
 0xb4f   : > { %v13808_v1 = vadd.f32 %v6466_v15, %v6297_v7  ;;  %v13810_v52 = vadd.f32 %v7112_v60, %v6944_v45  ;;  %v10364_v45 = vor.u32 %v11050_v44, %v10363_v6  ;;  %v10368_v15 = vor.u32 %v11049_v12, %v10365_v63  ;;  %v11052_v6 = vld [vmem:[#allocation3 + $0xb4] sm:$0xf0] }
 0xb51   : > { %15429 = vst [vmem:[#allocation184_spill] sm:$0xff] %v13808_v1 }
 0xb54   : > { %v6946_v48 = vpop.f32.mrf.mxu0  ;;  %v7115_v11 = vpop.f32.mrf.mxu1 }
 0xb55   : > { %v6947_v59 = vadd.f32 %v6946_v48, %v13446_v18 }
 0xb56   : > { %v6299_v16 = vpop.f32.mrf.mxu2  ;;  %v6468_v0 = vpop.f32.mrf.mxu3 }
 0xb57   : > { %v13813_v7 = vadd.f32 %v6468_v0, %v6299_v16  ;;  %v13815_v60 = vadd.f32 %v7115_v11, %v6947_v59  ;;  %6985 = vmatmul.bf16.gmra.mxu0 %v10092_v38  ;;  %7154 = vmatmul.bf16.gmra.mxu1 %v10096_v49  ;;  %v10099_v16 = vld [vmem:[#allocation3 + $0x110] sm:$0xf]  ;;  %v10911_v11 = vld [vmem:[#allocation3 + $0x114] sm:$0xf]  ;;  %v10101_v59 = vld [vmem:[#allocation3 + $0x118] sm:$0xf0] }
 0xb58   : > { %v10100_v63 = vor.u32 %v10912_v36, %v10099_v16 }
 0xb59   : > { %15430 = vst [vmem:[#allocation30_spill] sm:$0xff] %v13813_v7 }
 0xb5b   : > { %7787 = vmatmul.bf16.gmra.mxu2 %v10364_v45  ;;  %7956 = vmatmul.bf16.gmra.mxu3 %v10368_v15  ;;  %v10104_v45 = vor.u32 %v10911_v11, %v10101_v59  ;;  %v10373_v15 = vld [vmem:[#allocation3 + $0xb8] sm:$0xf0]  ;;  %v10107_v59 = vld [vmem:[#allocation3 + $0x120] sm:$0xf] }
 0xb5c   : > { %v6948_v1 = vpop.f32.mrf.mxu0  ;;  %v7117_v10 = vpop.f32.mrf.mxu1 }
 0xb5d   : > { %v6949_v18 = vadd.f32 %v6948_v1, %v13456_v5  ;;  %v10371_v5 = vld [vmem:[#allocation3 + $0xb0] sm:$0xf]  ;;  %v11051_v1 = vld [vmem:[#allocation3 + $0xb4] sm:$0xf] }
 0xb5e   : > { %v6302_v48 = vpop.f32.mrf.mxu2  ;;  %v6471_v40 = vpop.f32.mrf.mxu3 }
 0xb5f   : > { %v13818_v13 = vadd.f32 %v6471_v40, %v6302_v48  ;;  %v13820_v43 = vadd.f32 %v7117_v10, %v6949_v18  ;;  %v10372_v18 = vor.u32 %v11052_v6, %v10371_v5  ;;  %v10376_v40 = vor.u32 %v11051_v1, %v10373_v15  ;;  %v10379_v6 = vld [vmem:[#allocation3 + $0xc0] sm:$0xf] }
 0xb64   : > { %v6951_v0 = vpop.f32.mrf.mxu0  ;;  %v7120_v38 = vpop.f32.mrf.mxu1 }
 0xb65   : > { %v6952_v49 = vadd.f32 %v6951_v0, %v13470_v42 }
 0xb66   : > { %v6304_v44 = vpop.f32.mrf.mxu2  ;;  %v6473_v12 = vpop.f32.mrf.mxu3 }
 0xb67   : > { %v13823_v48 = vadd.f32 %v6473_v12, %v6304_v44  ;;  %v13825_v10 = vadd.f32 %v7120_v38, %v6952_v49  ;;  %6990 = vmatmul.bf16.gmra.mxu0 %v10100_v63  ;;  %7159 = vmatmul.bf16.gmra.mxu1 %v10104_v45  ;;  %v10914_v44 = vld [vmem:[#allocation3 + $0x124] sm:$0xf0]  ;;  %v10913_v38 = vld [vmem:[#allocation3 + $0x124] sm:$0xf]  ;;  %v10109_v49 = vld [vmem:[#allocation3 + $0x128] sm:$0xf0] }
 0xb68   : > { %v10108_v15 = vor.u32 %v10914_v44, %v10107_v59 }
 0xb69   : > { %15431 = vst [vmem:[#allocation185_spill] sm:$0xff] %v13823_v48 }
 0xb6b   : > { %7792 = vmatmul.bf16.gmra.mxu2 %v10372_v18  ;;  %7961 = vmatmul.bf16.gmra.mxu3 %v10376_v40  ;;  %v10112_v18 = vor.u32 %v10913_v38, %v10109_v49  ;;  %v10381_v40 = vld [vmem:[#allocation3 + $0xc8] sm:$0xf0] }
 0xb6c   : > { %v6953_v7 = vpop.f32.mrf.mxu0  ;;  %v7122_v25 = vpop.f32.mrf.mxu1 }
 0xb6d   : > { %v6954_v42 = vadd.f32 %v6953_v7, %v13480_v14  ;;  %v11054_v14 = vld [vmem:[#allocation3 + $0xc4] sm:$0xf0]  ;;  %v11053_v7 = vld [vmem:[#allocation3 + $0xc4] sm:$0xf] }
 0xb6e   : > { %v6307_v0 = vpop.f32.mrf.mxu2  ;;  %v6476_v36 = vpop.f32.mrf.mxu3 }
 0xb6f   : > { %v13828_v16 = vadd.f32 %v6476_v36, %v6307_v0  ;;  %v13830_v11 = vadd.f32 %v7122_v25, %v6954_v42  ;;  %v10380_v42 = vor.u32 %v11054_v14, %v10379_v6  ;;  %v10384_v36 = vor.u32 %v11053_v7, %v10381_v40 }
 0xb71   : > { %15432 = vst [vmem:[#allocation31_spill] sm:$0xff] %v13828_v16 }
 0xb74   : > { %v6956_v12 = vpop.f32.mrf.mxu0  ;;  %v7125_v63 = vpop.f32.mrf.mxu1 }
 0xb75   : > { %v6957_v45 = vadd.f32 %v6956_v12, %v13488_v41 }
 0xb76   : > { %v6309_v5 = vpop.f32.mrf.mxu2  ;;  %v6478_v1 = vpop.f32.mrf.mxu3 }
 0xb77   : > { %v13833_v0 = vadd.f32 %v6478_v1, %v6309_v5  ;;  %v13835_v25 = vadd.f32 %v7125_v63, %v6957_v45  ;;  %6995 = vmatmul.bf16.gmra.mxu0 %v10108_v15  ;;  %7164 = vmatmul.bf16.gmra.mxu1 %v10112_v18  ;;  %v10916_v5 = vld [vmem:[#allocation3 + $0x134] sm:$0xf0]  ;;  %v10115_v63 = vld [vmem:[#allocation3 + $0x130] sm:$0xf]  ;;  %v10915_v45 = vld [vmem:[#allocation3 + $0x134] sm:$0xf] }
 0xb78   : > { %v10117_v1 = vld [vmem:[#allocation3 + $0x138] sm:$0xf0]  ;;  %v11056_v18 = vld [vmem:[#allocation3 + $0xd4] sm:$0xf0] }
 0xb79   : > { %15433 = vst [vmem:[#allocation356_spill] sm:$0xff] %v13833_v0 }
 0xb7b   : > { %7797 = vmatmul.bf16.gmra.mxu2 %v10380_v42  ;;  %7966 = vmatmul.bf16.gmra.mxu3 %v10384_v36  ;;  %v10116_v42 = vor.u32 %v10916_v5, %v10115_v63  ;;  %v11055_v36 = vld [vmem:[#allocation3 + $0xd4] sm:$0xf] }
 0xb7c   : > { %v6958_v16 = vpop.f32.mrf.mxu0  ;;  %v7127_v48 = vpop.f32.mrf.mxu1 }
 0xb7d   : > { %v6959_v41 = vadd.f32 %v6958_v16, %v13504_v20  ;;  %v10120_v20 = vor.u32 %v10915_v45, %v10117_v1  ;;  %v10387_v16 = vld [vmem:[#allocation3 + $0xd0] sm:$0xf] }
 0xb7e   : > { %v7758_v12 = vpop.f32.mrf.mxu2  ;;  %v7927_v59 = vpop.f32.mrf.mxu3 }
 0xb7f   : > { %v7928_v44 = vadd.f32 %v7927_v59, %v7758_v12  ;;  %v13838_v38 = vadd.f32 %v7127_v48, %v6959_v41  ;;  %v10389_v12 = vld [vmem:[#allocation3 + $0xd8] sm:$0xf0]  ;;  %v10388_v59 = vor.u32 %v11056_v18, %v10387_v16  ;;  %v10125_v16 = vld [vmem:[#allocation3 + $0x148] sm:$0xf0] }
 0xb81   : > { %v8087_v49 = vadd.f32 %v7928_v44, %v13735_v61  ;;  %v10392_v44 = vor.u32 %v11055_v36, %v10389_v12 }
 0xb83   : > { %v8151_v0 = vrot.slane %v8087_v49, 7 }
 0xb84   : > { %v6961_v15 = vpop.f32.mrf.mxu0  ;;  %v7130_v6 = vpop.f32.mrf.mxu1 }
 0xb85   : > { %v6962_v14 = vadd.f32 %v6961_v15, %v13518_v37 }
 0xb86   : > { %v7760_v7 = vpop.f32.mrf.mxu2  ;;  %v7929_v40 = vpop.f32.mrf.mxu3 }
 0xb87   : > { %v7930_v48 = vadd.f32 %v7929_v40, %v7760_v7  ;;  %v13842_v41 = vadd.f32 %v7130_v6, %v6962_v14  ;;  %7000 = vmatmul.bf16.gmra.mxu0 %v10116_v42  ;;  %7169 = vmatmul.bf16.gmra.mxu1 %v10120_v20  ;;  %v10123_v14 = vld [vmem:[#allocation3 + $0x140] sm:$0xf]  ;;  %v10918_v7 = vld [vmem:[#allocation3 + $0x144] sm:$0xf0]  ;;  %v10917_v40 = vld [vmem:[#allocation3 + $0x144] sm:$0xf] }
 0xb89   : > { %v8088_v61 = vadd.f32 %v7930_v48, %v13740_v8  ;;  %v10395_v48 = vld [vmem:[#allocation3 + $0xe0] sm:$0xf] }
 0xb8b   : > { %7802 = vmatmul.bf16.gmra.mxu2 %v10388_v59  ;;  %7971 = vmatmul.bf16.gmra.mxu3 %v10392_v44  ;;  %v8152_v37 = vrot.slane %v8088_v61, 7  ;;  %v8327_v42 = vrot.slane %v8088_v61, 1 }
 0xb8c   : > { %8231 = vrot.lane.b32.xlu0 %v8088_v61, %s11285_s12  ;;  %v6963_v5 = vpop.f32.mrf.mxu0  ;;  %v7132_v63 = vpop.f32.mrf.mxu1  ;;  %v10124_v61 = vor.u32 %v10918_v7, %v10123_v14 }
 0xb8d   : > { %v13848_v45 = vsel %vm5045_vm0, %v8151_v0, %v8152_v37  ;;  %v6964_v1 = vadd.f32 %v6963_v5, %v13540_v53 }
 0xb8e   : > { %v7763_v15 = vpop.f32.mrf.mxu2  ;;  %v7932_v6 = vpop.f32.mrf.mxu3 }
 0xb8f   : > { %v7933_v8 = vadd.f32 %v7932_v6, %v7763_v15  ;;  %v13851_v18 = vadd.f32 %v7132_v63, %v6964_v1  ;;  %v10128_v63 = vor.u32 %v10917_v40, %v10125_v16  ;;  %v11058_v1 = vld [vmem:[#allocation3 + $0xe4] sm:$0xf0]  ;;  %v11057_v15 = vld [vmem:[#allocation3 + $0xe4] sm:$0xf]  ;;  %v10397_v6 = vld [vmem:[#allocation3 + $0xe8] sm:$0xf0] }
 0xb91   : > { %v8089_v49 = vadd.f32 %v7933_v8, %v13745_v4 }
 0xb93   : > { %v8328_v20 = vrot.slane %v8089_v49, 1  ;;  %v8153_v36 = vrot.slane %v8089_v49, 7 }
 0xb94   : > { %8233 = vrot.lane.b32.xlu0 %v8089_v49, %s11285_s12  ;;  %v6966_v0 = vpop.f32.mrf.mxu0  ;;  %v7135_v12 = vpop.f32.mrf.mxu1 }
 0xb95   : > { %v8406_v53 = vsel %vm5270_vm1, %v8327_v42, %v8328_v20  ;;  %v13859_v59 = vsel %vm5045_vm0, %v8152_v37, %v8153_v36  ;;  %v6967_v4 = vadd.f32 %v6966_v0, %v13542_v46  ;;  %v10396_v42 = vor.u32 %v11058_v1, %v10395_v48  ;;  %v10920_v48 = vld [vmem:[#allocation3 + $0x154] sm:$0xf0] }
 0xb96   : > { %v7765_v44 = vpop.f32.mrf.mxu2  ;;  %v7934_v5 = vpop.f32.mrf.mxu3  ;;  %8407 = vrot.lane.b32.xlu2 %v8406_v53, %s11286_s13  ;;  %v10400_v36 = vor.u32 %v11057_v15, %v10397_v6  ;;  %v11060_v1 = vld [vmem:[#allocation3 + $0xf4] sm:$0xf0] }
 0xb97   : > { %v7935_v8 = vadd.f32 %v7934_v5, %v7765_v44  ;;  %v13863_v49 = vadd.f32 %v7135_v12, %v6967_v4  ;;  %7005 = vmatmul.bf16.gmra.mxu0 %v10124_v61  ;;  %7174 = vmatmul.bf16.gmra.mxu1 %v10128_v63  ;;  %v10131_v4 = vld [vmem:[#allocation3 + $0x150] sm:$0xf]  ;;  %v10919_v44 = vld [vmem:[#allocation3 + $0x154] sm:$0xf]  ;;  %v10133_v5 = vld [vmem:[#allocation3 + $0x158] sm:$0xf0] }
 0xb98   : > { %v10132_v6 = vor.u32 %v10920_v48, %v10131_v4  ;;  %v15434_v48 = vld [vmem:[#allocation343_spill] sm:$0xff] }
 0xb99   : > { %v8090_v37 = vadd.f32 %v7935_v8, %v13750_v2  ;;  %v10136_v8 = vor.u32 %v10919_v44, %v10133_v5 }
 0xb9b   : > { %v8329_v46 = vrot.slane %v8090_v37, 1  ;;  %7807 = vmatmul.bf16.gmra.mxu2 %v10396_v42  ;;  %7976 = vmatmul.bf16.gmra.mxu3 %v10400_v36  ;;  %v10403_v37 = vld [vmem:[#allocation3 + $0xf0] sm:$0xf]  ;;  %v11059_v42 = vld [vmem:[#allocation3 + $0xf4] sm:$0xf] }
 0xb9c   : > { %v6968_v0 = vpop.f32.mrf.mxu0  ;;  %v7137_v34 = vpop.f32.mrf.mxu1  ;;  %v10405_v36 = vld [vmem:[#allocation3 + $0xf8] sm:$0xf0] }
 0xb9d   : > { %v8405_v14 = vsel %vm5270_vm1, %v8328_v20, %v8329_v46  ;;  %v6969_v7 = vadd.f32 %v6968_v0, %v13552_v39  ;;  %v10404_v0 = vor.u32 %v11060_v1, %v10403_v37  ;;  %v10922_v1 = vld [vmem:[#allocation3 + $0x164] sm:$0xf0] }
 0xb9e   : > { %v7768_v40 = vpop.f32.mrf.mxu2  ;;  %v7937_v16 = vpop.f32.mrf.mxu3  ;;  %8409 = vrot.lane.b32.xlu0 %v8405_v14, %s11286_s13  ;;  %v10408_v14 = vor.u32 %v11059_v42, %v10405_v36  ;;  %v10411_v36 = vld [vmem:[#allocation3 + $0x100] sm:$0xf] }
 0xb9f   : > { %v7938_v12 = vadd.f32 %v7937_v16, %v7768_v40  ;;  %v13870_v53 = vadd.f32 %v7137_v34, %v6969_v7 }
 0xba1   : > { %v8091_v2 = vadd.f32 %v7938_v12, %v13755_v56 }
 0xba3   : > { %v8154_v7 = vrot.slane %v8091_v2, 7 }
 0xba4   : > { %v6971_v61 = vpop.f32.mrf.mxu0  ;;  %v7140_v63 = vpop.f32.mrf.mxu1 }
 0xba5   : > { %v6972_v20 = vadd.f32 %v6971_v61, %v13566_v30 }
 0xba6   : > { %v7770_v15 = vpop.f32.mrf.mxu2  ;;  %v7939_v39 = vpop.f32.mrf.mxu3 }
 0xba7   : > { %v7940_v34 = vadd.f32 %v7939_v39, %v7770_v15  ;;  %v13874_v46 = vadd.f32 %v7140_v63, %v6972_v20  ;;  %7010 = vmatmul.bf16.gmra.mxu0 %v10132_v6  ;;  %7179 = vmatmul.bf16.gmra.mxu1 %v10136_v8  ;;  %v10139_v63 = vld [vmem:[#allocation3 + $0x160] sm:$0xf]  ;;  %v10921_v20 = vld [vmem:[#allocation3 + $0x164] sm:$0xf]  ;;  %v10141_v15 = vld [vmem:[#allocation3 + $0x168] sm:$0xf0] }
 0xba9   : > { %v8092_v56 = vadd.f32 %v7940_v34, %v13760_v51 }
 0xbab   : > { %7812 = vmatmul.bf16.gmra.mxu2 %v10404_v0  ;;  %7981 = vmatmul.bf16.gmra.mxu3 %v10408_v14  ;;  %v8155_v30 = vrot.slane %v8092_v56, 7  ;;  %v8330_v39 = vrot.slane %v8092_v56, 1 }
 0xbac   : > { %8235 = vrot.lane.b32.xlu1 %v8092_v56, %s11285_s12  ;;  %v6973_v40 = vpop.f32.mrf.mxu0  ;;  %v7142_v16 = vpop.f32.mrf.mxu1  ;;  %v10144_v56 = vor.u32 %v10921_v20, %v10141_v15  ;;  %v15436_v20 = vld [vmem:[#allocation172_spill] sm:$0xff] }
 0xbad   : > { %v13880_v12 = vsel %vm5045_vm0, %v8154_v7, %v8155_v30  ;;  %v6974_v4 = vadd.f32 %v6973_v40, %v15434_v48  ;;  %v11062_v48 = vld [vmem:[#allocation3 + $0x104] sm:$0xf0] }
 0xbae   : > { %v7773_v44 = vpop.f32.mrf.mxu2  ;;  %v7942_v5 = vpop.f32.mrf.mxu3 }
 0xbaf   : > { %v7943_v61 = vadd.f32 %v7942_v5, %v7773_v44  ;;  %v13883_v51 = vadd.f32 %v7142_v16, %v6974_v4  ;;  %v10140_v16 = vor.u32 %v10922_v1, %v10139_v63  ;;  %v11061_v4 = vld [vmem:[#allocation3 + $0x104] sm:$0xf]  ;;  %v10413_v44 = vld [vmem:[#allocation3 + $0x108] sm:$0xf0] }
 0xbb0   : > { %v10416_v32 = vor.u32 %v11061_v4, %v10413_v44 }
 0xbb1   : > { %v8093_v2 = vadd.f32 %v7943_v61, %v13765_v31  ;;  %v15435_v31 = vld [vmem:[#allocation19_spill] sm:$0xff] }
 0xbb3   : > { %v8331_v6 = vrot.slane %v8093_v2, 1  ;;  %v8156_v8 = vrot.slane %v8093_v2, 7 }
 0xbb4   : > { %8237 = vrot.lane.b32.xlu1 %v8093_v2, %s11285_s12  ;;  %v6976_v37 = vpop.f32.mrf.mxu0  ;;  %v7145_v42 = vpop.f32.mrf.mxu1 }
 0xbb5   : > { %v8404_v34 = vsel %vm5270_vm1, %v8330_v39, %v8331_v6  ;;  %v13891_v0 = vsel %vm5045_vm0, %v8155_v30, %v8156_v8  ;;  %v6977_v14 = vadd.f32 %v6976_v37, %v15435_v31  ;;  %v10412_v39 = vor.u32 %v11062_v48, %v10411_v36  ;;  %v15437_v48 = vld [vmem:[#allocation20_spill] sm:$0xff] }
 0xbb6   : > { %v7775_v7 = vpop.f32.mrf.mxu2  ;;  %v7944_v40 = vpop.f32.mrf.mxu3 }
 0xbb7   : > { %v7945_v5 = vadd.f32 %v7944_v40, %v7775_v7  ;;  %v13894_v61 = vadd.f32 %v7145_v42, %v6977_v14  ;;  %7015 = vmatmul.bf16.gmra.mxu0 %v10140_v16  ;;  %7184 = vmatmul.bf16.gmra.mxu1 %v10144_v56  ;;  %v10924_v14 = vld [vmem:[#allocation3 + $0x174] sm:$0xf0]  ;;  %v10923_v7 = vld [vmem:[#allocation3 + $0x174] sm:$0xf] }
 0xbb8   : > { %v11064_v56 = vld [vmem:[#allocation3 + $0x114] sm:$0xf0] }
 0xbb9   : > { %v8094_v2 = vadd.f32 %v7945_v5, %v13770_v23 }
 0xbbb   : > { %v8332_v30 = vrot.slane %v8094_v2, 1  ;;  %7817 = vmatmul.bf16.gmra.mxu2 %v10412_v39  ;;  %7986 = vmatmul.bf16.gmra.mxu3 %v10416_v32  ;;  %v10147_v32 = vld [vmem:[#allocation3 + $0x170] sm:$0xf] }
 0xbbc   : > { %8411 = vrot.lane.b32.xlu1 %v8404_v34, %s11286_s13  ;;  %v6978_v8 = vpop.f32.mrf.mxu0  ;;  %v7147_v63 = vpop.f32.mrf.mxu1  ;;  %v10149_v34 = vld [vmem:[#allocation3 + $0x178] sm:$0xf0]  ;;  %v10148_v5 = vor.u32 %v10924_v14, %v10147_v32  ;;  %v10419_v39 = vld [vmem:[#allocation3 + $0x110] sm:$0xf] }
 0xbbd   : > { %v8403_v1 = vsel %vm5270_vm1, %v8331_v6, %v8332_v30  ;;  %v6979_v15 = vadd.f32 %v6978_v8, %v15436_v20  ;;  %v10152_v2 = vor.u32 %v10923_v7, %v10149_v34  ;;  %v11063_v30 = vld [vmem:[#allocation3 + $0x114] sm:$0xf]  ;;  %v10421_v8 = vld [vmem:[#allocation3 + $0x118] sm:$0xf0]  ;;  %v10420_v20 = vor.u32 %v11064_v56, %v10419_v39  ;;  %v10155_v56 = vld [vmem:[#allocation3 + $0x180] sm:$0xf] }
 0xbbe   : > { %v7778_v37 = vpop.f32.mrf.mxu2  ;;  %v7947_v42 = vpop.f32.mrf.mxu3  ;;  %8413 = vrot.lane.b32.xlu2 %v8403_v1, %s11286_s13  ;;  %v15438_v7 = vld [vmem:[#allocation173_spill] sm:$0xff] }
 0xbbf   : > { %v7948_v31 = vadd.f32 %v7947_v42, %v7778_v37  ;;  %v13902_v23 = vadd.f32 %v7147_v63, %v6979_v15  ;;  %v10424_v15 = vor.u32 %v11063_v30, %v10421_v8 }
 0xbc1   : > { %v8095_v36 = vadd.f32 %v7948_v31, %v13775_v28 }
 0xbc3   : > { %v8157_v37 = vrot.slane %v8095_v36, 7 }
 0xbc4   : > { %v6981_v40 = vpop.f32.mrf.mxu0  ;;  %v7150_v16 = vpop.f32.mrf.mxu1 }
 0xbc5   : > { %v6982_v6 = vadd.f32 %v6981_v40, %v15437_v48 }
 0xbc6   : > { %v7780_v4 = vpop.f32.mrf.mxu2  ;;  %v7949_v44 = vpop.f32.mrf.mxu3 }
 0xbc7   : > { %v7950_v63 = vadd.f32 %v7949_v44, %v7780_v4  ;;  %v13906_v1 = vadd.f32 %v7150_v16, %v6982_v6  ;;  %7020 = vmatmul.bf16.gmra.mxu0 %v10148_v5  ;;  %7189 = vmatmul.bf16.gmra.mxu1 %v10152_v2  ;;  %v10926_v6 = vld [vmem:[#allocation3 + $0x184] sm:$0xf0]  ;;  %v10925_v4 = vld [vmem:[#allocation3 + $0x184] sm:$0xf]  ;;  %v10157_v2 = vld [vmem:[#allocation3 + $0x188] sm:$0xf0] }
 0xbc9   : > { %v8096_v28 = vadd.f32 %v7950_v63, %v13780_v58 }
 0xbcb   : > { %7822 = vmatmul.bf16.gmra.mxu2 %v10420_v20  ;;  %7991 = vmatmul.bf16.gmra.mxu3 %v10424_v15  ;;  %v8158_v42 = vrot.slane %v8096_v28, 7  ;;  %v8333_v44 = vrot.slane %v8096_v28, 1  ;;  %v10427_v20 = vld [vmem:[#allocation3 + $0x120] sm:$0xf] }
 0xbcc   : > { %8239 = vrot.lane.b32.xlu2 %v8096_v28, %s11285_s12  ;;  %v6983_v31 = vpop.f32.mrf.mxu0  ;;  %v7152_v14 = vpop.f32.mrf.mxu1  ;;  %v10156_v28 = vor.u32 %v10926_v6, %v10155_v56  ;;  %v15440_v6 = vld [vmem:[#allocation346_spill] sm:$0xff] }
 0xbcd   : > { %v13912_v32 = vsel %vm5045_vm0, %v8157_v37, %v8158_v42  ;;  %v6984_v34 = vadd.f32 %v6983_v31, %v15438_v7  ;;  %v10160_v7 = vor.u32 %v10925_v4, %v10157_v2 }
 0xbce   : > { %v7783_v40 = vpop.f32.mrf.mxu2  ;;  %v7952_v16 = vpop.f32.mrf.mxu3 }
 0xbcf   : > { %v7953_v48 = vadd.f32 %v7952_v16, %v7783_v40  ;;  %v13915_v58 = vadd.f32 %v7152_v14, %v6984_v34  ;;  %v11066_v34 = vld [vmem:[#allocation3 + $0x124] sm:$0xf0]  ;;  %v11065_v40 = vld [vmem:[#allocation3 + $0x124] sm:$0xf]  ;;  %v10429_v16 = vld [vmem:[#allocation3 + $0x128] sm:$0xf0] }
 0xbd1   : > { %v8097_v36 = vadd.f32 %v7953_v48, %v13785_v35  ;;  %v15439_v35 = vld [vmem:[#allocation21_spill] sm:$0xff] }
 0xbd3   : > { %v8334_v5 = vrot.slane %v8097_v36, 1  ;;  %v8159_v39 = vrot.slane %v8097_v36, 7 }
 0xbd4   : > { %8241 = vrot.lane.b32.xlu2 %v8097_v36, %s11285_s12  ;;  %v6986_v30 = vpop.f32.mrf.mxu0  ;;  %v7155_v8 = vpop.f32.mrf.mxu1 }
 0xbd5   : > { %v8402_v63 = vsel %vm5270_vm1, %v8333_v44, %v8334_v5  ;;  %v13923_v15 = vsel %vm5045_vm0, %v8158_v42, %v8159_v39  ;;  %v6987_v37 = vadd.f32 %v6986_v30, %v15439_v35  ;;  %v10428_v42 = vor.u32 %v11066_v34, %v10427_v20  ;;  %v10928_v20 = vld [vmem:[#allocation3 + $0x194] sm:$0xf0] }
 0xbd6   : > { %v7785_v31 = vpop.f32.mrf.mxu2  ;;  %v7954_v14 = vpop.f32.mrf.mxu3  ;;  %8415 = vrot.lane.b32.xlu0 %v8402_v63, %s11286_s13  ;;  %v10432_v39 = vor.u32 %v11065_v40, %v10429_v16  ;;  %v11068_v40 = vld [vmem:[#allocation3 + $0x134] sm:$0xf0] }
 0xbd7   : > { %v7955_v48 = vadd.f32 %v7954_v14, %v7785_v31  ;;  %v13927_v36 = vadd.f32 %v7155_v8, %v6987_v37  ;;  %7025 = vmatmul.bf16.gmra.mxu0 %v10156_v28  ;;  %7194 = vmatmul.bf16.gmra.mxu1 %v10160_v7  ;;  %v10163_v31 = vld [vmem:[#allocation3 + $0x190] sm:$0xf]  ;;  %v10927_v14 = vld [vmem:[#allocation3 + $0x194] sm:$0xf]  ;;  %v10165_v28 = vld [vmem:[#allocation3 + $0x198] sm:$0xf0] }
 0xbd8   : > { %v15441_v16 = vld [vmem:[#allocation22_spill] sm:$0xff] }
 0xbd9   : > { %v8098_v44 = vadd.f32 %v7955_v48, %v13790_v24 }
 0xbdb   : > { %v8335_v29 = vrot.slane %v8098_v44, 1  ;;  %7827 = vmatmul.bf16.gmra.mxu2 %v10428_v42  ;;  %7996 = vmatmul.bf16.gmra.mxu3 %v10432_v39  ;;  %v10164_v44 = vor.u32 %v10928_v20, %v10163_v31  ;;  %v10168_v42 = vor.u32 %v10927_v14, %v10165_v28  ;;  %v10435_v39 = vld [vmem:[#allocation3 + $0x130] sm:$0xf]  ;;  %v15442_v28 = vld [vmem:[#allocation347_spill] sm:$0xff] }
 0xbdc   : > { %v6988_v30 = vpop.f32.mrf.mxu0  ;;  %v7157_v35 = vpop.f32.mrf.mxu1 }
 0xbdd   : > { %v8401_v56 = vsel %vm5270_vm1, %v8334_v5, %v8335_v29  ;;  %v6989_v4 = vadd.f32 %v6988_v30, %v15440_v6  ;;  %v11067_v30 = vld [vmem:[#allocation3 + $0x134] sm:$0xf] }
 0xbde   : > { %v7788_v2 = vpop.f32.mrf.mxu2  ;;  %v7957_v63 = vpop.f32.mrf.mxu3  ;;  %8417 = vrot.lane.b32.xlu1 %v8401_v56, %s11286_s13  ;;  %v10437_v56 = vld [vmem:[#allocation3 + $0x138] sm:$0xf0] }
 0xbdf   : > { %v7958_v8 = vadd.f32 %v7957_v63, %v7788_v2  ;;  %v13934_v37 = vadd.f32 %v7157_v35, %v6989_v4  ;;  %v10436_v4 = vor.u32 %v11068_v40, %v10435_v39  ;;  %v10440_v2 = vor.u32 %v11067_v30, %v10437_v56  ;;  %v10171_v40 = vld [vmem:[#allocation3 + $0x1a0] sm:$0xf]  ;;  %v10173_v39 = vld [vmem:[#allocation3 + $0x1a8] sm:$0xf0] }
 0xbe1   : > { %v8099_v24 = vadd.f32 %v7958_v8, %v13795_v57 }
 0xbe3   : > { %v8160_v63 = vrot.slane %v8099_v24, 7 }
 0xbe4   : > { %v6991_v7 = vpop.f32.mrf.mxu0  ;;  %v7160_v34 = vpop.f32.mrf.mxu1 }
 0xbe5   : > { %v6992_v29 = vadd.f32 %v6991_v7, %v15441_v16 }
 0xbe6   : > { %v7790_v5 = vpop.f32.mrf.mxu2  ;;  %v7959_v48 = vpop.f32.mrf.mxu3 }
 0xbe7   : > { %v7960_v35 = vadd.f32 %v7959_v48, %v7790_v5  ;;  %v13938_v6 = vadd.f32 %v7160_v34, %v6992_v29  ;;  %7030 = vmatmul.bf16.gmra.mxu0 %v10164_v44  ;;  %7199 = vmatmul.bf16.gmra.mxu1 %v10168_v42  ;;  %v10930_v5 = vld [vmem:[#allocation3 + $0x1a4] sm:$0xf0]  ;;  %v10929_v48 = vld [vmem:[#allocation3 + $0x1a4] sm:$0xf] }
 0xbe9   : > { %v8100_v57 = vadd.f32 %v7960_v35, %v13800_v21 }
 0xbeb   : > { %7832 = vmatmul.bf16.gmra.mxu2 %v10436_v4  ;;  %8001 = vmatmul.bf16.gmra.mxu3 %v10440_v2  ;;  %v8161_v8 = vrot.slane %v8100_v57, 7  ;;  %v8336_v44 = vrot.slane %v8100_v57, 1  ;;  %v10443_v2 = vld [vmem:[#allocation3 + $0x140] sm:$0xf] }
 0xbec   : > { %8243 = vrot.lane.b32.xlu0 %v8100_v57, %s11285_s12  ;;  %v6993_v20 = vpop.f32.mrf.mxu0  ;;  %v7162_v31 = vpop.f32.mrf.mxu1  ;;  %v10172_v57 = vor.u32 %v10930_v5, %v10171_v40 }
 0xbed   : > { %v13944_v14 = vsel %vm5045_vm0, %v8160_v63, %v8161_v8  ;;  %v6994_v7 = vadd.f32 %v6993_v20, %v15442_v28 }
 0xbee   : > { %v7793_v34 = vpop.f32.mrf.mxu2  ;;  %v7962_v16 = vpop.f32.mrf.mxu3 }
 0xbef   : > { %v7963_v29 = vadd.f32 %v7962_v16, %v7793_v34  ;;  %v13947_v21 = vadd.f32 %v7162_v31, %v6994_v7  ;;  %v10176_v7 = vor.u32 %v10929_v48, %v10173_v39  ;;  %v11070_v34 = vld [vmem:[#allocation3 + $0x144] sm:$0xf0]  ;;  %v11069_v16 = vld [vmem:[#allocation3 + $0x144] sm:$0xf] }
 0xbf1   : > { %v8101_v24 = vadd.f32 %v7963_v29, %v13805_v54  ;;  %v15443_v54 = vld [vmem:[#allocation23_spill] sm:$0xff]  ;;  %v10445_v29 = vld [vmem:[#allocation3 + $0x148] sm:$0xf0] }
 0xbf3   : > { %8245 = vrot.lane.b32.xlu1 %v8101_v24, %s11285_s12  ;;  %v8337_v42 = vrot.slane %v8101_v24, 1  ;;  %v8162_v30 = vrot.slane %v8101_v24, 7 }
 0xbf4   : > { %v6996_v56 = vpop.f32.mrf.mxu0  ;;  %v7165_v35 = vpop.f32.mrf.mxu1 }
 0xbf5   : > { %v8400_v4 = vsel %vm5270_vm1, %v8336_v44, %v8337_v42  ;;  %v13955_v63 = vsel %vm5045_vm0, %v8161_v8, %v8162_v30  ;;  %v6997_v20 = vadd.f32 %v6996_v56, %v15443_v54  ;;  %v10444_v44 = vor.u32 %v11070_v34, %v10443_v2  ;;  %v10179_v34 = vld [vmem:[#allocation3 + $0x1b0] sm:$0xf] }
 0xbf6   : > { %v7795_v31 = vpop.f32.mrf.mxu2  ;;  %v7964_v28 = vpop.f32.mrf.mxu3  ;;  %8419 = vrot.lane.b32.xlu2 %v8400_v4, %s11286_s13  ;;  %v10448_v30 = vor.u32 %v11069_v16, %v10445_v29  ;;  %v10931_v16 = vld [vmem:[#allocation3 + $0x1b4] sm:$0xf] }
 0xbf7   : > { %v7965_v24 = vadd.f32 %v7964_v28, %v7795_v31  ;;  %v13959_v19 = vadd.f32 %v7165_v35, %v6997_v20  ;;  %7035 = vmatmul.bf16.gmra.mxu0 %v10172_v57  ;;  %7204 = vmatmul.bf16.gmra.mxu1 %v10176_v7  ;;  %v8408_v20 = vpop.permute.xlu2 %8407  ;;  %v10932_v57 = vld [vmem:[#allocation3 + $0x1b4] sm:$0xf0] }
 0xbf9   : > { %v8102_v8 = vadd.f32 %v7965_v24, %v13810_v52  ;;  %v13970_v52 = vld [vmem:[%s14435_s4] ss:$0 sm:$0xff] }
 0xbfb   : > { %v8338_v56 = vrot.slane %v8102_v8, 1  ;;  %7837 = vmatmul.bf16.gmra.mxu2 %v10444_v44  ;;  %8006 = vmatmul.bf16.gmra.mxu3 %v10448_v30  ;;  %v11072_v8 = vld [vmem:[#allocation3 + $0x154] sm:$0xf0] }
 0xbfc   : > { %v6998_v54 = vpop.f32.mrf.mxu0  ;;  %v7167_v4 = vpop.f32.mrf.mxu1 }
 0xbfd   : > { %v8399_v40 = vsel %vm5270_vm1, %v8337_v42, %v8338_v56  ;;  %v6999_v48 = vadd.f32 %v6998_v54, %v13672_v55  ;;  %v10180_v56 = vor.u32 %v10932_v57, %v10179_v34  ;;  %v15444_v34 = vld [vmem:[#allocation176_spill] sm:$0xff] }
 0xbfe   : > { %v8232_v5 = vpop.permute.xlu0 %8231  ;;  %v7798_v39 = vpop.f32.mrf.mxu2  ;;  %8421 = vrot.lane.b32.xlu0 %v8399_v40, %s11286_s13  ;;  %v11071_v40 = vld [vmem:[#allocation3 + $0x154] sm:$0xf] }
 0xbff   : > { %v8295_v35 = vadd.f32 %v8232_v5, %v13848_v45  ;;  %v7967_v2 = vpop.f32.mrf.mxu3  ;;  %v13973_v31 = vadd.f32 %v7167_v4, %v6999_v48  ;;  %v10181_v45 = vld [vmem:[#allocation3 + $0x1b8] sm:$0xf0]  ;;  %v10451_v4 = vld [vmem:[#allocation3 + $0x150] sm:$0xf] }
 0xc00   : > { %v7968_v28 = vadd.f32 %v7967_v2, %v7798_v39  ;;  %v10184_v54 = vor.u32 %v10931_v16, %v10181_v45  ;;  %v10453_v5 = vld [vmem:[#allocation3 + $0x158] sm:$0xf0]  ;;  %v10452_v2 = vor.u32 %v11072_v8, %v10451_v4  ;;  %v10934_v4 = vld [vmem:[#allocation3 + $0x1c4] sm:$0xf0] }
 0xc01   : > { %v8471_v42 = vadd.f32 %v8408_v20, %v8295_v35  ;;  %v10456_v20 = vor.u32 %v11071_v40, %v10453_v5  ;;  %v10933_v5 = vld [vmem:[#allocation3 + $0x1c4] sm:$0xf] }
 0xc02   : > { %v8103_v55 = vadd.f32 %v7968_v28, %v13815_v60 }
 0xc03   : > { %v8507_v7 = vadd.f32 %v13970_v52, %v8471_v42 }
 0xc04   : > { %v7001_v29 = vpop.f32.mrf.mxu0  ;;  %v7170_v24 = vpop.f32.mrf.mxu1 }
 0xc05   : > { %8539 = vst [vmem:[%s13978_s20] sm:$0xff] %v8507_v7  ;;  %v7002_v44 = vadd.f32 %v7001_v29, %v13686_v50  ;;  %v8163_v50 = vrot.slane %v8103_v55, 7 }
 0xc06   : > { %v7800_v30 = vpop.f32.mrf.mxu2  ;;  %v8234_v60 = vpop.permute.xlu0 %8233 }
 0xc07   : > { %v7969_v48 = vpop.f32.mrf.mxu3  ;;  %v13984_v39 = vadd.f32 %v7170_v24, %v7002_v44  ;;  %7040 = vmatmul.bf16.gmra.mxu0 %v10180_v56  ;;  %7209 = vmatmul.bf16.gmra.mxu1 %v10184_v54  ;;  %v8296_v24 = vadd.f32 %v8234_v60, %v13859_v59  ;;  %v10187_v54 = vld [vmem:[#allocation3 + $0x1c0] sm:$0xf] }
 0xc08   : > { %v7970_v35 = vadd.f32 %v7969_v48, %v7800_v30  ;;  %v10189_v48 = vld [vmem:[#allocation3 + $0x1c8] sm:$0xf0] }
 0xc0a   : > { %v8104_v28 = vadd.f32 %v7970_v35, %v13820_v43 }
 0xc0b   : > { %7842 = vmatmul.bf16.gmra.mxu2 %v10452_v2  ;;  %8011 = vmatmul.bf16.gmra.mxu3 %v10456_v20 }
 0xc0c   : > { %8247 = vrot.lane.b32.xlu2 %v8104_v28, %s11285_s12  ;;  %v8164_v42 = vrot.slane %v8104_v28, 7  ;;  %v7003_v57 = vpop.f32.mrf.mxu0  ;;  %v7172_v7 = vpop.f32.mrf.mxu1  ;;  %v8339_v35 = vrot.slane %v8104_v28, 1 }
 0xc0d   : > { %v7004_v16 = vadd.f32 %v7003_v57, %v15444_v34  ;;  %v10459_v57 = vld [vmem:[#allocation3 + $0x160] sm:$0xf] }
 0xc0e   : > { %v7803_v45 = vpop.f32.mrf.mxu2  ;;  %v13991_v29 = vsel %vm5045_vm0, %v8163_v50, %v8164_v42  ;;  %v10188_v50 = vor.u32 %v10934_v4, %v10187_v54 }
 0xc0f   : > { %v7972_v8 = vpop.f32.mrf.mxu3  ;;  %v13994_v43 = vadd.f32 %v7172_v7, %v7004_v16  ;;  %v15445_v7 = vld [vmem:[#allocation24_spill] sm:$0xff] }
 0xc10   : > { %v7973_v44 = vadd.f32 %v7972_v8, %v7803_v45  ;;  %v8410_v55 = vpop.permute.xlu0 %8409  ;;  %v10192_v45 = vor.u32 %v10933_v5, %v10189_v48  ;;  %v11073_v8 = vld [vmem:[#allocation3 + $0x164] sm:$0xf] }
 0xc11   : > { %v8472_v30 = vadd.f32 %v8410_v55, %v8296_v24  ;;  %v11074_v24 = vld [vmem:[#allocation3 + $0x164] sm:$0xf0] }
 0xc12   : > { %v8105_v56 = vadd.f32 %v7973_v44, %v13825_v10  ;;  %v10461_v44 = vld [vmem:[#allocation3 + $0x168] sm:$0xf0]  ;;  %v10460_v54 = vor.u32 %v11074_v24, %v10459_v57  ;;  %v11076_v24 = vld [vmem:[#allocation3 + $0x174] sm:$0xf0] }
 0xc13   : > { %v8508_v40 = vadd.f32 %v13970_v52, %v8472_v30  ;;  %v10464_v4 = vor.u32 %v11073_v8, %v10461_v44 }
 0xc14   : > { %8249 = vrot.lane.b32.xlu0 %v8105_v56, %s11285_s12  ;;  %v8340_v2 = vrot.slane %v8105_v56, 1  ;;  %v8165_v59 = vrot.slane %v8105_v56, 7  ;;  %v7006_v60 = vpop.f32.mrf.mxu0  ;;  %v7175_v20 = vpop.f32.mrf.mxu1 }
 0xc15   : > { %8540 = vst [vmem:[%s13978_s20 + $0x8] sm:$0xff] %v8508_v40  ;;  %v7007_v34 = vadd.f32 %v7006_v60, %v15445_v7  ;;  %v10936_v7 = vld [vmem:[#allocation3 + $0x1d4] sm:$0xf0] }
 0xc16   : > { %v7805_v16 = vpop.f32.mrf.mxu2  ;;  %v8398_v10 = vsel %vm5270_vm1, %v8339_v35, %v8340_v2  ;;  %v14005_v28 = vsel %vm5045_vm0, %v8164_v42, %v8165_v59 }
 0xc17   : > { %v7974_v55 = vpop.f32.mrf.mxu3  ;;  %8423 = vrot.lane.b32.xlu1 %v8398_v10, %s11286_s13  ;;  %v14008_v30 = vadd.f32 %v7175_v20, %v7007_v34  ;;  %7045 = vmatmul.bf16.gmra.mxu0 %v10188_v50  ;;  %v10935_v34 = vld [vmem:[#allocation3 + $0x1d4] sm:$0xf] }
 0xc18   : > { %v7975_v56 = vadd.f32 %v7974_v55, %v7805_v16  ;;  %7214 = vmatmul.bf16.gmra.mxu1 %v10192_v45  ;;  %v10197_v16 = vld [vmem:[#allocation3 + $0x1d8] sm:$0xf0] }
 0xc19   : > { %v10200_v55 = vor.u32 %v10935_v34, %v10197_v16 }
 0xc1a   : > { %v8106_v40 = vadd.f32 %v7975_v56, %v13830_v11  ;;  %v10195_v11 = vld [vmem:[#allocation3 + $0x1d0] sm:$0xf] }
 0xc1b   : > { %7847 = vmatmul.bf16.gmra.mxu2 %v10460_v54  ;;  %8016 = vmatmul.bf16.gmra.mxu3 %v10464_v4  ;;  %v10196_v44 = vor.u32 %v10936_v7, %v10195_v11  ;;  %v10467_v56 = vld [vmem:[#allocation3 + $0x170] sm:$0xf]  ;;  %v10469_v54 = vld [vmem:[#allocation3 + $0x178] sm:$0xf0] }
 0xc1c   : > { %v8341_v5 = vrot.slane %v8106_v40, 1  ;;  %v14011_v48 = vpop.f32.mrf.mxu0  ;;  %v14013_v35 = vpop.f32.mrf.mxu1 }
 0xc1e   : > { %v8236_v42 = vpop.permute.xlu1 %8235  ;;  %v7808_v59 = vpop.f32.mrf.mxu2  ;;  %v8397_v60 = vsel %vm5270_vm1, %v8340_v2, %v8341_v5  ;;  %v11075_v2 = vld [vmem:[#allocation3 + $0x174] sm:$0xf] }
 0xc1f   : > { %v7977_v20 = vpop.f32.mrf.mxu3  ;;  %8425 = vrot.lane.b32.xlu2 %v8397_v60, %s11286_s13  ;;  %v8297_v34 = vadd.f32 %v8236_v42, %v13880_v12  ;;  %v10938_v12 = vld [vmem:[#allocation3 + $0x1e4] sm:$0xf0]  ;;  %v10937_v42 = vld [vmem:[#allocation3 + $0x1e4] sm:$0xf] }
 0xc20   : > { %v7978_v50 = vadd.f32 %v7977_v20, %v7808_v59  ;;  %v10468_v20 = vor.u32 %v11076_v24, %v10467_v56 }
 0xc22   : > { %v8107_v57 = vadd.f32 %v7978_v50, %v13835_v25  ;;  %v8414_v25 = vpop.permute.xlu2 %8413  ;;  %v10472_v50 = vor.u32 %v11075_v2, %v10469_v54 }
 0xc24   : > { %v14019_v10 = vpop.f32.mrf.mxu0  ;;  %v14021_v45 = vpop.f32.mrf.mxu1  ;;  %v8166_v11 = vrot.slane %v8107_v57, 7 }
 0xc26   : > { %v8238_v8 = vpop.permute.xlu1 %8237  ;;  %v7810_v40 = vpop.f32.mrf.mxu2 }
 0xc27   : > { %v8298_v4 = vadd.f32 %v8238_v8, %v13891_v0  ;;  %v7979_v5 = vpop.f32.mrf.mxu3  ;;  %7050 = vmatmul.bf16.gmra.mxu0 %v10196_v44 }
 0xc28   : > { %v7980_v59 = vadd.f32 %v7979_v5, %v7810_v40  ;;  %7219 = vmatmul.bf16.gmra.mxu1 %v10200_v55  ;;  %v10205_v40 = vld [vmem:[#allocation3 + $0x1e8] sm:$0xf0] }
 0xc29   : > { %v8474_v60 = vadd.f32 %v8414_v25, %v8298_v4  ;;  %v10203_v4 = vld [vmem:[#allocation3 + $0x1e0] sm:$0xf] }
 0xc2a   : > { %v8108_v47 = vadd.f32 %v7980_v59, %v13838_v38 }
 0xc2b   : > { %v8510_v7 = vadd.f32 %v13970_v52, %v8474_v60  ;;  %7852 = vmatmul.bf16.gmra.mxu2 %v10468_v20  ;;  %8021 = vmatmul.bf16.gmra.mxu3 %v10472_v50  ;;  %v10204_v50 = vor.u32 %v10938_v12, %v10203_v4 }
 0xc2c   : > { %8251 = vrot.lane.b32.xlu1 %v8108_v47, %s11285_s12  ;;  %v8167_v0 = vrot.slane %v8108_v47, 7  ;;  %v14029_v16 = vpop.f32.mrf.mxu0  ;;  %v14031_v8 = vpop.f32.mrf.mxu1  ;;  %v8342_v5 = vrot.slane %v8108_v47, 1 }
 0xc2d   : > { %8542 = vst [vmem:[%s13978_s20 + $0x18] sm:$0xff] %v8510_v7  ;;  %v10475_v7 = vld [vmem:[#allocation3 + $0x180] sm:$0xf] }
 0xc2e   : > { %v8412_v24 = vpop.permute.xlu1 %8411  ;;  %v14035_v38 = vsel %vm5045_vm0, %v8166_v11, %v8167_v0  ;;  %v7813_v55 = vpop.f32.mrf.mxu2 }
 0xc2f   : > { %v8473_v44 = vadd.f32 %v8412_v24, %v8297_v34  ;;  %v7982_v56 = vpop.f32.mrf.mxu3  ;;  %v11078_v24 = vld [vmem:[#allocation3 + $0x184] sm:$0xf0] }
 0xc30   : > { %v7983_v57 = vadd.f32 %v7982_v56, %v7813_v55  ;;  %v10477_v55 = vld [vmem:[#allocation3 + $0x188] sm:$0xf0] }
 0xc31   : > { %v8509_v2 = vadd.f32 %v13970_v52, %v8473_v44  ;;  %v11077_v44 = vld [vmem:[#allocation3 + $0x184] sm:$0xf] }
 0xc32   : > { %v8109_v54 = vadd.f32 %v7983_v57, %v13842_v41  ;;  %v10208_v41 = vor.u32 %v10937_v42, %v10205_v40  ;;  %v10480_v4 = vor.u32 %v11077_v44, %v10477_v55  ;;  %v11080_v55 = vld [vmem:[#allocation3 + $0x194] sm:$0xf0] }
 0xc33   : > { %8541 = vst [vmem:[%s13978_s20 + $0x10] sm:$0xff] %v8509_v2 }
 0xc34   : > { %8253 = vrot.lane.b32.xlu2 %v8109_v54, %s11285_s12  ;;  %v8343_v25 = vrot.slane %v8109_v54, 1  ;;  %v8168_v59 = vrot.slane %v8109_v54, 7  ;;  %v7016_v60 = vpop.f32.mrf.mxu0  ;;  %v7185_v20 = vpop.f32.mrf.mxu1 }
 0xc35   : > { %v7017_v11 = vadd.f32 %v7016_v60, %v13738_v26  ;;  %v10476_v26 = vor.u32 %v11078_v24, %v10475_v7 }
 0xc36   : > { %v8396_v34 = vsel %vm5270_vm1, %v8342_v5, %v8343_v25  ;;  %v14046_v56 = vsel %vm5045_vm0, %v8167_v0, %v8168_v59  ;;  %v7815_v47 = vpop.f32.mrf.mxu2 }
 0xc37   : > { %v7984_v57 = vpop.f32.mrf.mxu3  ;;  %8427 = vrot.lane.b32.xlu0 %v8396_v34, %s11286_s13  ;;  %v14049_v2 = vadd.f32 %v7185_v20, %v7017_v11  ;;  %7055 = vmatmul.bf16.gmra.mxu0 %v10204_v50  ;;  %v8240_v50 = vpop.permute.xlu2 %8239  ;;  %v10940_v11 = vld [vmem:[#allocation3 + $0x1f4] sm:$0xf0]  ;;  %v10939_v34 = vld [vmem:[#allocation3 + $0x1f4] sm:$0xf] }
 0xc38   : > { %v7985_v54 = vadd.f32 %v7984_v57, %v7815_v47  ;;  %7224 = vmatmul.bf16.gmra.mxu1 %v10208_v41  ;;  %v10213_v41 = vld [vmem:[#allocation3 + $0x1f8] sm:$0xf0] }
 0xc39   : > { %v10216_v57 = vor.u32 %v10939_v34, %v10213_v41 }
 0xc3a   : > { %v8110_v12 = vadd.f32 %v7985_v54, %v13851_v18  ;;  %v10211_v18 = vld [vmem:[#allocation3 + $0x1f0] sm:$0xf]  ;;  %v11079_v54 = vld [vmem:[#allocation3 + $0x194] sm:$0xf] }
 0xc3b   : > { %7857 = vmatmul.bf16.gmra.mxu2 %v10476_v26  ;;  %8026 = vmatmul.bf16.gmra.mxu3 %v10480_v4  ;;  %v10212_v47 = vor.u32 %v10940_v11, %v10211_v18  ;;  %v10485_v26 = vld [vmem:[#allocation3 + $0x198] sm:$0xf0]  ;;  %v8299_v4 = vadd.f32 %v8240_v50, %v13912_v32 }
 0xc3c   : > { %v8344_v42 = vrot.slane %v8110_v12, 1  ;;  %v14052_v40 = vpop.f32.mrf.mxu0  ;;  %v14054_v0 = vpop.f32.mrf.mxu1 }
 0xc3e   : > { %v8395_v5 = vsel %vm5270_vm1, %v8343_v25, %v8344_v42  ;;  %v7818_v59 = vpop.f32.mrf.mxu2  ;;  %v10483_v25 = vld [vmem:[#allocation3 + $0x190] sm:$0xf] }
 0xc3f   : > { %v7987_v60 = vpop.f32.mrf.mxu3  ;;  %8429 = vrot.lane.b32.xlu1 %v8395_v5, %s11286_s13  ;;  %v8242_v18 = vpop.permute.xlu2 %8241 }
 0xc40   : > { %v7988_v20 = vadd.f32 %v7987_v60, %v7818_v59  ;;  %v10484_v60 = vor.u32 %v11080_v55, %v10483_v25 }
 0xc42   : > { %v8111_v7 = vadd.f32 %v7988_v20, %v13863_v49  ;;  %v10488_v20 = vor.u32 %v11079_v54, %v10485_v26 }
 0xc44   : > { %v14060_v24 = vpop.f32.mrf.mxu0  ;;  %v14062_v44 = vpop.f32.mrf.mxu1  ;;  %v8169_v34 = vrot.slane %v8111_v7, 7 }
 0xc45   : > { %15446 = vst [vmem:[#allocation32_spill] sm:$0xff] %v14062_v44 }
 0xc46   : > { %v7820_v12 = vpop.f32.mrf.mxu2 }
 0xc47   : > { %v7989_v42 = vpop.f32.mrf.mxu3  ;;  %7060 = vmatmul.bf16.gmra.mxu0 %v10212_v47 }
 0xc48   : > { %v7990_v49 = vadd.f32 %v7989_v42, %v7820_v12  ;;  %7229 = vmatmul.bf16.gmra.mxu1 %v10216_v57  ;;  %v8416_v5 = vpop.permute.xlu0 %8415 }
 0xc49   : > { %v8475_v59 = vadd.f32 %v8416_v5, %v8299_v4 }
 0xc4a   : > { %v8112_v44 = vadd.f32 %v7990_v49, %v13870_v53  ;;  %v8300_v53 = vadd.f32 %v8242_v18, %v13923_v15  ;;  %v11081_v18 = vld [vmem:[#allocation3 + $0x1a4] sm:$0xf] }
 0xc4b   : > { %v8511_v11 = vadd.f32 %v13970_v52, %v8475_v59  ;;  %7862 = vmatmul.bf16.gmra.mxu2 %v10484_v60  ;;  %8031 = vmatmul.bf16.gmra.mxu3 %v10488_v20  ;;  %v10491_v60 = vld [vmem:[#allocation3 + $0x1a0] sm:$0xf] }
 0xc4c   : > { %8255 = vrot.lane.b32.xlu0 %v8112_v44, %s11285_s12  ;;  %v8170_v32 = vrot.slane %v8112_v44, 7  ;;  %v14069_v50 = vpop.f32.mrf.mxu0  ;;  %v14071_v41 = vpop.f32.mrf.mxu1  ;;  %v8345_v12 = vrot.slane %v8112_v44, 1 }
 0xc4d   : > { %8543 = vst [vmem:[%s13978_s20 + $0x20] sm:$0xff] %v8511_v11  ;;  %v11082_v11 = vld [vmem:[#allocation3 + $0x1a4] sm:$0xf0] }
 0xc4e   : > { %v14075_v55 = vsel %vm5045_vm0, %v8169_v34, %v8170_v32  ;;  %v7823_v47 = vpop.f32.mrf.mxu2  ;;  %v10493_v34 = vld [vmem:[#allocation3 + $0x1a8] sm:$0xf0] }
 0xc4f   : > { %v7992_v57 = vpop.f32.mrf.mxu3 }
 0xc50   : > { %v7993_v25 = vadd.f32 %v7992_v57, %v7823_v47  ;;  %v8418_v54 = vpop.permute.xlu1 %8417 }
 0xc51   : > { %v8476_v7 = vadd.f32 %v8418_v54, %v8300_v53  ;;  %v10496_v54 = vor.u32 %v11081_v18, %v10493_v34 }
 0xc52   : > { %v8113_v26 = vadd.f32 %v7993_v25, %v13874_v46  ;;  %v10492_v25 = vor.u32 %v11082_v11, %v10491_v60  ;;  %v8420_v60 = vpop.permute.xlu2 %8419 }
 0xc53   : > { %v8512_v4 = vadd.f32 %v13970_v52, %v8476_v7 }
 0xc54   : > { %8257 = vrot.lane.b32.xlu1 %v8113_v26, %s11285_s12  ;;  %v8346_v42 = vrot.slane %v8113_v26, 1  ;;  %v8171_v49 = vrot.slane %v8113_v26, 7  ;;  %v7026_v5 = vpop.f32.mrf.mxu0  ;;  %v7195_v59 = vpop.f32.mrf.mxu1 }
 0xc55   : > { %8544 = vst [vmem:[%s13978_s20 + $0x28] sm:$0xff] %v8512_v4  ;;  %v7027_v15 = vadd.f32 %v7026_v5, %v13758_v33 }
 0xc56   : > { %v8394_v20 = vsel %vm5270_vm1, %v8345_v12, %v8346_v42  ;;  %v14087_v46 = vsel %vm5045_vm0, %v8170_v32, %v8171_v49  ;;  %v7825_v53 = vpop.f32.mrf.mxu2 }
 0xc57   : > { %v7994_v44 = vpop.f32.mrf.mxu3  ;;  %8431 = vrot.lane.b32.xlu2 %v8394_v20, %s11286_s13  ;;  %v14090_v47 = vadd.f32 %v7195_v59, %v7027_v15 }
 0xc58   : > { %v7995_v57 = vadd.f32 %v7994_v44, %v7825_v53  ;;  %v11084_v53 = vld [vmem:[#allocation3 + $0x1b4] sm:$0xf0]  ;;  %v11083_v44 = vld [vmem:[#allocation3 + $0x1b4] sm:$0xf] }
 0xc5a   : > { %v8114_v33 = vadd.f32 %v7995_v57, %v13883_v51 }
 0xc5b   : > { %7867 = vmatmul.bf16.gmra.mxu2 %v10492_v25  ;;  %8036 = vmatmul.bf16.gmra.mxu3 %v10496_v54 }
 0xc5c   : > { %v8347_v7 = vrot.slane %v8114_v33, 1  ;;  %v14093_v26 = vpop.f32.mrf.mxu0  ;;  %v14095_v4 = vpop.f32.mrf.mxu1 }
 0xc5e   : > { %v8244_v32 = vpop.permute.xlu0 %8243  ;;  %v8393_v12 = vsel %vm5270_vm1, %v8346_v42, %v8347_v7  ;;  %v7828_v5 = vpop.f32.mrf.mxu2  ;;  %v10499_v42 = vld [vmem:[#allocation3 + $0x1b0] sm:$0xf] }
 0xc5f   : > { %v8301_v49 = vadd.f32 %v8244_v32, %v13944_v14  ;;  %v7997_v59 = vpop.f32.mrf.mxu3  ;;  %8433 = vrot.lane.b32.xlu0 %v8393_v12, %s11286_s13  ;;  %v10501_v14 = vld [vmem:[#allocation3 + $0x1b8] sm:$0xf0]  ;;  %v10500_v33 = vor.u32 %v11084_v53, %v10499_v42 }
 0xc60   : > { %v7998_v51 = vadd.f32 %v7997_v59, %v7828_v5  ;;  %v10504_v7 = vor.u32 %v11083_v44, %v10501_v14 }
 0xc61   : > { %v8477_v15 = vadd.f32 %v8420_v60, %v8301_v49 }
 0xc62   : > { %v8115_v20 = vadd.f32 %v7998_v51, %v13894_v61 }
 0xc63   : > { %v8513_v11 = vadd.f32 %v13970_v52, %v8477_v15 }
 0xc64   : > { %v14104_v18 = vpop.f32.mrf.mxu0  ;;  %v14106_v34 = vpop.f32.mrf.mxu1  ;;  %v8172_v61 = vrot.slane %v8115_v20, 7 }
 0xc65   : > { %8545 = vst [vmem:[%s13978_s20 + $0x30] sm:$0xff] %v8513_v11  ;;  %v8246_v12 = vpop.permute.xlu1 %8245 }
 0xc66   : > { %v7830_v57 = vpop.f32.mrf.mxu2  ;;  %v8302_v51 = vadd.f32 %v8246_v12, %v13955_v63  ;;  %v11086_v12 = vld [vmem:[#allocation3 + $0x1c4] sm:$0xf0] }
 0xc67   : > { %v7999_v25 = vpop.f32.mrf.mxu3 }
 0xc68   : > { %v8000_v54 = vadd.f32 %v7999_v25, %v7830_v57 }
 0xc6a   : > { %v8116_v32 = vadd.f32 %v8000_v54, %v13902_v23 }
 0xc6b   : > { %7872 = vmatmul.bf16.gmra.mxu2 %v10500_v33  ;;  %8041 = vmatmul.bf16.gmra.mxu3 %v10504_v7  ;;  %v10507_v7 = vld [vmem:[#allocation3 + $0x1c0] sm:$0xf] }
 0xc6c   : > { %8259 = vrot.lane.b32.xlu2 %v8116_v32, %s11285_s12  ;;  %v8173_v49 = vrot.slane %v8116_v32, 7  ;;  %v14110_v5 = vpop.f32.mrf.mxu0  ;;  %v14112_v59 = vpop.f32.mrf.mxu1  ;;  %v8348_v14 = vrot.slane %v8116_v32, 1 }
 0xc6d   : > { %15447 = vst [vmem:[#allocation357_spill] sm:$0xff] %v14112_v59 }
 0xc6e   : > { %v14116_v60 = vsel %vm5045_vm0, %v8172_v61, %v8173_v49  ;;  %v7833_v15 = vpop.f32.mrf.mxu2 }
 0xc6f   : > { %v8002_v23 = vpop.f32.mrf.mxu3 }
 0xc70   : > { %v8003_v11 = vadd.f32 %v8002_v23, %v7833_v15  ;;  %v8422_v53 = vpop.permute.xlu0 %8421  ;;  %v10509_v15 = vld [vmem:[#allocation3 + $0x1c8] sm:$0xf0] }
 0xc71   : > { %v8478_v20 = vadd.f32 %v8422_v53, %v8302_v51  ;;  %v11085_v51 = vld [vmem:[#allocation3 + $0x1c4] sm:$0xf] }
 0xc72   : > { %v8117_v42 = vadd.f32 %v8003_v11, %v13906_v1 }
 0xc73   : > { %v8514_v44 = vadd.f32 %v13970_v52, %v8478_v20  ;;  %v10508_v20 = vor.u32 %v11086_v12, %v10507_v7  ;;  %v11088_v12 = vld [vmem:[#allocation3 + $0x1d4] sm:$0xf0] }
 0xc74   : > { %8261 = vrot.lane.b32.xlu0 %v8117_v42, %s11285_s12  ;;  %v8349_v57 = vrot.slane %v8117_v42, 1  ;;  %v8174_v25 = vrot.slane %v8117_v42, 7  ;;  %v7036_v54 = vpop.f32.mrf.mxu0  ;;  %v7205_v33 = vpop.f32.mrf.mxu1  ;;  %v10512_v42 = vor.u32 %v11085_v51, %v10509_v15  ;;  %v10515_v15 = vld [vmem:[#allocation3 + $0x1d0] sm:$0xf] }
 0xc75   : > { %8546 = vst [vmem:[%s13978_s20 + $0x38] sm:$0xff] %v8514_v44  ;;  %v7037_v63 = vadd.f32 %v7036_v54, %v13778_v9 }
 0xc76   : > { %v8392_v61 = vsel %vm5270_vm1, %v8348_v14, %v8349_v57  ;;  %v14128_v1 = vsel %vm5045_vm0, %v8173_v49, %v8174_v25  ;;  %v7835_v23 = vpop.f32.mrf.mxu2 }
 0xc77   : > { %v8004_v32 = vpop.f32.mrf.mxu3  ;;  %8435 = vrot.lane.b32.xlu1 %v8392_v61, %s11286_s13  ;;  %v14131_v11 = vadd.f32 %v7205_v33, %v7037_v63  ;;  %v8248_v33 = vpop.permute.xlu2 %8247 }
 0xc78   : > { %v8005_v53 = vadd.f32 %v8004_v32, %v7835_v23  ;;  %v11087_v23 = vld [vmem:[#allocation3 + $0x1d4] sm:$0xf]  ;;  %v10517_v32 = vld [vmem:[#allocation3 + $0x1d8] sm:$0xf0] }
 0xc7a   : > { %v8118_v9 = vadd.f32 %v8005_v53, %v13915_v58 }
 0xc7b   : > { %7877 = vmatmul.bf16.gmra.mxu2 %v10508_v20  ;;  %8046 = vmatmul.bf16.gmra.mxu3 %v10512_v42  ;;  %v8303_v42 = vadd.f32 %v8248_v33, %v13991_v29 }
 0xc7c   : > { %v8350_v44 = vrot.slane %v8118_v9, 1  ;;  %v14134_v14 = vpop.f32.mrf.mxu0  ;;  %v14136_v54 = vpop.f32.mrf.mxu1 }
 0xc7e   : > { %v8391_v49 = vsel %vm5270_vm1, %v8349_v57, %v8350_v44  ;;  %v7838_v25 = vpop.f32.mrf.mxu2 }
 0xc7f   : > { %v8007_v59 = vpop.f32.mrf.mxu3  ;;  %8437 = vrot.lane.b32.xlu2 %v8391_v49, %s11286_s13  ;;  %v8426_v9 = vpop.permute.xlu2 %8425  ;;  %v10516_v49 = vor.u32 %v11088_v12, %v10515_v15 }
 0xc80   : > { %v8008_v63 = vadd.f32 %v8007_v59, %v7838_v25  ;;  %v10520_v25 = vor.u32 %v11087_v23, %v10517_v32 }
 0xc82   : > { %v8119_v7 = vadd.f32 %v8008_v63, %v13927_v36 }
 0xc84   : > { %v14142_v61 = vpop.f32.mrf.mxu0  ;;  %v14144_v58 = vpop.f32.mrf.mxu1 }
 0xc85   : > { %15448 = vst [vmem:[#allocation33_spill] sm:$0xff] %v14142_v61 }
 0xc86   : > { %15449 = vst [vmem:[#allocation188_spill] sm:$0xff] %v14144_v58  ;;  %v8250_v51 = vpop.permute.xlu0 %8249  ;;  %v7840_v57 = vpop.f32.mrf.mxu2 }
 0xc87   : > { %v8304_v53 = vadd.f32 %v8250_v51, %v14005_v28  ;;  %v8009_v20 = vpop.f32.mrf.mxu3  ;;  %v8175_v28 = vrot.slane %v8119_v7, 7 }
 0xc88   : > { %v8010_v59 = vadd.f32 %v8009_v20, %v7840_v57 }
 0xc89   : > { %v8480_v44 = vadd.f32 %v8426_v9, %v8304_v53  ;;  %v8424_v36 = vpop.permute.xlu1 %8423 }
 0xc8a   : > { %v8120_v63 = vadd.f32 %v8010_v59, %v13934_v37  ;;  %v8479_v58 = vadd.f32 %v8424_v36, %v8303_v42  ;;  %v10523_v42 = vld [vmem:[#allocation3 + $0x1e0] sm:$0xf]  ;;  %v11089_v36 = vld [vmem:[#allocation3 + $0x1e4] sm:$0xf] }
 0xc8b   : > { %v8516_v61 = vadd.f32 %v13970_v52, %v8480_v44  ;;  %7882 = vmatmul.bf16.gmra.mxu2 %v10516_v49  ;;  %8051 = vmatmul.bf16.gmra.mxu3 %v10520_v25  ;;  %v11090_v44 = vld [vmem:[#allocation3 + $0x1e4] sm:$0xf0]  ;;  %v10525_v49 = vld [vmem:[#allocation3 + $0x1e8] sm:$0xf0] }
 0xc8c   : > { %v8515_v51 = vadd.f32 %v13970_v52, %v8479_v58  ;;  %8263 = vrot.lane.b32.xlu1 %v8120_v63, %s11285_s12  ;;  %v8176_v29 = vrot.slane %v8120_v63, 7  ;;  %v14153_v33 = vpop.f32.mrf.mxu0  ;;  %v14155_v53 = vpop.f32.mrf.mxu1  ;;  %v8351_v58 = vrot.slane %v8120_v63, 1 }
 0xc8d   : > { %8548 = vst [vmem:[%s13978_s20 + $0x48] sm:$0xff] %v8516_v61 }
 0xc8e   : > { %8547 = vst [vmem:[%s13978_s20 + $0x40] sm:$0xff] %v8515_v51  ;;  %v14160_v37 = vsel %vm5045_vm0, %v8175_v28, %v8176_v29  ;;  %v7843_v12 = vpop.f32.mrf.mxu2 }
 0xc8f   : > { %v8012_v15 = vpop.f32.mrf.mxu3 }
 0xc90   : > { %v8013_v23 = vadd.f32 %v8012_v15, %v7843_v12  ;;  %v10524_v12 = vor.u32 %v11090_v44, %v10523_v42  ;;  %v10528_v15 = vor.u32 %v11089_v36, %v10525_v49  ;;  %v11092_v44 = vld [vmem:[#allocation3 + $0x1f4] sm:$0xf0]  ;;  %v10531_v36 = vld [vmem:[#allocation3 + $0x1f0] sm:$0xf]  ;;  %v11091_v49 = vld [vmem:[#allocation3 + $0x1f4] sm:$0xf] }
 0xc92   : > { %v8121_v7 = vadd.f32 %v8013_v23, %v13938_v6 }
 0xc94   : > { %8265 = vrot.lane.b32.xlu2 %v8121_v7, %s11285_s12  ;;  %v8352_v32 = vrot.slane %v8121_v7, 1  ;;  %v8177_v57 = vrot.slane %v8121_v7, 7  ;;  %v7046_v61 = vpop.f32.mrf.mxu0 }
 0xc95   : > { %v7215_v20 = vpop.f32.mrf.mxu1  ;;  %v7047_v9 = vadd.f32 %v7046_v61, %v13798_v27 }
 0xc96   : > { %v8390_v59 = vsel %vm5270_vm1, %v8351_v58, %v8352_v32  ;;  %v14169_v25 = vsel %vm5045_vm0, %v8176_v29, %v8177_v57  ;;  %v7845_v6 = vpop.f32.mrf.mxu2 }
 0xc97   : > { %v8014_v28 = vpop.f32.mrf.mxu3  ;;  %8439 = vrot.lane.b32.xlu0 %v8390_v59, %s11286_s13  ;;  %v14172_v63 = vadd.f32 %v7215_v20, %v7047_v9 }
 0xc98   : > { %v8015_v51 = vadd.f32 %v8014_v28, %v7845_v6  ;;  %v10533_v6 = vld [vmem:[#allocation3 + $0x1f8] sm:$0xf0] }
 0xc9a   : > { %v8122_v27 = vadd.f32 %v8015_v51, %v13947_v21 }
 0xc9b   : > { %7887 = vmatmul.bf16.gmra.mxu2 %v10524_v12  ;;  %8056 = vmatmul.bf16.gmra.mxu3 %v10528_v15 }
 0xc9c   : > { %v8353_v23 = vrot.slane %v8122_v27, 1  ;;  %v14175_v7 = vpop.f32.mrf.mxu0  ;;  %v10532_v27 = vor.u32 %v11092_v44, %v10531_v36 }
 0xc9d   : > { %v14177_v58 = vpop.f32.mrf.mxu1 }
 0xc9e   : > { %v8389_v29 = vsel %vm5270_vm1, %v8352_v32, %v8353_v23  ;;  %v7848_v57 = vpop.f32.mrf.mxu2  ;;  %v8252_v9 = vpop.permute.xlu1 %8251  ;;  %v10536_v23 = vor.u32 %v11091_v49, %v10533_v6 }
 0xc9f   : > { %v8017_v61 = vpop.f32.mrf.mxu3  ;;  %8441 = vrot.lane.b32.xlu1 %v8389_v29, %s11286_s13  ;;  %v8305_v32 = vadd.f32 %v8252_v9, %v14035_v38 }
 0xca0   : > { %v8018_v20 = vadd.f32 %v8017_v61, %v7848_v57  ;;  %v8254_v57 = vpop.permute.xlu2 %8253 }
 0xca1   : > { %v8306_v36 = vadd.f32 %v8254_v57, %v14046_v56  ;;  %v11094_v57 = vld [vmem:[#allocation3 + $0x204] sm:$0xf0] }
 0xca2   : > { %v8123_v42 = vadd.f32 %v8018_v20, %v13959_v19 }
 0xca4   : > { %v14183_v59 = vpop.f32.mrf.mxu0  ;;  %v8178_v61 = vrot.slane %v8123_v42, 7 }
 0xca5   : > { %15450 = vst [vmem:[#allocation34_spill] sm:$0xff] %v14183_v59  ;;  %v14185_v21 = vpop.f32.mrf.mxu1 }
 0xca6   : > { %15451 = vst [vmem:[#allocation189_spill] sm:$0xff] %v14185_v21  ;;  %v7850_v28 = vpop.f32.mrf.mxu2 }
 0xca7   : > { %v8019_v51 = vpop.f32.mrf.mxu3 }
 0xca8   : > { %v8020_v12 = vadd.f32 %v8019_v51, %v7850_v28 }
 0xca9   : > { %v8428_v15 = vpop.permute.xlu0 %8427 }
 0xcaa   : > { %v8124_v19 = vadd.f32 %v8020_v12, %v13973_v31  ;;  %v8481_v29 = vadd.f32 %v8428_v15, %v8305_v32 }
 0xcab   : > { %7892 = vmatmul.bf16.gmra.mxu2 %v10532_v27  ;;  %8061 = vmatmul.bf16.gmra.mxu3 %v10536_v23  ;;  %v10539_v23 = vld [vmem:[#allocation3 + $0x200] sm:$0xf] }
 0xcac   : > { %v8517_v20 = vadd.f32 %v13970_v52, %v8481_v29  ;;  %8267 = vrot.lane.b32.xlu0 %v8124_v19, %s11285_s12  ;;  %v8179_v21 = vrot.slane %v8124_v19, 7  ;;  %v14191_v59 = vpop.f32.mrf.mxu0  ;;  %v8354_v32 = vrot.slane %v8124_v19, 1  ;;  %v11093_v29 = vld [vmem:[#allocation3 + $0x204] sm:$0xf] }
 0xcad   : > { %v14193_v38 = vpop.f32.mrf.mxu1 }
 0xcae   : > { %8549 = vst [vmem:[%s13978_s20 + $0x50] sm:$0xff] %v8517_v20  ;;  %v14198_v9 = vsel %vm5045_vm0, %v8178_v61, %v8179_v21  ;;  %v7853_v31 = vpop.f32.mrf.mxu2 }
 0xcaf   : > { %v8022_v44 = vpop.f32.mrf.mxu3 }
 0xcb0   : > { %v8023_v42 = vadd.f32 %v8022_v44, %v7853_v31 }
 0xcb1   : > { %v8430_v49 = vpop.permute.xlu1 %8429 }
 0xcb2   : > { %v8125_v6 = vadd.f32 %v8023_v42, %v13984_v39  ;;  %v8482_v28 = vadd.f32 %v8430_v49, %v8306_v36  ;;  %v10541_v39 = vld [vmem:[#allocation3 + $0x208] sm:$0xf0]  ;;  %v10540_v49 = vor.u32 %v11094_v57, %v10539_v23  ;;  %v11096_v57 = vld [vmem:[#allocation3 + $0x214] sm:$0xf0] }
 0xcb4   : > { %v8518_v51 = vadd.f32 %v13970_v52, %v8482_v28  ;;  %8269 = vrot.lane.b32.xlu1 %v8125_v6, %s11285_s12  ;;  %v8355_v12 = vrot.slane %v8125_v6, 1  ;;  %v8180_v15 = vrot.slane %v8125_v6, 7  ;;  %v7056_v27 = vpop.f32.mrf.mxu0  ;;  %v10544_v6 = vor.u32 %v11093_v29, %v10541_v39  ;;  %v10547_v39 = vld [vmem:[#allocation3 + $0x210] sm:$0xf] }
 0xcb5   : > { %v7057_v61 = vadd.f32 %v7056_v27, %v13818_v13  ;;  %v7225_v20 = vpop.f32.mrf.mxu1 }
 0xcb6   : > { %8550 = vst [vmem:[%s13978_s20 + $0x58] sm:$0xff] %v8518_v51  ;;  %v8388_v56 = vsel %vm5270_vm1, %v8354_v32, %v8355_v12  ;;  %v14210_v31 = vsel %vm5045_vm0, %v8179_v21, %v8180_v15  ;;  %v7855_v44 = vpop.f32.mrf.mxu2 }
 0xcb7   : > { %v8024_v19 = vpop.f32.mrf.mxu3  ;;  %8443 = vrot.lane.b32.xlu2 %v8388_v56, %s11286_s13  ;;  %v14213_v36 = vadd.f32 %v7225_v20, %v7057_v61  ;;  %v8432_v61 = vpop.permute.xlu2 %8431  ;;  %v7009_v56 = vadd.f32 %v14011_v48, %v13708_v62 }
 0xcb8   : > { %v8025_v42 = vadd.f32 %v8024_v19, %v7855_v44  ;;  %v10549_v44 = vld [vmem:[#allocation3 + $0x218] sm:$0xf0] }
 0xcba   : > { %v8126_v13 = vadd.f32 %v8025_v42, %v13994_v43  ;;  %v7178_v42 = vadd.f32 %v14013_v35, %v7009_v56  ;;  %v11097_v56 = vld [vmem:[#allocation3 + $0x224] sm:$0xf] }
 0xcbb   : > { %7897 = vmatmul.bf16.gmra.mxu2 %v10540_v49  ;;  %8066 = vmatmul.bf16.gmra.mxu3 %v10544_v6  ;;  %v10548_v6 = vor.u32 %v11096_v57, %v10547_v39 }
 0xcbc   : > { %v8356_v28 = vrot.slane %v8126_v13, 1 }
 0xcbe   : > { %v8256_v51 = vpop.permute.xlu0 %8255  ;;  %v8387_v21 = vsel %vm5270_vm1, %v8355_v12, %v8356_v28  ;;  %v7858_v15 = vpop.f32.mrf.mxu2  ;;  %v11095_v12 = vld [vmem:[#allocation3 + $0x214] sm:$0xf] }
 0xcbf   : > { %v8307_v32 = vadd.f32 %v8256_v51, %v14075_v55  ;;  %v8027_v27 = vpop.f32.mrf.mxu3  ;;  %8445 = vrot.lane.b32.xlu0 %v8387_v21, %s11286_s13  ;;  %v10552_v13 = vor.u32 %v11095_v12, %v10549_v44 }
 0xcc0   : > { %v8028_v20 = vadd.f32 %v8027_v27, %v7858_v15 }
 0xcc1   : > { %v8483_v23 = vadd.f32 %v8432_v61, %v8307_v32 }
 0xcc2   : > { %v8127_v29 = vadd.f32 %v8028_v20, %v14008_v30  ;;  %v7012_v30 = vadd.f32 %v14019_v10, %v13722_v22  ;;  %v7014_v10 = vadd.f32 %v14029_v16, %v13733_v3 }
 0xcc3   : > { %v8519_v43 = vadd.f32 %v13970_v52, %v8483_v23 }
 0xcc4   : > { %v8181_v51 = vrot.slane %v8127_v29, 7  ;;  %v7181_v15 = vadd.f32 %v14021_v45, %v7012_v30  ;;  %v10555_v29 = vld [vmem:[#allocation3 + $0x220] sm:$0xf]  ;;  %v10557_v45 = vld [vmem:[#allocation3 + $0x228] sm:$0xf0] }
 0xcc5   : > { %8551 = vst [vmem:[%s13978_s20 + $0x60] sm:$0xff] %v8519_v43  ;;  %v11098_v43 = vld [vmem:[#allocation3 + $0x224] sm:$0xf0] }
 0xcc6   : > { %v7860_v55 = vpop.f32.mrf.mxu2  ;;  %v8258_v48 = vpop.permute.xlu1 %8257 }
 0xcc7   : > { %v8029_v19 = vpop.f32.mrf.mxu3  ;;  %v8308_v27 = vadd.f32 %v8258_v48, %v14087_v46 }
 0xcc8   : > { %v8030_v49 = vadd.f32 %v8029_v19, %v7860_v55  ;;  %v10556_v19 = vor.u32 %v11098_v43, %v10555_v29 }
 0xcca   : > { %v8128_v28 = vadd.f32 %v8030_v49, %v7178_v42  ;;  %v7183_v42 = vadd.f32 %v14031_v8, %v7014_v10 }
 0xccb   : > { %7902 = vmatmul.bf16.gmra.mxu2 %v10548_v6  ;;  %8071 = vmatmul.bf16.gmra.mxu3 %v10552_v13 }
 0xccc   : > { %8271 = vrot.lane.b32.xlu2 %v8128_v28, %s11285_s12  ;;  %v8182_v62 = vrot.slane %v8128_v28, 7  ;;  %v8357_v39 = vrot.slane %v8128_v28, 1 }
 0xcce   : > { %v14231_v21 = vsel %vm5045_vm0, %v8181_v51, %v8182_v62  ;;  %v7863_v32 = vpop.f32.mrf.mxu2 }
 0xccf   : > { %v8032_v35 = vpop.f32.mrf.mxu3 }
 0xcd0   : > { %v8033_v61 = vadd.f32 %v8032_v35, %v7863_v32  ;;  %v10563_v35 = vld [vmem:[#allocation3 + $0x230] sm:$0xf] }
 0xcd1   : > { %v8434_v20 = vpop.permute.xlu0 %8433 }
 0xcd2   : > { %v8129_v23 = vadd.f32 %v8033_v61, %v7181_v15  ;;  %v8484_v22 = vadd.f32 %v8434_v20, %v8308_v27  ;;  %v15452_v15 = vld [vmem:[#allocation177_spill] sm:$0xff]  ;;  %v11100_v27 = vld [vmem:[#allocation3 + $0x234] sm:$0xf0]  ;;  %v10565_v20 = vld [vmem:[#allocation3 + $0x238] sm:$0xf0] }
 0xcd3   : > { %v7019_v8 = vadd.f32 %v14052_v40, %v15452_v15  ;;  %v11099_v61 = vld [vmem:[#allocation3 + $0x234] sm:$0xf]  ;;  %v10564_v43 = vor.u32 %v11100_v27, %v10563_v35 }
 0xcd4   : > { %v8520_v57 = vadd.f32 %v13970_v52, %v8484_v22  ;;  %8273 = vrot.lane.b32.xlu0 %v8129_v23, %s11285_s12  ;;  %v8358_v12 = vrot.slane %v8129_v23, 1  ;;  %v8183_v44 = vrot.slane %v8129_v23, 7  ;;  %v10560_v52 = vor.u32 %v11097_v56, %v10557_v45 }
 0xcd5   : > { %v10568_v56 = vor.u32 %v11099_v61, %v10565_v20 }
 0xcd6   : > { %8552 = vst [vmem:[%s13978_s20 + $0x68] sm:$0xff] %v8520_v57  ;;  %v8386_v46 = vsel %vm5270_vm1, %v8357_v39, %v8358_v12  ;;  %v14244_v55 = vsel %vm5045_vm0, %v8182_v62, %v8183_v44  ;;  %v7865_v3 = vpop.f32.mrf.mxu2  ;;  %v8260_v62 = vpop.permute.xlu2 %8259  ;;  %v7188_v57 = vadd.f32 %v14054_v0, %v7019_v8  ;;  %v15453_v0 = vld [vmem:[#allocation25_spill] sm:$0xff] }
 0xcd7   : > { %v8034_v16 = vpop.f32.mrf.mxu3  ;;  %8447 = vrot.lane.b32.xlu1 %v8386_v46, %s11286_s13  ;;  %v8309_v39 = vadd.f32 %v8260_v62, %v14116_v60  ;;  %v7022_v60 = vadd.f32 %v14060_v24, %v15453_v0  ;;  %v15455_v62 = vld [vmem:[#allocation180_spill] sm:$0xff] }
 0xcd8   : > { %v8035_v49 = vadd.f32 %v8034_v16, %v7865_v3  ;;  %v7024_v24 = vadd.f32 %v14069_v50, %v15455_v62 }
 0xcda   : > { %v8130_v6 = vadd.f32 %v8035_v49, %v7183_v42  ;;  %v7193_v20 = vadd.f32 %v14071_v41, %v7024_v24  ;;  %v15458_v24 = vld [vmem:[#allocation27_spill] sm:$0xff] }
 0xcdb   : > { %7907 = vmatmul.bf16.gmra.mxu2 %v10556_v19  ;;  %8076 = vmatmul.bf16.gmra.mxu3 %v10560_v52 }
 0xcdc   : > { %v8359_v13 = vrot.slane %v8130_v6, 1 }
 0xcde   : > { %v8385_v28 = vsel %vm5270_vm1, %v8358_v12, %v8359_v13  ;;  %v7868_v30 = vpop.f32.mrf.mxu2  ;;  %v15454_v13 = vld [vmem:[#allocation32_spill] sm:$0xff] }
 0xcdf   : > { %v8037_v51 = vpop.f32.mrf.mxu3  ;;  %8449 = vrot.lane.b32.xlu2 %v8385_v28, %s11286_s13  ;;  %v7191_v28 = vadd.f32 %v15454_v13, %v7022_v60 }
 0xce0   : > { %v8038_v48 = vadd.f32 %v8037_v51, %v7868_v30 }
 0xce2   : > { %v8131_v32 = vadd.f32 %v8038_v48, %v14049_v2  ;;  %v8438_v2 = vpop.permute.xlu2 %8437 }
 0xce4   : > { %v8184_v16 = vrot.slane %v8131_v32, 7 }
 0xce6   : > { %v8262_v23 = vpop.permute.xlu0 %8261  ;;  %v7870_v10 = vpop.f32.mrf.mxu2 }
 0xce7   : > { %v8310_v22 = vadd.f32 %v8262_v23, %v14128_v1  ;;  %v8039_v29 = vpop.f32.mrf.mxu3  ;;  %v14260_v1 = vld [vmem:[%s14435_s4] ss:$0 sm:$0xff] }
 0xce8   : > { %v8040_v12 = vadd.f32 %v8039_v29, %v7870_v10 }
 0xce9   : > { %v8486_v45 = vadd.f32 %v8438_v2, %v8310_v22  ;;  %v8436_v40 = vpop.permute.xlu1 %8435 }
 0xcea   : > { %v8132_v44 = vadd.f32 %v8040_v12, %v7188_v57  ;;  %v8485_v46 = vadd.f32 %v8436_v40, %v8309_v39  ;;  %v15456_v39 = vld [vmem:[#allocation26_spill] sm:$0xff] }
 0xceb   : > { %v8522_v3 = vadd.f32 %v14260_v1, %v8486_v45  ;;  %7912 = vmatmul.bf16.gmra.mxu2 %v10564_v43  ;;  %8081 = vmatmul.bf16.gmra.mxu3 %v10568_v56  ;;  %v7029_v2 = vadd.f32 %v14093_v26, %v15456_v39 }
 0xcec   : > { %v8521_v19 = vadd.f32 %v14260_v1, %v8485_v46  ;;  %8275 = vrot.lane.b32.xlu1 %v8132_v44, %s11285_s12  ;;  %v8185_v52 = vrot.slane %v8132_v44, 7  ;;  %v8360_v48 = vrot.slane %v8132_v44, 1 }
 0xced   : > { %8554 = vst [vmem:[%s13978_s20 + $0x78] sm:$0xff] %v8522_v3  ;;  %v7198_v40 = vadd.f32 %v14095_v4, %v7029_v2 }
 0xcee   : > { %8553 = vst [vmem:[%s13978_s20 + $0x70] sm:$0xff] %v8521_v19  ;;  %v14271_v42 = vsel %vm5045_vm0, %v8184_v16, %v8185_v52  ;;  %v7873_v49 = vpop.f32.mrf.mxu2  ;;  %v15457_v16 = vld [vmem:[#allocation181_spill] sm:$0xff] }
 0xcef   : > { %v8042_v6 = vpop.f32.mrf.mxu3  ;;  %v7032_v19 = vadd.f32 %v14104_v18, %v15457_v16 }
 0xcf0   : > { %v8043_v30 = vadd.f32 %v8042_v6, %v7873_v49  ;;  %v8266_v49 = vpop.permute.xlu2 %8265 }
 0xcf1   : > { %v7201_v13 = vadd.f32 %v14106_v34, %v7032_v19  ;;  %v15461_v19 = vld [vmem:[#allocation28_spill] sm:$0xff] }
 0xcf2   : > { %v8133_v51 = vadd.f32 %v8043_v30, %v7191_v28  ;;  %v8312_v28 = vadd.f32 %v8266_v49, %v14169_v25 }
 0xcf4   : > { %8277 = vrot.lane.b32.xlu2 %v8133_v51, %s11285_s12  ;;  %v8361_v32 = vrot.slane %v8133_v51, 1  ;;  %v8186_v35 = vrot.slane %v8133_v51, 7 }
 0xcf6   : > { %v8384_v15 = vsel %vm5270_vm1, %v8360_v48, %v8361_v32  ;;  %v14281_v8 = vsel %vm5045_vm0, %v8185_v52, %v8186_v35  ;;  %v7875_v27 = vpop.f32.mrf.mxu2  ;;  %v7034_v48 = vadd.f32 %v14110_v5, %v15458_v24  ;;  %v15459_v5 = vld [vmem:[#allocation357_spill] sm:$0xff] }
 0xcf7   : > { %v8044_v61 = vpop.f32.mrf.mxu3  ;;  %8451 = vrot.lane.b32.xlu0 %v8384_v15, %s11286_s13  ;;  %v15464_v24 = vld [vmem:[#allocation353_spill] sm:$0xff] }
 0xcf8   : > { %v8045_v23 = vadd.f32 %v8044_v61, %v7875_v27 }
 0xcfa   : > { %v8134_v50 = vadd.f32 %v8045_v23, %v7193_v20  ;;  %v7203_v23 = vadd.f32 %v15459_v5, %v7034_v48  ;;  %v7044_v48 = vadd.f32 %v14153_v33, %v15464_v24 }
 0xcfc   : > { %v8362_v22 = vrot.slane %v8134_v50, 1  ;;  %v7213_v33 = vadd.f32 %v14155_v53, %v7044_v48 }
 0xcfe   : > { %v8383_v10 = vsel %vm5270_vm1, %v8361_v32, %v8362_v22  ;;  %v7878_v29 = vpop.f32.mrf.mxu2  ;;  %v8264_v12 = vpop.permute.xlu1 %8263 }
 0xcff   : > { %v8047_v43 = vpop.f32.mrf.mxu3  ;;  %8453 = vrot.lane.b32.xlu1 %v8383_v10, %s11286_s13  ;;  %v8311_v44 = vadd.f32 %v8264_v12, %v14160_v37 }
 0xd00   : > { %v8048_v56 = vadd.f32 %v8047_v43, %v7878_v29 }
 0xd02   : > { %v8135_v57 = vadd.f32 %v8048_v56, %v14090_v47 }
 0xd04   : > { %v8187_v52 = vrot.slane %v8135_v57, 7 }
 0xd06   : > { %v7880_v45 = vpop.f32.mrf.mxu2 }
 0xd07   : > { %v8049_v41 = vpop.f32.mrf.mxu3 }
 0xd08   : > { %v8050_v46 = vadd.f32 %v8049_v41, %v7880_v45 }
 0xd09   : > { %v8440_v3 = vpop.permute.xlu0 %8439 }
 0xd0a   : > { %v8136_v0 = vadd.f32 %v8050_v46, %v7198_v40  ;;  %v8487_v60 = vadd.f32 %v8440_v3, %v8311_v44  ;;  %v15460_v44 = vld [vmem:[#allocation352_spill] sm:$0xff] }
 0xd0b   : > { %v7039_v46 = vadd.f32 %v14134_v14, %v15460_v44 }
 0xd0c   : > { %v8523_v47 = vadd.f32 %v14260_v1, %v8487_v60  ;;  %8279 = vrot.lane.b32.xlu0 %v8136_v0, %s11285_s12  ;;  %v8188_v26 = vrot.slane %v8136_v0, 7  ;;  %v8363_v35 = vrot.slane %v8136_v0, 1 }
 0xd0d   : > { %v7208_v60 = vadd.f32 %v14136_v54, %v7039_v46 }
 0xd0e   : > { %8555 = vst [vmem:[%s13978_s20 + $0x80] sm:$0xff] %v8523_v47  ;;  %v14300_v4 = vsel %vm5045_vm0, %v8187_v52, %v8188_v26  ;;  %v7883_v37 = vpop.f32.mrf.mxu2  ;;  %v15462_v52 = vld [vmem:[#allocation33_spill] sm:$0xff] }
 0xd0f   : > { %v8052_v6 = vpop.f32.mrf.mxu3  ;;  %v7042_v47 = vadd.f32 %v15462_v52, %v15461_v19  ;;  %v15467_v19 = vld [vmem:[#allocation34_spill] sm:$0xff] }
 0xd10   : > { %v8053_v18 = vadd.f32 %v8052_v6, %v7883_v37 }
 0xd11   : > { %v8442_v30 = vpop.permute.xlu1 %8441  ;;  %v8444_v2 = vpop.permute.xlu2 %8443 }
 0xd12   : > { %v8137_v51 = vadd.f32 %v8053_v18, %v7201_v13  ;;  %v8488_v62 = vadd.f32 %v8442_v30, %v8312_v28  ;;  %v15463_v13 = vld [vmem:[#allocation188_spill] sm:$0xff] }
 0xd13   : > { %v7211_v28 = vadd.f32 %v15463_v13, %v7042_v47 }
 0xd14   : > { %v8524_v32 = vadd.f32 %v14260_v1, %v8488_v62  ;;  %8281 = vrot.lane.b32.xlu1 %v8137_v51, %s11285_s12  ;;  %v8364_v15 = vrot.slane %v8137_v51, 1  ;;  %v8189_v27 = vrot.slane %v8137_v51, 7 }
 0xd16   : > { %8556 = vst [vmem:[%s13978_s20 + $0x88] sm:$0xff] %v8524_v32  ;;  %v8382_v34 = vsel %vm5270_vm1, %v8363_v35, %v8364_v15  ;;  %v14313_v25 = vsel %vm5045_vm0, %v8188_v26, %v8189_v27  ;;  %v7885_v61 = vpop.f32.mrf.mxu2 }
 0xd17   : > { %v8054_v20 = vpop.f32.mrf.mxu3  ;;  %8455 = vrot.lane.b32.xlu2 %v8382_v34, %s11286_s13 }
 0xd18   : > { %v8055_v50 = vadd.f32 %v8054_v20, %v7885_v61 }
 0xd1a   : > { %v8138_v22 = vadd.f32 %v8055_v50, %v7203_v23 }
 0xd1c   : > { %v8365_v10 = vrot.slane %v8138_v22, 1 }
 0xd1e   : > { %v8268_v29 = vpop.permute.xlu0 %8267  ;;  %v8381_v43 = vsel %vm5270_vm1, %v8364_v15, %v8365_v10  ;;  %v7888_v57 = vpop.f32.mrf.mxu2 }
 0xd1f   : > { %v8313_v56 = vadd.f32 %v8268_v29, %v14198_v9  ;;  %v8057_v39 = vpop.f32.mrf.mxu3  ;;  %8457 = vrot.lane.b32.xlu0 %v8381_v43, %s11286_s13 }
 0xd20   : > { %v8058_v12 = vadd.f32 %v8057_v39, %v7888_v57  ;;  %v15465_v39 = vld [vmem:[#allocation29_spill] sm:$0xff] }
 0xd21   : > { %v8489_v45 = vadd.f32 %v8444_v2, %v8313_v56  ;;  %v7049_v2 = vadd.f32 %v14175_v7, %v15465_v39  ;;  %v15466_v7 = vld [vmem:[#allocation184_spill] sm:$0xff] }
 0xd22   : > { %v8139_v41 = vadd.f32 %v8058_v12, %v14131_v11  ;;  %v7052_v52 = vadd.f32 %v15467_v19, %v15466_v7 }
 0xd23   : > { %v8525_v40 = vadd.f32 %v14260_v1, %v8489_v45 }
 0xd24   : > { %v8190_v26 = vrot.slane %v8139_v41, 7 }
 0xd25   : > { %8557 = vst [vmem:[%s13978_s20 + $0x90] sm:$0xff] %v8525_v40  ;;  %v7218_v40 = vadd.f32 %v14177_v58, %v7049_v2 }
 0xd26   : > { %v7890_v3 = vpop.f32.mrf.mxu2  ;;  %v8270_v11 = vpop.permute.xlu1 %8269 }
 0xd27   : > { %v8059_v0 = vpop.f32.mrf.mxu3  ;;  %v8314_v54 = vadd.f32 %v8270_v11, %v14210_v31  ;;  %v8272_v43 = vpop.permute.xlu2 %8271  ;;  %v15468_v11 = vld [vmem:[#allocation189_spill] sm:$0xff] }
 0xd28   : > { %v8060_v9 = vadd.f32 %v8059_v0, %v7890_v3  ;;  %v8315_v44 = vadd.f32 %v8272_v43, %v14231_v21 }
 0xd2a   : > { %v8140_v16 = vadd.f32 %v8060_v9, %v7208_v60 }
 0xd2c   : > { %8283 = vrot.lane.b32.xlu2 %v8140_v16, %s11285_s12  ;;  %v8191_v49 = vrot.slane %v8140_v16, 7  ;;  %v8366_v35 = vrot.slane %v8140_v16, 1 }
 0xd2e   : > { %v14332_v37 = vsel %vm5045_vm0, %v8190_v26, %v8191_v49  ;;  %v7893_v14 = vpop.f32.mrf.mxu2 }
 0xd2f   : > { %v8062_v6 = vpop.f32.mrf.mxu3 }
 0xd30   : > { %v8063_v18 = vadd.f32 %v8062_v6, %v7893_v14  ;;  %v7221_v14 = vadd.f32 %v15468_v11, %v7052_v52 }
 0xd31   : > { %v8446_v30 = vpop.permute.xlu0 %8445 }
 0xd32   : > { %v8141_v51 = vadd.f32 %v8063_v18, %v7211_v28  ;;  %v8490_v62 = vadd.f32 %v8446_v30, %v8314_v54  ;;  %v15469_v28 = vld [vmem:[#allocation30_spill] sm:$0xff] }
 0xd33   : > { %v7054_v54 = vadd.f32 %v14191_v59, %v15469_v28 }
 0xd34   : > { %v8526_v32 = vadd.f32 %v14260_v1, %v8490_v62  ;;  %8285 = vrot.lane.b32.xlu0 %v8141_v51, %s11285_s12  ;;  %v8367_v15 = vrot.slane %v8141_v51, 1  ;;  %v8192_v27 = vrot.slane %v8141_v51, 7 }
 0xd36   : > { %8558 = vst [vmem:[%s13978_s20 + $0x98] sm:$0xff] %v8526_v32  ;;  %v8380_v34 = vsel %vm5270_vm1, %v8366_v35, %v8367_v15  ;;  %v14345_v31 = vsel %vm5045_vm0, %v8191_v49, %v8192_v27  ;;  %v7895_v61 = vpop.f32.mrf.mxu2  ;;  %v7223_v35 = vadd.f32 %v14193_v38, %v7054_v54  ;;  %v7058_v27 = vpop.f32.mrf.mxu0 }
 0xd37   : > { %v8064_v20 = vpop.f32.mrf.mxu3  ;;  %8459 = vrot.lane.b32.xlu1 %v8380_v34, %s11286_s13 }
 0xd38   : > { %v8065_v5 = vadd.f32 %v8064_v20, %v7895_v61 }
 0xd39   : > { %v8450_v46 = vpop.permute.xlu2 %8449 }
 0xd3a   : > { %v8142_v23 = vadd.f32 %v8065_v5, %v7213_v33 }
 0xd3c   : > { %v8368_v50 = vrot.slane %v8142_v23, 1  ;;  %v7227_v23 = vpop.f32.mrf.mxu1 }
 0xd3e   : > { %v8379_v22 = vsel %vm5270_vm1, %v8367_v15, %v8368_v50  ;;  %v7898_v10 = vpop.f32.mrf.mxu2  ;;  %v7061_v43 = vpop.f32.mrf.mxu0 }
 0xd3f   : > { %v8067_v29 = vpop.f32.mrf.mxu3  ;;  %8461 = vrot.lane.b32.xlu2 %v8379_v22, %s11286_s13  ;;  %v15470_v22 = vld [vmem:[#allocation185_spill] sm:$0xff] }
 0xd40   : > { %v8068_v56 = vadd.f32 %v8067_v29, %v7898_v10  ;;  %v7059_v10 = vadd.f32 %v7058_v27, %v15470_v22 }
 0xd42   : > { %v8143_v57 = vadd.f32 %v8068_v56, %v14172_v63 }
 0xd46   : > { %v8274_v12 = vpop.permute.xlu0 %8273  ;;  %v7900_v45 = vpop.f32.mrf.mxu2 }
 0xd47   : > { %v8316_v53 = vadd.f32 %v8274_v12, %v14244_v55  ;;  %v8069_v41 = vpop.f32.mrf.mxu3  ;;  %v8193_v55 = vrot.slane %v8143_v57, 7  ;;  %v7228_v57 = vadd.f32 %v7227_v23, %v7059_v10 }
 0xd48   : > { %v8070_v3 = vadd.f32 %v8069_v41, %v7900_v45  ;;  %v15471_v41 = vld [vmem:[#allocation31_spill] sm:$0xff] }
 0xd49   : > { %v8492_v0 = vadd.f32 %v8450_v46, %v8316_v53  ;;  %v8448_v60 = vpop.permute.xlu1 %8447 }
 0xd4a   : > { %v8144_v9 = vadd.f32 %v8070_v3, %v7218_v40  ;;  %v8491_v63 = vadd.f32 %v8448_v60, %v8315_v44  ;;  %v7062_v40 = vadd.f32 %v7061_v43, %v15471_v41  ;;  %v7230_v44 = vpop.f32.mrf.mxu1 }
 0xd4b   : > { %v8528_v16 = vadd.f32 %v14260_v1, %v8492_v0 }
 0xd4c   : > { %v8527_v47 = vadd.f32 %v14260_v1, %v8491_v63  ;;  %8287 = vrot.lane.b32.xlu1 %v8144_v9, %s11285_s12  ;;  %v8194_v26 = vrot.slane %v8144_v9, 7  ;;  %v8369_v18 = vrot.slane %v8144_v9, 1  ;;  %v7231_v63 = vadd.f32 %v7230_v44, %v7062_v40 }
 0xd4d   : > { %8560 = vst [vmem:[%s13978_s20 + $0xa8] sm:$0xff] %v8528_v16  ;;  %v7063_v16 = vpop.f32.mrf.mxu0 }
 0xd4e   : > { %8559 = vst [vmem:[%s13978_s20 + $0xa0] sm:$0xff] %v8527_v47  ;;  %v14367_v58 = vsel %vm5045_vm0, %v8193_v55, %v8194_v26  ;;  %v7903_v21 = vpop.f32.mrf.mxu2  ;;  %v8278_v0 = vpop.permute.xlu2 %8277 }
 0xd4f   : > { %v8072_v49 = vpop.f32.mrf.mxu3  ;;  %v8318_v7 = vadd.f32 %v8278_v0, %v14281_v8 }
 0xd50   : > { %v8073_v6 = vadd.f32 %v8072_v49, %v7903_v21 }
 0xd52   : > { %v8145_v13 = vadd.f32 %v8073_v6, %v7221_v14 }
 0xd54   : > { %8289 = vrot.lane.b32.xlu2 %v8145_v13, %s11285_s12  ;;  %v8370_v30 = vrot.slane %v8145_v13, 1  ;;  %v8195_v51 = vrot.slane %v8145_v13, 7  ;;  %v7232_v13 = vpop.f32.mrf.mxu1 }
 0xd56   : > { %v8378_v62 = vsel %vm5270_vm1, %v8369_v18, %v8370_v30  ;;  %v14377_v24 = vsel %vm5045_vm0, %v8194_v26, %v8195_v51  ;;  %v7905_v48 = vpop.f32.mrf.mxu2  ;;  %v15472_v26 = vld [vmem:[#allocation356_spill] sm:$0xff] }
 0xd57   : > { %v8074_v32 = vpop.f32.mrf.mxu3  ;;  %8463 = vrot.lane.b32.xlu0 %v8378_v62, %s11286_s13  ;;  %v7064_v21 = vadd.f32 %v7063_v16, %v15472_v26 }
 0xd58   : > { %v8075_v15 = vadd.f32 %v8074_v32, %v7905_v48 }
 0xd5a   : > { %v8146_v59 = vadd.f32 %v8075_v15, %v7223_v35 }
 0xd5c   : > { %v8371_v34 = vrot.slane %v8146_v59, 1 }
 0xd5e   : > { %v8377_v61 = vsel %vm5270_vm1, %v8370_v30, %v8371_v34  ;;  %v7908_v20 = vpop.f32.mrf.mxu2  ;;  %v8276_v29 = vpop.permute.xlu1 %8275  ;;  %v7233_v30 = vadd.f32 %v7232_v13, %v7064_v21 }
 0xd5f   : > { %v8077_v33 = vpop.f32.mrf.mxu3  ;;  %v8317_v39 = vadd.f32 %v8276_v29, %v14271_v42 }
 0xd60   : > { %v8078_v5 = vadd.f32 %v8077_v33, %v7908_v20 }
 0xd62   : > { %v8147_v50 = vadd.f32 %v8078_v5, %v14213_v36 }
 0xd64   : > { %v8196_v46 = vrot.slane %v8147_v50, 7 }
 0xd66   : > { %v7910_v56 = vpop.f32.mrf.mxu2 }
 0xd67   : > { %v8079_v38 = vpop.f32.mrf.mxu3 }
 0xd68   : > { %v8080_v2 = vadd.f32 %v8079_v38, %v7910_v56 }
 0xd69   : > { %v8452_v12 = vpop.permute.xlu0 %8451 }
 0xd6a   : > { %v8148_v53 = vadd.f32 %v8080_v2, %v7228_v57  ;;  %v8493_v45 = vadd.f32 %v8452_v12, %v8317_v39 }
 0xd6c   : > { %v8529_v36 = vadd.f32 %v14260_v1, %v8493_v45  ;;  %8291 = vrot.lane.b32.xlu0 %v8148_v53, %s11285_s12  ;;  %v8197_v3 = vrot.slane %v8148_v53, 7  ;;  %v8372_v11 = vrot.slane %v8148_v53, 1 }
 0xd6e   : > { %8561 = vst [vmem:[%s13978_s20 + $0xb0] sm:$0xff] %v8529_v36  ;;  %v8200_v60 = vsel %vm5045_vm0, %v8196_v46, %v8197_v3  ;;  %v7913_v9 = vpop.f32.mrf.mxu2 }
 0xd6f   : > { %v8082_v42 = vpop.f32.mrf.mxu3 }
 0xd70   : > { %v8083_v19 = vadd.f32 %v8082_v42, %v7913_v9 }
 0xd71   : > { %v8454_v52 = vpop.permute.xlu1 %8453  ;;  %v8456_v59 = vpop.permute.xlu2 %8455 }
 0xd72   : > { %v8149_v55 = vadd.f32 %v8083_v19, %v7231_v63  ;;  %v8494_v47 = vadd.f32 %v8454_v52, %v8318_v7 }
 0xd74   : > { %v8530_v49 = vadd.f32 %v14260_v1, %v8494_v47  ;;  %8293 = vrot.lane.b32.xlu1 %v8149_v55, %s11285_s12  ;;  %v8373_v14 = vrot.slane %v8149_v55, 1  ;;  %v8198_v6 = vrot.slane %v8149_v55, 7 }
 0xd76   : > { %8562 = vst [vmem:[%s13978_s20 + $0xb8] sm:$0xff] %v8530_v49  ;;  %v8376_v28 = vsel %vm5270_vm1, %v8372_v11, %v8373_v14  ;;  %v8199_v8 = vsel %vm5045_vm0, %v8197_v3, %v8198_v6  ;;  %v7915_v54 = vpop.f32.mrf.mxu2 }
 0xd77   : > { %v8084_v18 = vpop.f32.mrf.mxu3  ;;  %8467 = vrot.lane.b32.xlu2 %v8376_v28, %s11286_s13 }
 0xd78   : > { %v8085_v51 = vadd.f32 %v8084_v18, %v7915_v54 }
 0xd7a   : > { %v8150_v62 = vadd.f32 %v8085_v51, %v7233_v30 }
 0xd7c   : > { %v8374_v48 = vrot.slane %v8150_v62, 1  ;;  %8465 = vrot.lane.b32.xlu1 %v8377_v61, %s11286_s13 }
 0xd7e   : > { %v8280_v32 = vpop.permute.xlu0 %8279  ;;  %v8375_v35 = vsel %vm5270_vm1, %v8373_v14, %v8374_v48 }
 0xd7f   : > { %v8319_v15 = vadd.f32 %v8280_v32, %v14300_v4  ;;  %8469 = vrot.lane.b32.xlu0 %v8375_v35, %s11286_s13 }
 0xd81   : > { %v8495_v27 = vadd.f32 %v8456_v59, %v8319_v15 }
 0xd83   : > { %v8531_v34 = vadd.f32 %v14260_v1, %v8495_v27 }
 0xd85   : > { %8563 = vst [vmem:[%s13978_s20 + $0xc0] sm:$0xff] %v8531_v34 }
 0xd86   : > { %v8282_v20 = vpop.permute.xlu1 %8281  ;;  %v8284_v17 = vpop.permute.xlu2 %8283 }
 0xd87   : > { %v8320_v33 = vadd.f32 %v8282_v20, %v14313_v25  ;;  %v8321_v22 = vadd.f32 %v8284_v17, %v14332_v37 }
 0xd91   : > { %v8458_v5 = vpop.permute.xlu0 %8457 }
 0xd92   : > { %v8496_v61 = vadd.f32 %v8458_v5, %v8320_v33 }
 0xd94   : > { %v8532_v23 = vadd.f32 %v14260_v1, %v8496_v61 }
 0xd96   : > { %8564 = vst [vmem:[%s13978_s20 + $0xc8] sm:$0xff] %v8532_v23 }
 0xd99   : > { %v8462_v10 = vpop.permute.xlu2 %8461 }
 0xda6   : > { %v8286_v50 = vpop.permute.xlu0 %8285 }
 0xda7   : > { %v8322_v4 = vadd.f32 %v8286_v50, %v14345_v31 }
 0xda9   : > { %v8498_v29 = vadd.f32 %v8462_v10, %v8322_v4  ;;  %v8460_v43 = vpop.permute.xlu1 %8459 }
 0xdaa   : > { %v8497_v56 = vadd.f32 %v8460_v43, %v8321_v22 }
 0xdab   : > { %v8534_v38 = vadd.f32 %v14260_v1, %v8498_v29 }
 0xdac   : > { %v8533_v25 = vadd.f32 %v14260_v1, %v8497_v56 }
 0xdad   : > { %8566 = vst [vmem:[%s13978_s20 + $0xd8] sm:$0xff] %v8534_v38 }
 0xdae   : > { %8565 = vst [vmem:[%s13978_s20 + $0xd0] sm:$0xff] %v8533_v25  ;;  %v8290_v37 = vpop.permute.xlu2 %8289 }
 0xdaf   : > { %v8324_v36 = vadd.f32 %v8290_v37, %v14377_v24 }
 0xdbe   : > { %v8288_v57 = vpop.permute.xlu1 %8287 }
 0xdbf   : > { %v8323_v39 = vadd.f32 %v8288_v57, %v14367_v58 }
 0xdc9   : > { %v8464_v2 = vpop.permute.xlu0 %8463 }
 0xdca   : > { %v8499_v12 = vadd.f32 %v8464_v2, %v8323_v39 }
 0xdcc   : > { %v8535_v31 = vadd.f32 %v14260_v1, %v8499_v12 }
 0xdce   : > { %8567 = vst [vmem:[%s13978_s20 + $0xe0] sm:$0xff] %v8535_v31 }
 0xdd1   : > { %v8468_v41 = vpop.permute.xlu2 %8467 }
 0xdde   : > { %v8292_v53 = vpop.permute.xlu0 %8291 }
 0xddf   : > { %v8325_v45 = vadd.f32 %v8292_v53, %v8200_v60 }
 0xde1   : > { %v8501_v40 = vadd.f32 %v8468_v41, %v8325_v45 }
 0xde3   : > { %v8537_v44 = vadd.f32 %v14260_v1, %v8501_v40 }
 0xde5   : > { %8569 = vst [vmem:[%s13978_s20 + $0xf0] sm:$0xff] %v8537_v44 }
 0xde6   : > { %v8294_v46 = vpop.permute.xlu1 %8293 }
 0xde7   : > { %v8326_v0 = vadd.f32 %v8294_v46, %v8199_v8 }
 0xdee   : > { %v8466_v3 = vpop.permute.xlu1 %8465 }
 0xdef   : > { %v8500_v58 = vadd.f32 %v8466_v3, %v8324_v36 }
 0xdf1   : > { %v8536_v9 = vadd.f32 %v14260_v1, %v8500_v58  ;;  %v8470_v42 = vpop.permute.xlu0 %8469 }
 0xdf2   : > { %v8502_v63 = vadd.f32 %v8470_v42, %v8326_v0 }
 0xdf3   : > { %8568 = vst [vmem:[%s13978_s20 + $0xe8] sm:$0xff] %v8536_v9 }
 0xdf4   : > { %v8538_v16 = vadd.f32 %v14260_v1, %v8502_v63 }
 0xdf6   : > { %8570 = vst [vmem:[%s13978_s20 + $0xf8] sm:$0xff] %v8538_v16 }
 0xdf7 PF: > { %s16_s18 = sadd.s32 1, %s11279_s18  }
 0xdf8   : > { %p13_p7 = scmp.ge.s32.totalorder %s16_s18, 4  }
 0xdfa   :  { %15 = sbr.rel (!%p13_p7) target bundleno = 1 (0x1), region = 85 }
 0xdff   :  { %8592 = vsyncpa [#allocation5], 1 }
 0xe00   :  { %8594 = vsyncpa [#allocation5 + $0x1], 1 }

</bundles_post_ra>
